<compile_context>
chip_gen: v5e
topology: v5e:2x2
jax: 0.10.0
libtpu: 0.0.40
codegen_flags: <defaults>
</compile_context>

<pallas_src>
import math

import jax
import jax.numpy as jnp
import numpy as np
from jax import lax
from jax.experimental import pallas as pl
from jax.experimental.pallas import tpu as pltpu

V = 57      # input_dim == output_dim (vocab)
E = 128     # token_embedding dimension
H = 256     # hidden_dim
L = 2       # num LSTM layers
EPS = 1e-3  # matches nn.LayerNorm(..., eps=0.001)


def _layernorm(x, gamma, beta):
    mu = jnp.mean(x, axis=-1, keepdims=True)
    var = jnp.mean((x - mu) ** 2, axis=-1, keepdims=True)
    return (x - mu) * lax.rsqrt(var + EPS) * gamma + beta


def _sigmoid_tanh(x):
    # sigmoid(x) = 0.5*(tanh(x/2)+1): one EUP push instead of exp + reciprocal.
    return 0.5 * jnp.tanh(0.5 * x) + 0.5


def _make_lstm_kernel(tc, t_actual, t_pad, unroll):
    capture_final = (t_pad != t_actual)

    def kernel(xg_ref, h0_ref, c0_ref, whh0_ref, wih1_ref, whh1_ref, b1_ref,
               h1_ref, hn_ref, cn_ref, h_st, c_st):
        chunk = pl.program_id(0)

        @pl.when(chunk == 0)
        def _():
            h_st[...] = h0_ref[...].astype(jnp.bfloat16)
            c_st[...] = c0_ref[...]

        whh0 = whh0_ref[...]          # (H, 4H)  bf16, resident
        wih1 = wih1_ref[...]          # (H, 4H)  bf16, resident
        whh1 = whh1_ref[...]          # (H, 4H)  bf16, resident
        b1 = b1_ref[...]              # (1, 4H)  f32

        def step(i, carry):
            # --- Layer 0: input-side gates precomputed per token outside the
            # serial loop; only h @ W_hh0 remains on the critical path.
            xg = xg_ref[i].astype(jnp.float32)               # (Bp, 4H)
            h0p = h_st[0]                                    # bf16, no cast
            c0p = c_st[0]
            h1p = h_st[1]
            c1p = c_st[1]

            g0 = jnp.dot(h0p, whh0, preferred_element_type=jnp.float32) + xg
            i0 = _sigmoid_tanh(g0[:, 0 * H:1 * H])
            f0 = _sigmoid_tanh(g0[:, 1 * H:2 * H])
            z0 = jnp.tanh(g0[:, 2 * H:3 * H])
            o0 = _sigmoid_tanh(g0[:, 3 * H:4 * H])
            c0n = f0 * c0p + i0 * z0
            h0n = o0 * jnp.tanh(c0n)
            h0nb = h0n.astype(jnp.bfloat16)

            # TODO(synk): nn.LSTM inter-layer dropout (p=0.3) applies only in
            #             training mode; this is the eval/inference path.
            # TODO(synk): on v6e/v7x the gate nonlinearities could be done in
            #             bf16 (bf16 EUP/VPU) to halve EUP pushes; kept f32
            #             here so the same kernel is optimal on v5e.

            # --- Layer 1: two dots (no per-step concatenate / lane repack).
            g1 = (jnp.dot(h0nb, wih1, preferred_element_type=jnp.float32)
                  + jnp.dot(h1p, whh1, preferred_element_type=jnp.float32)
                  + b1)
            i1 = _sigmoid_tanh(g1[:, 0 * H:1 * H])
            f1 = _sigmoid_tanh(g1[:, 1 * H:2 * H])
            z1 = jnp.tanh(g1[:, 2 * H:3 * H])
            o1 = _sigmoid_tanh(g1[:, 3 * H:4 * H])
            c1n = f1 * c1p + i1 * z1
            h1n = o1 * jnp.tanh(c1n)
            h1nb = h1n.astype(jnp.bfloat16)

            h_st[0] = h0nb
            c_st[0] = c0n
            h_st[1] = h1nb
            c_st[1] = c1n
            h1_ref[i] = h1nb

            if capture_final:
                # T % time_chunk != 0: capture h_n/c_n exactly at the last
                # real timestep instead of freezing state on padded steps.
                @pl.when(chunk * tc + i == t_actual - 1)
                def _():
                    hn_ref[0] = h0n
                    hn_ref[1] = h1n
                    cn_ref[0] = c0n
                    cn_ref[1] = c1n

            return carry

        lax.fori_loop(0, tc, step, 0, unroll=unroll)

        if not capture_final:
            @pl.when(chunk == pl.num_programs(0) - 1)
            def _():
                hn_ref[...] = h_st[...].astype(jnp.float32)
                cn_ref[...] = c_st[...]

    return kernel


def lstm_forward(tokens, h0, c0, kp, *, time_chunk=32):
    """tokens: (T, B) int32; h0, c0: (L, B, H) f32. Returns (features, (h_n, c_n))."""
    T, B = tokens.shape
    Bp = max(8, ((B + 7) // 8) * 8)            # pad batch to full sublanes
    TC = min(time_chunk, T)                    # timesteps per grid step
    n_chunks = pl.cdiv(T, TC)
    T_pad = n_chunks * TC
    unroll = math.gcd(TC, 8)                   # bounded unroll of the step loop

    # Glue (plain JAX): gather precomputed layer-0 gates per token (bf16), pad.
    xg = kp["gate_table"][tokens]                                     # (T, B, 4H) bf16
    xg = jnp.pad(xg, ((0, T_pad - T), (0, Bp - B), (0, 0)))
    h0p = jnp.pad(h0, ((0, 0), (0, Bp - B), (0, 0)))
    c0p = jnp.pad(c0, ((0, 0), (0, Bp - B), (0, 0)))

    grid_spec = pltpu.PrefetchScalarGridSpec(
        num_scalar_prefetch=0,
        grid=(n_chunks,),
        in_specs=[
            pl.BlockSpec((TC, Bp, 4 * H), lambda c: (c, 0, 0)),   # precomputed gates (bf16)
            pl.BlockSpec((L, Bp, H), lambda c: (0, 0, 0)),        # h0
            pl.BlockSpec((L, Bp, H), lambda c: (0, 0, 0)),        # c0
            pl.BlockSpec((H, 4 * H), lambda c: (0, 0)),           # W_hh0^T (bf16)
            pl.BlockSpec((H, 4 * H), lambda c: (0, 0)),           # W_ih1^T (bf16)
            pl.BlockSpec((H, 4 * H), lambda c: (0, 0)),           # W_hh1^T (bf16)
            pl.BlockSpec((1, 4 * H), lambda c: (0, 0)),           # b1
        ],
        out_specs=[
            pl.BlockSpec((TC, Bp, H), lambda c: (c, 0, 0)),       # h1 per step (bf16, lane-dense)
            pl.BlockSpec((L, Bp, H), lambda c: (0, 0, 0)),        # h_n
            pl.BlockSpec((L, Bp, H), lambda c: (0, 0, 0)),        # c_n
        ],
        scratch_shapes=[pltpu.VMEM((L, Bp, H), jnp.bfloat16),     # h-state (bf16)
                        pltpu.VMEM((L, Bp, H), jnp.float32)],     # c-state (f32)
    )

    h1_seq, hn, cn = pl.pallas_call(
        _make_lstm_kernel(TC, T, T_pad, unroll),
        out_shape=(jax.ShapeDtypeStruct((T_pad, Bp, H), jnp.bfloat16),
                   jax.ShapeDtypeStruct((L, Bp, H), jnp.float32),
                   jax.ShapeDtypeStruct((L, Bp, H), jnp.float32)),
        grid_spec=grid_spec,
        compiler_params=pltpu.CompilerParams(dimension_semantics=("arbitrary",)),
    )(xg, h0p, c0p, kp["whh0_bf16"], kp["wih1_bf16"], kp["whh1_bf16"], kp["b1"])

    # Tail hoisted out of the serial loop: norm_1 + fnn over the whole sequence.
    h1 = h1_seq[:T, :B].astype(jnp.float32)
    y = _layernorm(h1, kp["g1"], kp["be1"])
    feats = jnp.dot(y, kp["wf_t"], preferred_element_type=jnp.float32) + kp["bf"]
    return feats, (hn[:, :B], cn[:, :B])


def init_params(key):
    ks = jax.random.split(key, 6)

    def xavier(k, shape):
        fan_out, fan_in = shape
        lim = (6.0 / (fan_in + fan_out)) ** 0.5
        return jax.random.uniform(k, shape, jnp.float32, -lim, lim)

    emb = jax.random.normal(ks[0], (V, E), jnp.float32)
    wih0 = xavier(ks[1], (4 * H, E))
    wih1 = xavier(ks[2], (4 * H, H))
    # Deterministic stand-in for orthogonal init on the recurrent weights.
    whh0 = jax.random.normal(ks[3], (4 * H, H), jnp.float32) * (1.0 / jnp.sqrt(H))
    whh1 = jax.random.normal(ks[4], (4 * H, H), jnp.float32) * (1.0 / jnp.sqrt(H))
    # bias_ih + bias_hh: zeros everywhere except forget gate (1.0 each -> 2.0).
    b = jnp.zeros((4 * H,), jnp.float32).at[H:2 * H].set(2.0)
    wf = xavier(ks[5], (V, H))

    return dict(
        emb=emb,
        wih0_t=wih0.T, whh0_t=whh0.T, b0=b,
        wih1_t=wih1.T, whh1_t=whh1.T, b1=b,
        g0=jnp.ones((E,), jnp.float32), be0=jnp.zeros((E,), jnp.float32),
        g1=jnp.ones((H,), jnp.float32), be1=jnp.zeros((H,), jnp.float32),
        wf_t=wf.T, bf=jnp.zeros((V,), jnp.float32),
    )


def precompute_kernel_params(p):
    """One-time folding of everything that does not depend on the recurrent state."""
    # table[v] = LayerNorm(emb[v]) @ W_ih0^T + (b_ih0 + b_hh0)   -> (V, 4H)
    ln_emb = _layernorm(p["emb"], p["g0"], p["be0"])
    gate_table = (jnp.dot(ln_emb, p["wih0_t"], preferred_element_type=jnp.float32)
                  + p["b0"])
    return dict(
        gate_table=gate_table.astype(jnp.bfloat16),       # bf16 stream into the kernel
        whh0_bf16=p["whh0_t"].astype(jnp.bfloat16),
        wih1_bf16=p["wih1_t"].astype(jnp.bfloat16),
        whh1_bf16=p["whh1_t"].astype(jnp.bfloat16),
        b1=p["b1"].reshape(1, 4 * H),
        g1=p["g1"], be1=p["be1"], wf_t=p["wf_t"], bf=p["bf"],
    )


def reference_forward(tokens, h0, c0, p):
    """Pure-JAX reference (Embedding -> norm_0 -> 2-layer LSTM -> norm_1 -> fnn).
    Recurrent matmul operands are cast to bf16 (f32 accumulation) to mirror the
    kernel's MXU precision; everything else is f32."""
    bf16 = jnp.bfloat16
    x = _layernorm(p["emb"][tokens], p["g0"], p["be0"])          # (T, B, E)

    def cell(x_gates, h, c, whh_t):
        gates = x_gates + jnp.dot(h.astype(bf16), whh_t.astype(bf16),
                                  preferred_element_type=jnp.float32)
        i = jax.nn.sigmoid(gates[:, 0 * H:1 * H])
        f = jax.nn.sigmoid(gates[:, 1 * H:2 * H])
        g = jnp.tanh(gates[:, 2 * H:3 * H])
        o = jax.nn.sigmoid(gates[:, 3 * H:4 * H])
        c_new = f * c + i * g
        return o * jnp.tanh(c_new), c_new

    def step(carry, xt):
        h0_, c0_, h1_, c1_ = carry
        xg0 = jnp.dot(xt, p["wih0_t"], preferred_element_type=jnp.float32) + p["b0"]
        hh0, cc0 = cell(xg0, h0_, c0_, p["whh0_t"])
        xg1 = jnp.dot(hh0.astype(bf16), p["wih1_t"].astype(bf16),
                      preferred_element_type=jnp.float32) + p["b1"]
        hh1, cc1 = cell(xg1, h1_, c1_, p["whh1_t"])
        return (hh0, cc0, hh1, cc1), hh1

    carry, ys = jax.lax.scan(step, (h0[0], c0[0], h0[1], c0[1]), x)
    y = _layernorm(ys, p["g1"], p["be1"])
    y = jnp.dot(y, p["wf_t"], preferred_element_type=jnp.float32) + p["bf"]
    hn = jnp.stack([carry[0], carry[2]])
    cn = jnp.stack([carry[1], carry[3]])
    return y, hn, cn


if __name__ == "__main__":
    T, B = 10, 2
    key = jax.random.PRNGKey(0)
    k_par, k_tok, k_h, k_c = jax.random.split(key, 4)

    params = init_params(k_par)
    kparams = precompute_kernel_params(params)

    tokens = jax.random.randint(k_tok, (T, B), 0, V, dtype=jnp.int32)
    h0 = jax.random.normal(k_h, (L, B, H), jnp.float32)
    c0 = jax.random.normal(k_c, (L, B, H), jnp.float32)

    # time_chunk=4 with T=10 -> 3 sequential grid steps, last chunk padded:
    # exercises cross-chunk state carry and the capture-at-step-(T-1) path.
    feats, (h_n, c_n) = lstm_forward(tokens, h0, c0, kparams, time_chunk=4)
    jax.block_until_ready((feats, h_n, c_n))

    ref_y, ref_h, ref_c = reference_forward(tokens, h0, c0, params)
    np.testing.assert_allclose(np.asarray(feats), np.asarray(ref_y), rtol=2e-2, atol=2e-2)
    np.testing.assert_allclose(np.asarray(h_n), np.asarray(ref_h), rtol=2e-2, atol=2e-2)
    np.testing.assert_allclose(np.asarray(c_n), np.asarray(ref_c), rtol=2e-2, atol=2e-2)

    assert feats.shape == (T, B, V) and h_n.shape == (L, B, H) and c_n.shape == (L, B, H)
    print("KERNEL_OK")
</pallas_src>

<mosaic_0001>
module attributes {stable_mosaic.version = 11 : i64} {
  func.func @kernel(%arg0: i32, %arg1: memref<4x8x1024xbf16, #tpu.memory_space<vmem>>, %arg2: memref<2x8x256xf32, #tpu.memory_space<vmem>>, %arg3: memref<2x8x256xf32, #tpu.memory_space<vmem>>, %arg4: memref<256x1024xbf16, #tpu.memory_space<vmem>>, %arg5: memref<256x1024xbf16, #tpu.memory_space<vmem>>, %arg6: memref<256x1024xbf16, #tpu.memory_space<vmem>>, %arg7: memref<1x1024xf32, #tpu.memory_space<vmem>>, %arg8: memref<4x8x256xbf16, #tpu.memory_space<vmem>>, %arg9: memref<2x8x256xf32, #tpu.memory_space<vmem>>, %arg10: memref<2x8x256xf32, #tpu.memory_space<vmem>>, %arg11: memref<2x8x256xbf16, #tpu.memory_space<vmem>>, %arg12: memref<2x8x256xf32, #tpu.memory_space<vmem>>) attributes {dimension_semantics = [#tpu.dimension_semantics<arbitrary>], iteration_bounds = array<i64: 3>, scalar_prefetch = 0 : i64, scratch_operands = 2 : i64, tpu.core_type = #tpu.core_type<tc>, window_params = [{transform_indices = @transform_0, window_bounds = array<i64: 4, 8, 1024>}, {pipeline_mode = #tpu.pipeline_mode<synchronous>, transform_indices = @transform_1, window_bounds = array<i64: 2, 8, 256>}, {pipeline_mode = #tpu.pipeline_mode<synchronous>, transform_indices = @transform_2, window_bounds = array<i64: 2, 8, 256>}, {pipeline_mode = #tpu.pipeline_mode<synchronous>, transform_indices = @transform_3, window_bounds = array<i64: 256, 1024>}, {pipeline_mode = #tpu.pipeline_mode<synchronous>, transform_indices = @transform_4, window_bounds = array<i64: 256, 1024>}, {pipeline_mode = #tpu.pipeline_mode<synchronous>, transform_indices = @transform_5, window_bounds = array<i64: 256, 1024>}, {pipeline_mode = #tpu.pipeline_mode<synchronous>, transform_indices = @transform_6, window_bounds = array<i64: 1, 1024>}, {transform_indices = @transform_7, window_bounds = array<i64: 4, 8, 256>}, {pipeline_mode = #tpu.pipeline_mode<synchronous>, transform_indices = @transform_8, window_bounds = array<i64: 2, 8, 256>}, {pipeline_mode = #tpu.pipeline_mode<synchronous>, transform_indices = @transform_9, window_bounds = array<i64: 2, 8, 256>}]} {
    %c0_i32 = arith.constant 0 : i32
    %0 = arith.cmpi eq, %arg0, %c0_i32 : i32
    %1 = arith.extui %0 : i1 to i32
    %c0_i32_0 = arith.constant 0 : i32
    %2 = arith.cmpi ne, %1, %c0_i32_0 : i32
    scf.if %2 {
      %c0_214 = arith.constant 0 : index
      %c0_215 = arith.constant 0 : index
      %c0_216 = arith.constant 0 : index
      %423 = vector.load %arg2[%c0_214, %c0_215, %c0_216] : memref<2x8x256xf32, #tpu.memory_space<vmem>>, vector<2x8x256xf32>
      %424 = arith.truncf %423 : vector<2x8x256xf32> to vector<2x8x256xbf16>
      %c0_217 = arith.constant 0 : index
      %c0_218 = arith.constant 0 : index
      %c0_219 = arith.constant 0 : index
      %425 = vector.load %arg11[%c0_217, %c0_218, %c0_219] : memref<2x8x256xbf16, #tpu.memory_space<vmem>>, vector<2x8x256xbf16>
      tpu.vector_store %arg11[%c0_217, %c0_218, %c0_219], %424 {strides = array<i32>} : memref<2x8x256xbf16, #tpu.memory_space<vmem>>, vector<2x8x256xbf16>,
      %c0_220 = arith.constant 0 : index
      %c0_221 = arith.constant 0 : index
      %c0_222 = arith.constant 0 : index
      %426 = vector.load %arg3[%c0_220, %c0_221, %c0_222] : memref<2x8x256xf32, #tpu.memory_space<vmem>>, vector<2x8x256xf32>
      %c0_223 = arith.constant 0 : index
      %c0_224 = arith.constant 0 : index
      %c0_225 = arith.constant 0 : index
      %427 = vector.load %arg12[%c0_223, %c0_224, %c0_225] : memref<2x8x256xf32, #tpu.memory_space<vmem>>, vector<2x8x256xf32>
      tpu.vector_store %arg12[%c0_223, %c0_224, %c0_225], %426 {strides = array<i32>} : memref<2x8x256xf32, #tpu.memory_space<vmem>>, vector<2x8x256xf32>,
    } else {
    }
    %c0 = arith.constant 0 : index
    %c0_1 = arith.constant 0 : index
    %3 = vector.load %arg4[%c0, %c0_1] : memref<256x1024xbf16, #tpu.memory_space<vmem>>, vector<256x1024xbf16>
    %c0_2 = arith.constant 0 : index
    %c0_3 = arith.constant 0 : index
    %4 = vector.load %arg5[%c0_2, %c0_3] : memref<256x1024xbf16, #tpu.memory_space<vmem>>, vector<256x1024xbf16>
    %c0_4 = arith.constant 0 : index
    %c0_5 = arith.constant 0 : index
    %5 = vector.load %arg6[%c0_4, %c0_5] : memref<256x1024xbf16, #tpu.memory_space<vmem>>, vector<256x1024xbf16>
    %c0_6 = arith.constant 0 : index
    %c0_7 = arith.constant 0 : index
    %6 = vector.load %arg7[%c0_6, %c0_7] : memref<1x1024xf32, #tpu.memory_space<vmem>>, vector<1x1024xf32>
    %c0_i32_8 = arith.constant 0 : i32
    %7 = arith.index_cast %c0_i32_8 : i32 to index
    %c0_9 = arith.constant 0 : index
    %c0_10 = arith.constant 0 : index
    %8 = vector.load %arg1[%7, %c0_9, %c0_10] : memref<4x8x1024xbf16, #tpu.memory_space<vmem>>, vector<1x8x1024xbf16>
    %9 = vector.shape_cast %8 : vector<1x8x1024xbf16> to vector<8x1024xbf16>
    %10 = arith.extf %9 : vector<8x1024xbf16> to vector<8x1024xf32>
    %c0_11 = arith.constant 0 : index
    %c0_12 = arith.constant 0 : index
    %c0_13 = arith.constant 0 : index
    %11 = vector.load %arg11[%c0_11, %c0_12, %c0_13] : memref<2x8x256xbf16, #tpu.memory_space<vmem>>, vector<1x8x256xbf16>
    %12 = vector.shape_cast %11 : vector<1x8x256xbf16> to vector<8x256xbf16>
    %c0_14 = arith.constant 0 : index
    %c0_15 = arith.constant 0 : index
    %c0_16 = arith.constant 0 : index
    %13 = vector.load %arg12[%c0_14, %c0_15, %c0_16] : memref<2x8x256xf32, #tpu.memory_space<vmem>>, vector<1x8x256xf32>
    %14 = vector.shape_cast %13 : vector<1x8x256xf32> to vector<8x256xf32>
    %c1 = arith.constant 1 : index
    %c0_17 = arith.constant 0 : index
    %c0_18 = arith.constant 0 : index
    %15 = vector.load %arg11[%c1, %c0_17, %c0_18] : memref<2x8x256xbf16, #tpu.memory_space<vmem>>, vector<1x8x256xbf16>
    %16 = vector.shape_cast %15 : vector<1x8x256xbf16> to vector<8x256xbf16>
    %c1_19 = arith.constant 1 : index
    %c0_20 = arith.constant 0 : index
    %c0_21 = arith.constant 0 : index
    %17 = vector.load %arg12[%c1_19, %c0_20, %c0_21] : memref<2x8x256xf32, #tpu.memory_space<vmem>>, vector<1x8x256xf32>
    %18 = vector.shape_cast %17 : vector<1x8x256xf32> to vector<8x256xf32>
    %cst = arith.constant dense<0.000000e+00> : vector<8x1024xf32>
    %19 = tpu.matmul %12, %3, %cst {dimension_numbers = #tpu.dot_dimension_numbers<[1], [0], [0], [1], [0, 0, 1, 1], [], []>} : vector<8x256xbf16>, vector<256x1024xbf16>, vector<8x1024xf32> -> vector<8x1024xf32>
    %20 = arith.addf %19, %10 : vector<8x1024xf32>
    %21 = vector.extract_strided_slice %20 {offsets = [0, 0], sizes = [8, 256], strides = [1, 1]} : vector<8x1024xf32> to vector<8x256xf32>
    %cst_22 = arith.constant 5.000000e-01 : f32
    %22 = vector.broadcast %cst_22 : f32 to vector<8x256xf32>
    %23 = arith.mulf %22, %21 : vector<8x256xf32>
    %24 = math.tanh %23 : vector<8x256xf32>
    %cst_23 = arith.constant 5.000000e-01 : f32
    %25 = vector.broadcast %cst_23 : f32 to vector<8x256xf32>
    %26 = arith.mulf %25, %24 : vector<8x256xf32>
    %cst_24 = arith.constant 5.000000e-01 : f32
    %27 = vector.broadcast %cst_24 : f32 to vector<8x256xf32>
    %28 = arith.addf %26, %27 : vector<8x256xf32>
    %29 = vector.extract_strided_slice %20 {offsets = [0, 256], sizes = [8, 256], strides = [1, 1]} : vector<8x1024xf32> to vector<8x256xf32>
    %cst_25 = arith.constant 5.000000e-01 : f32
    %30 = vector.broadcast %cst_25 : f32 to vector<8x256xf32>
    %31 = arith.mulf %30, %29 : vector<8x256xf32>
    %32 = math.tanh %31 : vector<8x256xf32>
    %cst_26 = arith.constant 5.000000e-01 : f32
    %33 = vector.broadcast %cst_26 : f32 to vector<8x256xf32>
    %34 = arith.mulf %33, %32 : vector<8x256xf32>
    %cst_27 = arith.constant 5.000000e-01 : f32
    %35 = vector.broadcast %cst_27 : f32 to vector<8x256xf32>
    %36 = arith.addf %34, %35 : vector<8x256xf32>
    %37 = vector.extract_strided_slice %20 {offsets = [0, 512], sizes = [8, 256], strides = [1, 1]} : vector<8x1024xf32> to vector<8x256xf32>
    %38 = math.tanh %37 : vector<8x256xf32>
    %39 = vector.extract_strided_slice %20 {offsets = [0, 768], sizes = [8, 256], strides = [1, 1]} : vector<8x1024xf32> to vector<8x256xf32>
    %cst_28 = arith.constant 5.000000e-01 : f32
    %40 = vector.broadcast %cst_28 : f32 to vector<8x256xf32>
    %41 = arith.mulf %40, %39 : vector<8x256xf32>
    %42 = math.tanh %41 : vector<8x256xf32>
    %cst_29 = arith.constant 5.000000e-01 : f32
    %43 = vector.broadcast %cst_29 : f32 to vector<8x256xf32>
    %44 = arith.mulf %43, %42 : vector<8x256xf32>
    %cst_30 = arith.constant 5.000000e-01 : f32
    %45 = vector.broadcast %cst_30 : f32 to vector<8x256xf32>
    %46 = arith.addf %44, %45 : vector<8x256xf32>
    %47 = arith.mulf %36, %14 : vector<8x256xf32>
    %48 = arith.mulf %28, %38 : vector<8x256xf32>
    %49 = arith.addf %47, %48 : vector<8x256xf32>
    %50 = math.tanh %49 : vector<8x256xf32>
    %51 = arith.mulf %46, %50 : vector<8x256xf32>
    %52 = arith.truncf %51 : vector<8x256xf32> to vector<8x256xbf16>
    %cst_31 = arith.constant dense<0.000000e+00> : vector<8x1024xf32>
    %53 = tpu.matmul %52, %4, %cst_31 {dimension_numbers = #tpu.dot_dimension_numbers<[1], [0], [0], [1], [0, 0, 1, 1], [], []>} : vector<8x256xbf16>, vector<256x1024xbf16>, vector<8x1024xf32> -> vector<8x1024xf32>
    %cst_32 = arith.constant dense<0.000000e+00> : vector<8x1024xf32>
    %54 = tpu.matmul %16, %5, %cst_32 {dimension_numbers = #tpu.dot_dimension_numbers<[1], [0], [0], [1], [0, 0, 1, 1], [], []>} : vector<8x256xbf16>, vector<256x1024xbf16>, vector<8x1024xf32> -> vector<8x1024xf32>
    %55 = arith.addf %53, %54 : vector<8x1024xf32>
    %56 = vector.broadcast %6 : vector<1x1024xf32> to vector<8x1024xf32>
    %57 = arith.addf %55, %56 : vector<8x1024xf32>
    %58 = vector.extract_strided_slice %57 {offsets = [0, 0], sizes = [8, 256], strides = [1, 1]} : vector<8x1024xf32> to vector<8x256xf32>
    %cst_33 = arith.constant 5.000000e-01 : f32
    %59 = vector.broadcast %cst_33 : f32 to vector<8x256xf32>
    %60 = arith.mulf %59, %58 : vector<8x256xf32>
    %61 = math.tanh %60 : vector<8x256xf32>
    %cst_34 = arith.constant 5.000000e-01 : f32
    %62 = vector.broadcast %cst_34 : f32 to vector<8x256xf32>
    %63 = arith.mulf %62, %61 : vector<8x256xf32>
    %cst_35 = arith.constant 5.000000e-01 : f32
    %64 = vector.broadcast %cst_35 : f32 to vector<8x256xf32>
    %65 = arith.addf %63, %64 : vector<8x256xf32>
    %66 = vector.extract_strided_slice %57 {offsets = [0, 256], sizes = [8, 256], strides = [1, 1]} : vector<8x1024xf32> to vector<8x256xf32>
    %cst_36 = arith.constant 5.000000e-01 : f32
    %67 = vector.broadcast %cst_36 : f32 to vector<8x256xf32>
    %68 = arith.mulf %67, %66 : vector<8x256xf32>
    %69 = math.tanh %68 : vector<8x256xf32>
    %cst_37 = arith.constant 5.000000e-01 : f32
    %70 = vector.broadcast %cst_37 : f32 to vector<8x256xf32>
    %71 = arith.mulf %70, %69 : vector<8x256xf32>
    %cst_38 = arith.constant 5.000000e-01 : f32
    %72 = vector.broadcast %cst_38 : f32 to vector<8x256xf32>
    %73 = arith.addf %71, %72 : vector<8x256xf32>
    %74 = vector.extract_strided_slice %57 {offsets = [0, 512], sizes = [8, 256], strides = [1, 1]} : vector<8x1024xf32> to vector<8x256xf32>
    %75 = math.tanh %74 : vector<8x256xf32>
    %76 = vector.extract_strided_slice %57 {offsets = [0, 768], sizes = [8, 256], strides = [1, 1]} : vector<8x1024xf32> to vector<8x256xf32>
    %cst_39 = arith.constant 5.000000e-01 : f32
    %77 = vector.broadcast %cst_39 : f32 to vector<8x256xf32>
    %78 = arith.mulf %77, %76 : vector<8x256xf32>
    %79 = math.tanh %78 : vector<8x256xf32>
    %cst_40 = arith.constant 5.000000e-01 : f32
    %80 = vector.broadcast %cst_40 : f32 to vector<8x256xf32>
    %81 = arith.mulf %80, %79 : vector<8x256xf32>
    %cst_41 = arith.constant 5.000000e-01 : f32
    %82 = vector.broadcast %cst_41 : f32 to vector<8x256xf32>
    %83 = arith.addf %81, %82 : vector<8x256xf32>
    %84 = arith.mulf %73, %18 : vector<8x256xf32>
    %85 = arith.mulf %65, %75 : vector<8x256xf32>
    %86 = arith.addf %84, %85 : vector<8x256xf32>
    %87 = math.tanh %86 : vector<8x256xf32>
    %88 = arith.mulf %83, %87 : vector<8x256xf32>
    %89 = arith.truncf %88 : vector<8x256xf32> to vector<8x256xbf16>
    %c0_42 = arith.constant 0 : index
    %c0_43 = arith.constant 0 : index
    %c0_44 = arith.constant 0 : index
    %90 = vector.load %arg11[%c0_42, %c0_43, %c0_44] : memref<2x8x256xbf16, #tpu.memory_space<vmem>>, vector<1x8x256xbf16>
    %91 = vector.shape_cast %90 : vector<1x8x256xbf16> to vector<8x256xbf16>
    %92 = vector.shape_cast %52 : vector<8x256xbf16> to vector<1x8x256xbf16>
    tpu.vector_store %arg11[%c0_42, %c0_43, %c0_44], %92 {strides = array<i32>} : memref<2x8x256xbf16, #tpu.memory_space<vmem>>, vector<1x8x256xbf16>,
    %c0_45 = arith.constant 0 : index
    %c0_46 = arith.constant 0 : index
    %c0_47 = arith.constant 0 : index
    %93 = vector.load %arg12[%c0_45, %c0_46, %c0_47] : memref<2x8x256xf32, #tpu.memory_space<vmem>>, vector<1x8x256xf32>
    %94 = vector.shape_cast %93 : vector<1x8x256xf32> to vector<8x256xf32>
    %95 = vector.shape_cast %49 : vector<8x256xf32> to vector<1x8x256xf32>
    tpu.vector_store %arg12[%c0_45, %c0_46, %c0_47], %95 {strides = array<i32>} : memref<2x8x256xf32, #tpu.memory_space<vmem>>, vector<1x8x256xf32>,
    %c1_48 = arith.constant 1 : index
    %c0_49 = arith.constant 0 : index
    %c0_50 = arith.constant 0 : index
    %96 = vector.load %arg11[%c1_48, %c0_49, %c0_50] : memref<2x8x256xbf16, #tpu.memory_space<vmem>>, vector<1x8x256xbf16>
    %97 = vector.shape_cast %96 : vector<1x8x256xbf16> to vector<8x256xbf16>
    %98 = vector.shape_cast %89 : vector<8x256xbf16> to vector<1x8x256xbf16>
    tpu.vector_store %arg11[%c1_48, %c0_49, %c0_50], %98 {strides = array<i32>} : memref<2x8x256xbf16, #tpu.memory_space<vmem>>, vector<1x8x256xbf16>,
    %c1_51 = arith.constant 1 : index
    %c0_52 = arith.constant 0 : index
    %c0_53 = arith.constant 0 : index
    %99 = vector.load %arg12[%c1_51, %c0_52, %c0_53] : memref<2x8x256xf32, #tpu.memory_space<vmem>>, vector<1x8x256xf32>
    %100 = vector.shape_cast %99 : vector<1x8x256xf32> to vector<8x256xf32>
    %101 = vector.shape_cast %86 : vector<8x256xf32> to vector<1x8x256xf32>
    tpu.vector_store %arg12[%c1_51, %c0_52, %c0_53], %101 {strides = array<i32>} : memref<2x8x256xf32, #tpu.memory_space<vmem>>, vector<1x8x256xf32>,
    %102 = arith.index_cast %c0_i32_8 : i32 to index
    %c0_54 = arith.constant 0 : index
    %c0_55 = arith.constant 0 : index
    %103 = vector.load %arg8[%102, %c0_54, %c0_55] : memref<4x8x256xbf16, #tpu.memory_space<vmem>>, vector<1x8x256xbf16>
    %104 = vector.shape_cast %103 : vector<1x8x256xbf16> to vector<8x256xbf16>
    %105 = vector.shape_cast %89 : vector<8x256xbf16> to vector<1x8x256xbf16>
    tpu.vector_store %arg8[%102, %c0_54, %c0_55], %105 {strides = array<i32>} : memref<4x8x256xbf16, #tpu.memory_space<vmem>>, vector<1x8x256xbf16>,
    %c4_i32 = arith.constant 4 : i32
    %106 = arith.muli %arg0, %c4_i32 : i32
    %107 = arith.addi %106, %c0_i32_8 : i32
    %c9_i32 = arith.constant 9 : i32
    %108 = arith.cmpi eq, %107, %c9_i32 : i32
    %109 = arith.extui %108 : i1 to i32
    %c0_i32_56 = arith.constant 0 : i32
    %110 = arith.cmpi ne, %109, %c0_i32_56 : i32
    scf.if %110 {
      %c0_214 = arith.constant 0 : index
      %c0_215 = arith.constant 0 : index
      %c0_216 = arith.constant 0 : index
      %423 = vector.load %arg9[%c0_214, %c0_215, %c0_216] : memref<2x8x256xf32, #tpu.memory_space<vmem>>, vector<1x8x256xf32>
      %424 = vector.shape_cast %423 : vector<1x8x256xf32> to vector<8x256xf32>
      %425 = vector.shape_cast %51 : vector<8x256xf32> to vector<1x8x256xf32>
      tpu.vector_store %arg9[%c0_214, %c0_215, %c0_216], %425 {strides = array<i32>} : memref<2x8x256xf32, #tpu.memory_space<vmem>>, vector<1x8x256xf32>,
      %c1_217 = arith.constant 1 : index
      %c0_218 = arith.constant 0 : index
      %c0_219 = arith.constant 0 : index
      %426 = vector.load %arg9[%c1_217, %c0_218, %c0_219] : memref<2x8x256xf32, #tpu.memory_space<vmem>>, vector<1x8x256xf32>
      %427 = vector.shape_cast %426 : vector<1x8x256xf32> to vector<8x256xf32>
      %428 = vector.shape_cast %88 : vector<8x256xf32> to vector<1x8x256xf32>
      tpu.vector_store %arg9[%c1_217, %c0_218, %c0_219], %428 {strides = array<i32>} : memref<2x8x256xf32, #tpu.memory_space<vmem>>, vector<1x8x256xf32>,
      %c0_220 = arith.constant 0 : index
      %c0_221 = arith.constant 0 : index
      %c0_222 = arith.constant 0 : index
      %429 = vector.load %arg10[%c0_220, %c0_221, %c0_222] : memref<2x8x256xf32, #tpu.memory_space<vmem>>, vector<1x8x256xf32>
      %430 = vector.shape_cast %429 : vector<1x8x256xf32> to vector<8x256xf32>
      %431 = vector.shape_cast %49 : vector<8x256xf32> to vector<1x8x256xf32>
      tpu.vector_store %arg10[%c0_220, %c0_221, %c0_222], %431 {strides = array<i32>} : memref<2x8x256xf32, #tpu.memory_space<vmem>>, vector<1x8x256xf32>,
      %c1_223 = arith.constant 1 : index
      %c0_224 = arith.constant 0 : index
      %c0_225 = arith.constant 0 : index
      %432 = vector.load %arg10[%c1_223, %c0_224, %c0_225] : memref<2x8x256xf32, #tpu.memory_space<vmem>>, vector<1x8x256xf32>
      %433 = vector.shape_cast %432 : vector<1x8x256xf32> to vector<8x256xf32>
      %434 = vector.shape_cast %86 : vector<8x256xf32> to vector<1x8x256xf32>
      tpu.vector_store %arg10[%c1_223, %c0_224, %c0_225], %434 {strides = array<i32>} : memref<2x8x256xf32, #tpu.memory_space<vmem>>, vector<1x8x256xf32>,
    } else {
    }
    %c1_i32 = arith.constant 1 : i32
    %111 = arith.index_cast %c1_i32 : i32 to index
    %c0_57 = arith.constant 0 : index
    %c0_58 = arith.constant 0 : index
    %112 = vector.load %arg1[%111, %c0_57, %c0_58] : memref<4x8x1024xbf16, #tpu.memory_space<vmem>>, vector<1x8x1024xbf16>
    %113 = vector.shape_cast %112 : vector<1x8x1024xbf16> to vector<8x1024xbf16>
    %114 = arith.extf %113 : vector<8x1024xbf16> to vector<8x1024xf32>
    %c0_59 = arith.constant 0 : index
    %c0_60 = arith.constant 0 : index
    %c0_61 = arith.constant 0 : index
    %115 = vector.load %arg11[%c0_59, %c0_60, %c0_61] : memref<2x8x256xbf16, #tpu.memory_space<vmem>>, vector<1x8x256xbf16>
    %116 = vector.shape_cast %115 : vector<1x8x256xbf16> to vector<8x256xbf16>
    %c0_62 = arith.constant 0 : index
    %c0_63 = arith.constant 0 : index
    %c0_64 = arith.constant 0 : index
    %117 = vector.load %arg12[%c0_62, %c0_63, %c0_64] : memref<2x8x256xf32, #tpu.memory_space<vmem>>, vector<1x8x256xf32>
    %118 = vector.shape_cast %117 : vector<1x8x256xf32> to vector<8x256xf32>
    %c1_65 = arith.constant 1 : index
    %c0_66 = arith.constant 0 : index
    %c0_67 = arith.constant 0 : index
    %119 = vector.load %arg11[%c1_65, %c0_66, %c0_67] : memref<2x8x256xbf16, #tpu.memory_space<vmem>>, vector<1x8x256xbf16>
    %120 = vector.shape_cast %119 : vector<1x8x256xbf16> to vector<8x256xbf16>
    %c1_68 = arith.constant 1 : index
    %c0_69 = arith.constant 0 : index
    %c0_70 = arith.constant 0 : index
    %121 = vector.load %arg12[%c1_68, %c0_69, %c0_70] : memref<2x8x256xf32, #tpu.memory_space<vmem>>, vector<1x8x256xf32>
    %122 = vector.shape_cast %121 : vector<1x8x256xf32> to vector<8x256xf32>
    %cst_71 = arith.constant dense<0.000000e+00> : vector<8x1024xf32>
    %123 = tpu.matmul %116, %3, %cst_71 {dimension_numbers = #tpu.dot_dimension_numbers<[1], [0], [0], [1], [0, 0, 1, 1], [], []>} : vector<8x256xbf16>, vector<256x1024xbf16>, vector<8x1024xf32> -> vector<8x1024xf32>
    %124 = arith.addf %123, %114 : vector<8x1024xf32>
    %125 = vector.extract_strided_slice %124 {offsets = [0, 0], sizes = [8, 256], strides = [1, 1]} : vector<8x1024xf32> to vector<8x256xf32>
    %cst_72 = arith.constant 5.000000e-01 : f32
    %126 = vector.broadcast %cst_72 : f32 to vector<8x256xf32>
    %127 = arith.mulf %126, %125 : vector<8x256xf32>
    %128 = math.tanh %127 : vector<8x256xf32>
    %cst_73 = arith.constant 5.000000e-01 : f32
    %129 = vector.broadcast %cst_73 : f32 to vector<8x256xf32>
    %130 = arith.mulf %129, %128 : vector<8x256xf32>
    %cst_74 = arith.constant 5.000000e-01 : f32
    %131 = vector.broadcast %cst_74 : f32 to vector<8x256xf32>
    %132 = arith.addf %130, %131 : vector<8x256xf32>
    %133 = vector.extract_strided_slice %124 {offsets = [0, 256], sizes = [8, 256], strides = [1, 1]} : vector<8x1024xf32> to vector<8x256xf32>
    %cst_75 = arith.constant 5.000000e-01 : f32
    %134 = vector.broadcast %cst_75 : f32 to vector<8x256xf32>
    %135 = arith.mulf %134, %133 : vector<8x256xf32>
    %136 = math.tanh %135 : vector<8x256xf32>
    %cst_76 = arith.constant 5.000000e-01 : f32
    %137 = vector.broadcast %cst_76 : f32 to vector<8x256xf32>
    %138 = arith.mulf %137, %136 : vector<8x256xf32>
    %cst_77 = arith.constant 5.000000e-01 : f32
    %139 = vector.broadcast %cst_77 : f32 to vector<8x256xf32>
    %140 = arith.addf %138, %139 : vector<8x256xf32>
    %141 = vector.extract_strided_slice %124 {offsets = [0, 512], sizes = [8, 256], strides = [1, 1]} : vector<8x1024xf32> to vector<8x256xf32>
    %142 = math.tanh %141 : vector<8x256xf32>
    %143 = vector.extract_strided_slice %124 {offsets = [0, 768], sizes = [8, 256], strides = [1, 1]} : vector<8x1024xf32> to vector<8x256xf32>
    %cst_78 = arith.constant 5.000000e-01 : f32
    %144 = vector.broadcast %cst_78 : f32 to vector<8x256xf32>
    %145 = arith.mulf %144, %143 : vector<8x256xf32>
    %146 = math.tanh %145 : vector<8x256xf32>
    %cst_79 = arith.constant 5.000000e-01 : f32
    %147 = vector.broadcast %cst_79 : f32 to vector<8x256xf32>
    %148 = arith.mulf %147, %146 : vector<8x256xf32>
    %cst_80 = arith.constant 5.000000e-01 : f32
    %149 = vector.broadcast %cst_80 : f32 to vector<8x256xf32>
    %150 = arith.addf %148, %149 : vector<8x256xf32>
    %151 = arith.mulf %140, %118 : vector<8x256xf32>
    %152 = arith.mulf %132, %142 : vector<8x256xf32>
    %153 = arith.addf %151, %152 : vector<8x256xf32>
    %154 = math.tanh %153 : vector<8x256xf32>
    %155 = arith.mulf %150, %154 : vector<8x256xf32>
    %156 = arith.truncf %155 : vector<8x256xf32> to vector<8x256xbf16>
    %cst_81 = arith.constant dense<0.000000e+00> : vector<8x1024xf32>
    %157 = tpu.matmul %156, %4, %cst_81 {dimension_numbers = #tpu.dot_dimension_numbers<[1], [0], [0], [1], [0, 0, 1, 1], [], []>} : vector<8x256xbf16>, vector<256x1024xbf16>, vector<8x1024xf32> -> vector<8x1024xf32>
    %cst_82 = arith.constant dense<0.000000e+00> : vector<8x1024xf32>
    %158 = tpu.matmul %120, %5, %cst_82 {dimension_numbers = #tpu.dot_dimension_numbers<[1], [0], [0], [1], [0, 0, 1, 1], [], []>} : vector<8x256xbf16>, vector<256x1024xbf16>, vector<8x1024xf32> -> vector<8x1024xf32>
    %159 = arith.addf %157, %158 : vector<8x1024xf32>
    %160 = vector.broadcast %6 : vector<1x1024xf32> to vector<8x1024xf32>
    %161 = arith.addf %159, %160 : vector<8x1024xf32>
    %162 = vector.extract_strided_slice %161 {offsets = [0, 0], sizes = [8, 256], strides = [1, 1]} : vector<8x1024xf32> to vector<8x256xf32>
    %cst_83 = arith.constant 5.000000e-01 : f32
    %163 = vector.broadcast %cst_83 : f32 to vector<8x256xf32>
    %164 = arith.mulf %163, %162 : vector<8x256xf32>
    %165 = math.tanh %164 : vector<8x256xf32>
    %cst_84 = arith.constant 5.000000e-01 : f32
    %166 = vector.broadcast %cst_84 : f32 to vector<8x256xf32>
    %167 = arith.mulf %166, %165 : vector<8x256xf32>
    %cst_85 = arith.constant 5.000000e-01 : f32
    %168 = vector.broadcast %cst_85 : f32 to vector<8x256xf32>
    %169 = arith.addf %167, %168 : vector<8x256xf32>
    %170 = vector.extract_strided_slice %161 {offsets = [0, 256], sizes = [8, 256], strides = [1, 1]} : vector<8x1024xf32> to vector<8x256xf32>
    %cst_86 = arith.constant 5.000000e-01 : f32
    %171 = vector.broadcast %cst_86 : f32 to vector<8x256xf32>
    %172 = arith.mulf %171, %170 : vector<8x256xf32>
    %173 = math.tanh %172 : vector<8x256xf32>
    %cst_87 = arith.constant 5.000000e-01 : f32
    %174 = vector.broadcast %cst_87 : f32 to vector<8x256xf32>
    %175 = arith.mulf %174, %173 : vector<8x256xf32>
    %cst_88 = arith.constant 5.000000e-01 : f32
    %176 = vector.broadcast %cst_88 : f32 to vector<8x256xf32>
    %177 = arith.addf %175, %176 : vector<8x256xf32>
    %178 = vector.extract_strided_slice %161 {offsets = [0, 512], sizes = [8, 256], strides = [1, 1]} : vector<8x1024xf32> to vector<8x256xf32>
    %179 = math.tanh %178 : vector<8x256xf32>
    %180 = vector.extract_strided_slice %161 {offsets = [0, 768], sizes = [8, 256], strides = [1, 1]} : vector<8x1024xf32> to vector<8x256xf32>
    %cst_89 = arith.constant 5.000000e-01 : f32
    %181 = vector.broadcast %cst_89 : f32 to vector<8x256xf32>
    %182 = arith.mulf %181, %180 : vector<8x256xf32>
    %183 = math.tanh %182 : vector<8x256xf32>
    %cst_90 = arith.constant 5.000000e-01 : f32
    %184 = vector.broadcast %cst_90 : f32 to vector<8x256xf32>
    %185 = arith.mulf %184, %183 : vector<8x256xf32>
    %cst_91 = arith.constant 5.000000e-01 : f32
    %186 = vector.broadcast %cst_91 : f32 to vector<8x256xf32>
    %187 = arith.addf %185, %186 : vector<8x256xf32>
    %188 = arith.mulf %177, %122 : vector<8x256xf32>
    %189 = arith.mulf %169, %179 : vector<8x256xf32>
    %190 = arith.addf %188, %189 : vector<8x256xf32>
    %191 = math.tanh %190 : vector<8x256xf32>
    %192 = arith.mulf %187, %191 : vector<8x256xf32>
    %193 = arith.truncf %192 : vector<8x256xf32> to vector<8x256xbf16>
    %c0_92 = arith.constant 0 : index
    %c0_93 = arith.constant 0 : index
    %c0_94 = arith.constant 0 : index
    %194 = vector.load %arg11[%c0_92, %c0_93, %c0_94] : memref<2x8x256xbf16, #tpu.memory_space<vmem>>, vector<1x8x256xbf16>
    %195 = vector.shape_cast %194 : vector<1x8x256xbf16> to vector<8x256xbf16>
    %196 = vector.shape_cast %156 : vector<8x256xbf16> to vector<1x8x256xbf16>
    tpu.vector_store %arg11[%c0_92, %c0_93, %c0_94], %196 {strides = array<i32>} : memref<2x8x256xbf16, #tpu.memory_space<vmem>>, vector<1x8x256xbf16>,
    %c0_95 = arith.constant 0 : index
    %c0_96 = arith.constant 0 : index
    %c0_97 = arith.constant 0 : index
    %197 = vector.load %arg12[%c0_95, %c0_96, %c0_97] : memref<2x8x256xf32, #tpu.memory_space<vmem>>, vector<1x8x256xf32>
    %198 = vector.shape_cast %197 : vector<1x8x256xf32> to vector<8x256xf32>
    %199 = vector.shape_cast %153 : vector<8x256xf32> to vector<1x8x256xf32>
    tpu.vector_store %arg12[%c0_95, %c0_96, %c0_97], %199 {strides = array<i32>} : memref<2x8x256xf32, #tpu.memory_space<vmem>>, vector<1x8x256xf32>,
    %c1_98 = arith.constant 1 : index
    %c0_99 = arith.constant 0 : index
    %c0_100 = arith.constant 0 : index
    %200 = vector.load %arg11[%c1_98, %c0_99, %c0_100] : memref<2x8x256xbf16, #tpu.memory_space<vmem>>, vector<1x8x256xbf16>
    %201 = vector.shape_cast %200 : vector<1x8x256xbf16> to vector<8x256xbf16>
    %202 = vector.shape_cast %193 : vector<8x256xbf16> to vector<1x8x256xbf16>
    tpu.vector_store %arg11[%c1_98, %c0_99, %c0_100], %202 {strides = array<i32>} : memref<2x8x256xbf16, #tpu.memory_space<vmem>>, vector<1x8x256xbf16>,
    %c1_101 = arith.constant 1 : index
    %c0_102 = arith.constant 0 : index
    %c0_103 = arith.constant 0 : index
    %203 = vector.load %arg12[%c1_101, %c0_102, %c0_103] : memref<2x8x256xf32, #tpu.memory_space<vmem>>, vector<1x8x256xf32>
    %204 = vector.shape_cast %203 : vector<1x8x256xf32> to vector<8x256xf32>
    %205 = vector.shape_cast %190 : vector<8x256xf32> to vector<1x8x256xf32>
    tpu.vector_store %arg12[%c1_101, %c0_102, %c0_103], %205 {strides = array<i32>} : memref<2x8x256xf32, #tpu.memory_space<vmem>>, vector<1x8x256xf32>,
    %206 = arith.index_cast %c1_i32 : i32 to index
    %c0_104 = arith.constant 0 : index
    %c0_105 = arith.constant 0 : index
    %207 = vector.load %arg8[%206, %c0_104, %c0_105] : memref<4x8x256xbf16, #tpu.memory_space<vmem>>, vector<1x8x256xbf16>
    %208 = vector.shape_cast %207 : vector<1x8x256xbf16> to vector<8x256xbf16>
    %209 = vector.shape_cast %193 : vector<8x256xbf16> to vector<1x8x256xbf16>
    tpu.vector_store %arg8[%206, %c0_104, %c0_105], %209 {strides = array<i32>} : memref<4x8x256xbf16, #tpu.memory_space<vmem>>, vector<1x8x256xbf16>,
    %c4_i32_106 = arith.constant 4 : i32
    %210 = arith.muli %arg0, %c4_i32_106 : i32
    %211 = arith.addi %210, %c1_i32 : i32
    %c9_i32_107 = arith.constant 9 : i32
    %212 = arith.cmpi eq, %211, %c9_i32_107 : i32
    %213 = arith.extui %212 : i1 to i32
    %c0_i32_108 = arith.constant 0 : i32
    %214 = arith.cmpi ne, %213, %c0_i32_108 : i32
    scf.if %214 {
      %c0_214 = arith.constant 0 : index
      %c0_215 = arith.constant 0 : index
      %c0_216 = arith.constant 0 : index
      %423 = vector.load %arg9[%c0_214, %c0_215, %c0_216] : memref<2x8x256xf32, #tpu.memory_space<vmem>>, vector<1x8x256xf32>
      %424 = vector.shape_cast %423 : vector<1x8x256xf32> to vector<8x256xf32>
      %425 = vector.shape_cast %155 : vector<8x256xf32> to vector<1x8x256xf32>
      tpu.vector_store %arg9[%c0_214, %c0_215, %c0_216], %425 {strides = array<i32>} : memref<2x8x256xf32, #tpu.memory_space<vmem>>, vector<1x8x256xf32>,
      %c1_217 = arith.constant 1 : index
      %c0_218 = arith.constant 0 : index
      %c0_219 = arith.constant 0 : index
      %426 = vector.load %arg9[%c1_217, %c0_218, %c0_219] : memref<2x8x256xf32, #tpu.memory_space<vmem>>, vector<1x8x256xf32>
      %427 = vector.shape_cast %426 : vector<1x8x256xf32> to vector<8x256xf32>
      %428 = vector.shape_cast %192 : vector<8x256xf32> to vector<1x8x256xf32>
      tpu.vector_store %arg9[%c1_217, %c0_218, %c0_219], %428 {strides = array<i32>} : memref<2x8x256xf32, #tpu.memory_space<vmem>>, vector<1x8x256xf32>,
      %c0_220 = arith.constant 0 : index
      %c0_221 = arith.constant 0 : index
      %c0_222 = arith.constant 0 : index
      %429 = vector.load %arg10[%c0_220, %c0_221, %c0_222] : memref<2x8x256xf32, #tpu.memory_space<vmem>>, vector<1x8x256xf32>
      %430 = vector.shape_cast %429 : vector<1x8x256xf32> to vector<8x256xf32>
      %431 = vector.shape_cast %153 : vector<8x256xf32> to vector<1x8x256xf32>
      tpu.vector_store %arg10[%c0_220, %c0_221, %c0_222], %431 {strides = array<i32>} : memref<2x8x256xf32, #tpu.memory_space<vmem>>, vector<1x8x256xf32>,
      %c1_223 = arith.constant 1 : index
      %c0_224 = arith.constant 0 : index
      %c0_225 = arith.constant 0 : index
      %432 = vector.load %arg10[%c1_223, %c0_224, %c0_225] : memref<2x8x256xf32, #tpu.memory_space<vmem>>, vector<1x8x256xf32>
      %433 = vector.shape_cast %432 : vector<1x8x256xf32> to vector<8x256xf32>
      %434 = vector.shape_cast %190 : vector<8x256xf32> to vector<1x8x256xf32>
      tpu.vector_store %arg10[%c1_223, %c0_224, %c0_225], %434 {strides = array<i32>} : memref<2x8x256xf32, #tpu.memory_space<vmem>>, vector<1x8x256xf32>,
    } else {
    }
    %c2_i32 = arith.constant 2 : i32
    %215 = arith.index_cast %c2_i32 : i32 to index
    %c0_109 = arith.constant 0 : index
    %c0_110 = arith.constant 0 : index
    %216 = vector.load %arg1[%215, %c0_109, %c0_110] : memref<4x8x1024xbf16, #tpu.memory_space<vmem>>, vector<1x8x1024xbf16>
    %217 = vector.shape_cast %216 : vector<1x8x1024xbf16> to vector<8x1024xbf16>
    %218 = arith.extf %217 : vector<8x1024xbf16> to vector<8x1024xf32>
    %c0_111 = arith.constant 0 : index
    %c0_112 = arith.constant 0 : index
    %c0_113 = arith.constant 0 : index
    %219 = vector.load %arg11[%c0_111, %c0_112, %c0_113] : memref<2x8x256xbf16, #tpu.memory_space<vmem>>, vector<1x8x256xbf16>
    %220 = vector.shape_cast %219 : vector<1x8x256xbf16> to vector<8x256xbf16>
    %c0_114 = arith.constant 0 : index
    %c0_115 = arith.constant 0 : index
    %c0_116 = arith.constant 0 : index
    %221 = vector.load %arg12[%c0_114, %c0_115, %c0_116] : memref<2x8x256xf32, #tpu.memory_space<vmem>>, vector<1x8x256xf32>
    %222 = vector.shape_cast %221 : vector<1x8x256xf32> to vector<8x256xf32>
    %c1_117 = arith.constant 1 : index
    %c0_118 = arith.constant 0 : index
    %c0_119 = arith.constant 0 : index
    %223 = vector.load %arg11[%c1_117, %c0_118, %c0_119] : memref<2x8x256xbf16, #tpu.memory_space<vmem>>, vector<1x8x256xbf16>
    %224 = vector.shape_cast %223 : vector<1x8x256xbf16> to vector<8x256xbf16>
    %c1_120 = arith.constant 1 : index
    %c0_121 = arith.constant 0 : index
    %c0_122 = arith.constant 0 : index
    %225 = vector.load %arg12[%c1_120, %c0_121, %c0_122] : memref<2x8x256xf32, #tpu.memory_space<vmem>>, vector<1x8x256xf32>
    %226 = vector.shape_cast %225 : vector<1x8x256xf32> to vector<8x256xf32>
    %cst_123 = arith.constant dense<0.000000e+00> : vector<8x1024xf32>
    %227 = tpu.matmul %220, %3, %cst_123 {dimension_numbers = #tpu.dot_dimension_numbers<[1], [0], [0], [1], [0, 0, 1, 1], [], []>} : vector<8x256xbf16>, vector<256x1024xbf16>, vector<8x1024xf32> -> vector<8x1024xf32>
    %228 = arith.addf %227, %218 : vector<8x1024xf32>
    %229 = vector.extract_strided_slice %228 {offsets = [0, 0], sizes = [8, 256], strides = [1, 1]} : vector<8x1024xf32> to vector<8x256xf32>
    %cst_124 = arith.constant 5.000000e-01 : f32
    %230 = vector.broadcast %cst_124 : f32 to vector<8x256xf32>
    %231 = arith.mulf %230, %229 : vector<8x256xf32>
    %232 = math.tanh %231 : vector<8x256xf32>
    %cst_125 = arith.constant 5.000000e-01 : f32
    %233 = vector.broadcast %cst_125 : f32 to vector<8x256xf32>
    %234 = arith.mulf %233, %232 : vector<8x256xf32>
    %cst_126 = arith.constant 5.000000e-01 : f32
    %235 = vector.broadcast %cst_126 : f32 to vector<8x256xf32>
    %236 = arith.addf %234, %235 : vector<8x256xf32>
    %237 = vector.extract_strided_slice %228 {offsets = [0, 256], sizes = [8, 256], strides = [1, 1]} : vector<8x1024xf32> to vector<8x256xf32>
    %cst_127 = arith.constant 5.000000e-01 : f32
    %238 = vector.broadcast %cst_127 : f32 to vector<8x256xf32>
    %239 = arith.mulf %238, %237 : vector<8x256xf32>
    %240 = math.tanh %239 : vector<8x256xf32>
    %cst_128 = arith.constant 5.000000e-01 : f32
    %241 = vector.broadcast %cst_128 : f32 to vector<8x256xf32>
    %242 = arith.mulf %241, %240 : vector<8x256xf32>
    %cst_129 = arith.constant 5.000000e-01 : f32
    %243 = vector.broadcast %cst_129 : f32 to vector<8x256xf32>
    %244 = arith.addf %242, %243 : vector<8x256xf32>
    %245 = vector.extract_strided_slice %228 {offsets = [0, 512], sizes = [8, 256], strides = [1, 1]} : vector<8x1024xf32> to vector<8x256xf32>
    %246 = math.tanh %245 : vector<8x256xf32>
    %247 = vector.extract_strided_slice %228 {offsets = [0, 768], sizes = [8, 256], strides = [1, 1]} : vector<8x1024xf32> to vector<8x256xf32>
    %cst_130 = arith.constant 5.000000e-01 : f32
    %248 = vector.broadcast %cst_130 : f32 to vector<8x256xf32>
    %249 = arith.mulf %248, %247 : vector<8x256xf32>
    %250 = math.tanh %249 : vector<8x256xf32>
    %cst_131 = arith.constant 5.000000e-01 : f32
    %251 = vector.broadcast %cst_131 : f32 to vector<8x256xf32>
    %252 = arith.mulf %251, %250 : vector<8x256xf32>
    %cst_132 = arith.constant 5.000000e-01 : f32
    %253 = vector.broadcast %cst_132 : f32 to vector<8x256xf32>
    %254 = arith.addf %252, %253 : vector<8x256xf32>
    %255 = arith.mulf %244, %222 : vector<8x256xf32>
    %256 = arith.mulf %236, %246 : vector<8x256xf32>
    %257 = arith.addf %255, %256 : vector<8x256xf32>
    %258 = math.tanh %257 : vector<8x256xf32>
    %259 = arith.mulf %254, %258 : vector<8x256xf32>
    %260 = arith.truncf %259 : vector<8x256xf32> to vector<8x256xbf16>
    %cst_133 = arith.constant dense<0.000000e+00> : vector<8x1024xf32>
    %261 = tpu.matmul %260, %4, %cst_133 {dimension_numbers = #tpu.dot_dimension_numbers<[1], [0], [0], [1], [0, 0, 1, 1], [], []>} : vector<8x256xbf16>, vector<256x1024xbf16>, vector<8x1024xf32> -> vector<8x1024xf32>
    %cst_134 = arith.constant dense<0.000000e+00> : vector<8x1024xf32>
    %262 = tpu.matmul %224, %5, %cst_134 {dimension_numbers = #tpu.dot_dimension_numbers<[1], [0], [0], [1], [0, 0, 1, 1], [], []>} : vector<8x256xbf16>, vector<256x1024xbf16>, vector<8x1024xf32> -> vector<8x1024xf32>
    %263 = arith.addf %261, %262 : vector<8x1024xf32>
    %264 = vector.broadcast %6 : vector<1x1024xf32> to vector<8x1024xf32>
    %265 = arith.addf %263, %264 : vector<8x1024xf32>
    %266 = vector.extract_strided_slice %265 {offsets = [0, 0], sizes = [8, 256], strides = [1, 1]} : vector<8x1024xf32> to vector<8x256xf32>
    %cst_135 = arith.constant 5.000000e-01 : f32
    %267 = vector.broadcast %cst_135 : f32 to vector<8x256xf32>
    %268 = arith.mulf %267, %266 : vector<8x256xf32>
    %269 = math.tanh %268 : vector<8x256xf32>
    %cst_136 = arith.constant 5.000000e-01 : f32
    %270 = vector.broadcast %cst_136 : f32 to vector<8x256xf32>
    %271 = arith.mulf %270, %269 : vector<8x256xf32>
    %cst_137 = arith.constant 5.000000e-01 : f32
    %272 = vector.broadcast %cst_137 : f32 to vector<8x256xf32>
    %273 = arith.addf %271, %272 : vector<8x256xf32>
    %274 = vector.extract_strided_slice %265 {offsets = [0, 256], sizes = [8, 256], strides = [1, 1]} : vector<8x1024xf32> to vector<8x256xf32>
    %cst_138 = arith.constant 5.000000e-01 : f32
    %275 = vector.broadcast %cst_138 : f32 to vector<8x256xf32>
    %276 = arith.mulf %275, %274 : vector<8x256xf32>
    %277 = math.tanh %276 : vector<8x256xf32>
    %cst_139 = arith.constant 5.000000e-01 : f32
    %278 = vector.broadcast %cst_139 : f32 to vector<8x256xf32>
    %279 = arith.mulf %278, %277 : vector<8x256xf32>
    %cst_140 = arith.constant 5.000000e-01 : f32
    %280 = vector.broadcast %cst_140 : f32 to vector<8x256xf32>
    %281 = arith.addf %279, %280 : vector<8x256xf32>
    %282 = vector.extract_strided_slice %265 {offsets = [0, 512], sizes = [8, 256], strides = [1, 1]} : vector<8x1024xf32> to vector<8x256xf32>
    %283 = math.tanh %282 : vector<8x256xf32>
    %284 = vector.extract_strided_slice %265 {offsets = [0, 768], sizes = [8, 256], strides = [1, 1]} : vector<8x1024xf32> to vector<8x256xf32>
    %cst_141 = arith.constant 5.000000e-01 : f32
    %285 = vector.broadcast %cst_141 : f32 to vector<8x256xf32>
    %286 = arith.mulf %285, %284 : vector<8x256xf32>
    %287 = math.tanh %286 : vector<8x256xf32>
    %cst_142 = arith.constant 5.000000e-01 : f32
    %288 = vector.broadcast %cst_142 : f32 to vector<8x256xf32>
    %289 = arith.mulf %288, %287 : vector<8x256xf32>
    %cst_143 = arith.constant 5.000000e-01 : f32
    %290 = vector.broadcast %cst_143 : f32 to vector<8x256xf32>
    %291 = arith.addf %289, %290 : vector<8x256xf32>
    %292 = arith.mulf %281, %226 : vector<8x256xf32>
    %293 = arith.mulf %273, %283 : vector<8x256xf32>
    %294 = arith.addf %292, %293 : vector<8x256xf32>
    %295 = math.tanh %294 : vector<8x256xf32>
    %296 = arith.mulf %291, %295 : vector<8x256xf32>
    %297 = arith.truncf %296 : vector<8x256xf32> to vector<8x256xbf16>
    %c0_144 = arith.constant 0 : index
    %c0_145 = arith.constant 0 : index
    %c0_146 = arith.constant 0 : index
    %298 = vector.load %arg11[%c0_144, %c0_145, %c0_146] : memref<2x8x256xbf16, #tpu.memory_space<vmem>>, vector<1x8x256xbf16>
    %299 = vector.shape_cast %298 : vector<1x8x256xbf16> to vector<8x256xbf16>
    %300 = vector.shape_cast %260 : vector<8x256xbf16> to vector<1x8x256xbf16>
    tpu.vector_store %arg11[%c0_144, %c0_145, %c0_146], %300 {strides = array<i32>} : memref<2x8x256xbf16, #tpu.memory_space<vmem>>, vector<1x8x256xbf16>,
    %c0_147 = arith.constant 0 : index
    %c0_148 = arith.constant 0 : index
    %c0_149 = arith.constant 0 : index
    %301 = vector.load %arg12[%c0_147, %c0_148, %c0_149] : memref<2x8x256xf32, #tpu.memory_space<vmem>>, vector<1x8x256xf32>
    %302 = vector.shape_cast %301 : vector<1x8x256xf32> to vector<8x256xf32>
    %303 = vector.shape_cast %257 : vector<8x256xf32> to vector<1x8x256xf32>
    tpu.vector_store %arg12[%c0_147, %c0_148, %c0_149], %303 {strides = array<i32>} : memref<2x8x256xf32, #tpu.memory_space<vmem>>, vector<1x8x256xf32>,
    %c1_150 = arith.constant 1 : index
    %c0_151 = arith.constant 0 : index
    %c0_152 = arith.constant 0 : index
    %304 = vector.load %arg11[%c1_150, %c0_151, %c0_152] : memref<2x8x256xbf16, #tpu.memory_space<vmem>>, vector<1x8x256xbf16>
    %305 = vector.shape_cast %304 : vector<1x8x256xbf16> to vector<8x256xbf16>
    %306 = vector.shape_cast %297 : vector<8x256xbf16> to vector<1x8x256xbf16>
    tpu.vector_store %arg11[%c1_150, %c0_151, %c0_152], %306 {strides = array<i32>} : memref<2x8x256xbf16, #tpu.memory_space<vmem>>, vector<1x8x256xbf16>,
    %c1_153 = arith.constant 1 : index
    %c0_154 = arith.constant 0 : index
    %c0_155 = arith.constant 0 : index
    %307 = vector.load %arg12[%c1_153, %c0_154, %c0_155] : memref<2x8x256xf32, #tpu.memory_space<vmem>>, vector<1x8x256xf32>
    %308 = vector.shape_cast %307 : vector<1x8x256xf32> to vector<8x256xf32>
    %309 = vector.shape_cast %294 : vector<8x256xf32> to vector<1x8x256xf32>
    tpu.vector_store %arg12[%c1_153, %c0_154, %c0_155], %309 {strides = array<i32>} : memref<2x8x256xf32, #tpu.memory_space<vmem>>, vector<1x8x256xf32>,
    %310 = arith.index_cast %c2_i32 : i32 to index
    %c0_156 = arith.constant 0 : index
    %c0_157 = arith.constant 0 : index
    %311 = vector.load %arg8[%310, %c0_156, %c0_157] : memref<4x8x256xbf16, #tpu.memory_space<vmem>>, vector<1x8x256xbf16>
    %312 = vector.shape_cast %311 : vector<1x8x256xbf16> to vector<8x256xbf16>
    %313 = vector.shape_cast %297 : vector<8x256xbf16> to vector<1x8x256xbf16>
    tpu.vector_store %arg8[%310, %c0_156, %c0_157], %313 {strides = array<i32>} : memref<4x8x256xbf16, #tpu.memory_space<vmem>>, vector<1x8x256xbf16>,
    %c4_i32_158 = arith.constant 4 : i32
    %314 = arith.muli %arg0, %c4_i32_158 : i32
    %315 = arith.addi %314, %c2_i32 : i32
    %c9_i32_159 = arith.constant 9 : i32
    %316 = arith.cmpi eq, %315, %c9_i32_159 : i32
    %317 = arith.extui %316 : i1 to i32
    %c0_i32_160 = arith.constant 0 : i32
    %318 = arith.cmpi ne, %317, %c0_i32_160 : i32
    scf.if %318 {
      %c0_214 = arith.constant 0 : index
      %c0_215 = arith.constant 0 : index
      %c0_216 = arith.constant 0 : index
      %423 = vector.load %arg9[%c0_214, %c0_215, %c0_216] : memref<2x8x256xf32, #tpu.memory_space<vmem>>, vector<1x8x256xf32>
      %424 = vector.shape_cast %423 : vector<1x8x256xf32> to vector<8x256xf32>
      %425 = vector.shape_cast %259 : vector<8x256xf32> to vector<1x8x256xf32>
      tpu.vector_store %arg9[%c0_214, %c0_215, %c0_216], %425 {strides = array<i32>} : memref<2x8x256xf32, #tpu.memory_space<vmem>>, vector<1x8x256xf32>,
      %c1_217 = arith.constant 1 : index
      %c0_218 = arith.constant 0 : index
      %c0_219 = arith.constant 0 : index
      %426 = vector.load %arg9[%c1_217, %c0_218, %c0_219] : memref<2x8x256xf32, #tpu.memory_space<vmem>>, vector<1x8x256xf32>
      %427 = vector.shape_cast %426 : vector<1x8x256xf32> to vector<8x256xf32>
      %428 = vector.shape_cast %296 : vector<8x256xf32> to vector<1x8x256xf32>
      tpu.vector_store %arg9[%c1_217, %c0_218, %c0_219], %428 {strides = array<i32>} : memref<2x8x256xf32, #tpu.memory_space<vmem>>, vector<1x8x256xf32>,
      %c0_220 = arith.constant 0 : index
      %c0_221 = arith.constant 0 : index
      %c0_222 = arith.constant 0 : index
      %429 = vector.load %arg10[%c0_220, %c0_221, %c0_222] : memref<2x8x256xf32, #tpu.memory_space<vmem>>, vector<1x8x256xf32>
      %430 = vector.shape_cast %429 : vector<1x8x256xf32> to vector<8x256xf32>
      %431 = vector.shape_cast %257 : vector<8x256xf32> to vector<1x8x256xf32>
      tpu.vector_store %arg10[%c0_220, %c0_221, %c0_222], %431 {strides = array<i32>} : memref<2x8x256xf32, #tpu.memory_space<vmem>>, vector<1x8x256xf32>,
      %c1_223 = arith.constant 1 : index
      %c0_224 = arith.constant 0 : index
      %c0_225 = arith.constant 0 : index
      %432 = vector.load %arg10[%c1_223, %c0_224, %c0_225] : memref<2x8x256xf32, #tpu.memory_space<vmem>>, vector<1x8x256xf32>
      %433 = vector.shape_cast %432 : vector<1x8x256xf32> to vector<8x256xf32>
      %434 = vector.shape_cast %294 : vector<8x256xf32> to vector<1x8x256xf32>
      tpu.vector_store %arg10[%c1_223, %c0_224, %c0_225], %434 {strides = array<i32>} : memref<2x8x256xf32, #tpu.memory_space<vmem>>, vector<1x8x256xf32>,
    } else {
    }
    %c3_i32 = arith.constant 3 : i32
    %319 = arith.index_cast %c3_i32 : i32 to index
    %c0_161 = arith.constant 0 : index
    %c0_162 = arith.constant 0 : index
    %320 = vector.load %arg1[%319, %c0_161, %c0_162] : memref<4x8x1024xbf16, #tpu.memory_space<vmem>>, vector<1x8x1024xbf16>
    %321 = vector.shape_cast %320 : vector<1x8x1024xbf16> to vector<8x1024xbf16>
    %322 = arith.extf %321 : vector<8x1024xbf16> to vector<8x1024xf32>
    %c0_163 = arith.constant 0 : index
    %c0_164 = arith.constant 0 : index
    %c0_165 = arith.constant 0 : index
    %323 = vector.load %arg11[%c0_163, %c0_164, %c0_165] : memref<2x8x256xbf16, #tpu.memory_space<vmem>>, vector<1x8x256xbf16>
    %324 = vector.shape_cast %323 : vector<1x8x256xbf16> to vector<8x256xbf16>
    %c0_166 = arith.constant 0 : index
    %c0_167 = arith.constant 0 : index
    %c0_168 = arith.constant 0 : index
    %325 = vector.load %arg12[%c0_166, %c0_167, %c0_168] : memref<2x8x256xf32, #tpu.memory_space<vmem>>, vector<1x8x256xf32>
    %326 = vector.shape_cast %325 : vector<1x8x256xf32> to vector<8x256xf32>
    %c1_169 = arith.constant 1 : index
    %c0_170 = arith.constant 0 : index
    %c0_171 = arith.constant 0 : index
    %327 = vector.load %arg11[%c1_169, %c0_170, %c0_171] : memref<2x8x256xbf16, #tpu.memory_space<vmem>>, vector<1x8x256xbf16>
    %328 = vector.shape_cast %327 : vector<1x8x256xbf16> to vector<8x256xbf16>
    %c1_172 = arith.constant 1 : index
    %c0_173 = arith.constant 0 : index
    %c0_174 = arith.constant 0 : index
    %329 = vector.load %arg12[%c1_172, %c0_173, %c0_174] : memref<2x8x256xf32, #tpu.memory_space<vmem>>, vector<1x8x256xf32>
    %330 = vector.shape_cast %329 : vector<1x8x256xf32> to vector<8x256xf32>
    %cst_175 = arith.constant dense<0.000000e+00> : vector<8x1024xf32>
    %331 = tpu.matmul %324, %3, %cst_175 {dimension_numbers = #tpu.dot_dimension_numbers<[1], [0], [0], [1], [0, 0, 1, 1], [], []>} : vector<8x256xbf16>, vector<256x1024xbf16>, vector<8x1024xf32> -> vector<8x1024xf32>
    %332 = arith.addf %331, %322 : vector<8x1024xf32>
    %333 = vector.extract_strided_slice %332 {offsets = [0, 0], sizes = [8, 256], strides = [1, 1]} : vector<8x1024xf32> to vector<8x256xf32>
    %cst_176 = arith.constant 5.000000e-01 : f32
    %334 = vector.broadcast %cst_176 : f32 to vector<8x256xf32>
    %335 = arith.mulf %334, %333 : vector<8x256xf32>
    %336 = math.tanh %335 : vector<8x256xf32>
    %cst_177 = arith.constant 5.000000e-01 : f32
    %337 = vector.broadcast %cst_177 : f32 to vector<8x256xf32>
    %338 = arith.mulf %337, %336 : vector<8x256xf32>
    %cst_178 = arith.constant 5.000000e-01 : f32
    %339 = vector.broadcast %cst_178 : f32 to vector<8x256xf32>
    %340 = arith.addf %338, %339 : vector<8x256xf32>
    %341 = vector.extract_strided_slice %332 {offsets = [0, 256], sizes = [8, 256], strides = [1, 1]} : vector<8x1024xf32> to vector<8x256xf32>
    %cst_179 = arith.constant 5.000000e-01 : f32
    %342 = vector.broadcast %cst_179 : f32 to vector<8x256xf32>
    %343 = arith.mulf %342, %341 : vector<8x256xf32>
    %344 = math.tanh %343 : vector<8x256xf32>
    %cst_180 = arith.constant 5.000000e-01 : f32
    %345 = vector.broadcast %cst_180 : f32 to vector<8x256xf32>
    %346 = arith.mulf %345, %344 : vector<8x256xf32>
    %cst_181 = arith.constant 5.000000e-01 : f32
    %347 = vector.broadcast %cst_181 : f32 to vector<8x256xf32>
    %348 = arith.addf %346, %347 : vector<8x256xf32>
    %349 = vector.extract_strided_slice %332 {offsets = [0, 512], sizes = [8, 256], strides = [1, 1]} : vector<8x1024xf32> to vector<8x256xf32>
    %350 = math.tanh %349 : vector<8x256xf32>
    %351 = vector.extract_strided_slice %332 {offsets = [0, 768], sizes = [8, 256], strides = [1, 1]} : vector<8x1024xf32> to vector<8x256xf32>
    %cst_182 = arith.constant 5.000000e-01 : f32
    %352 = vector.broadcast %cst_182 : f32 to vector<8x256xf32>
    %353 = arith.mulf %352, %351 : vector<8x256xf32>
    %354 = math.tanh %353 : vector<8x256xf32>
    %cst_183 = arith.constant 5.000000e-01 : f32
    %355 = vector.broadcast %cst_183 : f32 to vector<8x256xf32>
    %356 = arith.mulf %355, %354 : vector<8x256xf32>
    %cst_184 = arith.constant 5.000000e-01 : f32
    %357 = vector.broadcast %cst_184 : f32 to vector<8x256xf32>
    %358 = arith.addf %356, %357 : vector<8x256xf32>
    %359 = arith.mulf %348, %326 : vector<8x256xf32>
    %360 = arith.mulf %340, %350 : vector<8x256xf32>
    %361 = arith.addf %359, %360 : vector<8x256xf32>
    %362 = math.tanh %361 : vector<8x256xf32>
    %363 = arith.mulf %358, %362 : vector<8x256xf32>
    %364 = arith.truncf %363 : vector<8x256xf32> to vector<8x256xbf16>
    %cst_185 = arith.constant dense<0.000000e+00> : vector<8x1024xf32>
    %365 = tpu.matmul %364, %4, %cst_185 {dimension_numbers = #tpu.dot_dimension_numbers<[1], [0], [0], [1], [0, 0, 1, 1], [], []>} : vector<8x256xbf16>, vector<256x1024xbf16>, vector<8x1024xf32> -> vector<8x1024xf32>
    %cst_186 = arith.constant dense<0.000000e+00> : vector<8x1024xf32>
    %366 = tpu.matmul %328, %5, %cst_186 {dimension_numbers = #tpu.dot_dimension_numbers<[1], [0], [0], [1], [0, 0, 1, 1], [], []>} : vector<8x256xbf16>, vector<256x1024xbf16>, vector<8x1024xf32> -> vector<8x1024xf32>
    %367 = arith.addf %365, %366 : vector<8x1024xf32>
    %368 = vector.broadcast %6 : vector<1x1024xf32> to vector<8x1024xf32>
    %369 = arith.addf %367, %368 : vector<8x1024xf32>
    %370 = vector.extract_strided_slice %369 {offsets = [0, 0], sizes = [8, 256], strides = [1, 1]} : vector<8x1024xf32> to vector<8x256xf32>
    %cst_187 = arith.constant 5.000000e-01 : f32
    %371 = vector.broadcast %cst_187 : f32 to vector<8x256xf32>
    %372 = arith.mulf %371, %370 : vector<8x256xf32>
    %373 = math.tanh %372 : vector<8x256xf32>
    %cst_188 = arith.constant 5.000000e-01 : f32
    %374 = vector.broadcast %cst_188 : f32 to vector<8x256xf32>
    %375 = arith.mulf %374, %373 : vector<8x256xf32>
    %cst_189 = arith.constant 5.000000e-01 : f32
    %376 = vector.broadcast %cst_189 : f32 to vector<8x256xf32>
    %377 = arith.addf %375, %376 : vector<8x256xf32>
    %378 = vector.extract_strided_slice %369 {offsets = [0, 256], sizes = [8, 256], strides = [1, 1]} : vector<8x1024xf32> to vector<8x256xf32>
    %cst_190 = arith.constant 5.000000e-01 : f32
    %379 = vector.broadcast %cst_190 : f32 to vector<8x256xf32>
    %380 = arith.mulf %379, %378 : vector<8x256xf32>
    %381 = math.tanh %380 : vector<8x256xf32>
    %cst_191 = arith.constant 5.000000e-01 : f32
    %382 = vector.broadcast %cst_191 : f32 to vector<8x256xf32>
    %383 = arith.mulf %382, %381 : vector<8x256xf32>
    %cst_192 = arith.constant 5.000000e-01 : f32
    %384 = vector.broadcast %cst_192 : f32 to vector<8x256xf32>
    %385 = arith.addf %383, %384 : vector<8x256xf32>
    %386 = vector.extract_strided_slice %369 {offsets = [0, 512], sizes = [8, 256], strides = [1, 1]} : vector<8x1024xf32> to vector<8x256xf32>
    %387 = math.tanh %386 : vector<8x256xf32>
    %388 = vector.extract_strided_slice %369 {offsets = [0, 768], sizes = [8, 256], strides = [1, 1]} : vector<8x1024xf32> to vector<8x256xf32>
    %cst_193 = arith.constant 5.000000e-01 : f32
    %389 = vector.broadcast %cst_193 : f32 to vector<8x256xf32>
    %390 = arith.mulf %389, %388 : vector<8x256xf32>
    %391 = math.tanh %390 : vector<8x256xf32>
    %cst_194 = arith.constant 5.000000e-01 : f32
    %392 = vector.broadcast %cst_194 : f32 to vector<8x256xf32>
    %393 = arith.mulf %392, %391 : vector<8x256xf32>
    %cst_195 = arith.constant 5.000000e-01 : f32
    %394 = vector.broadcast %cst_195 : f32 to vector<8x256xf32>
    %395 = arith.addf %393, %394 : vector<8x256xf32>
    %396 = arith.mulf %385, %330 : vector<8x256xf32>
    %397 = arith.mulf %377, %387 : vector<8x256xf32>
    %398 = arith.addf %396, %397 : vector<8x256xf32>
    %399 = math.tanh %398 : vector<8x256xf32>
    %400 = arith.mulf %395, %399 : vector<8x256xf32>
    %401 = arith.truncf %400 : vector<8x256xf32> to vector<8x256xbf16>
    %c0_196 = arith.constant 0 : index
    %c0_197 = arith.constant 0 : index
    %c0_198 = arith.constant 0 : index
    %402 = vector.load %arg11[%c0_196, %c0_197, %c0_198] : memref<2x8x256xbf16, #tpu.memory_space<vmem>>, vector<1x8x256xbf16>
    %403 = vector.shape_cast %402 : vector<1x8x256xbf16> to vector<8x256xbf16>
    %404 = vector.shape_cast %364 : vector<8x256xbf16> to vector<1x8x256xbf16>
    tpu.vector_store %arg11[%c0_196, %c0_197, %c0_198], %404 {strides = array<i32>} : memref<2x8x256xbf16, #tpu.memory_space<vmem>>, vector<1x8x256xbf16>,
    %c0_199 = arith.constant 0 : index
    %c0_200 = arith.constant 0 : index
    %c0_201 = arith.constant 0 : index
    %405 = vector.load %arg12[%c0_199, %c0_200, %c0_201] : memref<2x8x256xf32, #tpu.memory_space<vmem>>, vector<1x8x256xf32>
    %406 = vector.shape_cast %405 : vector<1x8x256xf32> to vector<8x256xf32>
    %407 = vector.shape_cast %361 : vector<8x256xf32> to vector<1x8x256xf32>
    tpu.vector_store %arg12[%c0_199, %c0_200, %c0_201], %407 {strides = array<i32>} : memref<2x8x256xf32, #tpu.memory_space<vmem>>, vector<1x8x256xf32>,
    %c1_202 = arith.constant 1 : index
    %c0_203 = arith.constant 0 : index
    %c0_204 = arith.constant 0 : index
    %408 = vector.load %arg11[%c1_202, %c0_203, %c0_204] : memref<2x8x256xbf16, #tpu.memory_space<vmem>>, vector<1x8x256xbf16>
    %409 = vector.shape_cast %408 : vector<1x8x256xbf16> to vector<8x256xbf16>
    %410 = vector.shape_cast %401 : vector<8x256xbf16> to vector<1x8x256xbf16>
    tpu.vector_store %arg11[%c1_202, %c0_203, %c0_204], %410 {strides = array<i32>} : memref<2x8x256xbf16, #tpu.memory_space<vmem>>, vector<1x8x256xbf16>,
    %c1_205 = arith.constant 1 : index
    %c0_206 = arith.constant 0 : index
    %c0_207 = arith.constant 0 : index
    %411 = vector.load %arg12[%c1_205, %c0_206, %c0_207] : memref<2x8x256xf32, #tpu.memory_space<vmem>>, vector<1x8x256xf32>
    %412 = vector.shape_cast %411 : vector<1x8x256xf32> to vector<8x256xf32>
    %413 = vector.shape_cast %398 : vector<8x256xf32> to vector<1x8x256xf32>
    tpu.vector_store %arg12[%c1_205, %c0_206, %c0_207], %413 {strides = array<i32>} : memref<2x8x256xf32, #tpu.memory_space<vmem>>, vector<1x8x256xf32>,
    %414 = arith.index_cast %c3_i32 : i32 to index
    %c0_208 = arith.constant 0 : index
    %c0_209 = arith.constant 0 : index
    %415 = vector.load %arg8[%414, %c0_208, %c0_209] : memref<4x8x256xbf16, #tpu.memory_space<vmem>>, vector<1x8x256xbf16>
    %416 = vector.shape_cast %415 : vector<1x8x256xbf16> to vector<8x256xbf16>
    %417 = vector.shape_cast %401 : vector<8x256xbf16> to vector<1x8x256xbf16>
    tpu.vector_store %arg8[%414, %c0_208, %c0_209], %417 {strides = array<i32>} : memref<4x8x256xbf16, #tpu.memory_space<vmem>>, vector<1x8x256xbf16>,
    %c4_i32_210 = arith.constant 4 : i32
    %418 = arith.muli %arg0, %c4_i32_210 : i32
    %419 = arith.addi %418, %c3_i32 : i32
    %c9_i32_211 = arith.constant 9 : i32
    %420 = arith.cmpi eq, %419, %c9_i32_211 : i32
    %421 = arith.extui %420 : i1 to i32
    %c0_i32_212 = arith.constant 0 : i32
    %422 = arith.cmpi ne, %421, %c0_i32_212 : i32
    scf.if %422 {
      %c0_214 = arith.constant 0 : index
      %c0_215 = arith.constant 0 : index
      %c0_216 = arith.constant 0 : index
      %423 = vector.load %arg9[%c0_214, %c0_215, %c0_216] : memref<2x8x256xf32, #tpu.memory_space<vmem>>, vector<1x8x256xf32>
      %424 = vector.shape_cast %423 : vector<1x8x256xf32> to vector<8x256xf32>
      %425 = vector.shape_cast %363 : vector<8x256xf32> to vector<1x8x256xf32>
      tpu.vector_store %arg9[%c0_214, %c0_215, %c0_216], %425 {strides = array<i32>} : memref<2x8x256xf32, #tpu.memory_space<vmem>>, vector<1x8x256xf32>,
      %c1_217 = arith.constant 1 : index
      %c0_218 = arith.constant 0 : index
      %c0_219 = arith.constant 0 : index
      %426 = vector.load %arg9[%c1_217, %c0_218, %c0_219] : memref<2x8x256xf32, #tpu.memory_space<vmem>>, vector<1x8x256xf32>
      %427 = vector.shape_cast %426 : vector<1x8x256xf32> to vector<8x256xf32>
      %428 = vector.shape_cast %400 : vector<8x256xf32> to vector<1x8x256xf32>
      tpu.vector_store %arg9[%c1_217, %c0_218, %c0_219], %428 {strides = array<i32>} : memref<2x8x256xf32, #tpu.memory_space<vmem>>, vector<1x8x256xf32>,
      %c0_220 = arith.constant 0 : index
      %c0_221 = arith.constant 0 : index
      %c0_222 = arith.constant 0 : index
      %429 = vector.load %arg10[%c0_220, %c0_221, %c0_222] : memref<2x8x256xf32, #tpu.memory_space<vmem>>, vector<1x8x256xf32>
      %430 = vector.shape_cast %429 : vector<1x8x256xf32> to vector<8x256xf32>
      %431 = vector.shape_cast %361 : vector<8x256xf32> to vector<1x8x256xf32>
      tpu.vector_store %arg10[%c0_220, %c0_221, %c0_222], %431 {strides = array<i32>} : memref<2x8x256xf32, #tpu.memory_space<vmem>>, vector<1x8x256xf32>,
      %c1_223 = arith.constant 1 : index
      %c0_224 = arith.constant 0 : index
      %c0_225 = arith.constant 0 : index
      %432 = vector.load %arg10[%c1_223, %c0_224, %c0_225] : memref<2x8x256xf32, #tpu.memory_space<vmem>>, vector<1x8x256xf32>
      %433 = vector.shape_cast %432 : vector<1x8x256xf32> to vector<8x256xf32>
      %434 = vector.shape_cast %398 : vector<8x256xf32> to vector<1x8x256xf32>
      tpu.vector_store %arg10[%c1_223, %c0_224, %c0_225], %434 {strides = array<i32>} : memref<2x8x256xf32, #tpu.memory_space<vmem>>, vector<1x8x256xf32>,
    } else {
    }
    %c4_i32_213 = arith.constant 4 : i32
    return
  }
  func.func @transform_0(%arg0: i32) -> (i32, i32, i32) {
    %c0_i32 = arith.constant 0 : i32
    %c0_i32_0 = arith.constant 0 : i32
    %c0_i32_1 = arith.constant 0 : i32
    return %arg0, %c0_i32, %c0_i32_0 : i32, i32, i32
  }
  func.func @transform_1(%arg0: i32) -> (i32, i32, i32) {
    %c0_i32 = arith.constant 0 : i32
    %c0_i32_0 = arith.constant 0 : i32
    %c0_i32_1 = arith.constant 0 : i32
    %c0_i32_2 = arith.constant 0 : i32
    return %c0_i32, %c0_i32_0, %c0_i32_1 : i32, i32, i32
  }
  func.func @transform_2(%arg0: i32) -> (i32, i32, i32) {
    %c0_i32 = arith.constant 0 : i32
    %c0_i32_0 = arith.constant 0 : i32
    %c0_i32_1 = arith.constant 0 : i32
    %c0_i32_2 = arith.constant 0 : i32
    return %c0_i32, %c0_i32_0, %c0_i32_1 : i32, i32, i32
  }
  func.func @transform_3(%arg0: i32) -> (i32, i32) {
    %c0_i32 = arith.constant 0 : i32
    %c0_i32_0 = arith.constant 0 : i32
    %c0_i32_1 = arith.constant 0 : i32
    return %c0_i32, %c0_i32_0 : i32, i32
  }
  func.func @transform_4(%arg0: i32) -> (i32, i32) {
    %c0_i32 = arith.constant 0 : i32
    %c0_i32_0 = arith.constant 0 : i32
    %c0_i32_1 = arith.constant 0 : i32
    return %c0_i32, %c0_i32_0 : i32, i32
  }
  func.func @transform_5(%arg0: i32) -> (i32, i32) {
    %c0_i32 = arith.constant 0 : i32
    %c0_i32_0 = arith.constant 0 : i32
    %c0_i32_1 = arith.constant 0 : i32
    return %c0_i32, %c0_i32_0 : i32, i32
  }
  func.func @transform_6(%arg0: i32) -> (i32, i32) {
    %c0_i32 = arith.constant 0 : i32
    %c0_i32_0 = arith.constant 0 : i32
    %c0_i32_1 = arith.constant 0 : i32
    return %c0_i32, %c0_i32_0 : i32, i32
  }
  func.func @transform_7(%arg0: i32) -> (i32, i32, i32) {
    %c0_i32 = arith.constant 0 : i32
    %c0_i32_0 = arith.constant 0 : i32
    %c0_i32_1 = arith.constant 0 : i32
    return %arg0, %c0_i32, %c0_i32_0 : i32, i32, i32
  }
  func.func @transform_8(%arg0: i32) -> (i32, i32, i32) {
    %c0_i32 = arith.constant 0 : i32
    %c0_i32_0 = arith.constant 0 : i32
    %c0_i32_1 = arith.constant 0 : i32
    %c0_i32_2 = arith.constant 0 : i32
    return %c0_i32, %c0_i32_0, %c0_i32_1 : i32, i32, i32
  }
  func.func @transform_9(%arg0: i32) -> (i32, i32, i32) {
    %c0_i32 = arith.constant 0 : i32
    %c0_i32_0 = arith.constant 0 : i32
    %c0_i32_1 = arith.constant 0 : i32
    %c0_i32_2 = arith.constant 0 : i32
    return %c0_i32, %c0_i32_0, %c0_i32_1 : i32, i32, i32
  }
}

</mosaic_0001>

<bundles_post_ra>
// kernel: tpu_custom_call.1
= control target key start
LH: loop header
LB: loop body
LE: loop exit
PB: predicated region body
PF: predicated region fallthrough
CT: control target
= control target key end

     0   :  { %s11842_s0 = inlined_call_operand.hbm [shape: bf16[12,8,1024], index: 0, kind: input, shape index: {}]   ;;  %s11843_s1 = inlined_call_operand.hbm [shape: f32[2,8,256], index: 1, kind: input, shape index: {}]   ;;  %s11844_s2 = inlined_call_operand.hbm [shape: f32[2,8,256], index: 2, kind: input, shape index: {}]   ;;  %s11845_s3 = inlined_call_operand.hbm [shape: bf16[256,1024], index: 3, kind: input, shape index: {}]   ;;  %s11846_s4 = inlined_call_operand.hbm [shape: bf16[256,1024], index: 4, kind: input, shape index: {}]   ;;  %s11847_s5 = inlined_call_operand.hbm [shape: bf16[256,1024], index: 5, kind: input, shape index: {}]   ;;  %s11848_s6 = inlined_call_operand.hbm [shape: f32[1,1024], index: 6, kind: input, shape index: {}]   ;;  %s11849_s7 = inlined_call_operand.hbm [shape: bf16[12,8,256], index: 7, kind: output, shape index: {0}]   ;;  %s11850_s8 = inlined_call_operand.hbm [shape: f32[2,8,256], index: 8, kind: output, shape index: {1}]   ;;  %s11851_s9 = inlined_call_operand.hbm [shape: f32[2,8,256], index: 9, kind: output, shape index: {2}]  }
   0x1   :  { %12220 = sst [smem:[#allocation390_spill]] %s11842_s0 }
   0x2   :  { %12221 = sst [smem:[#allocation391_spill]] %s11843_s1 }
   0x3   :  { %12222 = sst [smem:[#allocation392_spill]] %s11844_s2 }
   0x4   :  { %12223 = sst [smem:[#allocation393_spill]] %s11845_s3 }
   0x5   :  { %12224 = sst [smem:[#allocation394_spill]] %s11846_s4 }
   0x6   :  { %15 = vsyncpa [#allocation5], 0 }
   0x7   :  { %17 = vsyncpa [#allocation5 + $0x1], 0 }
   0x8   :  { %18 = vsyncpa [#allocation8], 0 }
   0x9   :  { %19 = vsyncpa [#allocation11], 0 }
   0xa   :  { %20 = vsyncpa [#allocation14], 0 }
   0xb   :  { %21 = vsyncpa [#allocation6], 0 }
   0xc   :  { %23 = vsyncpa [#allocation6 + $0x1], 0 }
   0xd   :  { %24 = vsyncpa [#allocation18], 0  ;;  %s8747_s30 = smov 0   ;;  %s8749_s10 = smov 0  }
   0xe   :  { %s8751_s11 = smov 0   ;;  %s8753_s12 = smov 0  }
   0xf LB: > { %s12225_s1 = sld [smem:[#allocation391_spill]]  ;;  %s8771_s16 = sadd.s32 4294967295, %s8679_s12   ;;  %s8679_s12 = sphi %s8753_s12, %s13696_s12   ;;  %s8675_s11 = sphi %s8751_s11, %s13695_s11   ;;  %s8671_s10 = sphi %s8749_s10, %s13694_s10   ;;  %s8667_s30 = sphi %s8747_s30, %s13693_s30  }
  0x10   : > { %p6066_p0 = scmp.ge.s32.totalorder %s8679_s12, 1  ;;  %p51_p1 = scmp.eq.s32.totalorder %s8771_s16, 0 }
  0x11   : > { %p255_p2 = scmp.lt.s32.totalorder %s8679_s12, 4  ;;  %s8681_s18 = smov [#allocation7]  }
  0x12   : > { %s268_s19 = sshll.u32 %s8681_s18, 4  ;;  %s12227_s3 = sld [smem:[#allocation393_spill]]  ;;  %s269_s19 = int_to_ptr.vmem [resolvable:$true] %s268_s19 }
  0x13   : > { %p8777_p4 = pnand %p6066_p0, %p255_p2  ;;  %s8682_s24 = smov [#allocation10]  }
  0x14   : > { %s296_s25 = sshll.u32 %s8682_s24, 4  ;;  %s8683_s26 = smov 256   ;;  %s297_s25 = int_to_ptr.vmem [resolvable:$true] %s296_s25 }
  0x15   : > { %s266_s15 = sshll.u32 %s12225_s1, 4  ;;  %p8078_p5 = pneg %p8777_p4  ;;  %s267_s15 = int_to_ptr.hbm [resolvable:$true] %s266_s15 }
  0x16   : > { %s8684_s27 = smov 16   ;;  %s11852_s28 = smov 512  }
  0x17   : > { %p8788_p6 = pnand %p8078_p5, %p51_p1  ;;  %s11853_s29 = smov 32  }
  0x18   : > { %s294_s22 = sshll.u32 %s12227_s3, 4  ;;  %s322_s18 = sshll.u32 %s11847_s5, 4  ;;  %s295_s22 = int_to_ptr.hbm [resolvable:$true] %s294_s22  ;;  %s323_s18 = int_to_ptr.hbm [resolvable:$true] %s322_s18 }
  0x19   : > { %8081 = dma.hbm_to_vmem [thread:$0]  (!%p8788_p6), %s267_s15, 512, %s269_s19, [#allocation8], %s8683_s26, %s8683_s26, %s8684_s27  }
  0x1a   : > { %8087 = dma.hbm_to_vmem [thread:$0]  (!%p8788_p6), %s295_s22, 16384, %s297_s25, [#allocation11], %s11852_s28, %s11852_s28, %s11853_s29  }
  0x1b   : > { %s8687_s20 = smov [#allocation13]   ;;  %s12229_s2 = sld [smem:[#allocation392_spill]] }
  0x1c   : > { %s324_s21 = sshll.u32 %s8687_s20, 4  ;;  %s8688_s22 = smov [#allocation9]   ;;  %s325_s21 = int_to_ptr.vmem [resolvable:$true] %s324_s21 }
  0x1d   : > { %8093 = dma.hbm_to_vmem [thread:$0]  (!%p8788_p6), %s323_s18, 16384, %s325_s21, [#allocation14], %s11852_s28, %s11852_s28, %s11853_s29  }
  0x1e   : > { %s282_s25 = sshll.u32 %s8688_s22, 4  ;;  %s12230_s4 = sld [smem:[#allocation394_spill]]  ;;  %s283_s25 = int_to_ptr.vmem [resolvable:$true] %s282_s25 }
  0x1f   : > { %s337_s18 = sshll.u32 %s11848_s6, 4  ;;  %s8689_s21 = smov [#allocation12]   ;;  %s338_s18 = int_to_ptr.hbm [resolvable:$true] %s337_s18 }
  0x20   : > { %s310_s22 = sshll.u32 %s8689_s21, 4  ;;  %s37_s14 = sadd.s32 1, %s8675_s11  ;;  %s311_s22 = int_to_ptr.vmem [resolvable:$true] %s310_s22 }
  0x21   : > { %s280_s19 = sshll.u32 %s12229_s2, 4  ;;  %p44_p8 = scmp.ne.s32.totalorder %s8675_s11, %s8671_s10  ;;  %s281_s19 = int_to_ptr.hbm [resolvable:$true] %s280_s19 }
  0x22   : > { %8084 = dma.hbm_to_vmem [thread:$0]  (!%p8788_p6), %s281_s19, 512, %s283_s25, [#allocation8], %s8683_s26, %s8683_s26, %s8684_s27  }
  0x23   : > { %s8690_s26 = smov [#allocation15]   ;;  %s6065_s19 = sadd.s32 4294967294, %s8679_s12  }
  0x24   : > { %s308_s20 = sshll.u32 %s12230_s4, 4  ;;  %s339_s27 = sshll.u32 %s8690_s26, 4  ;;  %s309_s20 = int_to_ptr.hbm [resolvable:$true] %s308_s20  ;;  %s340_s27 = int_to_ptr.vmem [resolvable:$true] %s339_s27 }
  0x25   : > { %8090 = dma.hbm_to_vmem [thread:$0]  (!%p8788_p6), %s309_s20, 16384, %s311_s22, [#allocation11], %s11852_s28, %s11852_s28, %s11853_s29  }
  0x26   : > { %8096 = dma.hbm_to_vmem [thread:$0]  (!%p8788_p6), %s338_s18, 128, %s340_s27, [#allocation14]  }
  0x27   : > { %s8827_s25 = sadd.s32 1, %s8679_s12   ;;  %p45_p9 = scmp.eq.s32.totalorder %s8679_s12, 0 }
  0x28   : > { %s34_s13 = ssub.s32 %s8679_s12, %s8827_s25  ;;  %p50_p10 = scmp.ne.s32.totalorder %s8671_s10, %s8667_s30 }
  0x29   : > { %p35_p7 = scmp.eq.s32.totalorder %s34_s13, 0  ;;  %p8840_p11 = por %p45_p9, %p44_p8 }
  0x2a   : > { %p8846_p12 = por %p51_p1, %p50_p10  ;;  %p11854_p13 = scmp.eq.s32.totalorder %s8771_s16, 2 }
  0x2b   : > { %s8838_s20 = scalar_select %p35_p7, %s8675_s11, %s37_s14  }
  0x2c   : > { %p206_p0 = scmp.eq.s32.totalorder %s6065_s19, 2  ;;  %p8111_p2 = scmp.lt.s32.totalorder %s8679_s12, 3 }
  0x2d   : > { %s350_s15 = sand.u32 1, %s8675_s11   ;;  %p8855_p5 = por %p11854_p13, %p44_p8 }
  0x2e   : > { %p8859_p6 = por %p206_p0, %p50_p10  ;;  %s6074_s22 = sshll.u32 %s350_s15, 7 }
  0x2f   : > { %s7655_s26 = sshll.u32 %s8679_s12, 7  ;;  %s12235_s0 = sld [smem:[#allocation390_spill]] }
  0x30   : > { %s354_s28 = scalar_lea.vmem [#allocation4], %s6074_s22  ;;  %p8869_p7 = pnand %p8111_p2, %p8840_p11 }
  0x31   : > { %s363_s29 = sshll.u32 %s354_s28, 4  ;;  %s351_s2 = scalar_lea.sflag [#allocation5], %s350_s15  ;;  %s364_s29 = int_to_ptr.vmem [resolvable:$true] %s363_s29 }
  0x32   : > { %p8515_p9 = pneg %p8869_p7 }
  0x35   : > { %s360_s14 = scalar_lea.hbm %s12235_s0, %s7655_s26  ;;  %s8518_s26 = scalar_lea.hbm %s12235_s0, 384 }
  0x36   : > { %s361_s19 = sshll.u32 %s360_s14, 4  ;;  %s362_s19 = int_to_ptr.hbm [resolvable:$true] %s361_s19 }
  0x37   : > { %s8511_s3 = sshra.s32 %s362_s19, 4  ;;  %s8512_s3 = int_to_ptr.hbm [resolvable:$true] %s8511_s3 }
  0x38   : > { %s8513_s4 = scalar_lea.hbm %s8512_s3, 128  ;;  %p8519_p11 = scmp.lt.s32.totalorder %s8512_s3, %s12235_s0 }
  0x39   : > { %p8514_p8 = scmp.ne.s32.totalorder %s8512_s3, %s8513_s4  ;;  %p8520_p2 = scmp.lt.s32.totalorder %s8518_s26, %s8513_s4 }
  0x3b   : > { %p8516_p10 = pnand %p8515_p9, %p8514_p8  ;;  %p8521_p13 = por %p8520_p2, %p8519_p11 }
  0x3d   : > { %p8517_p0 = pneg %p8516_p10 }
  0x3f   : > { %p8522_p3 = pnand %p8521_p13, %p8517_p0 }
  0x41   : > { %8525 = shalt.err (!%p8522_p3)
}
  0x42   : > { %s12237_s15 = smov 32   ;;  %s12238_s13 = smov 512  }
  0x43   : > { %8100 = dma.hbm_to_vmem [thread:$0]  (!%p8869_p7), %s362_s19, 2048, %s364_s29, %s351_s2, %s12238_s13, %s12238_s13, %s12237_s15  }
  0x44   : > { %375 = sbr.rel (%p8777_p4) target bundleno = 2325 (0x915), region = 48 }
  0x49   : > { %s8889_s14 = sand.u32 1, %s8671_s10  }
  0x4a   : > { %s6079_s3 = sshll.u32 %s8889_s14, 7  ;;  %s378_s4 = scalar_lea.sflag [#allocation5], %s8889_s14 }
  0x4b   : > { %s8893_s22 = scalar_lea.vmem [#allocation4], %s6079_s3 }
  0x4c   : > { %8642 = dma.done.wait (%p8846_p12), %s378_s4, 2048  }
  0x4d   : > { %8644 = vsyncadd (%p8846_p12), %s378_s4, 4294965248 }
  0x4e   : > { %8646 = dma.done.wait (%p51_p1), [#allocation8], 1024  }
  0x4f   : > { %8648 = vsyncadd (%p51_p1), [#allocation8], 4294966272 }
  0x50   : > { %8650 = dma.done.wait (%p51_p1), [#allocation11], 32768  }
  0x51   : > { %8652 = vsyncadd (%p51_p1), [#allocation11], 4294934528 }
  0x52   : > { %8654 = dma.done.wait (%p51_p1), [#allocation14], 16512  }
  0x53   : > { %8656 = vsyncadd (%p51_p1), [#allocation14], 4294950784  ;;  %s6086_s1 = sshll.u32 %s8889_s14, 5  ;;  %p12239_p3 = scmp.ne.s32.totalorder %s8771_s16, 0 }
  0x54   : > { %s8912_s2 = scalar_lea.vmem [#allocation16], %s6086_s1 }
  0x55   : > { %452 = sbr.rel (%p12239_p3) target bundleno = 98 (0x62), region = 80 }
  0x5a   : > { %v453_v0 = vld [vmem:[#allocation7] sm:$0xff]  ;;  %v454_v1 = vld [vmem:[#allocation7 + $0x8] sm:$0xff]  ;;  %v455_v2 = vld [vmem:[#allocation7 + $0x10] sm:$0xff] }
  0x5b   : > { %v457_v3 = vpack.c.bf16 %v454_v1, %v453_v0  ;;  %v456_v4 = vld [vmem:[#allocation7 + $0x18] sm:$0xff]  ;;  %v461_v5 = vld [vmem:[#allocation9] sm:$0xff]  ;;  %v462_v7 = vld [vmem:[#allocation9 + $0x8] sm:$0xff] }
  0x5c   : > { %v458_v6 = vpack.c.bf16 %v456_v4, %v455_v2  ;;  %465 = vst [vmem:[#allocation3 + $0x8] sm:$0xff] %v461_v5  ;;  %v463_v8 = vld [vmem:[#allocation9 + $0x10] sm:$0xff]  ;;  %v464_v9 = vld [vmem:[#allocation9 + $0x18] sm:$0xff] }
  0x5d   : > { %459 = vst [vmem:[#allocation2] sm:$0xff] %v457_v3 }
  0x5e   : > { %460 = vst [vmem:[#allocation2 + $0x8] sm:$0xff] %v458_v6 }
  0x5f   : > { %466 = vst [vmem:[#allocation3 + $0x10] sm:$0xff] %v462_v7 }
  0x60   : > { %467 = vst [vmem:[#allocation3] sm:$0xff] %v463_v8 }
  0x61   : > { %468 = vst [vmem:[#allocation3 + $0x18] sm:$0xff] %v464_v9 }
  0x62 PF: > { %v6314_v10 = vld [vmem:[#allocation10 + $0x1c0] sm:$0xf]  ;;  %v7712_v15 = vld [vmem:[#allocation10 + $0x1c4] sm:$0xf]  ;;  %s10197_s17 = sshll.u32 %s8771_s16, 2 }
  0x63   : > { %v7716_v11 = vld [vmem:[#allocation10 + $0x1dc] sm:$0xf0]  ;;  %v6316_v16 = vld [vmem:[#allocation10 + $0x1e0] sm:$0xf0]  ;;  %p7625_p1 = scmp.ne.s32.totalorder %s10197_s17, 9 }
  0x64   : > { %v6570_v12 = vld [vmem:[#allocation10 + $0x3c0] sm:$0xf]  ;;  %v8916_v13 = vor.u32 %v7716_v11, %v6314_v10  ;;  %v8920_v18 = vor.u32 %v7712_v15, %v6316_v16  ;;  %v7776_v19 = vld [vmem:[#allocation10 + $0x3c4] sm:$0xf] }
  0x65   : > { %v7780_v14 = vld [vmem:[#allocation10 + $0x3dc] sm:$0xf0]  ;;  %v6572_v20 = vld [vmem:[#allocation10 + $0x3e0] sm:$0xf0] }
  0x66   : > { %v8918_v17 = vor.u32 %v7780_v14, %v6570_v12  ;;  %v6282_v21 = vld [vmem:[#allocation10 + $0x180] sm:$0xf]  ;;  %1521 = vmatpush.bf16.msra.mxu0 %v8916_v13  ;;  %v8923_v22 = vor.u32 %v7776_v19, %v6572_v20  ;;  %1547 = vmatpush.bf16.msra.mxu2 %v8920_v18  ;;  %v7704_v28 = vld [vmem:[#allocation10 + $0x184] sm:$0xf] }
  0x67   : > { %v7708_v23 = vld [vmem:[#allocation10 + $0x19c] sm:$0xf0]  ;;  %v6284_v29 = vld [vmem:[#allocation10 + $0x1a0] sm:$0xf0] }
  0x68   : > { %v6538_v24 = vld [vmem:[#allocation10 + $0x380] sm:$0xf]  ;;  %1534 = vmatpush.bf16.msra.mxu1 %v8918_v17  ;;  %v8927_v26 = vor.u32 %v7708_v23, %v6282_v21  ;;  %v7768_v30 = vld [vmem:[#allocation10 + $0x384] sm:$0xf]  ;;  %1560 = vmatpush.bf16.msra.mxu3 %v8923_v22  ;;  %v8932_v31 = vor.u32 %v7704_v28, %v6284_v29 }
  0x69   : > { %v7772_v25 = vld [vmem:[#allocation10 + $0x39c] sm:$0xf0]  ;;  %v6540_v32 = vld [vmem:[#allocation10 + $0x3a0] sm:$0xf0] }
  0x6a   : > { %v8929_v27 = vor.u32 %v7772_v25, %v6538_v24  ;;  %v6250_v33 = vld [vmem:[#allocation10 + $0x140] sm:$0xf]  ;;  %v8934_v35 = vor.u32 %v7768_v30, %v6540_v32  ;;  %v7696_v38 = vld [vmem:[#allocation10 + $0x144] sm:$0xf]  ;;  %1522 = vmatpush.bf16.msra.mxu0 %v8927_v26  ;;  %1548 = vmatpush.bf16.msra.mxu2 %v8932_v31 }
  0x6b   : > { %v7700_v34 = vld [vmem:[#allocation10 + $0x15c] sm:$0xf0]  ;;  %v6252_v40 = vld [vmem:[#allocation10 + $0x160] sm:$0xf0] }
  0x6c   : > { %v6506_v36 = vld [vmem:[#allocation10 + $0x340] sm:$0xf]  ;;  %v8937_v39 = vor.u32 %v7700_v34, %v6250_v33  ;;  %v7760_v41 = vld [vmem:[#allocation10 + $0x344] sm:$0xf]  ;;  %1535 = vmatpush.bf16.msra.mxu1 %v8929_v27  ;;  %v8943_v44 = vor.u32 %v7696_v38, %v6252_v40  ;;  %1561 = vmatpush.bf16.msra.mxu3 %v8934_v35 }
  0x6d   : > { %v7764_v37 = vld [vmem:[#allocation10 + $0x35c] sm:$0xf0]  ;;  %v6508_v42 = vld [vmem:[#allocation10 + $0x360] sm:$0xf0] }
  0x6e   : > { %v8941_v43 = vor.u32 %v7764_v37, %v6506_v36  ;;  %v6218_v45 = vld [vmem:[#allocation10 + $0x100] sm:$0xf]  ;;  %v8946_v48 = vor.u32 %v7760_v41, %v6508_v42  ;;  %v7688_v50 = vld [vmem:[#allocation10 + $0x104] sm:$0xf]  ;;  %1523 = vmatpush.bf16.msra.mxu0 %v8937_v39  ;;  %1549 = vmatpush.bf16.msra.mxu2 %v8943_v44 }
  0x6f   : > { %v7692_v46 = vld [vmem:[#allocation10 + $0x11c] sm:$0xf0]  ;;  %v6220_v51 = vld [vmem:[#allocation10 + $0x120] sm:$0xf0] }
  0x70   : > { %v6474_v47 = vld [vmem:[#allocation10 + $0x300] sm:$0xf]  ;;  %v7752_v52 = vld [vmem:[#allocation10 + $0x304] sm:$0xf]  ;;  %v8949_v54 = vor.u32 %v7692_v46, %v6218_v45  ;;  %1536 = vmatpush.bf16.msra.mxu1 %v8941_v43  ;;  %v8955_v56 = vor.u32 %v7688_v50, %v6220_v51  ;;  %1562 = vmatpush.bf16.msra.mxu3 %v8946_v48  ;;  %v6322_v50 = vld [vmem:[#allocation10 + $0x1c8] sm:$0xf] }
  0x71   : > { %v7756_v49 = vld [vmem:[#allocation10 + $0x31c] sm:$0xf0]  ;;  %v6476_v53 = vld [vmem:[#allocation10 + $0x320] sm:$0xf0]  ;;  %v7717_v51 = vld [vmem:[#allocation10 + $0x1e4] sm:$0xf0] }
  0x72   : > { %v8953_v55 = vor.u32 %v7756_v49, %v6474_v47  ;;  %v6186_v57 = vld [vmem:[#allocation10 + $0xc0] sm:$0xf]  ;;  %v8958_v60 = vor.u32 %v7752_v52, %v6476_v53  ;;  %v7680_v62 = vld [vmem:[#allocation10 + $0xc4] sm:$0xf]  ;;  %1524 = vmatpush.bf16.msra.mxu0 %v8949_v54  ;;  %1550 = vmatpush.bf16.msra.mxu2 %v8955_v56  ;;  %v6578_v52 = vld [vmem:[#allocation10 + $0x3c8] sm:$0xf] }
  0x73   : > { %v7684_v58 = vld [vmem:[#allocation10 + $0xdc] sm:$0xf0]  ;;  %v6188_v63 = vld [vmem:[#allocation10 + $0xe0] sm:$0xf0] }
  0x74   : > { %v6442_v59 = vld [vmem:[#allocation10 + $0x2c0] sm:$0xf]  ;;  %v7744_v0 = vld [vmem:[#allocation10 + $0x2c4] sm:$0xf]  ;;  %v8961_v2 = vor.u32 %v7684_v58, %v6186_v57  ;;  %1537 = vmatpush.bf16.msra.mxu1 %v8953_v55  ;;  %v8967_v4 = vor.u32 %v7680_v62, %v6188_v63  ;;  %1563 = vmatpush.bf16.msra.mxu3 %v8958_v60  ;;  %v7781_v57 = vld [vmem:[#allocation10 + $0x3e4] sm:$0xf0] }
  0x75   : > { %v7748_v61 = vld [vmem:[#allocation10 + $0x2dc] sm:$0xf0]  ;;  %v6444_v1 = vld [vmem:[#allocation10 + $0x2e0] sm:$0xf0]  ;;  %v7713_v58 = vld [vmem:[#allocation10 + $0x1cc] sm:$0xf] }
  0x76   : > { %v8965_v3 = vor.u32 %v7748_v61, %v6442_v59  ;;  %v6154_v5 = vld [vmem:[#allocation10 + $0x80] sm:$0xf]  ;;  %v8970_v8 = vor.u32 %v7744_v0, %v6444_v1  ;;  %v7672_v10 = vld [vmem:[#allocation10 + $0x84] sm:$0xf]  ;;  %1525 = vmatpush.bf16.msra.mxu0 %v8961_v2  ;;  %1551 = vmatpush.bf16.msra.mxu2 %v8967_v4  ;;  %v6324_v59 = vld [vmem:[#allocation10 + $0x1e8] sm:$0xf0] }
  0x77   : > { %v7676_v6 = vld [vmem:[#allocation10 + $0x9c] sm:$0xf0]  ;;  %v6156_v11 = vld [vmem:[#allocation10 + $0xa0] sm:$0xf0]  ;;  %v7777_v63 = vld [vmem:[#allocation10 + $0x3cc] sm:$0xf] }
  0x78   : > { %v6410_v7 = vld [vmem:[#allocation10 + $0x280] sm:$0xf]  ;;  %v7736_v12 = vld [vmem:[#allocation10 + $0x284] sm:$0xf]  ;;  %v8973_v15 = vor.u32 %v7676_v6, %v6154_v5  ;;  %1538 = vmatpush.bf16.msra.mxu1 %v8965_v3  ;;  %v8979_v19 = vor.u32 %v7672_v10, %v6156_v11  ;;  %1564 = vmatpush.bf16.msra.mxu3 %v8970_v8  ;;  %v6580_v0 = vld [vmem:[#allocation10 + $0x3e8] sm:$0xf0]  ;;  %v9008_v5 = vor.u32 %v7717_v51, %v6322_v50 }
  0x79   : > { %v7740_v9 = vld [vmem:[#allocation10 + $0x29c] sm:$0xf0]  ;;  %v6412_v14 = vld [vmem:[#allocation10 + $0x2a0] sm:$0xf0]  ;;  %v9010_v6 = vor.u32 %v7781_v57, %v6578_v52  ;;  %v7709_v10 = vld [vmem:[#allocation10 + $0x1a4] sm:$0xf0] }
  0x7a   : > { %v8977_v16 = vor.u32 %v7740_v9, %v6410_v7  ;;  %v6122_v20 = vld [vmem:[#allocation10 + $0x40] sm:$0xf]  ;;  %v8982_v24 = vor.u32 %v7736_v12, %v6412_v14  ;;  %v7664_v28 = vld [vmem:[#allocation10 + $0x44] sm:$0xf]  ;;  %1526 = vmatpush.bf16.msra.mxu0 %v8973_v15  ;;  %1552 = vmatpush.bf16.msra.mxu2 %v8979_v19  ;;  %12248 = vst [vmem:[#allocation34_spill] sm:$0xff] %v9008_v5  ;;  %v866_v51 = vld [vmem:[#allocation2] sm:$0xff] }
  0x7b   : > { %v7668_v21 = vld [vmem:[#allocation10 + $0x5c] sm:$0xf0]  ;;  %v6124_v29 = vld [vmem:[#allocation10 + $0x60] sm:$0xf0]  ;;  %12249 = vst [vmem:[#allocation35_spill] sm:$0xff] %v9010_v6  ;;  %v9012_v7 = vor.u32 %v7713_v58, %v6324_v59  ;;  %v9015_v12 = vor.u32 %v7777_v63, %v6580_v0  ;;  %v875_v0 = vunpack.c.l.b16 %v866_v51 }
  0x7c   : > { %v6378_v23 = vld [vmem:[#allocation10 + $0x240] sm:$0xf]  ;;  %v7728_v30 = vld [vmem:[#allocation10 + $0x244] sm:$0xf]  ;;  %v8985_v33 = vor.u32 %v7668_v21, %v6122_v20  ;;  %1539 = vmatpush.bf16.msra.mxu1 %v8977_v16  ;;  %v8991_v38 = vor.u32 %v7664_v28, %v6124_v29  ;;  %1565 = vmatpush.bf16.msra.mxu3 %v8982_v24  ;;  %v6290_v9 = vld [vmem:[#allocation10 + $0x188] sm:$0xf] }
  0x7d   : > { %v7732_v25 = vld [vmem:[#allocation10 + $0x25c] sm:$0xf0]  ;;  %v6380_v32 = vld [vmem:[#allocation10 + $0x260] sm:$0xf0]  ;;  %12250 = vst [vmem:[#allocation36_spill] sm:$0xff] %v9012_v7  ;;  %v9021_v28 = vor.u32 %v7709_v10, %v6290_v9  ;;  %v876_v9 = vunpack.c.h.b16 %v866_v51 }
  0x7e   : > { %12240 = vst [vmem:[#allocation26_spill] sm:$0xff] %v8985_v33  ;;  %v6090_v34 = vld [vmem:[#allocation10] sm:$0xf]  ;;  %v8989_v37 = vor.u32 %v7732_v25, %v6378_v23  ;;  %v7656_v42 = vld [vmem:[#allocation10 + $0x4] sm:$0xf]  ;;  %v8994_v45 = vor.u32 %v7728_v30, %v6380_v32  ;;  %1527 = vmatpush.bf16.msra.mxu0 %v8985_v33  ;;  %1553 = vmatpush.bf16.msra.mxu2 %v8991_v38 }
  0x7f   : > { %v7660_v36 = vld [vmem:[#allocation10 + $0x1c] sm:$0xf0]  ;;  %12242 = vst [vmem:[#allocation28_spill] sm:$0xff] %v8991_v38  ;;  %v6092_v46 = vld [vmem:[#allocation10 + $0x20] sm:$0xf0] }
  0x80   : > { %12241 = vst [vmem:[#allocation27_spill] sm:$0xff] %v8989_v37  ;;  %v6346_v40 = vld [vmem:[#allocation10 + $0x200] sm:$0xf]  ;;  %v7720_v47 = vld [vmem:[#allocation10 + $0x204] sm:$0xf]  ;;  %v8997_v53 = vor.u32 %v7660_v36, %v6090_v34  ;;  %1540 = vmatpush.bf16.msra.mxu1 %v8989_v37  ;;  %v9003_v62 = vor.u32 %v7656_v42, %v6092_v46  ;;  %1566 = vmatpush.bf16.msra.mxu3 %v8994_v45 }
  0x81   : > { %v7724_v41 = vld [vmem:[#allocation10 + $0x21c] sm:$0xf0]  ;;  %12243 = vst [vmem:[#allocation29_spill] sm:$0xff] %v8994_v45  ;;  %v6348_v49 = vld [vmem:[#allocation10 + $0x220] sm:$0xf0] }
  0x82   : > { %12244 = vst [vmem:[#allocation30_spill] sm:$0xff] %v8997_v53  ;;  %v9001_v61 = vor.u32 %v7724_v41, %v6346_v40  ;;  %v9006_v1 = vor.u32 %v7720_v47, %v6348_v49  ;;  %v6546_v11 = vld [vmem:[#allocation10 + $0x388] sm:$0xf]  ;;  %1528 = vmatpush.bf16.msra.mxu0 %v8997_v53  ;;  %v7705_v20 = vld [vmem:[#allocation10 + $0x18c] sm:$0xf]  ;;  %1554 = vmatpush.bf16.msra.mxu2 %v9003_v62 }
  0x83   : > { %12246 = vst [vmem:[#allocation32_spill] sm:$0xff] %v9003_v62  ;;  %v7773_v14 = vld [vmem:[#allocation10 + $0x3a4] sm:$0xf0]  ;;  %v6292_v21 = vld [vmem:[#allocation10 + $0x1a8] sm:$0xf0] }
  0x84   : > { %12245 = vst [vmem:[#allocation31_spill] sm:$0xff] %v9001_v61  ;;  %1541 = vmatpush.bf16.msra.mxu1 %v9001_v61  ;;  %v7769_v23 = vld [vmem:[#allocation10 + $0x38c] sm:$0xf]  ;;  %1567 = vmatpush.bf16.msra.mxu3 %v9006_v1  ;;  %v9025_v29 = vor.u32 %v7773_v14, %v6546_v11  ;;  %v9027_v30 = vor.u32 %v7705_v20, %v6292_v21  ;;  %v6258_v32 = vld [vmem:[#allocation10 + $0x148] sm:$0xf] }
  0x85   : > { %12247 = vst [vmem:[#allocation33_spill] sm:$0xff] %v9006_v1  ;;  %v6548_v25 = vld [vmem:[#allocation10 + $0x3a8] sm:$0xf0]  ;;  %v7701_v34 = vld [vmem:[#allocation10 + $0x164] sm:$0xf0] }
  0x86   : > { %12251 = vst [vmem:[#allocation37_spill] sm:$0xff] %v9015_v12  ;;  %1573 = vmatpush.bf16.msrb.mxu0 %v9008_v5  ;;  %1599 = vmatpush.bf16.msrb.mxu2 %v9012_v7  ;;  %v6514_v36 = vld [vmem:[#allocation10 + $0x348] sm:$0xf]  ;;  %v9030_v40 = vor.u32 %v7769_v23, %v6548_v25  ;;  %v7697_v42 = vld [vmem:[#allocation10 + $0x14c] sm:$0xf]  ;;  %v9033_v50 = vor.u32 %v7701_v34, %v6258_v32 }
  0x87   : > { %12252 = vst [vmem:[#allocation38_spill] sm:$0xff] %v9021_v28  ;;  %v7765_v41 = vld [vmem:[#allocation10 + $0x364] sm:$0xf0]  ;;  %v6260_v46 = vld [vmem:[#allocation10 + $0x168] sm:$0xf0]  ;;  %v9044_v25 = vpack.c.b16 %v875_v0, %v875_v0  ;;  %v9046_v32 = vpack.c.b16 %v876_v9, %v876_v9 }
  0x88   : > { %1586 = vmatpush.bf16.msrb.mxu1 %v9010_v6  ;;  %12253 = vst [vmem:[#allocation39_spill] sm:$0xff] %v9025_v29  ;;  %1612 = vmatpush.bf16.msrb.mxu3 %v9015_v12  ;;  %v7761_v47 = vld [vmem:[#allocation10 + $0x34c] sm:$0xf]  ;;  %v9037_v52 = vor.u32 %v7765_v41, %v6514_v36  ;;  %v9039_v57 = vor.u32 %v7697_v42, %v6260_v46  ;;  %v6226_v58 = vld [vmem:[#allocation10 + $0x108] sm:$0xf] }
  0x89   : > { %12254 = vst [vmem:[#allocation40_spill] sm:$0xff] %v9027_v30  ;;  %v6516_v49 = vld [vmem:[#allocation10 + $0x368] sm:$0xf0]  ;;  %v7693_v59 = vld [vmem:[#allocation10 + $0x124] sm:$0xf0]  ;;  %1555 = vmatmul.bf16.vlgmr.msra.gmra.mxu2 %v9044_v25  ;;  %1568 = vmatmul.bf16.vlgmr.msra.gmra.mxu3 %v9046_v32 }
  0x8a   : > { %12255 = vst [vmem:[#allocation41_spill] sm:$0xff] %v9030_v40  ;;  %1574 = vmatpush.bf16.msrb.mxu0 %v9021_v28  ;;  %1600 = vmatpush.bf16.msrb.mxu2 %v9027_v30  ;;  %v6482_v63 = vld [vmem:[#allocation10 + $0x308] sm:$0xf]  ;;  %v9042_v10 = vor.u32 %v7761_v47, %v6516_v49  ;;  %v7689_v14 = vld [vmem:[#allocation10 + $0x10c] sm:$0xf]  ;;  %v9049_v34 = vor.u32 %v7693_v59, %v6226_v58 }
  0x8b   : > { %12256 = vst [vmem:[#allocation42_spill] sm:$0xff] %v9033_v50  ;;  %v7757_v11 = vld [vmem:[#allocation10 + $0x324] sm:$0xf0]  ;;  %v6228_v20 = vld [vmem:[#allocation10 + $0x128] sm:$0xf0]  ;;  %1529 = vmatmul.bf16.vlgmr.msra.gmra.mxu0 %v9044_v25  ;;  %1542 = vmatmul.bf16.vlgmr.msra.gmra.mxu1 %v9046_v32 }
  0x8c   : > { %1587 = vmatpush.bf16.msrb.mxu1 %v9025_v29  ;;  %12257 = vst [vmem:[#allocation43_spill] sm:$0xff] %v9037_v52  ;;  %1613 = vmatpush.bf16.msrb.mxu3 %v9030_v40  ;;  %v7753_v21 = vld [vmem:[#allocation10 + $0x30c] sm:$0xf]  ;;  %v9053_v36 = vor.u32 %v7757_v11, %v6482_v63  ;;  %v9055_v41 = vor.u32 %v7689_v14, %v6228_v20  ;;  %v6194_v42 = vld [vmem:[#allocation10 + $0xc8] sm:$0xf] }
  0x8d   : > { %12258 = vst [vmem:[#allocation44_spill] sm:$0xff] %v9039_v57  ;;  %v6484_v23 = vld [vmem:[#allocation10 + $0x328] sm:$0xf0]  ;;  %v7685_v46 = vld [vmem:[#allocation10 + $0xe4] sm:$0xf0] }
  0x8e   : > { %12259 = vst [vmem:[#allocation45_spill] sm:$0xff] %v9042_v10  ;;  %1575 = vmatpush.bf16.msrb.mxu0 %v9033_v50  ;;  %1601 = vmatpush.bf16.msrb.mxu2 %v9039_v57  ;;  %v6450_v47 = vld [vmem:[#allocation10 + $0x2c8] sm:$0xf]  ;;  %v9058_v49 = vor.u32 %v7753_v21, %v6484_v23  ;;  %v7681_v0 = vld [vmem:[#allocation10 + $0xcc] sm:$0xf]  ;;  %v9064_v63 = vor.u32 %v7685_v46, %v6194_v42 }
  0x8f   : > { %12260 = vst [vmem:[#allocation46_spill] sm:$0xff] %v9049_v34  ;;  %v7749_v51 = vld [vmem:[#allocation10 + $0x2e4] sm:$0xf0]  ;;  %v6196_v9 = vld [vmem:[#allocation10 + $0xe8] sm:$0xf0] }
  0x90   : > { %1588 = vmatpush.bf16.msrb.mxu1 %v9037_v52  ;;  %12261 = vst [vmem:[#allocation47_spill] sm:$0xff] %v9053_v36  ;;  %1614 = vmatpush.bf16.msrb.mxu3 %v9042_v10  ;;  %v7745_v58 = vld [vmem:[#allocation10 + $0x2cc] sm:$0xf]  ;;  %v9069_v11 = vor.u32 %v7749_v51, %v6450_v47  ;;  %v9071_v14 = vor.u32 %v7681_v0, %v6196_v9  ;;  %v6162_v20 = vld [vmem:[#allocation10 + $0x88] sm:$0xf] }
  0x91   : > { %12262 = vst [vmem:[#allocation48_spill] sm:$0xff] %v9055_v41  ;;  %v6452_v59 = vld [vmem:[#allocation10 + $0x2e8] sm:$0xf0]  ;;  %v7677_v21 = vld [vmem:[#allocation10 + $0xa4] sm:$0xf0] }
  0x92   : > { %12263 = vst [vmem:[#allocation49_spill] sm:$0xff] %v9058_v49  ;;  %1576 = vmatpush.bf16.msrb.mxu0 %v9049_v34  ;;  %1602 = vmatpush.bf16.msrb.mxu2 %v9055_v41  ;;  %v6418_v23 = vld [vmem:[#allocation10 + $0x288] sm:$0xf]  ;;  %v9074_v10 = vor.u32 %v7745_v58, %v6452_v59  ;;  %v7673_v42 = vld [vmem:[#allocation10 + $0x8c] sm:$0xf] }
  0x93   : > { %12264 = vst [vmem:[#allocation50_spill] sm:$0xff] %v9064_v63  ;;  %v7741_v34 = vld [vmem:[#allocation10 + $0x2a4] sm:$0xf0]  ;;  %v6164_v46 = vld [vmem:[#allocation10 + $0xa8] sm:$0xf0] }
  0x94   : > { %1589 = vmatpush.bf16.msrb.mxu1 %v9053_v36  ;;  %12265 = vst [vmem:[#allocation51_spill] sm:$0xff] %v9069_v11  ;;  %1615 = vmatpush.bf16.msrb.mxu3 %v9058_v49  ;;  %v7737_v57 = vld [vmem:[#allocation10 + $0x28c] sm:$0xf]  ;;  %v9077_v36 = vor.u32 %v7677_v21, %v6162_v20  ;;  %v9081_v47 = vor.u32 %v7741_v34, %v6418_v23  ;;  %v6130_v0 = vld [vmem:[#allocation10 + $0x48] sm:$0xf] }
  0x95   : > { %12266 = vst [vmem:[#allocation52_spill] sm:$0xff] %v9071_v14  ;;  %v6420_v52 = vld [vmem:[#allocation10 + $0x2a8] sm:$0xf0]  ;;  %v9083_v51 = vor.u32 %v7673_v42, %v6164_v46  ;;  %v7669_v9 = vld [vmem:[#allocation10 + $0x64] sm:$0xf0] }
  0x96   : > { %12267 = vst [vmem:[#allocation53_spill] sm:$0xff] %v9074_v10  ;;  %1577 = vmatpush.bf16.msrb.mxu0 %v9064_v63  ;;  %1603 = vmatpush.bf16.msrb.mxu2 %v9071_v14  ;;  %v6386_v58 = vld [vmem:[#allocation10 + $0x248] sm:$0xf]  ;;  %v9086_v59 = vor.u32 %v7737_v57, %v6420_v52  ;;  %v7665_v41 = vld [vmem:[#allocation10 + $0x4c] sm:$0xf] }
  0x97   : > { %12268 = vst [vmem:[#allocation54_spill] sm:$0xff] %v9077_v36  ;;  %v7733_v49 = vld [vmem:[#allocation10 + $0x264] sm:$0xf0]  ;;  %v6132_v63 = vld [vmem:[#allocation10 + $0x68] sm:$0xf0] }
  0x98   : > { %1590 = vmatpush.bf16.msrb.mxu1 %v9069_v11  ;;  %12269 = vst [vmem:[#allocation55_spill] sm:$0xff] %v9081_v47  ;;  %1616 = vmatpush.bf16.msrb.mxu3 %v9074_v10  ;;  %v7729_v20 = vld [vmem:[#allocation10 + $0x24c] sm:$0xf]  ;;  %v9089_v11 = vor.u32 %v7669_v9, %v6130_v0  ;;  %v6098_v34 = vld [vmem:[#allocation10 + $0x8] sm:$0xf]  ;;  %v9093_v42 = vor.u32 %v7733_v49, %v6386_v58 }
  0x99   : > { %12270 = vst [vmem:[#allocation56_spill] sm:$0xff] %v9083_v51  ;;  %v6388_v21 = vld [vmem:[#allocation10 + $0x268] sm:$0xf0]  ;;  %v7661_v23 = vld [vmem:[#allocation10 + $0x24] sm:$0xf0]  ;;  %v9095_v46 = vor.u32 %v7665_v41, %v6132_v63 }
  0x9a   : > { %12271 = vst [vmem:[#allocation57_spill] sm:$0xff] %v9086_v59  ;;  %1578 = vmatpush.bf16.msrb.mxu0 %v9077_v36  ;;  %1604 = vmatpush.bf16.msrb.mxu2 %v9083_v51  ;;  %v6354_v52 = vld [vmem:[#allocation10 + $0x208] sm:$0xf]  ;;  %v7657_v10 = vld [vmem:[#allocation10 + $0xc] sm:$0xf]  ;;  %v9098_v14 = vor.u32 %v7729_v20, %v6388_v21  ;;  %v9101_v51 = vor.u32 %v7661_v23, %v6098_v34 }
  0x9b   : > { %12272 = vst [vmem:[#allocation58_spill] sm:$0xff] %v9089_v11  ;;  %v7725_v57 = vld [vmem:[#allocation10 + $0x224] sm:$0xf0]  ;;  %v6100_v36 = vld [vmem:[#allocation10 + $0x28] sm:$0xf0] }
  0x9c   : > { %1591 = vmatpush.bf16.msrb.mxu1 %v9081_v47  ;;  %12273 = vst [vmem:[#allocation59_spill] sm:$0xff] %v9093_v42  ;;  %1617 = vmatpush.bf16.msrb.mxu3 %v9086_v59  ;;  %v7721_v0 = vld [vmem:[#allocation10 + $0x20c] sm:$0xf]  ;;  %v6330_v50 = vld [vmem:[#allocation10 + $0x1d0] sm:$0xf]  ;;  %v9105_v58 = vor.u32 %v7725_v57, %v6354_v52  ;;  %v9107_v20 = vor.u32 %v7657_v10, %v6100_v36 }
  0x9d   : > { %12274 = vst [vmem:[#allocation60_spill] sm:$0xff] %v9095_v46  ;;  %v6356_v9 = vld [vmem:[#allocation10 + $0x228] sm:$0xf0]  ;;  %v7718_v40 = vld [vmem:[#allocation10 + $0x1ec] sm:$0xf0] }
  0x9e   : > { %12275 = vst [vmem:[#allocation61_spill] sm:$0xff] %v9098_v14  ;;  %v6586_v30 = vld [vmem:[#allocation10 + $0x3d0] sm:$0xf]  ;;  %1579 = vmatpush.bf16.msrb.mxu0 %v9089_v11  ;;  %v7714_v41 = vld [vmem:[#allocation10 + $0x1d4] sm:$0xf]  ;;  %1605 = vmatpush.bf16.msrb.mxu2 %v9095_v46  ;;  %v9110_v47 = vor.u32 %v7721_v0, %v6356_v9  ;;  %v9112_v11 = vor.u32 %v7718_v40, %v6330_v50 }
  0x9f   : > { %12276 = vst [vmem:[#allocation62_spill] sm:$0xff] %v9101_v51  ;;  %v7782_v49 = vld [vmem:[#allocation10 + $0x3ec] sm:$0xf0]  ;;  %v6332_v63 = vld [vmem:[#allocation10 + $0x1f0] sm:$0xf0] }
  0xa0   : > { %1592 = vmatpush.bf16.msrb.mxu1 %v9093_v42  ;;  %12277 = vst [vmem:[#allocation63_spill] sm:$0xff] %v9105_v58  ;;  %v7778_v21 = vld [vmem:[#allocation10 + $0x3d4] sm:$0xf]  ;;  %1618 = vmatpush.bf16.msrb.mxu3 %v9098_v14  ;;  %v9114_v34 = vor.u32 %v7782_v49, %v6586_v30  ;;  %v9116_v23 = vor.u32 %v7714_v41, %v6332_v63  ;;  %v6298_v29 = vld [vmem:[#allocation10 + $0x190] sm:$0xf] }
  0xa1   : > { %12278 = vst [vmem:[#allocation64_spill] sm:$0xff] %v9107_v20  ;;  %v6588_v59 = vld [vmem:[#allocation10 + $0x3f0] sm:$0xf0]  ;;  %v7710_v42 = vld [vmem:[#allocation10 + $0x1ac] sm:$0xf0] }
  0xa2   : > { %12279 = vst [vmem:[#allocation65_spill] sm:$0xff] %v9110_v47  ;;  %v6554_v28 = vld [vmem:[#allocation10 + $0x390] sm:$0xf]  ;;  %1580 = vmatpush.bf16.msrb.mxu0 %v9101_v51  ;;  %v9119_v52 = vor.u32 %v7778_v21, %v6588_v59  ;;  %v7706_v36 = vld [vmem:[#allocation10 + $0x194] sm:$0xf]  ;;  %1606 = vmatpush.bf16.msrb.mxu2 %v9107_v20  ;;  %v9125_v30 = vor.u32 %v7710_v42, %v6298_v29 }
  0xa3   : > { %12280 = vst [vmem:[#allocation66_spill] sm:$0xff] %v9112_v11  ;;  %v7774_v10 = vld [vmem:[#allocation10 + $0x3ac] sm:$0xf0]  ;;  %v6300_v57 = vld [vmem:[#allocation10 + $0x1b0] sm:$0xf0] }
  0xa4   : > { %12281 = vst [vmem:[#allocation67_spill] sm:$0xff] %v9114_v34  ;;  %1593 = vmatpush.bf16.msrb.mxu1 %v9105_v58  ;;  %v7770_v40 = vld [vmem:[#allocation10 + $0x394] sm:$0xf]  ;;  %1619 = vmatpush.bf16.msrb.mxu3 %v9110_v47  ;;  %v9129_v59 = vor.u32 %v7774_v10, %v6554_v28  ;;  %v9131_v0 = vor.u32 %v7706_v36, %v6300_v57  ;;  %v6266_v9 = vld [vmem:[#allocation10 + $0x150] sm:$0xf] }
  0xa5   : > { %12282 = vst [vmem:[#allocation68_spill] sm:$0xff] %v9116_v23  ;;  %v6556_v50 = vld [vmem:[#allocation10 + $0x3b0] sm:$0xf0]  ;;  %v7702_v49 = vld [vmem:[#allocation10 + $0x16c] sm:$0xf0]  ;;  %1581 = vmatmul.bf16.vlgmr.msrb.gmra.mxu0 %v9044_v25  ;;  %1607 = vmatmul.bf16.vlgmr.msrb.gmra.mxu2 %v9044_v25 }
  0xa6   : > { %12283 = vst [vmem:[#allocation69_spill] sm:$0xff] %v9119_v52  ;;  %1625 = vmatpush.bf16.msra.mxu0 %v9112_v11  ;;  %1651 = vmatpush.bf16.msra.mxu2 %v9116_v23  ;;  %v6522_v41 = vld [vmem:[#allocation10 + $0x350] sm:$0xf]  ;;  %v9134_v63 = vor.u32 %v7770_v40, %v6556_v50  ;;  %v7698_v47 = vld [vmem:[#allocation10 + $0x154] sm:$0xf]  ;;  %v9140_v28 = vor.u32 %v7702_v49, %v6266_v9 }
  0xa7   : > { %12284 = vst [vmem:[#allocation70_spill] sm:$0xff] %v9125_v30  ;;  %v7766_v21 = vld [vmem:[#allocation10 + $0x36c] sm:$0xf0]  ;;  %v6268_v11 = vld [vmem:[#allocation10 + $0x170] sm:$0xf0]  ;;  %1594 = vmatmul.bf16.vlgmr.msrb.gmra.mxu1 %v9046_v32  ;;  %1620 = vmatmul.bf16.vlgmr.msrb.gmra.mxu3 %v9046_v32 }
  0xa8   : > { %1638 = vmatpush.bf16.msra.mxu1 %v9114_v34  ;;  %12285 = vst [vmem:[#allocation71_spill] sm:$0xff] %v9129_v59  ;;  %1664 = vmatpush.bf16.msra.mxu3 %v9119_v52  ;;  %v7762_v29 = vld [vmem:[#allocation10 + $0x354] sm:$0xf]  ;;  %v9145_v10 = vor.u32 %v7766_v21, %v6522_v41  ;;  %v9147_v36 = vor.u32 %v7698_v47, %v6268_v11  ;;  %v6234_v57 = vld [vmem:[#allocation10 + $0x110] sm:$0xf] }
  0xa9   : > { %12286 = vst [vmem:[#allocation72_spill] sm:$0xff] %v9131_v0  ;;  %v6524_v42 = vld [vmem:[#allocation10 + $0x370] sm:$0xf0]  ;;  %v7694_v40 = vld [vmem:[#allocation10 + $0x12c] sm:$0xf0] }
  0xaa   : > { %12287 = vst [vmem:[#allocation73_spill] sm:$0xff] %v9134_v63  ;;  %1626 = vmatpush.bf16.msra.mxu0 %v9125_v30  ;;  %1652 = vmatpush.bf16.msra.mxu2 %v9131_v0  ;;  %v6490_v50 = vld [vmem:[#allocation10 + $0x310] sm:$0xf]  ;;  %v9150_v52 = vor.u32 %v7762_v29, %v6524_v42  ;;  %v7690_v9 = vld [vmem:[#allocation10 + $0x114] sm:$0xf] }
  0xab   : > { %12288 = vst [vmem:[#allocation74_spill] sm:$0xff] %v9140_v28  ;;  %v7758_v30 = vld [vmem:[#allocation10 + $0x32c] sm:$0xf0]  ;;  %v6236_v49 = vld [vmem:[#allocation10 + $0x130] sm:$0xf0] }
  0xac   : > { %1639 = vmatpush.bf16.msra.mxu1 %v9129_v59  ;;  %12289 = vst [vmem:[#allocation75_spill] sm:$0xff] %v9145_v10  ;;  %1665 = vmatpush.bf16.msra.mxu3 %v9134_v63  ;;  %v7754_v23 = vld [vmem:[#allocation10 + $0x314] sm:$0xf]  ;;  %v9153_v59 = vor.u32 %v7694_v40, %v6234_v57  ;;  %v9157_v11 = vor.u32 %v7758_v30, %v6490_v50  ;;  %v6202_v41 = vld [vmem:[#allocation10 + $0xd0] sm:$0xf] }
  0xad   : > { %12290 = vst [vmem:[#allocation76_spill] sm:$0xff] %v9147_v36  ;;  %v6492_v34 = vld [vmem:[#allocation10 + $0x330] sm:$0xf0]  ;;  %v9159_v47 = vor.u32 %v7690_v9, %v6236_v49  ;;  %v7686_v21 = vld [vmem:[#allocation10 + $0xec] sm:$0xf0] }
  0xae   : > { %12291 = vst [vmem:[#allocation77_spill] sm:$0xff] %v9150_v52  ;;  %1627 = vmatpush.bf16.msra.mxu0 %v9140_v28  ;;  %1653 = vmatpush.bf16.msra.mxu2 %v9147_v36  ;;  %v6458_v29 = vld [vmem:[#allocation10 + $0x2d0] sm:$0xf]  ;;  %v9162_v42 = vor.u32 %v7754_v23, %v6492_v34  ;;  %v7682_v0 = vld [vmem:[#allocation10 + $0xd4] sm:$0xf] }
  0xaf   : > { %12292 = vst [vmem:[#allocation78_spill] sm:$0xff] %v9153_v59  ;;  %v7750_v63 = vld [vmem:[#allocation10 + $0x2ec] sm:$0xf0]  ;;  %v6204_v28 = vld [vmem:[#allocation10 + $0xf0] sm:$0xf0] }
  0xb0   : > { %1640 = vmatpush.bf16.msra.mxu1 %v9145_v10  ;;  %12293 = vst [vmem:[#allocation79_spill] sm:$0xff] %v9157_v11  ;;  %1666 = vmatpush.bf16.msra.mxu3 %v9150_v52  ;;  %v7746_v57 = vld [vmem:[#allocation10 + $0x2d4] sm:$0xf]  ;;  %v9165_v10 = vor.u32 %v7686_v21, %v6202_v41  ;;  %v9169_v30 = vor.u32 %v7750_v63, %v6458_v29  ;;  %v6170_v9 = vld [vmem:[#allocation10 + $0x90] sm:$0xf] }
  0xb1   : > { %12294 = vst [vmem:[#allocation80_spill] sm:$0xff] %v9159_v47  ;;  %v6460_v40 = vld [vmem:[#allocation10 + $0x2f0] sm:$0xf0]  ;;  %v9171_v50 = vor.u32 %v7682_v0, %v6204_v28  ;;  %v7678_v34 = vld [vmem:[#allocation10 + $0xac] sm:$0xf0] }
  0xb2   : > { %12295 = vst [vmem:[#allocation81_spill] sm:$0xff] %v9162_v42  ;;  %1628 = vmatpush.bf16.msra.mxu0 %v9153_v59  ;;  %1654 = vmatpush.bf16.msra.mxu2 %v9159_v47  ;;  %v6426_v23 = vld [vmem:[#allocation10 + $0x290] sm:$0xf]  ;;  %v9174_v49 = vor.u32 %v7746_v57, %v6460_v40  ;;  %v7674_v36 = vld [vmem:[#allocation10 + $0x94] sm:$0xf] }
  0xb3   : > { %12296 = vst [vmem:[#allocation82_spill] sm:$0xff] %v9165_v10  ;;  %v7742_v52 = vld [vmem:[#allocation10 + $0x2ac] sm:$0xf0]  ;;  %v6172_v59 = vld [vmem:[#allocation10 + $0xb0] sm:$0xf0] }
  0xb4   : > { %1641 = vmatpush.bf16.msra.mxu1 %v9157_v11  ;;  %12297 = vst [vmem:[#allocation83_spill] sm:$0xff] %v9169_v30  ;;  %1667 = vmatpush.bf16.msra.mxu3 %v9162_v42  ;;  %v7738_v41 = vld [vmem:[#allocation10 + $0x294] sm:$0xf]  ;;  %v9177_v11 = vor.u32 %v7678_v34, %v6170_v9  ;;  %v9181_v0 = vor.u32 %v7742_v52, %v6426_v23  ;;  %v6138_v28 = vld [vmem:[#allocation10 + $0x50] sm:$0xf] }
  0xb5   : > { %12298 = vst [vmem:[#allocation84_spill] sm:$0xff] %v9171_v50  ;;  %v6428_v21 = vld [vmem:[#allocation10 + $0x2b0] sm:$0xf0]  ;;  %v9183_v63 = vor.u32 %v7674_v36, %v6172_v59  ;;  %v7670_v29 = vld [vmem:[#allocation10 + $0x6c] sm:$0xf0] }
  0xb6   : > { %12299 = vst [vmem:[#allocation85_spill] sm:$0xff] %v9174_v49  ;;  %1629 = vmatpush.bf16.msra.mxu0 %v9165_v10  ;;  %1655 = vmatpush.bf16.msra.mxu2 %v9171_v50  ;;  %v6394_v57 = vld [vmem:[#allocation10 + $0x250] sm:$0xf]  ;;  %v9186_v40 = vor.u32 %v7738_v41, %v6428_v21  ;;  %v7666_v47 = vld [vmem:[#allocation10 + $0x54] sm:$0xf] }
  0xb7   : > { %12300 = vst [vmem:[#allocation86_spill] sm:$0xff] %v9177_v11  ;;  %v7734_v42 = vld [vmem:[#allocation10 + $0x26c] sm:$0xf0]  ;;  %v6140_v10 = vld [vmem:[#allocation10 + $0x70] sm:$0xf0] }
  0xb8   : > { %1642 = vmatpush.bf16.msra.mxu1 %v9169_v30  ;;  %12301 = vst [vmem:[#allocation87_spill] sm:$0xff] %v9181_v0  ;;  %1668 = vmatpush.bf16.msra.mxu3 %v9174_v49  ;;  %v7730_v9 = vld [vmem:[#allocation10 + $0x254] sm:$0xf]  ;;  %v9189_v30 = vor.u32 %v7670_v29, %v6138_v28  ;;  %v6106_v52 = vld [vmem:[#allocation10 + $0x10] sm:$0xf]  ;;  %v9193_v59 = vor.u32 %v7734_v42, %v6394_v57 }
  0xb9   : > { %12302 = vst [vmem:[#allocation88_spill] sm:$0xff] %v9183_v63  ;;  %v6396_v34 = vld [vmem:[#allocation10 + $0x270] sm:$0xf0]  ;;  %v7662_v23 = vld [vmem:[#allocation10 + $0x2c] sm:$0xf0]  ;;  %v9195_v36 = vor.u32 %v7666_v47, %v6140_v10 }
  0xba   : > { %12303 = vst [vmem:[#allocation89_spill] sm:$0xff] %v9186_v40  ;;  %1630 = vmatpush.bf16.msra.mxu0 %v9177_v11  ;;  %1656 = vmatpush.bf16.msra.mxu2 %v9183_v63  ;;  %v6362_v41 = vld [vmem:[#allocation10 + $0x210] sm:$0xf]  ;;  %v7658_v49 = vld [vmem:[#allocation10 + $0x14] sm:$0xf]  ;;  %v9198_v50 = vor.u32 %v7730_v9, %v6396_v34  ;;  %v9201_v63 = vor.u32 %v7662_v23, %v6106_v52 }
  0xbb   : > { %12304 = vst [vmem:[#allocation90_spill] sm:$0xff] %v9189_v30  ;;  %v7726_v21 = vld [vmem:[#allocation10 + $0x22c] sm:$0xf0]  ;;  %v6108_v11 = vld [vmem:[#allocation10 + $0x30] sm:$0xf0] }
  0xbc   : > { %1643 = vmatpush.bf16.msra.mxu1 %v9181_v0  ;;  %12305 = vst [vmem:[#allocation91_spill] sm:$0xff] %v9193_v59  ;;  %1669 = vmatpush.bf16.msra.mxu3 %v9186_v40  ;;  %v7722_v28 = vld [vmem:[#allocation10 + $0x214] sm:$0xf]  ;;  %v6338_v20 = vld [vmem:[#allocation10 + $0x1d8] sm:$0xf]  ;;  %v9205_v57 = vor.u32 %v7726_v21, %v6362_v41  ;;  %v9207_v9 = vor.u32 %v7658_v49, %v6108_v11 }
  0xbd   : > { %12306 = vst [vmem:[#allocation92_spill] sm:$0xff] %v9195_v36  ;;  %v6364_v29 = vld [vmem:[#allocation10 + $0x230] sm:$0xf0]  ;;  %v7719_v58 = vld [vmem:[#allocation10 + $0x1f4] sm:$0xf0] }
  0xbe   : > { %12307 = vst [vmem:[#allocation93_spill] sm:$0xff] %v9198_v50  ;;  %v6594_v51 = vld [vmem:[#allocation10 + $0x3d8] sm:$0xf]  ;;  %1631 = vmatpush.bf16.msra.mxu0 %v9189_v30  ;;  %v7715_v10 = vld [vmem:[#allocation10 + $0x1dc] sm:$0xf]  ;;  %1657 = vmatpush.bf16.msra.mxu2 %v9195_v36  ;;  %v9210_v0 = vor.u32 %v7722_v28, %v6364_v29  ;;  %v9212_v30 = vor.u32 %v7719_v58, %v6338_v20 }
  0xbf   : > { %12308 = vst [vmem:[#allocation94_spill] sm:$0xff] %v9201_v63  ;;  %v7783_v42 = vld [vmem:[#allocation10 + $0x3f4] sm:$0xf0]  ;;  %v6340_v47 = vld [vmem:[#allocation10 + $0x1f8] sm:$0xf0] }
  0xc0   : > { %1644 = vmatpush.bf16.msra.mxu1 %v9193_v59  ;;  %12309 = vst [vmem:[#allocation95_spill] sm:$0xff] %v9205_v57  ;;  %v7779_v34 = vld [vmem:[#allocation10 + $0x3dc] sm:$0xf]  ;;  %1670 = vmatpush.bf16.msra.mxu3 %v9198_v50  ;;  %v9214_v52 = vor.u32 %v7783_v42, %v6594_v51  ;;  %v9216_v23 = vor.u32 %v7715_v10, %v6340_v47  ;;  %v6306_v14 = vld [vmem:[#allocation10 + $0x198] sm:$0xf] }
  0xc1   : > { %12310 = vst [vmem:[#allocation96_spill] sm:$0xff] %v9207_v9  ;;  %v6596_v40 = vld [vmem:[#allocation10 + $0x3f8] sm:$0xf0]  ;;  %v7711_v59 = vld [vmem:[#allocation10 + $0x1b4] sm:$0xf0] }
  0xc2   : > { %12311 = vst [vmem:[#allocation97_spill] sm:$0xff] %v9210_v0  ;;  %v6562_v46 = vld [vmem:[#allocation10 + $0x398] sm:$0xf]  ;;  %1632 = vmatpush.bf16.msra.mxu0 %v9201_v63  ;;  %v9219_v41 = vor.u32 %v7779_v34, %v6596_v40  ;;  %v7707_v49 = vld [vmem:[#allocation10 + $0x19c] sm:$0xf]  ;;  %1658 = vmatpush.bf16.msra.mxu2 %v9207_v9  ;;  %v9225_v51 = vor.u32 %v7711_v59, %v6306_v14 }
  0xc3   : > { %12312 = vst [vmem:[#allocation98_spill] sm:$0xff] %v9212_v30  ;;  %v7775_v11 = vld [vmem:[#allocation10 + $0x3b4] sm:$0xf0]  ;;  %v6308_v21 = vld [vmem:[#allocation10 + $0x1b8] sm:$0xf0] }
  0xc4   : > { %12313 = vst [vmem:[#allocation99_spill] sm:$0xff] %v9214_v52  ;;  %1645 = vmatpush.bf16.msra.mxu1 %v9205_v57  ;;  %v7771_v58 = vld [vmem:[#allocation10 + $0x39c] sm:$0xf]  ;;  %1671 = vmatpush.bf16.msra.mxu3 %v9210_v0  ;;  %v9229_v40 = vor.u32 %v7775_v11, %v6562_v46  ;;  %v9231_v28 = vor.u32 %v7707_v49, %v6308_v21  ;;  %v6274_v29 = vld [vmem:[#allocation10 + $0x158] sm:$0xf] }
  0xc5   : > { %12314 = vst [vmem:[#allocation100_spill] sm:$0xff] %v9216_v23  ;;  %v6564_v20 = vld [vmem:[#allocation10 + $0x3b8] sm:$0xf0]  ;;  %v7703_v42 = vld [vmem:[#allocation10 + $0x174] sm:$0xf0]  ;;  %1633 = vmatmul.bf16.vlgmr.msra.gmra.mxu0 %v9044_v25  ;;  %1659 = vmatmul.bf16.vlgmr.msra.gmra.mxu2 %v9044_v25 }
  0xc6   : > { %12315 = vst [vmem:[#allocation101_spill] sm:$0xff] %v9219_v41  ;;  %1677 = vmatpush.bf16.msrb.mxu0 %v9212_v30  ;;  %1703 = vmatpush.bf16.msrb.mxu2 %v9216_v23  ;;  %v6530_v10 = vld [vmem:[#allocation10 + $0x358] sm:$0xf]  ;;  %v9235_v47 = vor.u32 %v7771_v58, %v6564_v20  ;;  %v7699_v14 = vld [vmem:[#allocation10 + $0x15c] sm:$0xf]  ;;  %v9241_v49 = vor.u32 %v7703_v42, %v6274_v29 }
  0xc7   : > { %12316 = vst [vmem:[#allocation102_spill] sm:$0xff] %v9225_v51  ;;  %v7767_v34 = vld [vmem:[#allocation10 + $0x374] sm:$0xf0]  ;;  %v6276_v59 = vld [vmem:[#allocation10 + $0x178] sm:$0xf0]  ;;  %1646 = vmatmul.bf16.vlgmr.msra.gmra.mxu1 %v9046_v32  ;;  %1672 = vmatmul.bf16.vlgmr.msra.gmra.mxu3 %v9046_v32 }
  0xc8   : > { %1690 = vmatpush.bf16.msrb.mxu1 %v9214_v52  ;;  %12317 = vst [vmem:[#allocation103_spill] sm:$0xff] %v9229_v40  ;;  %1716 = vmatpush.bf16.msrb.mxu3 %v9219_v41  ;;  %v7763_v46 = vld [vmem:[#allocation10 + $0x35c] sm:$0xf]  ;;  %v9245_v21 = vor.u32 %v7767_v34, %v6530_v10  ;;  %v9247_v58 = vor.u32 %v7699_v14, %v6276_v59  ;;  %v6242_v20 = vld [vmem:[#allocation10 + $0x118] sm:$0xf] }
  0xc9   : > { %12318 = vst [vmem:[#allocation104_spill] sm:$0xff] %v9231_v28  ;;  %v6532_v11 = vld [vmem:[#allocation10 + $0x378] sm:$0xf0]  ;;  %v7695_v41 = vld [vmem:[#allocation10 + $0x134] sm:$0xf0] }
  0xca   : > { %12319 = vst [vmem:[#allocation105_spill] sm:$0xff] %v9235_v47  ;;  %1678 = vmatpush.bf16.msrb.mxu0 %v9225_v51  ;;  %1704 = vmatpush.bf16.msrb.mxu2 %v9231_v28  ;;  %v6498_v23 = vld [vmem:[#allocation10 + $0x318] sm:$0xf]  ;;  %v9250_v52 = vor.u32 %v7763_v46, %v6532_v11  ;;  %v7691_v0 = vld [vmem:[#allocation10 + $0x11c] sm:$0xf] }
  0xcb   : > { %12320 = vst [vmem:[#allocation106_spill] sm:$0xff] %v9241_v49  ;;  %v7759_v30 = vld [vmem:[#allocation10 + $0x334] sm:$0xf0]  ;;  %v6244_v51 = vld [vmem:[#allocation10 + $0x138] sm:$0xf0] }
  0xcc   : > { %1691 = vmatpush.bf16.msrb.mxu1 %v9229_v40  ;;  %12321 = vst [vmem:[#allocation107_spill] sm:$0xff] %v9245_v21  ;;  %1717 = vmatpush.bf16.msrb.mxu3 %v9235_v47  ;;  %v7755_v29 = vld [vmem:[#allocation10 + $0x31c] sm:$0xf]  ;;  %v9253_v40 = vor.u32 %v7695_v41, %v6242_v20  ;;  %v9257_v10 = vor.u32 %v7759_v30, %v6498_v23  ;;  %v6210_v14 = vld [vmem:[#allocation10 + $0xd8] sm:$0xf] }
  0xcd   : > { %12322 = vst [vmem:[#allocation108_spill] sm:$0xff] %v9247_v58  ;;  %v6500_v42 = vld [vmem:[#allocation10 + $0x338] sm:$0xf0]  ;;  %v9259_v34 = vor.u32 %v7691_v0, %v6244_v51  ;;  %v7687_v59 = vld [vmem:[#allocation10 + $0xf4] sm:$0xf0] }
  0xce   : > { %12323 = vst [vmem:[#allocation109_spill] sm:$0xff] %v9250_v52  ;;  %1679 = vmatpush.bf16.msrb.mxu0 %v9241_v49  ;;  %1705 = vmatpush.bf16.msrb.mxu2 %v9247_v58  ;;  %v6466_v46 = vld [vmem:[#allocation10 + $0x2d8] sm:$0xf]  ;;  %v9262_v11 = vor.u32 %v7755_v29, %v6500_v42  ;;  %v7683_v28 = vld [vmem:[#allocation10 + $0xdc] sm:$0xf] }
  0xcf   : > { %12324 = vst [vmem:[#allocation110_spill] sm:$0xff] %v9253_v40  ;;  %v7751_v47 = vld [vmem:[#allocation10 + $0x2f4] sm:$0xf0]  ;;  %v6212_v49 = vld [vmem:[#allocation10 + $0xf8] sm:$0xf0] }
  0xd0   : > { %1692 = vmatpush.bf16.msrb.mxu1 %v9245_v21  ;;  %12325 = vst [vmem:[#allocation111_spill] sm:$0xff] %v9257_v10  ;;  %1718 = vmatpush.bf16.msrb.mxu3 %v9250_v52  ;;  %v7747_v41 = vld [vmem:[#allocation10 + $0x2dc] sm:$0xf]  ;;  %v9265_v21 = vor.u32 %v7687_v59, %v6210_v14  ;;  %v9269_v30 = vor.u32 %v7751_v47, %v6466_v46  ;;  %v6178_v23 = vld [vmem:[#allocation10 + $0x98] sm:$0xf] }
  0xd1   : > { %12326 = vst [vmem:[#allocation112_spill] sm:$0xff] %v9259_v34  ;;  %v6468_v20 = vld [vmem:[#allocation10 + $0x2f8] sm:$0xf0]  ;;  %v9271_v0 = vor.u32 %v7683_v28, %v6212_v49  ;;  %v7679_v51 = vld [vmem:[#allocation10 + $0xb4] sm:$0xf0] }
  0xd2   : > { %12327 = vst [vmem:[#allocation113_spill] sm:$0xff] %v9262_v11  ;;  %1680 = vmatpush.bf16.msrb.mxu0 %v9253_v40  ;;  %1706 = vmatpush.bf16.msrb.mxu2 %v9259_v34  ;;  %v6434_v29 = vld [vmem:[#allocation10 + $0x298] sm:$0xf]  ;;  %v9274_v42 = vor.u32 %v7747_v41, %v6468_v20  ;;  %v7675_v58 = vld [vmem:[#allocation10 + $0x9c] sm:$0xf] }
  0xd3   : > { %12328 = vst [vmem:[#allocation114_spill] sm:$0xff] %v9265_v21  ;;  %v7743_v52 = vld [vmem:[#allocation10 + $0x2b4] sm:$0xf0]  ;;  %v6180_v40 = vld [vmem:[#allocation10 + $0xb8] sm:$0xf0] }
  0xd4   : > { %1693 = vmatpush.bf16.msrb.mxu1 %v9257_v10  ;;  %12329 = vst [vmem:[#allocation115_spill] sm:$0xff] %v9269_v30  ;;  %1719 = vmatpush.bf16.msrb.mxu3 %v9262_v11  ;;  %v7739_v14 = vld [vmem:[#allocation10 + $0x29c] sm:$0xf]  ;;  %v9277_v10 = vor.u32 %v7679_v51, %v6178_v23  ;;  %v9281_v28 = vor.u32 %v7743_v52, %v6434_v29  ;;  %v6146_v49 = vld [vmem:[#allocation10 + $0x58] sm:$0xf] }
  0xd5   : > { %12330 = vst [vmem:[#allocation116_spill] sm:$0xff] %v9271_v0  ;;  %v6436_v59 = vld [vmem:[#allocation10 + $0x2b8] sm:$0xf0]  ;;  %v9283_v47 = vor.u32 %v7675_v58, %v6180_v40  ;;  %v7671_v46 = vld [vmem:[#allocation10 + $0x74] sm:$0xf0] }
  0xd6   : > { %12331 = vst [vmem:[#allocation117_spill] sm:$0xff] %v9274_v42  ;;  %1681 = vmatpush.bf16.msrb.mxu0 %v9265_v21  ;;  %1707 = vmatpush.bf16.msrb.mxu2 %v9271_v0  ;;  %v6402_v41 = vld [vmem:[#allocation10 + $0x258] sm:$0xf]  ;;  %v9286_v20 = vor.u32 %v7739_v14, %v6436_v59  ;;  %v7667_v34 = vld [vmem:[#allocation10 + $0x5c] sm:$0xf] }
  0xd7   : > { %12332 = vst [vmem:[#allocation118_spill] sm:$0xff] %v9277_v10  ;;  %v7735_v11 = vld [vmem:[#allocation10 + $0x274] sm:$0xf0]  ;;  %v6148_v21 = vld [vmem:[#allocation10 + $0x78] sm:$0xf0] }
  0xd8   : > { %1694 = vmatpush.bf16.msrb.mxu1 %v9269_v30  ;;  %12333 = vst [vmem:[#allocation119_spill] sm:$0xff] %v9281_v28  ;;  %1720 = vmatpush.bf16.msrb.mxu3 %v9274_v42  ;;  %v7731_v23 = vld [vmem:[#allocation10 + $0x25c] sm:$0xf]  ;;  %v9289_v30 = vor.u32 %v7671_v46, %v6146_v49  ;;  %v6114_v52 = vld [vmem:[#allocation10 + $0x18] sm:$0xf]  ;;  %v9293_v40 = vor.u32 %v7735_v11, %v6402_v41 }
  0xd9   : > { %12334 = vst [vmem:[#allocation120_spill] sm:$0xff] %v9283_v47  ;;  %v6404_v51 = vld [vmem:[#allocation10 + $0x278] sm:$0xf0]  ;;  %v7663_v29 = vld [vmem:[#allocation10 + $0x34] sm:$0xf0]  ;;  %v9295_v58 = vor.u32 %v7667_v34, %v6148_v21 }
  0xda   : > { %12335 = vst [vmem:[#allocation121_spill] sm:$0xff] %v9286_v20  ;;  %1682 = vmatpush.bf16.msrb.mxu0 %v9277_v10  ;;  %1708 = vmatpush.bf16.msrb.mxu2 %v9283_v47  ;;  %v6370_v14 = vld [vmem:[#allocation10 + $0x218] sm:$0xf]  ;;  %v7659_v42 = vld [vmem:[#allocation10 + $0x1c] sm:$0xf]  ;;  %v9298_v0 = vor.u32 %v7731_v23, %v6404_v51  ;;  %v9301_v47 = vor.u32 %v7663_v29, %v6114_v52 }
  0xdb   : > { %12336 = vst [vmem:[#allocation122_spill] sm:$0xff] %v9289_v30  ;;  %v7727_v59 = vld [vmem:[#allocation10 + $0x234] sm:$0xf0]  ;;  %v6116_v10 = vld [vmem:[#allocation10 + $0x38] sm:$0xf0] }
  0xdc   : > { %1695 = vmatpush.bf16.msrb.mxu1 %v9281_v28  ;;  %12337 = vst [vmem:[#allocation123_spill] sm:$0xff] %v9293_v40  ;;  %1721 = vmatpush.bf16.msrb.mxu3 %v9286_v20  ;;  %v7723_v49 = vld [vmem:[#allocation10 + $0x21c] sm:$0xf]  ;;  %v6826_v9 = vld [vmem:[#allocation13 + $0x1c0] sm:$0xf]  ;;  %v9305_v41 = vor.u32 %v7727_v59, %v6370_v14  ;;  %v9307_v23 = vor.u32 %v7659_v42, %v6116_v10 }
  0xdd   : > { %12338 = vst [vmem:[#allocation124_spill] sm:$0xff] %v9295_v58  ;;  %v6372_v46 = vld [vmem:[#allocation10 + $0x238] sm:$0xf0]  ;;  %v7972_v57 = vld [vmem:[#allocation13 + $0x1dc] sm:$0xf0] }
  0xde   : > { %12339 = vst [vmem:[#allocation125_spill] sm:$0xff] %v9298_v0  ;;  %v7082_v63 = vld [vmem:[#allocation13 + $0x3c0] sm:$0xf]  ;;  %1683 = vmatpush.bf16.msrb.mxu0 %v9289_v30  ;;  %v7968_v21 = vld [vmem:[#allocation13 + $0x1c4] sm:$0xf]  ;;  %1709 = vmatpush.bf16.msrb.mxu2 %v9295_v58  ;;  %v9310_v28 = vor.u32 %v7723_v49, %v6372_v46  ;;  %v9312_v30 = vor.u32 %v7972_v57, %v6826_v9 }
  0xdf   : > { %12340 = vst [vmem:[#allocation126_spill] sm:$0xff] %v9301_v47  ;;  %v8036_v11 = vld [vmem:[#allocation13 + $0x3dc] sm:$0xf0]  ;;  %v6828_v34 = vld [vmem:[#allocation13 + $0x1e0] sm:$0xf0] }
  0xe0   : > { %1696 = vmatpush.bf16.msrb.mxu1 %v9293_v40  ;;  %12341 = vst [vmem:[#allocation127_spill] sm:$0xff] %v9305_v41  ;;  %v8032_v51 = vld [vmem:[#allocation13 + $0x3c4] sm:$0xf]  ;;  %1722 = vmatpush.bf16.msrb.mxu3 %v9298_v0  ;;  %v9314_v52 = vor.u32 %v8036_v11, %v7082_v63  ;;  %v9316_v29 = vor.u32 %v7968_v21, %v6828_v34  ;;  %v6794_v50 = vld [vmem:[#allocation13 + $0x180] sm:$0xf] }
  0xe1   : > { %12342 = vst [vmem:[#allocation128_spill] sm:$0xff] %v9307_v23  ;;  %v7084_v20 = vld [vmem:[#allocation13 + $0x3e0] sm:$0xf0]  ;;  %v7964_v40 = vld [vmem:[#allocation13 + $0x19c] sm:$0xf0] }
  0xe2   : > { %12343 = vst [vmem:[#allocation129_spill] sm:$0xff] %v9310_v28  ;;  %v7050_v36 = vld [vmem:[#allocation13 + $0x380] sm:$0xf]  ;;  %1684 = vmatpush.bf16.msrb.mxu0 %v9301_v47  ;;  %v9319_v14 = vor.u32 %v8032_v51, %v7084_v20  ;;  %v7960_v42 = vld [vmem:[#allocation13 + $0x184] sm:$0xf]  ;;  %1710 = vmatpush.bf16.msrb.mxu2 %v9307_v23  ;;  %v9325_v63 = vor.u32 %v7964_v40, %v6794_v50 }
  0xe3   : > { %12344 = vst [vmem:[#allocation130_spill] sm:$0xff] %v9312_v30  ;;  %v8028_v10 = vld [vmem:[#allocation13 + $0x39c] sm:$0xf0]  ;;  %v6796_v59 = vld [vmem:[#allocation13 + $0x1a0] sm:$0xf0] }
  0xe4   : > { %12345 = vst [vmem:[#allocation131_spill] sm:$0xff] %v9314_v52  ;;  %1697 = vmatpush.bf16.msrb.mxu1 %v9305_v41  ;;  %v8024_v57 = vld [vmem:[#allocation13 + $0x384] sm:$0xf]  ;;  %1723 = vmatpush.bf16.msrb.mxu3 %v9310_v28  ;;  %v9329_v20 = vor.u32 %v8028_v10, %v7050_v36  ;;  %v9331_v49 = vor.u32 %v7960_v42, %v6796_v59  ;;  %v6762_v46 = vld [vmem:[#allocation13 + $0x140] sm:$0xf] }
  0xe5   : > { %12346 = vst [vmem:[#allocation132_spill] sm:$0xff] %v9316_v29  ;;  %v7052_v9 = vld [vmem:[#allocation13 + $0x3a0] sm:$0xf0]  ;;  %v7956_v11 = vld [vmem:[#allocation13 + $0x15c] sm:$0xf0]  ;;  %1685 = vmatmul.bf16.vlgmr.msrb.gmra.mxu0 %v9044_v25  ;;  %1711 = vmatmul.bf16.vlgmr.msrb.gmra.mxu2 %v9044_v25 }
  0xe6   : > { %12347 = vst [vmem:[#allocation133_spill] sm:$0xff] %v9319_v14  ;;  %2413 = vmatpush.bf16.msra.mxu0 %v9312_v30  ;;  %2439 = vmatpush.bf16.msra.mxu2 %v9316_v29  ;;  %v7018_v21 = vld [vmem:[#allocation13 + $0x340] sm:$0xf]  ;;  %v9335_v34 = vor.u32 %v8024_v57, %v7052_v9  ;;  %v7952_v50 = vld [vmem:[#allocation13 + $0x144] sm:$0xf]  ;;  %v9341_v42 = vor.u32 %v7956_v11, %v6762_v46 }
  0xe7   : > { %12348 = vst [vmem:[#allocation134_spill] sm:$0xff] %v9325_v63  ;;  %v8020_v51 = vld [vmem:[#allocation13 + $0x35c] sm:$0xf0]  ;;  %v6764_v40 = vld [vmem:[#allocation13 + $0x160] sm:$0xf0]  ;;  %1698 = vmatmul.bf16.vlgmr.msrb.gmra.mxu1 %v9046_v32  ;;  %1724 = vmatmul.bf16.vlgmr.msrb.gmra.mxu3 %v9046_v32 }
  0xe8   : > { %2426 = vmatpush.bf16.msra.mxu1 %v9314_v52  ;;  %12349 = vst [vmem:[#allocation135_spill] sm:$0xff] %v9329_v20  ;;  %2452 = vmatpush.bf16.msra.mxu3 %v9319_v14  ;;  %v8016_v36 = vld [vmem:[#allocation13 + $0x344] sm:$0xf]  ;;  %v9345_v59 = vor.u32 %v8020_v51, %v7018_v21  ;;  %v9347_v57 = vor.u32 %v7952_v50, %v6764_v40  ;;  %v6730_v9 = vld [vmem:[#allocation13 + $0x100] sm:$0xf] }
  0xe9   : > { %12350 = vst [vmem:[#allocation136_spill] sm:$0xff] %v9331_v49  ;;  %v7020_v10 = vld [vmem:[#allocation13 + $0x360] sm:$0xf0]  ;;  %v7948_v25 = vld [vmem:[#allocation13 + $0x11c] sm:$0xf0] }
  0xea   : > { %12351 = vst [vmem:[#allocation137_spill] sm:$0xff] %v9335_v34  ;;  %2414 = vmatpush.bf16.msra.mxu0 %v9325_v63  ;;  %2440 = vmatpush.bf16.msra.mxu2 %v9331_v49  ;;  %v6986_v14 = vld [vmem:[#allocation13 + $0x300] sm:$0xf]  ;;  %v9350_v29 = vor.u32 %v8016_v36, %v7020_v10  ;;  %v7944_v52 = vld [vmem:[#allocation13 + $0x104] sm:$0xf] }
  0xeb   : > { %12352 = vst [vmem:[#allocation138_spill] sm:$0xff] %v9341_v42  ;;  %v8012_v32 = vld [vmem:[#allocation13 + $0x31c] sm:$0xf0]  ;;  %v6732_v63 = vld [vmem:[#allocation13 + $0x120] sm:$0xf0] }
  0xec   : > { %2427 = vmatpush.bf16.msra.mxu1 %v9329_v20  ;;  %12353 = vst [vmem:[#allocation139_spill] sm:$0xff] %v9345_v59  ;;  %2453 = vmatpush.bf16.msra.mxu3 %v9335_v34  ;;  %v8008_v46 = vld [vmem:[#allocation13 + $0x304] sm:$0xf]  ;;  %v9353_v20 = vor.u32 %v7948_v25, %v6730_v9  ;;  %v9357_v21 = vor.u32 %v8012_v32, %v6986_v14  ;;  %v6698_v50 = vld [vmem:[#allocation13 + $0xc0] sm:$0xf] }
  0xed   : > { %12354 = vst [vmem:[#allocation140_spill] sm:$0xff] %v9347_v57  ;;  %v6988_v11 = vld [vmem:[#allocation13 + $0x320] sm:$0xf0]  ;;  %v9359_v51 = vor.u32 %v7944_v52, %v6732_v63  ;;  %v7940_v40 = vld [vmem:[#allocation13 + $0xdc] sm:$0xf0] }
  0xee   : > { %12355 = vst [vmem:[#allocation141_spill] sm:$0xff] %v9350_v29  ;;  %2415 = vmatpush.bf16.msra.mxu0 %v9341_v42  ;;  %2441 = vmatpush.bf16.msra.mxu2 %v9347_v57  ;;  %v6954_v36 = vld [vmem:[#allocation13 + $0x2c0] sm:$0xf]  ;;  %v9362_v10 = vor.u32 %v8008_v46, %v6988_v11  ;;  %v7936_v49 = vld [vmem:[#allocation13 + $0xc4] sm:$0xf] }
  0xef   : > { %12356 = vst [vmem:[#allocation142_spill] sm:$0xff] %v9353_v20  ;;  %v8004_v34 = vld [vmem:[#allocation13 + $0x2dc] sm:$0xf0]  ;;  %v6700_v42 = vld [vmem:[#allocation13 + $0xe0] sm:$0xf0] }
  0xf0   : > { %2428 = vmatpush.bf16.msra.mxu1 %v9345_v59  ;;  %12357 = vst [vmem:[#allocation143_spill] sm:$0xff] %v9357_v21  ;;  %2454 = vmatpush.bf16.msra.mxu3 %v9350_v29  ;;  %v8000_v9 = vld [vmem:[#allocation13 + $0x2c4] sm:$0xf]  ;;  %v9365_v59 = vor.u32 %v7940_v40, %v6698_v50  ;;  %v9369_v52 = vor.u32 %v8004_v34, %v6954_v36  ;;  %v6666_v63 = vld [vmem:[#allocation13 + $0x80] sm:$0xf] }
  0xf1   : > { %12358 = vst [vmem:[#allocation144_spill] sm:$0xff] %v9359_v51  ;;  %v6956_v25 = vld [vmem:[#allocation13 + $0x2e0] sm:$0xf0]  ;;  %v9371_v14 = vor.u32 %v7936_v49, %v6700_v42  ;;  %v7932_v32 = vld [vmem:[#allocation13 + $0x9c] sm:$0xf0] }
  0xf2   : > { %12359 = vst [vmem:[#allocation145_spill] sm:$0xff] %v9362_v10  ;;  %2416 = vmatpush.bf16.msra.mxu0 %v9353_v20  ;;  %2442 = vmatpush.bf16.msra.mxu2 %v9359_v51  ;;  %v6922_v46 = vld [vmem:[#allocation13 + $0x280] sm:$0xf]  ;;  %v9374_v11 = vor.u32 %v8000_v9, %v6956_v25  ;;  %v7928_v57 = vld [vmem:[#allocation13 + $0x84] sm:$0xf] }
  0xf3   : > { %12360 = vst [vmem:[#allocation146_spill] sm:$0xff] %v9365_v59  ;;  %v7996_v29 = vld [vmem:[#allocation13 + $0x29c] sm:$0xf0]  ;;  %v6668_v20 = vld [vmem:[#allocation13 + $0xa0] sm:$0xf0] }
  0xf4   : > { %2429 = vmatpush.bf16.msra.mxu1 %v9357_v21  ;;  %12361 = vst [vmem:[#allocation147_spill] sm:$0xff] %v9369_v52  ;;  %2455 = vmatpush.bf16.msra.mxu3 %v9362_v10  ;;  %v7992_v50 = vld [vmem:[#allocation13 + $0x284] sm:$0xf]  ;;  %v9377_v21 = vor.u32 %v7932_v32, %v6666_v63  ;;  %v9381_v49 = vor.u32 %v7996_v29, %v6922_v46  ;;  %v6634_v42 = vld [vmem:[#allocation13 + $0x40] sm:$0xf] }
  0xf5   : > { %12362 = vst [vmem:[#allocation148_spill] sm:$0xff] %v9371_v14  ;;  %v6924_v40 = vld [vmem:[#allocation13 + $0x2a0] sm:$0xf0]  ;;  %v9383_v34 = vor.u32 %v7928_v57, %v6668_v20  ;;  %v7924_v36 = vld [vmem:[#allocation13 + $0x5c] sm:$0xf0] }
  0xf6   : > { %12363 = vst [vmem:[#allocation149_spill] sm:$0xff] %v9374_v11  ;;  %2417 = vmatpush.bf16.msra.mxu0 %v9365_v59  ;;  %2443 = vmatpush.bf16.msra.mxu2 %v9371_v14  ;;  %v6890_v9 = vld [vmem:[#allocation13 + $0x240] sm:$0xf]  ;;  %v9386_v25 = vor.u32 %v7992_v50, %v6924_v40  ;;  %v7920_v51 = vld [vmem:[#allocation13 + $0x44] sm:$0xf]  ;;  %v870_v14 = vld [vmem:[#allocation2 + $0x8] sm:$0xff] }
  0xf7   : > { %12364 = vst [vmem:[#allocation150_spill] sm:$0xff] %v9377_v21  ;;  %v7988_v10 = vld [vmem:[#allocation13 + $0x25c] sm:$0xf0]  ;;  %v6636_v59 = vld [vmem:[#allocation13 + $0x60] sm:$0xf0]  ;;  %v1768_v47 = vunpack.c.h.b16 %v870_v14 }
  0xf8   : > { %2430 = vmatpush.bf16.msra.mxu1 %v9369_v52  ;;  %12365 = vst [vmem:[#allocation151_spill] sm:$0xff] %v9381_v49  ;;  %2456 = vmatpush.bf16.msra.mxu3 %v9374_v11  ;;  %v7984_v63 = vld [vmem:[#allocation13 + $0x244] sm:$0xf]  ;;  %v9389_v52 = vor.u32 %v7924_v36, %v6634_v42  ;;  %v6602_v29 = vld [vmem:[#allocation13] sm:$0xf]  ;;  %v9393_v57 = vor.u32 %v7988_v10, %v6890_v9  ;;  %v1767_v9 = vunpack.c.l.b16 %v870_v14 }
  0xf9   : > { %12366 = vst [vmem:[#allocation152_spill] sm:$0xff] %v9383_v34  ;;  %v6892_v32 = vld [vmem:[#allocation13 + $0x260] sm:$0xf0]  ;;  %v7916_v46 = vld [vmem:[#allocation13 + $0x1c] sm:$0xf0]  ;;  %v9395_v50 = vor.u32 %v7920_v51, %v6636_v59 }
  0xfa   : > { %12367 = vst [vmem:[#allocation153_spill] sm:$0xff] %v9386_v25  ;;  %2418 = vmatpush.bf16.msra.mxu0 %v9377_v21  ;;  %v6858_v20 = vld [vmem:[#allocation13 + $0x200] sm:$0xf]  ;;  %2444 = vmatpush.bf16.msra.mxu2 %v9383_v34  ;;  %v7912_v11 = vld [vmem:[#allocation13 + $0x4] sm:$0xf]  ;;  %v9398_v30 = vor.u32 %v7984_v63, %v6892_v32  ;;  %v9401_v34 = vor.u32 %v7916_v46, %v6602_v29 }
  0xfb   : > { %12368 = vst [vmem:[#allocation154_spill] sm:$0xff] %v9389_v52  ;;  %v7980_v40 = vld [vmem:[#allocation13 + $0x21c] sm:$0xf0]  ;;  %v6604_v42 = vld [vmem:[#allocation13 + $0x20] sm:$0xf0] }
  0xfc   : > { %2431 = vmatpush.bf16.msra.mxu1 %v9381_v49  ;;  %12369 = vst [vmem:[#allocation155_spill] sm:$0xff] %v9393_v57  ;;  %2457 = vmatpush.bf16.msra.mxu3 %v9386_v25  ;;  %v7976_v36 = vld [vmem:[#allocation13 + $0x204] sm:$0xf]  ;;  %v6834_v28 = vld [vmem:[#allocation13 + $0x1c8] sm:$0xf]  ;;  %v9405_v63 = vor.u32 %v7980_v40, %v6858_v20  ;;  %v9407_v32 = vor.u32 %v7912_v11, %v6604_v42 }
  0xfd   : > { %12370 = vst [vmem:[#allocation156_spill] sm:$0xff] %v9395_v50  ;;  %v6860_v21 = vld [vmem:[#allocation13 + $0x220] sm:$0xf0]  ;;  %v7973_v23 = vld [vmem:[#allocation13 + $0x1e4] sm:$0xf0]  ;;  %v9421_v42 = vpack.c.b16 %v1767_v9, %v1767_v9 }
  0xfe   : > { %12371 = vst [vmem:[#allocation157_spill] sm:$0xff] %v9398_v30  ;;  %v7090_v41 = vld [vmem:[#allocation13 + $0x3c8] sm:$0xf]  ;;  %2419 = vmatpush.bf16.msra.mxu0 %v9389_v52  ;;  %v7969_v59 = vld [vmem:[#allocation13 + $0x1cc] sm:$0xf]  ;;  %2445 = vmatpush.bf16.msra.mxu2 %v9395_v50  ;;  %v9410_v52 = vor.u32 %v7976_v36, %v6860_v21  ;;  %v9412_v29 = vor.u32 %v7973_v23, %v6834_v28 }
  0xff   : > { %12372 = vst [vmem:[#allocation158_spill] sm:$0xff] %v9401_v34  ;;  %v8037_v10 = vld [vmem:[#allocation13 + $0x3e4] sm:$0xf0]  ;;  %v6836_v51 = vld [vmem:[#allocation13 + $0x1e8] sm:$0xf0]  ;;  %v9425_v23 = vpack.c.b16 %v1768_v47, %v1768_v47 }
 0x100   : > { %2432 = vmatpush.bf16.msra.mxu1 %v9393_v57  ;;  %12373 = vst [vmem:[#allocation159_spill] sm:$0xff] %v9405_v63  ;;  %v8033_v25 = vld [vmem:[#allocation13 + $0x3cc] sm:$0xf]  ;;  %2458 = vmatpush.bf16.msra.mxu3 %v9398_v30  ;;  %v9414_v46 = vor.u32 %v8037_v10, %v7090_v41  ;;  %v9416_v0 = vor.u32 %v7969_v59, %v6836_v51  ;;  %v6802_v57 = vld [vmem:[#allocation13 + $0x188] sm:$0xf] }
 0x101   : > { %12374 = vst [vmem:[#allocation160_spill] sm:$0xff] %v9407_v32  ;;  %v7092_v49 = vld [vmem:[#allocation13 + $0x3e8] sm:$0xf0]  ;;  %v7965_v58 = vld [vmem:[#allocation13 + $0x1a4] sm:$0xf0] }
 0x102   : > { %12375 = vst [vmem:[#allocation161_spill] sm:$0xff] %v9410_v52  ;;  %v7058_v50 = vld [vmem:[#allocation13 + $0x388] sm:$0xf]  ;;  %2420 = vmatpush.bf16.msra.mxu0 %v9401_v34  ;;  %v9419_v11 = vor.u32 %v8033_v25, %v7092_v49  ;;  %v7961_v40 = vld [vmem:[#allocation13 + $0x18c] sm:$0xf]  ;;  %2446 = vmatpush.bf16.msra.mxu2 %v9407_v32  ;;  %v9429_v21 = vor.u32 %v7965_v58, %v6802_v57 }
 0x103   : > { %12376 = vst [vmem:[#allocation162_spill] sm:$0xff] %v9412_v29  ;;  %v8029_v20 = vld [vmem:[#allocation13 + $0x3a4] sm:$0xf0]  ;;  %v6804_v14 = vld [vmem:[#allocation13 + $0x1a8] sm:$0xf0] }
 0x104   : > { %12377 = vst [vmem:[#allocation163_spill] sm:$0xff] %v9414_v46  ;;  %2433 = vmatpush.bf16.msra.mxu1 %v9405_v63  ;;  %v8025_v28 = vld [vmem:[#allocation13 + $0x38c] sm:$0xf]  ;;  %2459 = vmatpush.bf16.msra.mxu3 %v9410_v52  ;;  %v9433_v49 = vor.u32 %v8029_v20, %v7058_v50  ;;  %v9435_v25 = vor.u32 %v7961_v40, %v6804_v14  ;;  %v6770_v36 = vld [vmem:[#allocation13 + $0x148] sm:$0xf] }
 0x105   : > { %12378 = vst [vmem:[#allocation164_spill] sm:$0xff] %v9416_v0  ;;  %v7060_v41 = vld [vmem:[#allocation13 + $0x3a8] sm:$0xf0]  ;;  %v7957_v10 = vld [vmem:[#allocation13 + $0x164] sm:$0xf0]  ;;  %2447 = vmatmul.bf16.vlgmr.msra.gmra.mxu2 %v9421_v42  ;;  %2421 = vmatmul.bf16.vlgmr.msra.gmra.mxu0 %v9421_v42 }
 0x106   : > { %12379 = vst [vmem:[#allocation165_spill] sm:$0xff] %v9419_v11  ;;  %2465 = vmatpush.bf16.msrb.mxu0 %v9412_v29  ;;  %2491 = vmatpush.bf16.msrb.mxu2 %v9416_v0  ;;  %v7026_v59 = vld [vmem:[#allocation13 + $0x348] sm:$0xf]  ;;  %v9438_v47 = vor.u32 %v8025_v28, %v7060_v41  ;;  %v7953_v9 = vld [vmem:[#allocation13 + $0x14c] sm:$0xf]  ;;  %v9444_v50 = vor.u32 %v7957_v10, %v6770_v36 }
 0x107   : > { %12380 = vst [vmem:[#allocation166_spill] sm:$0xff] %v9429_v21  ;;  %v8021_v51 = vld [vmem:[#allocation13 + $0x364] sm:$0xf0]  ;;  %v6772_v29 = vld [vmem:[#allocation13 + $0x168] sm:$0xf0]  ;;  %2460 = vmatmul.bf16.vlgmr.msra.gmra.mxu3 %v9425_v23  ;;  %2434 = vmatmul.bf16.vlgmr.msra.gmra.mxu1 %v9425_v23 }
 0x108   : > { %2478 = vmatpush.bf16.msrb.mxu1 %v9414_v46  ;;  %12381 = vst [vmem:[#allocation167_spill] sm:$0xff] %v9433_v49  ;;  %2504 = vmatpush.bf16.msrb.mxu3 %v9419_v11  ;;  %v8017_v58 = vld [vmem:[#allocation13 + $0x34c] sm:$0xf]  ;;  %v9449_v20 = vor.u32 %v8021_v51, %v7026_v59  ;;  %v9451_v40 = vor.u32 %v7953_v9, %v6772_v29  ;;  %v6738_v14 = vld [vmem:[#allocation13 + $0x108] sm:$0xf] }
 0x109   : > { %12382 = vst [vmem:[#allocation168_spill] sm:$0xff] %v9435_v25  ;;  %v7028_v57 = vld [vmem:[#allocation13 + $0x368] sm:$0xf0]  ;;  %v7949_v28 = vld [vmem:[#allocation13 + $0x124] sm:$0xf0] }
 0x10a   : > { %12383 = vst [vmem:[#allocation169_spill] sm:$0xff] %v9438_v47  ;;  %2466 = vmatpush.bf16.msrb.mxu0 %v9429_v21  ;;  %2492 = vmatpush.bf16.msrb.mxu2 %v9435_v25  ;;  %v6994_v41 = vld [vmem:[#allocation13 + $0x308] sm:$0xf]  ;;  %v9454_v11 = vor.u32 %v8017_v58, %v7028_v57  ;;  %v7945_v36 = vld [vmem:[#allocation13 + $0x10c] sm:$0xf] }
 0x10b   : > { %12384 = vst [vmem:[#allocation170_spill] sm:$0xff] %v9444_v50  ;;  %v8013_v21 = vld [vmem:[#allocation13 + $0x324] sm:$0xf0]  ;;  %v6740_v10 = vld [vmem:[#allocation13 + $0x128] sm:$0xf0] }
 0x10c   : > { %2479 = vmatpush.bf16.msrb.mxu1 %v9433_v49  ;;  %12385 = vst [vmem:[#allocation171_spill] sm:$0xff] %v9449_v20  ;;  %2505 = vmatpush.bf16.msrb.mxu3 %v9438_v47  ;;  %v8009_v0 = vld [vmem:[#allocation13 + $0x30c] sm:$0xf]  ;;  %v9457_v49 = vor.u32 %v7949_v28, %v6738_v14  ;;  %v9461_v29 = vor.u32 %v8013_v21, %v6994_v41  ;;  %v6706_v51 = vld [vmem:[#allocation13 + $0xc8] sm:$0xf]  ;;  %v9505_v32 = vpop.f32.mrf.mxu2  ;;  %v9510_v34 = vpop.f32.mrf.mxu3 }
 0x10d   : > { %12386 = vst [vmem:[#allocation172_spill] sm:$0xff] %v9451_v40  ;;  %v6996_v46 = vld [vmem:[#allocation13 + $0x328] sm:$0xf0]  ;;  %v9463_v59 = vor.u32 %v7945_v36, %v6740_v10  ;;  %v7941_v9 = vld [vmem:[#allocation13 + $0xe4] sm:$0xf0] }
 0x10e   : > { %12387 = vst [vmem:[#allocation173_spill] sm:$0xff] %v9454_v11  ;;  %2467 = vmatpush.bf16.msrb.mxu0 %v9444_v50  ;;  %2493 = vmatpush.bf16.msrb.mxu2 %v9451_v40  ;;  %v6962_v58 = vld [vmem:[#allocation13 + $0x2c8] sm:$0xf]  ;;  %v9466_v57 = vor.u32 %v8009_v0, %v6996_v46  ;;  %v7937_v25 = vld [vmem:[#allocation13 + $0xcc] sm:$0xf] }
 0x10f   : > { %12388 = vst [vmem:[#allocation174_spill] sm:$0xff] %v9457_v49  ;;  %v8005_v47 = vld [vmem:[#allocation13 + $0x2e4] sm:$0xf0]  ;;  %v6708_v50 = vld [vmem:[#allocation13 + $0xe8] sm:$0xf0] }
 0x110   : > { %2480 = vmatpush.bf16.msrb.mxu1 %v9449_v20  ;;  %12389 = vst [vmem:[#allocation175_spill] sm:$0xff] %v9461_v29  ;;  %2506 = vmatpush.bf16.msrb.mxu3 %v9454_v11  ;;  %v8001_v14 = vld [vmem:[#allocation13 + $0x2cc] sm:$0xf]  ;;  %v9469_v20 = vor.u32 %v7941_v9, %v6706_v51  ;;  %v9473_v21 = vor.u32 %v8005_v47, %v6962_v58  ;;  %v6674_v36 = vld [vmem:[#allocation13 + $0x88] sm:$0xf]  ;;  %v9483_v47 = vpop.f32.mrf.mxu0 }
 0x111   : > { %12390 = vst [vmem:[#allocation176_spill] sm:$0xff] %v9463_v59  ;;  %v6964_v28 = vld [vmem:[#allocation13 + $0x2e8] sm:$0xf0]  ;;  %v9475_v41 = vor.u32 %v7937_v25, %v6708_v50  ;;  %v7933_v0 = vld [vmem:[#allocation13 + $0xa4] sm:$0xf0] }
 0x112   : > { %12391 = vst [vmem:[#allocation177_spill] sm:$0xff] %v9466_v57  ;;  %2468 = vmatpush.bf16.msrb.mxu0 %v9457_v49  ;;  %2494 = vmatpush.bf16.msrb.mxu2 %v9463_v59  ;;  %v6930_v46 = vld [vmem:[#allocation13 + $0x288] sm:$0xf]  ;;  %v9478_v10 = vor.u32 %v8001_v14, %v6964_v28  ;;  %v7929_v40 = vld [vmem:[#allocation13 + $0x8c] sm:$0xf] }
 0x113   : > { %12392 = vst [vmem:[#allocation178_spill] sm:$0xff] %v9469_v20  ;;  %v7997_v11 = vld [vmem:[#allocation13 + $0x2a4] sm:$0xf0]  ;;  %v6676_v49 = vld [vmem:[#allocation13 + $0xa8] sm:$0xf0] }
 0x114   : > { %2481 = vmatpush.bf16.msrb.mxu1 %v9461_v29  ;;  %12393 = vst [vmem:[#allocation179_spill] sm:$0xff] %v9473_v21  ;;  %2507 = vmatpush.bf16.msrb.mxu3 %v9466_v57  ;;  %v7993_v51 = vld [vmem:[#allocation13 + $0x28c] sm:$0xf]  ;;  %v9481_v29 = vor.u32 %v7933_v0, %v6674_v36  ;;  %v9487_v25 = vor.u32 %v7997_v11, %v6930_v46  ;;  %v6642_v58 = vld [vmem:[#allocation13 + $0x48] sm:$0xf]  ;;  %v9491_v57 = vpop.f32.mrf.mxu1 }
 0x115   : > { %12394 = vst [vmem:[#allocation180_spill] sm:$0xff] %v9475_v41  ;;  %v6932_v9 = vld [vmem:[#allocation13 + $0x2a8] sm:$0xf0]  ;;  %v9489_v50 = vor.u32 %v7929_v40, %v6676_v49  ;;  %v7925_v14 = vld [vmem:[#allocation13 + $0x64] sm:$0xf0] }
 0x116   : > { %12395 = vst [vmem:[#allocation181_spill] sm:$0xff] %v9478_v10  ;;  %2469 = vmatpush.bf16.msrb.mxu0 %v9469_v20  ;;  %2495 = vmatpush.bf16.msrb.mxu2 %v9475_v41  ;;  %v6898_v28 = vld [vmem:[#allocation13 + $0x248] sm:$0xf]  ;;  %v9494_v20 = vor.u32 %v7993_v51, %v6932_v9  ;;  %v7921_v0 = vld [vmem:[#allocation13 + $0x4c] sm:$0xf]  ;;  %v9497_v11 = vor.u32 %v7925_v14, %v6642_v58 }
 0x117   : > { %12396 = vst [vmem:[#allocation182_spill] sm:$0xff] %v9481_v29  ;;  %v7989_v36 = vld [vmem:[#allocation13 + $0x264] sm:$0xf0]  ;;  %v6644_v59 = vld [vmem:[#allocation13 + $0x68] sm:$0xf0] }
 0x118   : > { %2482 = vmatpush.bf16.msrb.mxu1 %v9473_v21  ;;  %12397 = vst [vmem:[#allocation183_spill] sm:$0xff] %v9487_v25  ;;  %2508 = vmatpush.bf16.msrb.mxu3 %v9478_v10  ;;  %v7985_v52 = vld [vmem:[#allocation13 + $0x24c] sm:$0xf]  ;;  %v6610_v49 = vld [vmem:[#allocation13 + $0x8] sm:$0xf]  ;;  %v9501_v46 = vor.u32 %v7989_v36, %v6898_v28  ;;  %v9503_v10 = vor.u32 %v7921_v0, %v6644_v59  ;;  %v1532_v12 = vpop.f32.mrf.mxu0 }
 0x119   : > { %12398 = vst [vmem:[#allocation184_spill] sm:$0xff] %v9489_v50  ;;  %v6900_v21 = vld [vmem:[#allocation13 + $0x268] sm:$0xf0]  ;;  %v7917_v40 = vld [vmem:[#allocation13 + $0x24] sm:$0xf0] }
 0x11a   : > { %12399 = vst [vmem:[#allocation185_spill] sm:$0xff] %v9494_v20  ;;  %2470 = vmatpush.bf16.msrb.mxu0 %v9481_v29  ;;  %2496 = vmatpush.bf16.msrb.mxu2 %v9489_v50  ;;  %v6866_v51 = vld [vmem:[#allocation13 + $0x208] sm:$0xf]  ;;  %v7913_v41 = vld [vmem:[#allocation13 + $0xc] sm:$0xf]  ;;  %v9508_v29 = vor.u32 %v7985_v52, %v6900_v21  ;;  %v9513_v59 = vor.u32 %v7917_v40, %v6610_v49 }
 0x11b   : > { %12400 = vst [vmem:[#allocation186_spill] sm:$0xff] %v9497_v11  ;;  %v7981_v9 = vld [vmem:[#allocation13 + $0x224] sm:$0xf0]  ;;  %v6612_v58 = vld [vmem:[#allocation13 + $0x28] sm:$0xf0] }
 0x11c   : > { %2483 = vmatpush.bf16.msrb.mxu1 %v9487_v25  ;;  %12401 = vst [vmem:[#allocation187_spill] sm:$0xff] %v9501_v46  ;;  %2509 = vmatpush.bf16.msrb.mxu3 %v9494_v20  ;;  %v7977_v14 = vld [vmem:[#allocation13 + $0x20c] sm:$0xf]  ;;  %v6842_v25 = vld [vmem:[#allocation13 + $0x1d0] sm:$0xf]  ;;  %v9517_v52 = vor.u32 %v7981_v9, %v6866_v51  ;;  %v9519_v21 = vor.u32 %v7913_v41, %v6612_v58  ;;  %v1545_v6 = vpop.f32.mrf.mxu1  ;;  %v1571_v58 = vpop.f32.mrf.mxu3 }
 0x11d   : > { %12402 = vst [vmem:[#allocation188_spill] sm:$0xff] %v9503_v10  ;;  %v6868_v63 = vld [vmem:[#allocation13 + $0x228] sm:$0xf0]  ;;  %v7974_v50 = vld [vmem:[#allocation13 + $0x1ec] sm:$0xf0] }
 0x11e   : > { %12403 = vst [vmem:[#allocation189_spill] sm:$0xff] %v9508_v29  ;;  %v7098_v28 = vld [vmem:[#allocation13 + $0x3d0] sm:$0xf]  ;;  %2471 = vmatpush.bf16.msrb.mxu0 %v9497_v11  ;;  %v7970_v0 = vld [vmem:[#allocation13 + $0x1d4] sm:$0xf]  ;;  %2497 = vmatpush.bf16.msrb.mxu2 %v9503_v10  ;;  %v9522_v11 = vor.u32 %v7977_v14, %v6868_v63  ;;  %v9524_v49 = vor.u32 %v7974_v50, %v6842_v25  ;;  %v1558_v50 = vpop.f32.mrf.mxu2 }
 0x11f   : > { %12404 = vst [vmem:[#allocation190_spill] sm:$0xff] %v9513_v59  ;;  %v8038_v36 = vld [vmem:[#allocation13 + $0x3ec] sm:$0xf0]  ;;  %v6844_v30 = vld [vmem:[#allocation13 + $0x1f0] sm:$0xf0] }
 0x120   : > { %2484 = vmatpush.bf16.msrb.mxu1 %v9501_v46  ;;  %12405 = vst [vmem:[#allocation191_spill] sm:$0xff] %v9517_v52  ;;  %v8034_v20 = vld [vmem:[#allocation13 + $0x3d4] sm:$0xf]  ;;  %2510 = vmatpush.bf16.msrb.mxu3 %v9508_v29  ;;  %v9526_v40 = vor.u32 %v8038_v36, %v7098_v28  ;;  %v9528_v12 = vor.u32 %v7970_v0, %v6844_v30  ;;  %v6810_v46 = vld [vmem:[#allocation13 + $0x190] sm:$0xf] }
 0x121   : > { %12406 = vst [vmem:[#allocation192_spill] sm:$0xff] %v9519_v21  ;;  %v7100_v7 = vld [vmem:[#allocation13 + $0x3f0] sm:$0xf0]  ;;  %v7966_v5 = vld [vmem:[#allocation13 + $0x1ac] sm:$0xf0] }
 0x122   : > { %12407 = vst [vmem:[#allocation193_spill] sm:$0xff] %v9522_v11  ;;  %v7066_v10 = vld [vmem:[#allocation13 + $0x390] sm:$0xf]  ;;  %2472 = vmatpush.bf16.msrb.mxu0 %v9513_v59  ;;  %v9531_v41 = vor.u32 %v8034_v20, %v7100_v7  ;;  %v7962_v9 = vld [vmem:[#allocation13 + $0x194] sm:$0xf]  ;;  %2498 = vmatpush.bf16.msrb.mxu2 %v9519_v21  ;;  %v9537_v30 = vor.u32 %v7966_v5, %v6810_v46  ;;  %v9582_v59 = vld [vmem:[%s8893_s22 + $0x8] sm:$0xff] }
 0x123   : > { %12408 = vst [vmem:[#allocation194_spill] sm:$0xff] %v9524_v49  ;;  %v8030_v51 = vld [vmem:[#allocation13 + $0x3ac] sm:$0xf0]  ;;  %v6812_v6 = vld [vmem:[#allocation13 + $0x1b0] sm:$0xf0] }
 0x124   : > { %12409 = vst [vmem:[#allocation195_spill] sm:$0xff] %v9526_v40  ;;  %2485 = vmatpush.bf16.msrb.mxu1 %v9517_v52  ;;  %v8026_v63 = vld [vmem:[#allocation13 + $0x394] sm:$0xf]  ;;  %2511 = vmatpush.bf16.msrb.mxu3 %v9522_v11  ;;  %v9541_v7 = vor.u32 %v8030_v51, %v7066_v10  ;;  %v9543_v20 = vor.u32 %v7962_v9, %v6812_v6  ;;  %v6778_v14 = vld [vmem:[#allocation13 + $0x150] sm:$0xf] }
 0x125   : > { %12410 = vst [vmem:[#allocation196_spill] sm:$0xff] %v9528_v12  ;;  %v7068_v25 = vld [vmem:[#allocation13 + $0x3b0] sm:$0xf0]  ;;  %v7958_v28 = vld [vmem:[#allocation13 + $0x16c] sm:$0xf0]  ;;  %2499 = vmatmul.bf16.vlgmr.msrb.gmra.mxu2 %v9421_v42  ;;  %2473 = vmatmul.bf16.vlgmr.msrb.gmra.mxu0 %v9421_v42 }
 0x126   : > { %12411 = vst [vmem:[#allocation197_spill] sm:$0xff] %v9531_v41  ;;  %2517 = vmatpush.bf16.msra.mxu0 %v9524_v49  ;;  %2543 = vmatpush.bf16.msra.mxu2 %v9528_v12  ;;  %v7034_v36 = vld [vmem:[#allocation13 + $0x350] sm:$0xf]  ;;  %v9546_v0 = vor.u32 %v8026_v63, %v7068_v25  ;;  %v7954_v49 = vld [vmem:[#allocation13 + $0x154] sm:$0xf]  ;;  %v9552_v10 = vor.u32 %v7958_v28, %v6778_v14 }
 0x127   : > { %12412 = vst [vmem:[#allocation198_spill] sm:$0xff] %v9537_v30  ;;  %v8022_v50 = vld [vmem:[#allocation13 + $0x36c] sm:$0xf0]  ;;  %v6780_v5 = vld [vmem:[#allocation13 + $0x170] sm:$0xf0]  ;;  %2512 = vmatmul.bf16.vlgmr.msrb.gmra.mxu3 %v9425_v23  ;;  %2486 = vmatmul.bf16.vlgmr.msrb.gmra.mxu1 %v9425_v23 }
 0x128   : > { %2530 = vmatpush.bf16.msra.mxu1 %v9526_v40  ;;  %12413 = vst [vmem:[#allocation199_spill] sm:$0xff] %v9541_v7  ;;  %2556 = vmatpush.bf16.msra.mxu3 %v9531_v41  ;;  %v8018_v46 = vld [vmem:[#allocation13 + $0x354] sm:$0xf]  ;;  %v9557_v51 = vor.u32 %v8022_v50, %v7034_v36  ;;  %v9559_v9 = vor.u32 %v7954_v49, %v6780_v5  ;;  %v6746_v6 = vld [vmem:[#allocation13 + $0x110] sm:$0xf]  ;;  %v9567_v50 = vpop.f32.mrf.mxu1  ;;  %v9570_v49 = vld [vmem:[%s8893_s22] sm:$0xff] }
 0x129   : > { %12414 = vst [vmem:[#allocation200_spill] sm:$0xff] %v9543_v20  ;;  %v7036_v58 = vld [vmem:[#allocation13 + $0x370] sm:$0xf0]  ;;  %v7950_v63 = vld [vmem:[#allocation13 + $0x12c] sm:$0xf0] }
 0x12a   : > { %12415 = vst [vmem:[#allocation201_spill] sm:$0xff] %v9546_v0  ;;  %2518 = vmatpush.bf16.msra.mxu0 %v9537_v30  ;;  %2544 = vmatpush.bf16.msra.mxu2 %v9543_v20  ;;  %v7002_v25 = vld [vmem:[#allocation13 + $0x310] sm:$0xf]  ;;  %v9562_v41 = vor.u32 %v8018_v46, %v7036_v58  ;;  %v7946_v28 = vld [vmem:[#allocation13 + $0x114] sm:$0xf]  ;;  %v9565_v36 = vor.u32 %v7950_v63, %v6746_v6 }
 0x12b   : > { %12416 = vst [vmem:[#allocation202_spill] sm:$0xff] %v9552_v10  ;;  %v8014_v14 = vld [vmem:[#allocation13 + $0x32c] sm:$0xf0]  ;;  %v6748_v30 = vld [vmem:[#allocation13 + $0x130] sm:$0xf0] }
 0x12c   : > { %2531 = vmatpush.bf16.msra.mxu1 %v9541_v7  ;;  %12417 = vst [vmem:[#allocation203_spill] sm:$0xff] %v9557_v51  ;;  %2557 = vmatpush.bf16.msra.mxu3 %v9546_v0  ;;  %v8010_v12 = vld [vmem:[#allocation13 + $0x314] sm:$0xf]  ;;  %v1582_v7 = vpop.f32.mrf.mxu0  ;;  %v9574_v5 = vor.u32 %v8014_v14, %v7002_v25  ;;  %v9576_v46 = vor.u32 %v7946_v28, %v6748_v30  ;;  %v6714_v58 = vld [vmem:[#allocation13 + $0xd0] sm:$0xf] }
 0x12d   : > { %12418 = vst [vmem:[#allocation204_spill] sm:$0xff] %v9559_v9  ;;  %v7004_v40 = vld [vmem:[#allocation13 + $0x330] sm:$0xf0]  ;;  %v7942_v0 = vld [vmem:[#allocation13 + $0xec] sm:$0xf0] }
 0x12e   : > { %12419 = vst [vmem:[#allocation205_spill] sm:$0xff] %v9562_v41  ;;  %2519 = vmatpush.bf16.msra.mxu0 %v9552_v10  ;;  %2545 = vmatpush.bf16.msra.mxu2 %v9559_v9  ;;  %v6970_v20 = vld [vmem:[#allocation13 + $0x2d0] sm:$0xf]  ;;  %v9579_v6 = vor.u32 %v8010_v12, %v7004_v40  ;;  %v7938_v10 = vld [vmem:[#allocation13 + $0xd4] sm:$0xf]  ;;  %v9585_v25 = vor.u32 %v7942_v0, %v6714_v58 }
 0x12f   : > { %12420 = vst [vmem:[#allocation206_spill] sm:$0xff] %v9565_v36  ;;  %v8006_v63 = vld [vmem:[#allocation13 + $0x2ec] sm:$0xf0]  ;;  %v6716_v11 = vld [vmem:[#allocation13 + $0xf0] sm:$0xf0] }
 0x130   : > { %2532 = vmatpush.bf16.msra.mxu1 %v9557_v51  ;;  %12421 = vst [vmem:[#allocation207_spill] sm:$0xff] %v9574_v5  ;;  %2558 = vmatpush.bf16.msra.mxu3 %v9562_v41  ;;  %v8002_v21 = vld [vmem:[#allocation13 + $0x2d4] sm:$0xf]  ;;  %v9589_v30 = vor.u32 %v8006_v63, %v6970_v20  ;;  %v9591_v14 = vor.u32 %v7938_v10, %v6716_v11  ;;  %v6682_v40 = vld [vmem:[#allocation13 + $0x90] sm:$0xf]  ;;  %v858_v41 = vunpack.c.l.bf16 %v9570_v49  ;;  %v1608_v51 = vpop.f32.mrf.mxu2  ;;  %v9598_v11 = vpop.f32.mrf.mxu3 }
 0x131   : > { %12422 = vst [vmem:[#allocation208_spill] sm:$0xff] %v9576_v46  ;;  %v6972_v52 = vld [vmem:[#allocation13 + $0x2f0] sm:$0xf0]  ;;  %v7934_v12 = vld [vmem:[#allocation13 + $0xac] sm:$0xf0]  ;;  %v1597_v29 = vpop.f32.mrf.mxu1 }
 0x132   : > { %12423 = vst [vmem:[#allocation209_spill] sm:$0xff] %v9579_v6  ;;  %2520 = vmatpush.bf16.msra.mxu0 %v9565_v36  ;;  %2546 = vmatpush.bf16.msra.mxu2 %v9576_v46  ;;  %v6938_v28 = vld [vmem:[#allocation13 + $0x290] sm:$0xf]  ;;  %v9595_v9 = vor.u32 %v8002_v21, %v6972_v52  ;;  %v7930_v0 = vld [vmem:[#allocation13 + $0x94] sm:$0xf]  ;;  %v9601_v10 = vor.u32 %v7934_v12, %v6682_v40 }
 0x133   : > { %12424 = vst [vmem:[#allocation210_spill] sm:$0xff] %v9585_v25  ;;  %v7998_v36 = vld [vmem:[#allocation13 + $0x2ac] sm:$0xf0]  ;;  %v6684_v58 = vld [vmem:[#allocation13 + $0xb0] sm:$0xf0] }
 0x134   : > { %2533 = vmatpush.bf16.msra.mxu1 %v9574_v5  ;;  %12425 = vst [vmem:[#allocation211_spill] sm:$0xff] %v9589_v30  ;;  %2559 = vmatpush.bf16.msra.mxu3 %v9579_v6  ;;  %v860_v5 = vunpack.c.l.bf16 %v9582_v59  ;;  %v7994_v46 = vld [vmem:[#allocation13 + $0x294] sm:$0xf]  ;;  %v1584_v63 = vpop.f32.mrf.mxu0  ;;  %v9605_v52 = vor.u32 %v7998_v36, %v6938_v28  ;;  %v9607_v21 = vor.u32 %v7930_v0, %v6684_v58  ;;  %v6650_v6 = vld [vmem:[#allocation13 + $0x50] sm:$0xf] }
 0x135   : > { %12426 = vst [vmem:[#allocation212_spill] sm:$0xff] %v9591_v14  ;;  %v6940_v20 = vld [vmem:[#allocation13 + $0x2b0] sm:$0xf0]  ;;  %v7926_v1 = vld [vmem:[#allocation13 + $0x6c] sm:$0xf0]  ;;  %v1531_v63 = vadd.f32 %v9483_v47, %v858_v41 }
 0x136   : > { %12427 = vst [vmem:[#allocation213_spill] sm:$0xff] %v9595_v9  ;;  %2521 = vmatpush.bf16.msra.mxu0 %v9585_v25  ;;  %2547 = vmatpush.bf16.msra.mxu2 %v9591_v14  ;;  %v6906_v62 = vld [vmem:[#allocation13 + $0x250] sm:$0xf]  ;;  %v9611_v61 = vor.u32 %v7994_v46, %v6940_v20  ;;  %v1583_v40 = vadd.f32 %v1582_v7, %v860_v5  ;;  %v7922_v29 = vld [vmem:[#allocation13 + $0x54] sm:$0xf] }
 0x137   : > { %12428 = vst [vmem:[#allocation214_spill] sm:$0xff] %v9601_v10  ;;  %v7990_v12 = vld [vmem:[#allocation13 + $0x26c] sm:$0xf0]  ;;  %v6652_v25 = vld [vmem:[#allocation13 + $0x70] sm:$0xf0]  ;;  %v9615_v28 = vor.u32 %v7926_v1, %v6650_v6  ;;  %v1544_v20 = vadd.f32 %v9491_v57, %v1531_v63 }
 0x138   : > { %2534 = vmatpush.bf16.msra.mxu1 %v9589_v30  ;;  %12429 = vst [vmem:[#allocation215_spill] sm:$0xff] %v9605_v52  ;;  %2560 = vmatpush.bf16.msra.mxu3 %v9595_v9  ;;  %v859_v30 = vunpack.c.h.bf16 %v9570_v49  ;;  %v7986_v14 = vld [vmem:[#allocation13 + $0x254] sm:$0xf]  ;;  %v6618_v0 = vld [vmem:[#allocation13 + $0x10] sm:$0xf]  ;;  %v9619_v47 = vor.u32 %v7990_v12, %v6906_v62  ;;  %v9621_v41 = vor.u32 %v7922_v29, %v6652_v25  ;;  %v861_v49 = vunpack.c.h.bf16 %v9582_v59  ;;  %v1610_v62 = vpop.f32.mrf.mxu2  ;;  %v1623_v53 = vpop.f32.mrf.mxu3 }
 0x139   : > { %12430 = vst [vmem:[#allocation216_spill] sm:$0xff] %v9607_v21  ;;  %v6908_v36 = vld [vmem:[#allocation13 + $0x270] sm:$0xf0]  ;;  %v7918_v58 = vld [vmem:[#allocation13 + $0x2c] sm:$0xf0]  ;;  %v1596_v6 = vadd.f32 %v9567_v50, %v1583_v40  ;;  %v1729_v62 = vmul.f32 0.5, %v1544_v20 }
 0x13a   : > { %12431 = vst [vmem:[#allocation217_spill] sm:$0xff] %v9611_v61  ;;  %2522 = vmatpush.bf16.msra.mxu0 %v9601_v10  ;;  %2548 = vmatpush.bf16.msra.mxu2 %v9607_v21  ;;  %v6874_v7 = vld [vmem:[#allocation13 + $0x210] sm:$0xf]  ;;  %v7914_v46 = vld [vmem:[#allocation13 + $0x14] sm:$0xf]  ;;  %v9626_v1 = vor.u32 %v7986_v14, %v6908_v36  ;;  %v1557_v25 = vadd.f32 %v9505_v32, %v859_v30 }
 0x13b   : > { %12432 = vst [vmem:[#allocation218_spill] sm:$0xff] %v9615_v28  ;;  %v7982_v5 = vld [vmem:[#allocation13 + $0x22c] sm:$0xf0]  ;;  %v7978_v10 = vld [vmem:[#allocation13 + $0x214] sm:$0xf]  ;;  %v9631_v59 = vor.u32 %v7918_v58, %v6618_v0  ;;  %v1609_v36 = vadd.f32 %v1608_v51, %v861_v49  ;;  %v1737_v53 = vmul.f32 0.5, %v1596_v6 }
 0x13c   : > { %2535 = vmatpush.bf16.msra.mxu1 %v9605_v52  ;;  %12433 = vst [vmem:[#allocation219_spill] sm:$0xff] %v9619_v47  ;;  %2561 = vmatpush.bf16.msra.mxu3 %v9611_v61  ;;  %v6620_v52 = vld [vmem:[#allocation13 + $0x30] sm:$0xf0]  ;;  %v6850_v12 = vld [vmem:[#allocation13 + $0x1d8] sm:$0xf]  ;;  %v9635_v50 = vor.u32 %v7982_v5, %v6874_v7 }
 0x13d   : > { %12434 = vst [vmem:[#allocation220_spill] sm:$0xff] %v9621_v41  ;;  %v6876_v21 = vld [vmem:[#allocation13 + $0x230] sm:$0xf0]  ;;  %v7975_v29 = vld [vmem:[#allocation13 + $0x1f4] sm:$0xf0]  ;;  %v9637_v40 = vor.u32 %v7914_v46, %v6620_v52  ;;  %8171 = vtanh.f32 %v1737_v53 }
 0x13e   : > { %12435 = vst [vmem:[#allocation221_spill] sm:$0xff] %v9626_v1  ;;  %v7106_v9 = vld [vmem:[#allocation13 + $0x3d8] sm:$0xf]  ;;  %2523 = vmatpush.bf16.msra.mxu0 %v9615_v28  ;;  %v7971_v63 = vld [vmem:[#allocation13 + $0x1dc] sm:$0xf]  ;;  %2549 = vmatpush.bf16.msra.mxu2 %v9621_v41  ;;  %v9640_v0 = vor.u32 %v7978_v10, %v6876_v21  ;;  %v9642_v58 = vor.u32 %v7975_v29, %v6850_v12  ;;  %8173 = vtanh.f32 %v1729_v62 }
 0x13f   : > { %12436 = vst [vmem:[#allocation222_spill] sm:$0xff] %v9631_v59  ;;  %v8039_v57 = vld [vmem:[#allocation13 + $0x3f4] sm:$0xf0]  ;;  %v6852_v14 = vld [vmem:[#allocation13 + $0x1f8] sm:$0xf0]  ;;  %v1570_v28 = vadd.f32 %v9510_v34, %v1557_v25  ;;  %v1622_v34 = vadd.f32 %v9598_v11, %v1609_v36 }
 0x140   : > { %2536 = vmatpush.bf16.msra.mxu1 %v9619_v47  ;;  %12437 = vst [vmem:[#allocation223_spill] sm:$0xff] %v9635_v50  ;;  %v8035_v32 = vld [vmem:[#allocation13 + $0x3dc] sm:$0xf]  ;;  %2562 = vmatpush.bf16.msra.mxu3 %v9626_v1  ;;  %v9645_v47 = vor.u32 %v8039_v57, %v7106_v9  ;;  %v9647_v41 = vor.u32 %v7971_v63, %v6852_v14  ;;  %v6818_v7 = vld [vmem:[#allocation13 + $0x198] sm:$0xf]  ;;  %v9666_v63 = vld [vmem:[%s8893_s22 + $0x10] sm:$0xff] }
 0x141   : > { %12438 = vst [vmem:[#allocation224_spill] sm:$0xff] %v9637_v40  ;;  %v7108_v30 = vld [vmem:[#allocation13 + $0x3f8] sm:$0xf0]  ;;  %v7967_v52 = vld [vmem:[#allocation13 + $0x1b4] sm:$0xf0]  ;;  %v1730_v25 = vmul.f32 0.5, %v1570_v28  ;;  %v862_v62 = vunpack.c.l.bf16 %v9666_v63 }
 0x142   : > { %12439 = vst [vmem:[#allocation225_spill] sm:$0xff] %v9640_v0  ;;  %v7074_v5 = vld [vmem:[#allocation13 + $0x398] sm:$0xf]  ;;  %2524 = vmatpush.bf16.msra.mxu0 %v9631_v59  ;;  %v9650_v51 = vor.u32 %v8035_v32, %v7108_v30  ;;  %v7963_v49 = vld [vmem:[#allocation13 + $0x19c] sm:$0xf]  ;;  %2550 = vmatpush.bf16.msra.mxu2 %v9637_v40  ;;  %v9657_v21 = vor.u32 %v7967_v52, %v6818_v7  ;;  %v1738_v36 = vmul.f32 0.5, %v1622_v34 }
 0x143   : > { %12440 = vst [vmem:[#allocation226_spill] sm:$0xff] %v9642_v58  ;;  %v8031_v46 = vld [vmem:[#allocation13 + $0x3b4] sm:$0xf0]  ;;  %v6820_v20 = vld [vmem:[#allocation13 + $0x1b8] sm:$0xf0]  ;;  %8175 = vtanh.f32 %v1730_v25 }
 0x144   : > { %12441 = vst [vmem:[#allocation227_spill] sm:$0xff] %v9645_v47  ;;  %2537 = vmatpush.bf16.msra.mxu1 %v9635_v50  ;;  %v8027_v9 = vld [vmem:[#allocation13 + $0x39c] sm:$0xf]  ;;  %2563 = vmatpush.bf16.msra.mxu3 %v9640_v0  ;;  %v6786_v6 = vld [vmem:[#allocation13 + $0x158] sm:$0xf]  ;;  %v9661_v12 = vor.u32 %v8031_v46, %v7074_v5  ;;  %v9663_v29 = vor.u32 %v7963_v49, %v6820_v20  ;;  %8177 = vtanh.f32 %v1738_v36 }
 0x145   : > { %12442 = vst [vmem:[#allocation228_spill] sm:$0xff] %v9647_v41  ;;  %v7076_v10 = vld [vmem:[#allocation13 + $0x3b8] sm:$0xf0]  ;;  %v7959_v11 = vld [vmem:[#allocation13 + $0x174] sm:$0xf0]  ;;  %2551 = vmatmul.bf16.vlgmr.msra.gmra.mxu2 %v9421_v42  ;;  %2525 = vmatmul.bf16.vlgmr.msra.gmra.mxu0 %v9421_v42 }
 0x146   : > { %12443 = vst [vmem:[#allocation229_spill] sm:$0xff] %v9650_v51  ;;  %2569 = vmatpush.bf16.msrb.mxu0 %v9642_v58  ;;  %2595 = vmatpush.bf16.msrb.mxu2 %v9647_v41  ;;  %v7042_v57 = vld [vmem:[#allocation13 + $0x358] sm:$0xf]  ;;  %v9669_v14 = vor.u32 %v8027_v9, %v7076_v10  ;;  %v7955_v30 = vld [vmem:[#allocation13 + $0x15c] sm:$0xf]  ;;  %v9675_v52 = vor.u32 %v7959_v11, %v6786_v6  ;;  %v8172_v9 = vpop.eup %8171 }
 0x147   : > { %12444 = vst [vmem:[#allocation230_spill] sm:$0xff] %v9657_v21  ;;  %v8023_v32 = vld [vmem:[#allocation13 + $0x374] sm:$0xf0]  ;;  %v6788_v28 = vld [vmem:[#allocation13 + $0x178] sm:$0xf0]  ;;  %2564 = vmatmul.bf16.vlgmr.msra.gmra.mxu3 %v9425_v23  ;;  %2538 = vmatmul.bf16.vlgmr.msra.gmra.mxu1 %v9425_v23  ;;  %v1741_v25 = vmul.f32 0.5, %v8172_v9 }
 0x148   : > { %2582 = vmatpush.bf16.msrb.mxu1 %v9645_v47  ;;  %12445 = vst [vmem:[#allocation231_spill] sm:$0xff] %v9661_v12  ;;  %2608 = vmatpush.bf16.msrb.mxu3 %v9650_v51  ;;  %v8019_v53 = vld [vmem:[#allocation13 + $0x35c] sm:$0xf]  ;;  %v9681_v5 = vor.u32 %v8023_v32, %v7042_v57  ;;  %v9683_v46 = vor.u32 %v7955_v30, %v6788_v28  ;;  %v6754_v49 = vld [vmem:[#allocation13 + $0x118] sm:$0xf]  ;;  %v8174_v57 = vpop.eup %8173  ;;  %v1647_v28 = vpop.f32.mrf.mxu1 }
 0x149   : > { %12446 = vst [vmem:[#allocation232_spill] sm:$0xff] %v9663_v29  ;;  %v7044_v7 = vld [vmem:[#allocation13 + $0x378] sm:$0xf0]  ;;  %v7951_v20 = vld [vmem:[#allocation13 + $0x134] sm:$0xf0] }
 0x14a   : > { %12447 = vst [vmem:[#allocation233_spill] sm:$0xff] %v9669_v14  ;;  %2570 = vmatpush.bf16.msrb.mxu0 %v9657_v21  ;;  %2596 = vmatpush.bf16.msrb.mxu2 %v9663_v29  ;;  %v7010_v34 = vld [vmem:[#allocation13 + $0x318] sm:$0xf]  ;;  %v9686_v10 = vor.u32 %v8019_v53, %v7044_v7  ;;  %v7947_v11 = vld [vmem:[#allocation13 + $0x11c] sm:$0xf]  ;;  %v9689_v30 = vor.u32 %v7951_v20, %v6754_v49  ;;  %v1673_v0 = vpop.f32.mrf.mxu3 }
 0x14b   : > { %12448 = vst [vmem:[#allocation234_spill] sm:$0xff] %v9675_v52  ;;  %v8015_v6 = vld [vmem:[#allocation13 + $0x334] sm:$0xf0]  ;;  %v6756_v21 = vld [vmem:[#allocation13 + $0x138] sm:$0xf0] }
 0x14c   : > { %2583 = vmatpush.bf16.msrb.mxu1 %v9661_v12  ;;  %12449 = vst [vmem:[#allocation235_spill] sm:$0xff] %v9681_v5  ;;  %2609 = vmatpush.bf16.msrb.mxu3 %v9669_v14  ;;  %v1634_v12 = vpop.f32.mrf.mxu0  ;;  %v8011_v51 = vld [vmem:[#allocation13 + $0x31c] sm:$0xf]  ;;  %v6722_v41 = vld [vmem:[#allocation13 + $0xd8] sm:$0xf]  ;;  %v9693_v53 = vor.u32 %v8015_v6, %v7010_v34  ;;  %v9695_v7 = vor.u32 %v7947_v11, %v6756_v21 }
 0x14d   : > { %12450 = vst [vmem:[#allocation236_spill] sm:$0xff] %v9683_v46  ;;  %v7012_v29 = vld [vmem:[#allocation13 + $0x338] sm:$0xf0]  ;;  %v1635_v32 = vadd.f32 %v1634_v12, %v862_v62  ;;  %v7943_v36 = vld [vmem:[#allocation13 + $0xf4] sm:$0xf0] }
 0x14e   : > { %12451 = vst [vmem:[#allocation237_spill] sm:$0xff] %v9686_v10  ;;  %2571 = vmatpush.bf16.msrb.mxu0 %v9675_v52  ;;  %2597 = vmatpush.bf16.msrb.mxu2 %v9683_v46  ;;  %v6978_v14 = vld [vmem:[#allocation13 + $0x2d8] sm:$0xf]  ;;  %v9698_v47 = vor.u32 %v8011_v51, %v7012_v29  ;;  %v7939_v49 = vld [vmem:[#allocation13 + $0xdc] sm:$0xf]  ;;  %v1733_v52 = vmul.f32 0.5, %v8174_v57  ;;  %v8176_v46 = vpop.eup %8175  ;;  %v9702_v21 = vor.u32 %v7943_v36, %v6722_v41  ;;  %v1660_v41 = vpop.f32.mrf.mxu2 }
 0x14f   : > { %12452 = vst [vmem:[#allocation238_spill] sm:$0xff] %v9689_v30  ;;  %v1648_v12 = vadd.f32 %v1647_v28, %v1635_v32  ;;  %v8007_v62 = vld [vmem:[#allocation13 + $0x2f4] sm:$0xf0]  ;;  %v6724_v20 = vld [vmem:[#allocation13 + $0xf8] sm:$0xf0]  ;;  %v8178_v11 = vpop.eup %8177  ;;  %v1743_v51 = vadd.f32 0.5, %v1741_v25 }
 0x150   : > { %2584 = vmatpush.bf16.msrb.mxu1 %v9681_v5  ;;  %12453 = vst [vmem:[#allocation239_spill] sm:$0xff] %v9693_v53  ;;  %2610 = vmatpush.bf16.msrb.mxu3 %v9686_v10  ;;  %v8003_v9 = vld [vmem:[#allocation13 + $0x2dc] sm:$0xf]  ;;  %v863_v5 = vunpack.c.h.bf16 %v9666_v63  ;;  %v6690_v34 = vld [vmem:[#allocation13 + $0x98] sm:$0xf]  ;;  %v9706_v29 = vor.u32 %v8007_v62, %v6978_v14  ;;  %v9708_v57 = vor.u32 %v7939_v49, %v6724_v20  ;;  %v867_v28 = vld [vmem:[#allocation3 + $0x8] sm:$0xff] }
 0x151   : > { %12454 = vst [vmem:[#allocation240_spill] sm:$0xff] %v9695_v7  ;;  %v6980_v58 = vld [vmem:[#allocation13 + $0x2f8] sm:$0xf0]  ;;  %8179 = vtanh.f32 %v1648_v12  ;;  %v7935_v6 = vld [vmem:[#allocation13 + $0xb4] sm:$0xf0]  ;;  %v1735_v10 = vadd.f32 0.5, %v1733_v52 }
 0x152   : > { %12455 = vst [vmem:[#allocation241_spill] sm:$0xff] %v9698_v47  ;;  %2572 = vmatpush.bf16.msrb.mxu0 %v9689_v30  ;;  %2598 = vmatpush.bf16.msrb.mxu2 %v9695_v7  ;;  %v6946_v32 = vld [vmem:[#allocation13 + $0x298] sm:$0xf]  ;;  %v9711_v12 = vor.u32 %v8003_v9, %v6980_v58  ;;  %v7931_v36 = vld [vmem:[#allocation13 + $0x9c] sm:$0xf]  ;;  %v1661_v25 = vadd.f32 %v1660_v41, %v863_v5  ;;  %v1734_v14 = vmul.f32 0.5, %v8176_v46 }
 0x153   : > { %12456 = vst [vmem:[#allocation242_spill] sm:$0xff] %v9702_v21  ;;  %v7999_v63 = vld [vmem:[#allocation13 + $0x2b4] sm:$0xf0]  ;;  %v6692_v30 = vld [vmem:[#allocation13 + $0xb8] sm:$0xf0]  ;;  %v1742_v62 = vmul.f32 0.5, %v8178_v11  ;;  %v9714_v49 = vor.u32 %v7935_v6, %v6690_v34  ;;  %v1755_v58 = vmul.f32 %v1743_v51, %v867_v28 }
 0x154   : > { %2585 = vmatpush.bf16.msrb.mxu1 %v9693_v53  ;;  %12457 = vst [vmem:[#allocation243_spill] sm:$0xff] %v9706_v29  ;;  %2611 = vmatpush.bf16.msrb.mxu3 %v9698_v47  ;;  %v7995_v53 = vld [vmem:[#allocation13 + $0x29c] sm:$0xf]  ;;  %v1636_v7 = vpop.f32.mrf.mxu0  ;;  %v9716_v20 = vor.u32 %v7999_v63, %v6946_v32  ;;  %v1649_v47 = vpop.f32.mrf.mxu1  ;;  %v1674_v52 = vadd.f32 %v1673_v0, %v1661_v25  ;;  %v6658_v9 = vld [vmem:[#allocation13 + $0x58] sm:$0xf] }
 0x155   : > { %12458 = vst [vmem:[#allocation244_spill] sm:$0xff] %v9708_v57  ;;  %v6948_v40 = vld [vmem:[#allocation13 + $0x2b8] sm:$0xf0]  ;;  %v9720_v5 = vor.u32 %v7931_v36, %v6692_v30  ;;  %v7927_v41 = vld [vmem:[#allocation13 + $0x74] sm:$0xf0]  ;;  %v1744_v0 = vadd.f32 0.5, %v1742_v62 }
 0x156   : > { %12459 = vst [vmem:[#allocation245_spill] sm:$0xff] %v9711_v12  ;;  %2573 = vmatpush.bf16.msrb.mxu0 %v9702_v21  ;;  %2599 = vmatpush.bf16.msrb.mxu2 %v9708_v57  ;;  %v6914_v7 = vld [vmem:[#allocation13 + $0x258] sm:$0xf]  ;;  %v9723_v11 = vor.u32 %v7995_v53, %v6948_v40  ;;  %v7923_v6 = vld [vmem:[#allocation13 + $0x5c] sm:$0xf]  ;;  %8181 = vtanh.f32 %v1674_v52  ;;  %v868_v57 = vld [vmem:[#allocation3 + $0x10] sm:$0xff]  ;;  %v9726_v30 = vor.u32 %v7927_v41, %v6658_v9 }
 0x157   : > { %12460 = vst [vmem:[#allocation246_spill] sm:$0xff] %v9714_v49  ;;  %v8180_v46 = vpop.eup %8179  ;;  %v7991_v34 = vld [vmem:[#allocation13 + $0x274] sm:$0xf0]  ;;  %v6660_v32 = vld [vmem:[#allocation13 + $0x78] sm:$0xf0] }
 0x158   : > { %12461 = vst [vmem:[#allocation247_spill] sm:$0xff] %v9716_v20  ;;  %2586 = vmatpush.bf16.msrb.mxu1 %v9706_v29  ;;  %2612 = vmatpush.bf16.msrb.mxu3 %v9711_v12  ;;  %v1757_v47 = vmul.f32 %v8180_v46, %v1735_v10  ;;  %v7987_v51 = vld [vmem:[#allocation13 + $0x25c] sm:$0xf]  ;;  %v6626_v28 = vld [vmem:[#allocation13 + $0x18] sm:$0xf]  ;;  %v9732_v40 = vor.u32 %v7991_v34, %v6914_v7  ;;  %v1675_v7 = vpop.f32.mrf.mxu3 }
 0x159   : > { %12462 = vst [vmem:[#allocation248_spill] sm:$0xff] %v9720_v5  ;;  %v6916_v63 = vld [vmem:[#allocation13 + $0x278] sm:$0xf0]  ;;  %v7919_v36 = vld [vmem:[#allocation13 + $0x34] sm:$0xf0]  ;;  %v9734_v10 = vor.u32 %v7923_v6, %v6660_v32  ;;  %v1756_v34 = vmul.f32 %v1744_v0, %v868_v57 }
 0x15a   : > { %12463 = vst [vmem:[#allocation249_spill] sm:$0xff] %v9723_v11  ;;  %2574 = vmatpush.bf16.msrb.mxu0 %v9714_v49  ;;  %v6882_v25 = vld [vmem:[#allocation13 + $0x218] sm:$0xf]  ;;  %v9728_v29 = vadd.f32 %v1757_v47, %v1755_v58  ;;  %2600 = vmatpush.bf16.msrb.mxu2 %v9720_v5  ;;  %v7915_v52 = vld [vmem:[#allocation13 + $0x1c] sm:$0xf]  ;;  %v9737_v62 = vor.u32 %v7987_v51, %v6916_v63  ;;  %v1662_v58 = vpop.f32.mrf.mxu2  ;;  %v1736_v47 = vadd.f32 0.5, %v1734_v14 }
 0x15b   : > { %12464 = vst [vmem:[#allocation250_spill] sm:$0xff] %v9726_v30  ;;  %v7983_v53 = vld [vmem:[#allocation13 + $0x234] sm:$0xf0]  ;;  %v6628_v46 = vld [vmem:[#allocation13 + $0x38] sm:$0xf0]  ;;  %v9741_v6 = vor.u32 %v7919_v36, %v6626_v28 }
 0x15c   : > { %2587 = vmatpush.bf16.msrb.mxu1 %v9716_v20  ;;  %12465 = vst [vmem:[#allocation251_spill] sm:$0xff] %v9732_v40  ;;  %2613 = vmatpush.bf16.msrb.mxu3 %v9723_v11  ;;  %v7979_v9 = vld [vmem:[#allocation13 + $0x21c] sm:$0xf]  ;;  %v7338_v49 = vld [vmem:[#allocation12 + $0x1c0] sm:$0xf]  ;;  %v8182_v51 = vpop.eup %8181  ;;  %v9745_v63 = vor.u32 %v7983_v53, %v6882_v25  ;;  %v9747_v14 = vor.u32 %v7915_v52, %v6628_v46 }
 0x15d   : > { %12466 = vst [vmem:[#allocation252_spill] sm:$0xff] %v9734_v10  ;;  %v6884_v41 = vld [vmem:[#allocation13 + $0x238] sm:$0xf0]  ;;  %v7844_v20 = vld [vmem:[#allocation12 + $0x1dc] sm:$0xf0]  ;;  %v1758_v7 = vmul.f32 %v8182_v51, %v1736_v47 }
 0x15e   : > { %12467 = vst [vmem:[#allocation253_spill] sm:$0xff] %v9737_v62  ;;  %v7594_v5 = vld [vmem:[#allocation12 + $0x3c0] sm:$0xf]  ;;  %2575 = vmatpush.bf16.msrb.mxu0 %v9726_v30  ;;  %v7840_v12 = vld [vmem:[#allocation12 + $0x1c4] sm:$0xf]  ;;  %2601 = vmatpush.bf16.msrb.mxu2 %v9734_v10  ;;  %v9750_v57 = vor.u32 %v7979_v9, %v6884_v41  ;;  %v9752_v28 = vor.u32 %v7844_v20, %v7338_v49 }
 0x15f   : > { %3539 = vst [vmem:[#allocation3 + $0x8] sm:$0xff] %v9728_v29  ;;  %v7908_v32 = vld [vmem:[#allocation12 + $0x3dc] sm:$0xf0]  ;;  %v7340_v11 = vld [vmem:[#allocation12 + $0x1e0] sm:$0xf0]  ;;  %v9758_v25 = vadd.f32 %v1758_v7, %v1756_v34  ;;  %v9777_v34 = vld [vmem:[%s8893_s22 + $0x18] sm:$0xff] }
 0x160   : > { %12468 = vst [vmem:[#allocation254_spill] sm:$0xff] %v9741_v6  ;;  %2588 = vmatpush.bf16.msrb.mxu1 %v9732_v40  ;;  %v7904_v58 = vld [vmem:[#allocation12 + $0x3c4] sm:$0xf]  ;;  %2614 = vmatpush.bf16.msrb.mxu3 %v9737_v62  ;;  %v9754_v0 = vor.u32 %v7908_v32, %v7594_v5  ;;  %v9756_v36 = vor.u32 %v7840_v12, %v7340_v11  ;;  %v7306_v40 = vld [vmem:[#allocation12 + $0x180] sm:$0xf] }
 0x161   : > { %12469 = vst [vmem:[#allocation255_spill] sm:$0xff] %v9745_v63  ;;  %v7596_v21 = vld [vmem:[#allocation12 + $0x3e0] sm:$0xf0]  ;;  %v7836_v30 = vld [vmem:[#allocation12 + $0x19c] sm:$0xf0] }
 0x162   : > { %12470 = vst [vmem:[#allocation256_spill] sm:$0xff] %v9747_v14  ;;  %v7562_v10 = vld [vmem:[#allocation12 + $0x380] sm:$0xf]  ;;  %2576 = vmatpush.bf16.msrb.mxu0 %v9741_v6  ;;  %v9761_v53 = vor.u32 %v7904_v58, %v7596_v21  ;;  %v7832_v46 = vld [vmem:[#allocation12 + $0x184] sm:$0xf]  ;;  %2602 = vmatpush.bf16.msrb.mxu2 %v9747_v14  ;;  %v9768_v20 = vor.u32 %v7836_v30, %v7306_v40 }
 0x163   : > { %12471 = vst [vmem:[#allocation257_spill] sm:$0xff] %v9750_v57  ;;  %v7900_v52 = vld [vmem:[#allocation12 + $0x39c] sm:$0xf0]  ;;  %v7308_v47 = vld [vmem:[#allocation12 + $0x1a0] sm:$0xf0] }
 0x164   : > { %12472 = vst [vmem:[#allocation258_spill] sm:$0xff] %v9752_v28  ;;  %2589 = vmatpush.bf16.msrb.mxu1 %v9745_v63  ;;  %v7896_v49 = vld [vmem:[#allocation12 + $0x384] sm:$0xf]  ;;  %2615 = vmatpush.bf16.msrb.mxu3 %v9750_v57  ;;  %v7274_v21 = vld [vmem:[#allocation12 + $0x140] sm:$0xf]  ;;  %v9772_v5 = vor.u32 %v7900_v52, %v7562_v10  ;;  %v9774_v11 = vor.u32 %v7832_v46, %v7308_v47  ;;  %v864_v52 = vunpack.c.l.bf16 %v9777_v34 }
 0x165   : > { %12473 = vst [vmem:[#allocation259_spill] sm:$0xff] %v9754_v0  ;;  %v7564_v12 = vld [vmem:[#allocation12 + $0x3a0] sm:$0xf0]  ;;  %v7828_v9 = vld [vmem:[#allocation12 + $0x15c] sm:$0xf0]  ;;  %2603 = vmatmul.bf16.vlgmr.msrb.gmra.mxu2 %v9421_v42  ;;  %2577 = vmatmul.bf16.vlgmr.msrb.gmra.mxu0 %v9421_v42 }
 0x166   : > { %12474 = vst [vmem:[#allocation260_spill] sm:$0xff] %v9756_v36  ;;  %3268 = vmatpush.bf16.msra.mxu0 %v9752_v28  ;;  %3294 = vmatpush.bf16.msra.mxu2 %v9756_v36  ;;  %v7530_v41 = vld [vmem:[#allocation12 + $0x340] sm:$0xf]  ;;  %v9780_v32 = vor.u32 %v7896_v49, %v7564_v12  ;;  %v7824_v30 = vld [vmem:[#allocation12 + $0x144] sm:$0xf]  ;;  %v9786_v10 = vor.u32 %v7828_v9, %v7274_v21  ;;  %v1686_v36 = vpop.f32.mrf.mxu0 }
 0x167   : > { %12475 = vst [vmem:[#allocation261_spill] sm:$0xff] %v9761_v53  ;;  %v7892_v51 = vld [vmem:[#allocation12 + $0x35c] sm:$0xf0]  ;;  %v7276_v40 = vld [vmem:[#allocation12 + $0x160] sm:$0xf0]  ;;  %2616 = vmatmul.bf16.vlgmr.msrb.gmra.mxu3 %v9425_v23  ;;  %2590 = vmatmul.bf16.vlgmr.msrb.gmra.mxu1 %v9425_v23 }
 0x168   : > { %3540 = vst [vmem:[#allocation3 + $0x10] sm:$0xff] %v9758_v25  ;;  %3281 = vmatpush.bf16.msra.mxu1 %v9754_v0  ;;  %3307 = vmatpush.bf16.msra.mxu3 %v9761_v53  ;;  %v7888_v58 = vld [vmem:[#allocation12 + $0x344] sm:$0xf]  ;;  %v9792_v46 = vor.u32 %v7892_v51, %v7530_v41  ;;  %v9794_v47 = vor.u32 %v7824_v30, %v7276_v40  ;;  %v7242_v49 = vld [vmem:[#allocation12 + $0x100] sm:$0xf]  ;;  %v1699_v51 = vpop.f32.mrf.mxu1 }
 0x169   : > { %12476 = vst [vmem:[#allocation262_spill] sm:$0xff] %v9768_v20  ;;  %v7532_v7 = vld [vmem:[#allocation12 + $0x360] sm:$0xf0]  ;;  %v7820_v12 = vld [vmem:[#allocation12 + $0x11c] sm:$0xf0] }
 0x16a   : > { %12477 = vst [vmem:[#allocation263_spill] sm:$0xff] %v9772_v5  ;;  %3269 = vmatpush.bf16.msra.mxu0 %v9768_v20  ;;  %3295 = vmatpush.bf16.msra.mxu2 %v9774_v11  ;;  %v7498_v53 = vld [vmem:[#allocation12 + $0x300] sm:$0xf]  ;;  %v9797_v42 = vor.u32 %v7888_v58, %v7532_v7  ;;  %v7816_v9 = vld [vmem:[#allocation12 + $0x104] sm:$0xf]  ;;  %v9800_v41 = vor.u32 %v7820_v12, %v7242_v49 }
 0x16b   : > { %12478 = vst [vmem:[#allocation264_spill] sm:$0xff] %v9774_v11  ;;  %v7884_v21 = vld [vmem:[#allocation12 + $0x31c] sm:$0xf0]  ;;  %v7244_v20 = vld [vmem:[#allocation12 + $0x120] sm:$0xf0]  ;;  %v1687_v11 = vadd.f32 %v1686_v36, %v864_v52 }
 0x16c   : > { %12479 = vst [vmem:[#allocation265_spill] sm:$0xff] %v9780_v32  ;;  %3282 = vmatpush.bf16.msra.mxu1 %v9772_v5  ;;  %3308 = vmatpush.bf16.msra.mxu3 %v9780_v32  ;;  %v7880_v23 = vld [vmem:[#allocation12 + $0x304] sm:$0xf]  ;;  %v9804_v30 = vor.u32 %v7884_v21, %v7498_v53  ;;  %v9806_v40 = vor.u32 %v7816_v9, %v7244_v20  ;;  %v7210_v58 = vld [vmem:[#allocation12 + $0xc0] sm:$0xf] }
 0x16d   : > { %12480 = vst [vmem:[#allocation266_spill] sm:$0xff] %v9786_v10  ;;  %v7500_v0 = vld [vmem:[#allocation12 + $0x320] sm:$0xf0]  ;;  %v7812_v7 = vld [vmem:[#allocation12 + $0xdc] sm:$0xf0] }
 0x16e   : > { %12481 = vst [vmem:[#allocation267_spill] sm:$0xff] %v9792_v46  ;;  %3270 = vmatpush.bf16.msra.mxu0 %v9786_v10  ;;  %3296 = vmatpush.bf16.msra.mxu2 %v9794_v47  ;;  %v7466_v32 = vld [vmem:[#allocation12 + $0x2c0] sm:$0xf]  ;;  %v9809_v5 = vor.u32 %v7880_v23, %v7500_v0  ;;  %v1700_v10 = vadd.f32 %v1699_v51, %v1687_v11  ;;  %v7808_v52 = vld [vmem:[#allocation12 + $0xc4] sm:$0xf] }
 0x16f   : > { %12482 = vst [vmem:[#allocation268_spill] sm:$0xff] %v9794_v47  ;;  %v7876_v36 = vld [vmem:[#allocation12 + $0x2dc] sm:$0xf0]  ;;  %v7212_v49 = vld [vmem:[#allocation12 + $0xe0] sm:$0xf0]  ;;  %v9813_v20 = vor.u32 %v7812_v7, %v7210_v58 }
 0x170   : > { %12483 = vst [vmem:[#allocation269_spill] sm:$0xff] %v9797_v42  ;;  %3283 = vmatpush.bf16.msra.mxu1 %v9792_v46  ;;  %3309 = vmatpush.bf16.msra.mxu3 %v9797_v42  ;;  %v7872_v12 = vld [vmem:[#allocation12 + $0x2c4] sm:$0xf]  ;;  %v865_v46 = vunpack.c.h.bf16 %v9777_v34  ;;  %v1747_v53 = vmul.f32 0.5, %v1700_v10  ;;  %v9817_v21 = vor.u32 %v7876_v36, %v7466_v32  ;;  %v9819_v0 = vor.u32 %v7808_v52, %v7212_v49  ;;  %v7178_v11 = vld [vmem:[#allocation12 + $0x80] sm:$0xf]  ;;  %v1712_v34 = vpop.f32.mrf.mxu2  ;;  %v1688_v32 = vpop.f32.mrf.mxu0 }
 0x171   : > { %12484 = vst [vmem:[#allocation270_spill] sm:$0xff] %v9800_v41  ;;  %v7468_v28 = vld [vmem:[#allocation12 + $0x2e0] sm:$0xf0]  ;;  %v7804_v9 = vld [vmem:[#allocation12 + $0x9c] sm:$0xf0]  ;;  %v1701_v52 = vpop.f32.mrf.mxu1 }
 0x172   : > { %12485 = vst [vmem:[#allocation271_spill] sm:$0xff] %v9804_v30  ;;  %3271 = vmatpush.bf16.msra.mxu0 %v9800_v41  ;;  %3297 = vmatpush.bf16.msra.mxu2 %v9806_v40  ;;  %v7434_v23 = vld [vmem:[#allocation12 + $0x280] sm:$0xf]  ;;  %v9822_v51 = vor.u32 %v7872_v12, %v7468_v28  ;;  %v7800_v10 = vld [vmem:[#allocation12 + $0x84] sm:$0xf]  ;;  %8183 = vtanh.f32 %v1747_v53  ;;  %v1713_v7 = vadd.f32 %v1712_v34, %v865_v46 }
 0x173   : > { %12486 = vst [vmem:[#allocation272_spill] sm:$0xff] %v9806_v40  ;;  %v7868_v41 = vld [vmem:[#allocation12 + $0x29c] sm:$0xf0]  ;;  %v7180_v58 = vld [vmem:[#allocation12 + $0xa0] sm:$0xf0]  ;;  %v9825_v36 = vor.u32 %v7804_v9, %v7178_v11 }
 0x174   : > { %12487 = vst [vmem:[#allocation273_spill] sm:$0xff] %v9809_v5  ;;  %3284 = vmatpush.bf16.msra.mxu1 %v9804_v30  ;;  %3310 = vmatpush.bf16.msra.mxu3 %v9809_v5  ;;  %v1725_v30 = vpop.f32.mrf.mxu3  ;;  %v7864_v42 = vld [vmem:[#allocation12 + $0x284] sm:$0xf]  ;;  %v9829_v49 = vor.u32 %v7868_v41, %v7434_v23  ;;  %v9831_v12 = vor.u32 %v7800_v10, %v7180_v58  ;;  %v7146_v53 = vld [vmem:[#allocation12 + $0x40] sm:$0xf] }
 0x175   : > { %12488 = vst [vmem:[#allocation274_spill] sm:$0xff] %v9813_v20  ;;  %v7436_v40 = vld [vmem:[#allocation12 + $0x2a0] sm:$0xf0]  ;;  %v1726_v28 = vadd.f32 %v1725_v30, %v1713_v7  ;;  %v7796_v46 = vld [vmem:[#allocation12 + $0x5c] sm:$0xf0] }
 0x176   : > { %12489 = vst [vmem:[#allocation275_spill] sm:$0xff] %v9817_v21  ;;  %3272 = vmatpush.bf16.msra.mxu0 %v9813_v20  ;;  %3298 = vmatpush.bf16.msra.mxu2 %v9819_v0  ;;  %v7402_v34 = vld [vmem:[#allocation12 + $0x240] sm:$0xf]  ;;  %v9834_v32 = vor.u32 %v7864_v42, %v7436_v40  ;;  %v7792_v11 = vld [vmem:[#allocation12 + $0x44] sm:$0xf]  ;;  %v9837_v30 = vor.u32 %v7796_v46, %v7146_v53 }
 0x177   : > { %12490 = vst [vmem:[#allocation276_spill] sm:$0xff] %v9819_v0  ;;  %v7860_v20 = vld [vmem:[#allocation12 + $0x25c] sm:$0xf0]  ;;  %v7148_v9 = vld [vmem:[#allocation12 + $0x60] sm:$0xf0]  ;;  %v1748_v52 = vmul.f32 0.5, %v1726_v28 }
 0x178   : > { %12491 = vst [vmem:[#allocation277_spill] sm:$0xff] %v9822_v51  ;;  %3285 = vmatpush.bf16.msra.mxu1 %v9817_v21  ;;  %3311 = vmatpush.bf16.msra.mxu3 %v9822_v51  ;;  %v7856_v5 = vld [vmem:[#allocation12 + $0x244] sm:$0xf]  ;;  %v7114_v41 = vld [vmem:[#allocation12] sm:$0xf]  ;;  %v8184_v58 = vpop.eup %8183  ;;  %v9841_v42 = vor.u32 %v7860_v20, %v7402_v34  ;;  %v9843_v40 = vor.u32 %v7792_v11, %v7148_v9  ;;  %v1714_v47 = vpop.f32.mrf.mxu2 }
 0x179   : > { %12492 = vst [vmem:[#allocation278_spill] sm:$0xff] %v9825_v36  ;;  %v7404_v21 = vld [vmem:[#allocation12 + $0x260] sm:$0xf0]  ;;  %v7788_v23 = vld [vmem:[#allocation12 + $0x1c] sm:$0xf0]  ;;  %8185 = vtanh.f32 %v1748_v52  ;;  %v1751_v20 = vmul.f32 0.5, %v8184_v58 }
 0x17a   : > { %12493 = vst [vmem:[#allocation279_spill] sm:$0xff] %v9829_v49  ;;  %3273 = vmatpush.bf16.msra.mxu0 %v9825_v36  ;;  %v7370_v10 = vld [vmem:[#allocation12 + $0x200] sm:$0xf]  ;;  %3299 = vmatpush.bf16.msra.mxu2 %v9831_v12  ;;  %v7784_v28 = vld [vmem:[#allocation12 + $0x4] sm:$0xf]  ;;  %v9846_v53 = vor.u32 %v7856_v5, %v7404_v21  ;;  %8187 = vtanh.f32 %v9728_v29  ;;  %v9850_v34 = vor.u32 %v7788_v23, %v7114_v41 }
 0x17b   : > { %12494 = vst [vmem:[#allocation280_spill] sm:$0xff] %v9831_v12  ;;  %v7852_v7 = vld [vmem:[#allocation12 + $0x21c] sm:$0xf0]  ;;  %v7116_v51 = vld [vmem:[#allocation12 + $0x20] sm:$0xf0]  ;;  %8189 = vtanh.f32 %v9758_v25 }
 0x17c   : > { %12495 = vst [vmem:[#allocation281_spill] sm:$0xff] %v9834_v32  ;;  %3286 = vmatpush.bf16.msra.mxu1 %v9829_v49  ;;  %3312 = vmatpush.bf16.msra.mxu3 %v9834_v32  ;;  %v7848_v46 = vld [vmem:[#allocation12 + $0x204] sm:$0xf]  ;;  %v7346_v0 = vld [vmem:[#allocation12 + $0x1c8] sm:$0xf]  ;;  %v1727_v14 = vpop.f32.mrf.mxu3  ;;  %v9855_v5 = vor.u32 %v7852_v7, %v7370_v10  ;;  %v9857_v47 = vor.u32 %v7784_v28, %v7116_v51  ;;  %v1753_v7 = vadd.f32 0.5, %v1751_v20 }
 0x17d   : > { %12496 = vst [vmem:[#allocation282_spill] sm:$0xff] %v9837_v30  ;;  %v7372_v36 = vld [vmem:[#allocation12 + $0x220] sm:$0xf0]  ;;  %v7845_v52 = vld [vmem:[#allocation12 + $0x1e4] sm:$0xf0] }
 0x17e   : > { %12497 = vst [vmem:[#allocation283_spill] sm:$0xff] %v9841_v42  ;;  %v7602_v57 = vld [vmem:[#allocation12 + $0x3c8] sm:$0xf]  ;;  %3274 = vmatpush.bf16.msra.mxu0 %v9837_v30  ;;  %v7841_v11 = vld [vmem:[#allocation12 + $0x1cc] sm:$0xf]  ;;  %3300 = vmatpush.bf16.msra.mxu2 %v9843_v40  ;;  %v9860_v58 = vor.u32 %v7848_v46, %v7372_v36  ;;  %v9862_v41 = vor.u32 %v7845_v52, %v7346_v0 }
 0x17f   : > { %12498 = vst [vmem:[#allocation284_spill] sm:$0xff] %v9843_v40  ;;  %v7909_v49 = vld [vmem:[#allocation12 + $0x3e4] sm:$0xf0]  ;;  %v7348_v9 = vld [vmem:[#allocation12 + $0x1e8] sm:$0xf0]  ;;  %v8186_v30 = vpop.eup %8185 }
 0x180   : > { %12499 = vst [vmem:[#allocation285_spill] sm:$0xff] %v9846_v53  ;;  %3287 = vmatpush.bf16.msra.mxu1 %v9841_v42  ;;  %v7905_v14 = vld [vmem:[#allocation12 + $0x3cc] sm:$0xf]  ;;  %3313 = vmatpush.bf16.msra.mxu3 %v9846_v53  ;;  %v7314_v23 = vld [vmem:[#allocation12 + $0x188] sm:$0xf]  ;;  %v9864_v32 = vor.u32 %v7909_v49, %v7602_v57  ;;  %v9866_v12 = vor.u32 %v7841_v11, %v7348_v9  ;;  %v1752_v51 = vmul.f32 0.5, %v8186_v30  ;;  %v8188_v49 = vpop.eup %8187 }
 0x181   : > { %12500 = vst [vmem:[#allocation286_spill] sm:$0xff] %v9850_v34  ;;  %v7604_v21 = vld [vmem:[#allocation12 + $0x3e8] sm:$0xf0]  ;;  %v7837_v42 = vld [vmem:[#allocation12 + $0x1a4] sm:$0xf0]  ;;  %v8190_v30 = vpop.eup %8189 }
 0x182   : > { %12501 = vst [vmem:[#allocation287_spill] sm:$0xff] %v9855_v5  ;;  %v7570_v40 = vld [vmem:[#allocation12 + $0x388] sm:$0xf]  ;;  %3275 = vmatpush.bf16.msra.mxu0 %v9850_v34  ;;  %v9869_v28 = vor.u32 %v7905_v14, %v7604_v21  ;;  %v7833_v53 = vld [vmem:[#allocation12 + $0x18c] sm:$0xf]  ;;  %3301 = vmatpush.bf16.msra.mxu2 %v9857_v47  ;;  %v1754_v46 = vadd.f32 0.5, %v1752_v51  ;;  %v9875_v52 = vor.u32 %v7837_v42, %v7314_v23 }
 0x183   : > { %12502 = vst [vmem:[#allocation288_spill] sm:$0xff] %v9857_v47  ;;  %v7901_v10 = vld [vmem:[#allocation12 + $0x3a4] sm:$0xf0]  ;;  %v7316_v36 = vld [vmem:[#allocation12 + $0x1a8] sm:$0xf0]  ;;  %v9883_v47 = vmul.f32 %v8188_v49, %v1753_v7 }
 0x184   : > { %12503 = vst [vmem:[#allocation289_spill] sm:$0xff] %v9860_v58  ;;  %3288 = vmatpush.bf16.msra.mxu1 %v9855_v5  ;;  %v7897_v0 = vld [vmem:[#allocation12 + $0x38c] sm:$0xf]  ;;  %3314 = vmatpush.bf16.msra.mxu3 %v9860_v58  ;;  %v9879_v20 = vor.u32 %v7901_v10, %v7570_v40  ;;  %v9881_v11 = vor.u32 %v7833_v53, %v7316_v36  ;;  %v7282_v9 = vld [vmem:[#allocation12 + $0x148] sm:$0xf] }
 0x185   : > { %12504 = vst [vmem:[#allocation290_spill] sm:$0xff] %v9862_v41  ;;  %v7572_v57 = vld [vmem:[#allocation12 + $0x3a8] sm:$0xf0]  ;;  %v7829_v14 = vld [vmem:[#allocation12 + $0x164] sm:$0xf0]  ;;  %v9885_v51 = vmul.f32 %v8190_v30, %v1754_v46 }
 0x186   : > { %12505 = vst [vmem:[#allocation291_spill] sm:$0xff] %v9864_v32  ;;  %3320 = vmatpush.bf16.msrb.mxu0 %v9862_v41  ;;  %3346 = vmatpush.bf16.msrb.mxu2 %v9866_v12  ;;  %v7538_v21 = vld [vmem:[#allocation12 + $0x348] sm:$0xf]  ;;  %v9888_v42 = vor.u32 %v7897_v0, %v7572_v57  ;;  %v7825_v41 = vld [vmem:[#allocation12 + $0x14c] sm:$0xf]  ;;  %v9893_v53 = vor.u32 %v7829_v14, %v7282_v9 }
 0x187   : > { %12506 = vst [vmem:[#allocation292_spill] sm:$0xff] %v9866_v12  ;;  %v7893_v23 = vld [vmem:[#allocation12 + $0x364] sm:$0xf0]  ;;  %v7889_v58 = vld [vmem:[#allocation12 + $0x34c] sm:$0xf]  ;;  %v1765_v40 = vpack.c.bf16 %v9885_v51, %v9883_v47 }
 0x188   : > { %12507 = vst [vmem:[#allocation293_spill] sm:$0xff] %v9869_v28  ;;  %3333 = vmatpush.bf16.msrb.mxu1 %v9864_v32  ;;  %3359 = vmatpush.bf16.msrb.mxu3 %v9869_v28  ;;  %v7284_v32 = vld [vmem:[#allocation12 + $0x168] sm:$0xf0]  ;;  %v7250_v10 = vld [vmem:[#allocation12 + $0x108] sm:$0xf]  ;;  %v9897_v7 = vor.u32 %v7893_v23, %v7538_v21 }
 0x189   : > { %12508 = vst [vmem:[#allocation294_spill] sm:$0xff] %v9875_v52  ;;  %v7540_v12 = vld [vmem:[#allocation12 + $0x368] sm:$0xf0]  ;;  %v9899_v36 = vor.u32 %v7825_v41, %v7284_v32  ;;  %v7821_v0 = vld [vmem:[#allocation12 + $0x124] sm:$0xf0]  ;;  %v2622_v46 = vunpack.c.l.b16 %v1765_v40  ;;  %v2623_v30 = vunpack.c.h.b16 %v1765_v40  ;;  %v2422_v41 = vpop.f32.mrf.mxu0 }
 0x18a   : > { %12509 = vst [vmem:[#allocation295_spill] sm:$0xff] %v9879_v20  ;;  %3321 = vmatpush.bf16.msrb.mxu0 %v9875_v52  ;;  %3347 = vmatpush.bf16.msrb.mxu2 %v9881_v11  ;;  %v7506_v57 = vld [vmem:[#allocation12 + $0x308] sm:$0xf]  ;;  %v9902_v52 = vor.u32 %v7889_v58, %v7540_v12  ;;  %v7817_v9 = vld [vmem:[#allocation12 + $0x10c] sm:$0xf]  ;;  %v9909_v32 = vor.u32 %v7821_v0, %v7250_v10 }
 0x18b   : > { %12510 = vst [vmem:[#allocation296_spill] sm:$0xff] %v9881_v11  ;;  %v7885_v49 = vld [vmem:[#allocation12 + $0x324] sm:$0xf0]  ;;  %v7252_v14 = vld [vmem:[#allocation12 + $0x128] sm:$0xf0]  ;;  %v9904_v5 = vpack.c.b16 %v2622_v46, %v2622_v46  ;;  %v9906_v21 = vpack.c.b16 %v2623_v30, %v2623_v30  ;;  %v2435_v46 = vpop.f32.mrf.mxu1 }
 0x18c   : > { %12511 = vst [vmem:[#allocation297_spill] sm:$0xff] %v9888_v42  ;;  %3334 = vmatpush.bf16.msrb.mxu1 %v9879_v20  ;;  %3360 = vmatpush.bf16.msrb.mxu3 %v9888_v42  ;;  %v7881_v28 = vld [vmem:[#allocation12 + $0x30c] sm:$0xf]  ;;  %v9913_v23 = vor.u32 %v7885_v49, %v7506_v57  ;;  %v9915_v12 = vor.u32 %v7817_v9, %v7252_v14  ;;  %v7218_v58 = vld [vmem:[#allocation12 + $0xc8] sm:$0xf] }
 0x18d   : > { %12512 = vst [vmem:[#allocation298_spill] sm:$0xff] %v9893_v53  ;;  %v7508_v20 = vld [vmem:[#allocation12 + $0x328] sm:$0xf0]  ;;  %v7474_v42 = vld [vmem:[#allocation12 + $0x2c8] sm:$0xf]  ;;  %3276 = vmatmul.bf16.vlgmr.msra.gmra.mxu0 %v9904_v5  ;;  %3289 = vmatmul.bf16.vlgmr.msra.gmra.mxu1 %v9906_v21 }
 0x18e   : > { %12513 = vst [vmem:[#allocation299_spill] sm:$0xff] %v9897_v7  ;;  %3322 = vmatpush.bf16.msrb.mxu0 %v9893_v53  ;;  %3348 = vmatpush.bf16.msrb.mxu2 %v9899_v36  ;;  %v9918_v30 = vor.u32 %v7881_v28, %v7508_v20  ;;  %v7877_v10 = vld [vmem:[#allocation12 + $0x2e4] sm:$0xf0]  ;;  %v7809_v0 = vld [vmem:[#allocation12 + $0xcc] sm:$0xf] }
 0x18f   : > { %12514 = vst [vmem:[#allocation300_spill] sm:$0xff] %v9899_v36  ;;  %v7220_v53 = vld [vmem:[#allocation12 + $0xe8] sm:$0xf0]  ;;  %3302 = vmatmul.bf16.vlgmr.msra.gmra.mxu2 %v9904_v5  ;;  %3315 = vmatmul.bf16.vlgmr.msra.gmra.mxu3 %v9906_v21  ;;  %v9931_v28 = vor.u32 %v7877_v10, %v7474_v42  ;;  %v7186_v14 = vld [vmem:[#allocation12 + $0x88] sm:$0xf] }
 0x190   : > { %3538 = vst [vmem:[#allocation2] sm:$0xff] %v1765_v40  ;;  %3335 = vmatpush.bf16.msrb.mxu1 %v9897_v7  ;;  %v7813_v40 = vld [vmem:[#allocation12 + $0xe4] sm:$0xf0]  ;;  %3361 = vmatpush.bf16.msrb.mxu3 %v9902_v52  ;;  %v9921_v7 = vadd.f32 %v2435_v46, %v2422_v41  ;;  %v7873_v57 = vld [vmem:[#allocation12 + $0x2cc] sm:$0xf]  ;;  %v9933_v20 = vor.u32 %v7809_v0, %v7220_v53 }
 0x191   : > { %12515 = vst [vmem:[#allocation301_spill] sm:$0xff] %v9902_v52  ;;  %v7476_v49 = vld [vmem:[#allocation12 + $0x2e8] sm:$0xf0]  ;;  %v9927_v9 = vor.u32 %v7813_v40, %v7218_v58  ;;  %v7805_v41 = vld [vmem:[#allocation12 + $0xa4] sm:$0xf0]  ;;  %v2448_v52 = vpop.f32.mrf.mxu2  ;;  %v2461_v40 = vpop.f32.mrf.mxu3 }
 0x192   : > { %12516 = vst [vmem:[#allocation302_spill] sm:$0xff] %v9909_v32  ;;  %3323 = vmatpush.bf16.msrb.mxu0 %v9909_v32  ;;  %3349 = vmatpush.bf16.msrb.mxu2 %v9915_v12  ;;  %v7442_v46 = vld [vmem:[#allocation12 + $0x288] sm:$0xf]  ;;  %v9936_v36 = vor.u32 %v7873_v57, %v7476_v49  ;;  %v7801_v11 = vld [vmem:[#allocation12 + $0x8c] sm:$0xf]  ;;  %v9938_v63 = vadd.f32 %v2461_v40, %v2448_v52  ;;  %v2424_v53 = vpop.f32.mrf.mxu0 }
 0x193   : > { %12517 = vst [vmem:[#allocation303_spill] sm:$0xff] %v9913_v23  ;;  %v7869_v32 = vld [vmem:[#allocation12 + $0x2a4] sm:$0xf0]  ;;  %v7188_v58 = vld [vmem:[#allocation12 + $0xa8] sm:$0xf0]  ;;  %v9941_v42 = vor.u32 %v7805_v41, %v7186_v14 }
 0x194   : > { %12518 = vst [vmem:[#allocation304_spill] sm:$0xff] %v9915_v12  ;;  %3336 = vmatpush.bf16.msrb.mxu1 %v9913_v23  ;;  %3362 = vmatpush.bf16.msrb.mxu3 %v9918_v30  ;;  %v7865_v34 = vld [vmem:[#allocation12 + $0x28c] sm:$0xf]  ;;  %v9945_v10 = vor.u32 %v7869_v32, %v7442_v46  ;;  %v9947_v0 = vor.u32 %v7801_v11, %v7188_v58  ;;  %v7154_v57 = vld [vmem:[#allocation12 + $0x48] sm:$0xf]  ;;  %v2437_v12 = vpop.f32.mrf.mxu1 }
 0x195   : > { %12519 = vst [vmem:[#allocation305_spill] sm:$0xff] %v9918_v30  ;;  %v7444_v23 = vld [vmem:[#allocation12 + $0x2a8] sm:$0xf0]  ;;  %v7797_v49 = vld [vmem:[#allocation12 + $0x64] sm:$0xf0] }
 0x196   : > { %12520 = vst [vmem:[#allocation306_spill] sm:$0xff] %v9927_v9  ;;  %3324 = vmatpush.bf16.msrb.mxu0 %v9927_v9  ;;  %3350 = vmatpush.bf16.msrb.mxu2 %v9933_v20  ;;  %v7410_v30 = vld [vmem:[#allocation12 + $0x248] sm:$0xf]  ;;  %v9950_v52 = vor.u32 %v7865_v34, %v7444_v23  ;;  %v7793_v14 = vld [vmem:[#allocation12 + $0x4c] sm:$0xf] }
 0x197   : > { %12521 = vst [vmem:[#allocation307_spill] sm:$0xff] %v9931_v28  ;;  %v7861_v40 = vld [vmem:[#allocation12 + $0x264] sm:$0xf0]  ;;  %v7156_v41 = vld [vmem:[#allocation12 + $0x68] sm:$0xf0] }
 0x198   : > { %12522 = vst [vmem:[#allocation308_spill] sm:$0xff] %v9933_v20  ;;  %3337 = vmatpush.bf16.msrb.mxu1 %v9931_v28  ;;  %3363 = vmatpush.bf16.msrb.mxu3 %v9936_v36  ;;  %v7857_v53 = vld [vmem:[#allocation12 + $0x24c] sm:$0xf]  ;;  %v9953_v20 = vor.u32 %v7797_v49, %v7154_v57  ;;  %v7122_v32 = vld [vmem:[#allocation12 + $0x8] sm:$0xf]  ;;  %v9957_v12 = vor.u32 %v7861_v40, %v7410_v30 }
 0x199   : > { %12523 = vst [vmem:[#allocation309_spill] sm:$0xff] %v9936_v36  ;;  %v7412_v9 = vld [vmem:[#allocation12 + $0x268] sm:$0xf0]  ;;  %v7789_v11 = vld [vmem:[#allocation12 + $0x24] sm:$0xf0]  ;;  %v9959_v46 = vor.u32 %v7793_v14, %v7156_v41  ;;  %v2450_v36 = vpop.f32.mrf.mxu2  ;;  %v2463_v6 = vpop.f32.mrf.mxu3 }
 0x19a   : > { %12524 = vst [vmem:[#allocation310_spill] sm:$0xff] %v9941_v42  ;;  %3325 = vmatpush.bf16.msrb.mxu0 %v9941_v42  ;;  %3351 = vmatpush.bf16.msrb.mxu2 %v9947_v0  ;;  %v7378_v34 = vld [vmem:[#allocation12 + $0x208] sm:$0xf]  ;;  %v7785_v58 = vld [vmem:[#allocation12 + $0xc] sm:$0xf]  ;;  %v9962_v28 = vor.u32 %v7857_v53, %v7412_v9  ;;  %v9965_v30 = vor.u32 %v7789_v11, %v7122_v32 }
 0x19b   : > { %12525 = vst [vmem:[#allocation311_spill] sm:$0xff] %v9945_v10  ;;  %v7853_v23 = vld [vmem:[#allocation12 + $0x224] sm:$0xf0]  ;;  %v7124_v57 = vld [vmem:[#allocation12 + $0x28] sm:$0xf0] }
 0x19c   : > { %12526 = vst [vmem:[#allocation312_spill] sm:$0xff] %v9947_v0  ;;  %3338 = vmatpush.bf16.msrb.mxu1 %v9945_v10  ;;  %3364 = vmatpush.bf16.msrb.mxu3 %v9950_v52  ;;  %v7849_v49 = vld [vmem:[#allocation12 + $0x20c] sm:$0xf]  ;;  %v7354_v62 = vld [vmem:[#allocation12 + $0x1d0] sm:$0xf]  ;;  %v9969_v36 = vor.u32 %v7853_v23, %v7378_v34  ;;  %v9971_v9 = vor.u32 %v7785_v58, %v7124_v57 }
 0x19d   : > { %12527 = vst [vmem:[#allocation313_spill] sm:$0xff] %v9950_v52  ;;  %v7380_v42 = vld [vmem:[#allocation12 + $0x228] sm:$0xf0]  ;;  %v7846_v10 = vld [vmem:[#allocation12 + $0x1ec] sm:$0xf0] }
 0x19e   : > { %12528 = vst [vmem:[#allocation314_spill] sm:$0xff] %v9953_v20  ;;  %v7610_v50 = vld [vmem:[#allocation12 + $0x3d0] sm:$0xf]  ;;  %3326 = vmatpush.bf16.msrb.mxu0 %v9953_v20  ;;  %v7842_v14 = vld [vmem:[#allocation12 + $0x1d4] sm:$0xf]  ;;  %3352 = vmatpush.bf16.msrb.mxu2 %v9959_v46  ;;  %v9974_v52 = vor.u32 %v7849_v49, %v7380_v42  ;;  %v9976_v20 = vor.u32 %v7846_v10, %v7354_v62 }
 0x19f   : > { %12529 = vst [vmem:[#allocation315_spill] sm:$0xff] %v9957_v12  ;;  %v7910_v40 = vld [vmem:[#allocation12 + $0x3ec] sm:$0xf0]  ;;  %v7356_v41 = vld [vmem:[#allocation12 + $0x1f0] sm:$0xf0] }
 0x1a0   : > { %12530 = vst [vmem:[#allocation316_spill] sm:$0xff] %v9959_v46  ;;  %3339 = vmatpush.bf16.msrb.mxu1 %v9957_v12  ;;  %v7906_v53 = vld [vmem:[#allocation12 + $0x3d4] sm:$0xf]  ;;  %3365 = vmatpush.bf16.msrb.mxu3 %v9962_v28  ;;  %v9978_v32 = vor.u32 %v7910_v40, %v7610_v50  ;;  %v9980_v11 = vor.u32 %v7842_v14, %v7356_v41  ;;  %v7322_v0 = vld [vmem:[#allocation12 + $0x190] sm:$0xf] }
 0x1a1   : > { %12531 = vst [vmem:[#allocation317_spill] sm:$0xff] %v9962_v28  ;;  %v7612_v6 = vld [vmem:[#allocation12 + $0x3f0] sm:$0xf0]  ;;  %v7838_v12 = vld [vmem:[#allocation12 + $0x1ac] sm:$0xf0] }
 0x1a2   : > { %12532 = vst [vmem:[#allocation318_spill] sm:$0xff] %v9965_v30  ;;  %v7578_v59 = vld [vmem:[#allocation12 + $0x390] sm:$0xf]  ;;  %3327 = vmatpush.bf16.msrb.mxu0 %v9965_v30  ;;  %v9983_v34 = vor.u32 %v7906_v53, %v7612_v6  ;;  %v7834_v58 = vld [vmem:[#allocation12 + $0x194] sm:$0xf]  ;;  %3353 = vmatpush.bf16.msrb.mxu2 %v9971_v9  ;;  %v9989_v50 = vor.u32 %v7838_v12, %v7322_v0 }
 0x1a3   : > { %12533 = vst [vmem:[#allocation319_spill] sm:$0xff] %v9969_v36  ;;  %v7902_v23 = vld [vmem:[#allocation12 + $0x3ac] sm:$0xf0]  ;;  %v7324_v57 = vld [vmem:[#allocation12 + $0x1b0] sm:$0xf0] }
 0x1a4   : > { %12534 = vst [vmem:[#allocation320_spill] sm:$0xff] %v9971_v9  ;;  %3340 = vmatpush.bf16.msrb.mxu1 %v9969_v36  ;;  %v7898_v62 = vld [vmem:[#allocation12 + $0x394] sm:$0xf]  ;;  %3366 = vmatpush.bf16.msrb.mxu3 %v9974_v52  ;;  %v9993_v10 = vor.u32 %v7902_v23, %v7578_v59  ;;  %v9995_v49 = vor.u32 %v7834_v58, %v7324_v57  ;;  %v7290_v40 = vld [vmem:[#allocation12 + $0x150] sm:$0xf] }
 0x1a5   : > { %12535 = vst [vmem:[#allocation321_spill] sm:$0xff] %v9974_v52  ;;  %v7580_v42 = vld [vmem:[#allocation12 + $0x3b0] sm:$0xf0]  ;;  %v7830_v14 = vld [vmem:[#allocation12 + $0x16c] sm:$0xf0]  ;;  %3328 = vmatmul.bf16.vlgmr.msrb.gmra.mxu0 %v9904_v5  ;;  %3354 = vmatmul.bf16.vlgmr.msrb.gmra.mxu2 %v9904_v5 }
 0x1a6   : > { %12536 = vst [vmem:[#allocation322_spill] sm:$0xff] %v9976_v20  ;;  %3372 = vmatpush.bf16.msra.mxu0 %v9976_v20  ;;  %3398 = vmatpush.bf16.msra.mxu2 %v9980_v11  ;;  %v7546_v41 = vld [vmem:[#allocation12 + $0x350] sm:$0xf]  ;;  %v9999_v53 = vor.u32 %v7898_v62, %v7580_v42  ;;  %v7826_v0 = vld [vmem:[#allocation12 + $0x154] sm:$0xf]  ;;  %v10005_v58 = vor.u32 %v7830_v14, %v7290_v40 }
 0x1a7   : > { %12537 = vst [vmem:[#allocation323_spill] sm:$0xff] %v9978_v32  ;;  %v7894_v6 = vld [vmem:[#allocation12 + $0x36c] sm:$0xf0]  ;;  %v7292_v12 = vld [vmem:[#allocation12 + $0x170] sm:$0xf0]  ;;  %3341 = vmatmul.bf16.vlgmr.msrb.gmra.mxu1 %v9906_v21  ;;  %3367 = vmatmul.bf16.vlgmr.msrb.gmra.mxu3 %v9906_v21 }
 0x1a8   : > { %12538 = vst [vmem:[#allocation324_spill] sm:$0xff] %v9980_v11  ;;  %3385 = vmatpush.bf16.msra.mxu1 %v9978_v32  ;;  %3411 = vmatpush.bf16.msra.mxu3 %v9983_v34  ;;  %v7890_v59 = vld [vmem:[#allocation12 + $0x354] sm:$0xf]  ;;  %v10009_v57 = vor.u32 %v7894_v6, %v7546_v41  ;;  %v10011_v62 = vor.u32 %v7826_v0, %v7292_v12  ;;  %v7258_v42 = vld [vmem:[#allocation12 + $0x110] sm:$0xf]  ;;  %v2474_v41 = vpop.f32.mrf.mxu0 }
 0x1a9   : > { %12539 = vst [vmem:[#allocation325_spill] sm:$0xff] %v9983_v34  ;;  %v7548_v23 = vld [vmem:[#allocation12 + $0x370] sm:$0xf0]  ;;  %v7822_v34 = vld [vmem:[#allocation12 + $0x12c] sm:$0xf0] }
 0x1aa   : > { %12540 = vst [vmem:[#allocation326_spill] sm:$0xff] %v9989_v50  ;;  %3373 = vmatpush.bf16.msra.mxu0 %v9989_v50  ;;  %3399 = vmatpush.bf16.msra.mxu2 %v9995_v49  ;;  %v7514_v11 = vld [vmem:[#allocation12 + $0x310] sm:$0xf]  ;;  %v10014_v32 = vor.u32 %v7890_v59, %v7548_v23  ;;  %v7818_v52 = vld [vmem:[#allocation12 + $0x114] sm:$0xf] }
 0x1ab   : > { %12541 = vst [vmem:[#allocation327_spill] sm:$0xff] %v9993_v10  ;;  %v7886_v20 = vld [vmem:[#allocation12 + $0x32c] sm:$0xf0]  ;;  %v7260_v50 = vld [vmem:[#allocation12 + $0x130] sm:$0xf0] }
 0x1ac   : > { %12542 = vst [vmem:[#allocation328_spill] sm:$0xff] %v9995_v49  ;;  %3386 = vmatpush.bf16.msra.mxu1 %v9993_v10  ;;  %3412 = vmatpush.bf16.msra.mxu3 %v9999_v53  ;;  %v7882_v40 = vld [vmem:[#allocation12 + $0x314] sm:$0xf]  ;;  %v10017_v10 = vor.u32 %v7822_v34, %v7258_v42  ;;  %v10021_v6 = vor.u32 %v7886_v20, %v7514_v11  ;;  %v7226_v12 = vld [vmem:[#allocation12 + $0xd0] sm:$0xf] }
 0x1ad   : > { %12543 = vst [vmem:[#allocation329_spill] sm:$0xff] %v9999_v53  ;;  %v7516_v14 = vld [vmem:[#allocation12 + $0x330] sm:$0xf0]  ;;  %v10023_v0 = vor.u32 %v7818_v52, %v7260_v50  ;;  %v7814_v59 = vld [vmem:[#allocation12 + $0xec] sm:$0xf0]  ;;  %v2487_v53 = vpop.f32.mrf.mxu1 }
 0x1ae   : > { %12544 = vst [vmem:[#allocation330_spill] sm:$0xff] %v10005_v58  ;;  %3374 = vmatpush.bf16.msra.mxu0 %v10005_v58  ;;  %3400 = vmatpush.bf16.msra.mxu2 %v10011_v62  ;;  %v7482_v23 = vld [vmem:[#allocation12 + $0x2d0] sm:$0xf]  ;;  %v10026_v49 = vor.u32 %v7882_v40, %v7516_v14  ;;  %v7810_v34 = vld [vmem:[#allocation12 + $0xd4] sm:$0xf]  ;;  %v10028_v9 = vadd.f32 %v2487_v53, %v2474_v41 }
 0x1af   : > { %12545 = vst [vmem:[#allocation331_spill] sm:$0xff] %v10009_v57  ;;  %v7878_v58 = vld [vmem:[#allocation12 + $0x2ec] sm:$0xf0]  ;;  %v7228_v42 = vld [vmem:[#allocation12 + $0xf0] sm:$0xf0]  ;;  %v10031_v20 = vor.u32 %v7814_v59, %v7226_v12  ;;  %v2513_v59 = vpop.f32.mrf.mxu3 }
 0x1b0   : > { %12546 = vst [vmem:[#allocation332_spill] sm:$0xff] %v10011_v62  ;;  %3387 = vmatpush.bf16.msra.mxu1 %v10009_v57  ;;  %3413 = vmatpush.bf16.msra.mxu3 %v10014_v32  ;;  %v7874_v57 = vld [vmem:[#allocation12 + $0x2d4] sm:$0xf]  ;;  %v10035_v52 = vor.u32 %v7878_v58, %v7482_v23  ;;  %v10037_v11 = vor.u32 %v7810_v34, %v7228_v42  ;;  %v7194_v50 = vld [vmem:[#allocation12 + $0x90] sm:$0xf]  ;;  %v2476_v23 = vpop.f32.mrf.mxu0 }
 0x1b1   : > { %12547 = vst [vmem:[#allocation333_spill] sm:$0xff] %v10014_v32  ;;  %v7484_v36 = vld [vmem:[#allocation12 + $0x2f0] sm:$0xf0]  ;;  %v7806_v40 = vld [vmem:[#allocation12 + $0xac] sm:$0xf0]  ;;  %v2500_v32 = vpop.f32.mrf.mxu2 }
 0x1b2   : > { %12548 = vst [vmem:[#allocation334_spill] sm:$0xff] %v10017_v10  ;;  %3375 = vmatpush.bf16.msra.mxu0 %v10017_v10  ;;  %3401 = vmatpush.bf16.msra.mxu2 %v10023_v0  ;;  %v7450_v14 = vld [vmem:[#allocation12 + $0x290] sm:$0xf]  ;;  %v10040_v53 = vor.u32 %v7874_v57, %v7484_v36  ;;  %v7802_v10 = vld [vmem:[#allocation12 + $0x94] sm:$0xf]  ;;  %v10042_v30 = vadd.f32 %v2513_v59, %v2500_v32 }
 0x1b3   : > { %12549 = vst [vmem:[#allocation335_spill] sm:$0xff] %v10021_v6  ;;  %v7870_v41 = vld [vmem:[#allocation12 + $0x2ac] sm:$0xf0]  ;;  %v7196_v12 = vld [vmem:[#allocation12 + $0xb0] sm:$0xf0]  ;;  %v10045_v58 = vor.u32 %v7806_v40, %v7194_v50 }
 0x1b4   : > { %12550 = vst [vmem:[#allocation336_spill] sm:$0xff] %v10023_v0  ;;  %3388 = vmatpush.bf16.msra.mxu1 %v10021_v6  ;;  %3414 = vmatpush.bf16.msra.mxu3 %v10026_v49  ;;  %v7866_v62 = vld [vmem:[#allocation12 + $0x294] sm:$0xf]  ;;  %v10049_v34 = vor.u32 %v7870_v41, %v7450_v14  ;;  %v10051_v36 = vor.u32 %v7802_v10, %v7196_v12  ;;  %v7162_v57 = vld [vmem:[#allocation12 + $0x50] sm:$0xf] }
 0x1b5   : > { %12551 = vst [vmem:[#allocation337_spill] sm:$0xff] %v10026_v49  ;;  %v7452_v6 = vld [vmem:[#allocation12 + $0x2b0] sm:$0xf0]  ;;  %v7798_v42 = vld [vmem:[#allocation12 + $0x6c] sm:$0xf0]  ;;  %v2489_v0 = vpop.f32.mrf.mxu1 }
 0x1b6   : > { %12552 = vst [vmem:[#allocation338_spill] sm:$0xff] %v10031_v20  ;;  %3376 = vmatpush.bf16.msra.mxu0 %v10031_v20  ;;  %3402 = vmatpush.bf16.msra.mxu2 %v10037_v11  ;;  %v7418_v49 = vld [vmem:[#allocation12 + $0x250] sm:$0xf]  ;;  %v10054_v32 = vor.u32 %v7866_v62, %v7452_v6  ;;  %v7794_v50 = vld [vmem:[#allocation12 + $0x54] sm:$0xf] }
 0x1b7   : > { %12553 = vst [vmem:[#allocation339_spill] sm:$0xff] %v10035_v52  ;;  %v7862_v59 = vld [vmem:[#allocation12 + $0x26c] sm:$0xf0]  ;;  %v7164_v40 = vld [vmem:[#allocation12 + $0x70] sm:$0xf0]  ;;  %v2515_v28 = vpop.f32.mrf.mxu3 }
 0x1b8   : > { %12554 = vst [vmem:[#allocation340_spill] sm:$0xff] %v10037_v11  ;;  %3389 = vmatpush.bf16.msra.mxu1 %v10035_v52  ;;  %3415 = vmatpush.bf16.msra.mxu3 %v10040_v53  ;;  %v7858_v23 = vld [vmem:[#allocation12 + $0x254] sm:$0xf]  ;;  %v10057_v11 = vor.u32 %v7798_v42, %v7162_v57  ;;  %v7130_v14 = vld [vmem:[#allocation12 + $0x10] sm:$0xf]  ;;  %v10061_v0 = vor.u32 %v7862_v59, %v7418_v49 }
 0x1b9   : > { %12555 = vst [vmem:[#allocation341_spill] sm:$0xff] %v10040_v53  ;;  %v7420_v20 = vld [vmem:[#allocation12 + $0x270] sm:$0xf0]  ;;  %v7790_v10 = vld [vmem:[#allocation12 + $0x2c] sm:$0xf0]  ;;  %v10063_v41 = vor.u32 %v7794_v50, %v7164_v40  ;;  %v2502_v53 = vpop.f32.mrf.mxu2 }
 0x1ba   : > { %12556 = vst [vmem:[#allocation342_spill] sm:$0xff] %v10045_v58  ;;  %3377 = vmatpush.bf16.msra.mxu0 %v10045_v58  ;;  %3403 = vmatpush.bf16.msra.mxu2 %v10051_v36  ;;  %v7386_v62 = vld [vmem:[#allocation12 + $0x210] sm:$0xf]  ;;  %v7786_v12 = vld [vmem:[#allocation12 + $0x14] sm:$0xf]  ;;  %v10066_v52 = vor.u32 %v7858_v23, %v7420_v20  ;;  %v10069_v49 = vor.u32 %v7790_v10, %v7130_v14 }
 0x1bb   : > { %12557 = vst [vmem:[#allocation343_spill] sm:$0xff] %v10049_v34  ;;  %v7854_v6 = vld [vmem:[#allocation12 + $0x22c] sm:$0xf0]  ;;  %v7132_v57 = vld [vmem:[#allocation12 + $0x30] sm:$0xf0] }
 0x1bc   : > { %12558 = vst [vmem:[#allocation344_spill] sm:$0xff] %v10051_v36  ;;  %3390 = vmatpush.bf16.msra.mxu1 %v10049_v34  ;;  %3416 = vmatpush.bf16.msra.mxu3 %v10054_v32  ;;  %v7850_v42 = vld [vmem:[#allocation12 + $0x214] sm:$0xf]  ;;  %v7362_v46 = vld [vmem:[#allocation12 + $0x1d8] sm:$0xf]  ;;  %v10073_v20 = vor.u32 %v7854_v6, %v7386_v62  ;;  %v10075_v53 = vor.u32 %v7786_v12, %v7132_v57 }
 0x1bd   : > { %12559 = vst [vmem:[#allocation345_spill] sm:$0xff] %v10054_v32  ;;  %v7388_v58 = vld [vmem:[#allocation12 + $0x230] sm:$0xf0]  ;;  %v7847_v34 = vld [vmem:[#allocation12 + $0x1f4] sm:$0xf0] }
 0x1be   : > { %12560 = vst [vmem:[#allocation346_spill] sm:$0xff] %v10057_v11  ;;  %v7618_v1 = vld [vmem:[#allocation12 + $0x3d8] sm:$0xf]  ;;  %3378 = vmatpush.bf16.msra.mxu0 %v10057_v11  ;;  %v7843_v50 = vld [vmem:[#allocation12 + $0x1dc] sm:$0xf]  ;;  %3404 = vmatpush.bf16.msra.mxu2 %v10063_v41  ;;  %v10078_v32 = vor.u32 %v7850_v42, %v7388_v58  ;;  %v10080_v11 = vor.u32 %v7847_v34, %v7362_v46 }
 0x1bf   : > { %12561 = vst [vmem:[#allocation347_spill] sm:$0xff] %v10061_v0  ;;  %v7911_v59 = vld [vmem:[#allocation12 + $0x3f4] sm:$0xf0]  ;;  %v7364_v40 = vld [vmem:[#allocation12 + $0x1f8] sm:$0xf0] }
 0x1c0   : > { %12562 = vst [vmem:[#allocation348_spill] sm:$0xff] %v10063_v41  ;;  %3391 = vmatpush.bf16.msra.mxu1 %v10061_v0  ;;  %v7907_v23 = vld [vmem:[#allocation12 + $0x3dc] sm:$0xf]  ;;  %3417 = vmatpush.bf16.msra.mxu3 %v10066_v52  ;;  %v10082_v14 = vor.u32 %v7911_v59, %v7618_v1  ;;  %v10084_v10 = vor.u32 %v7843_v50, %v7364_v40  ;;  %v7330_v36 = vld [vmem:[#allocation12 + $0x198] sm:$0xf] }
 0x1c1   : > { %12563 = vst [vmem:[#allocation349_spill] sm:$0xff] %v10066_v52  ;;  %v7620_v28 = vld [vmem:[#allocation12 + $0x3f8] sm:$0xf0]  ;;  %v7839_v0 = vld [vmem:[#allocation12 + $0x1b4] sm:$0xf0] }
 0x1c2   : > { %12564 = vst [vmem:[#allocation350_spill] sm:$0xff] %v10069_v49  ;;  %v7586_v61 = vld [vmem:[#allocation12 + $0x398] sm:$0xf]  ;;  %3379 = vmatpush.bf16.msra.mxu0 %v10069_v49  ;;  %v10087_v62 = vor.u32 %v7907_v23, %v7620_v28  ;;  %v7835_v12 = vld [vmem:[#allocation12 + $0x19c] sm:$0xf]  ;;  %3405 = vmatpush.bf16.msra.mxu2 %v10075_v53  ;;  %v10093_v1 = vor.u32 %v7839_v0, %v7330_v36 }
 0x1c3   : > { %12565 = vst [vmem:[#allocation351_spill] sm:$0xff] %v10073_v20  ;;  %v7903_v6 = vld [vmem:[#allocation12 + $0x3b4] sm:$0xf0]  ;;  %v7332_v57 = vld [vmem:[#allocation12 + $0x1b8] sm:$0xf0] }
 0x1c4   : > { %12566 = vst [vmem:[#allocation352_spill] sm:$0xff] %v10075_v53  ;;  %3392 = vmatpush.bf16.msra.mxu1 %v10073_v20  ;;  %v7899_v46 = vld [vmem:[#allocation12 + $0x39c] sm:$0xf]  ;;  %3418 = vmatpush.bf16.msra.mxu3 %v10078_v32  ;;  %v10097_v34 = vor.u32 %v7903_v6, %v7586_v61  ;;  %v10099_v42 = vor.u32 %v7835_v12, %v7332_v57  ;;  %v7298_v59 = vld [vmem:[#allocation12 + $0x158] sm:$0xf] }
 0x1c5   : > { %12567 = vst [vmem:[#allocation353_spill] sm:$0xff] %v10078_v32  ;;  %v7588_v58 = vld [vmem:[#allocation12 + $0x3b8] sm:$0xf0]  ;;  %v7831_v50 = vld [vmem:[#allocation12 + $0x174] sm:$0xf0]  ;;  %3380 = vmatmul.bf16.vlgmr.msra.gmra.mxu0 %v9904_v5  ;;  %3406 = vmatmul.bf16.vlgmr.msra.gmra.mxu2 %v9904_v5 }
 0x1c6   : > { %12568 = vst [vmem:[#allocation354_spill] sm:$0xff] %v10080_v11  ;;  %3424 = vmatpush.bf16.msrb.mxu0 %v10080_v11  ;;  %3450 = vmatpush.bf16.msrb.mxu2 %v10084_v10  ;;  %v7554_v40 = vld [vmem:[#allocation12 + $0x358] sm:$0xf]  ;;  %v10103_v23 = vor.u32 %v7899_v46, %v7588_v58  ;;  %v7827_v36 = vld [vmem:[#allocation12 + $0x15c] sm:$0xf]  ;;  %v10109_v12 = vor.u32 %v7831_v50, %v7298_v59 }
 0x1c7   : > { %12569 = vst [vmem:[#allocation355_spill] sm:$0xff] %v10082_v14  ;;  %v7895_v28 = vld [vmem:[#allocation12 + $0x374] sm:$0xf0]  ;;  %v7300_v0 = vld [vmem:[#allocation12 + $0x178] sm:$0xf0]  ;;  %3393 = vmatmul.bf16.vlgmr.msra.gmra.mxu1 %v9906_v21  ;;  %3419 = vmatmul.bf16.vlgmr.msra.gmra.mxu3 %v9906_v21 }
 0x1c8   : > { %12570 = vst [vmem:[#allocation356_spill] sm:$0xff] %v10084_v10  ;;  %3437 = vmatpush.bf16.msrb.mxu1 %v10082_v14  ;;  %3463 = vmatpush.bf16.msrb.mxu3 %v10087_v62  ;;  %v7891_v61 = vld [vmem:[#allocation12 + $0x35c] sm:$0xf]  ;;  %v10113_v57 = vor.u32 %v7895_v28, %v7554_v40  ;;  %v10115_v46 = vor.u32 %v7827_v36, %v7300_v0  ;;  %v7266_v58 = vld [vmem:[#allocation12 + $0x118] sm:$0xf]  ;;  %v2526_v40 = vpop.f32.mrf.mxu0 }
 0x1c9   : > { %12571 = vst [vmem:[#allocation357_spill] sm:$0xff] %v10087_v62  ;;  %v7556_v6 = vld [vmem:[#allocation12 + $0x378] sm:$0xf0]  ;;  %v7823_v62 = vld [vmem:[#allocation12 + $0x134] sm:$0xf0] }
 0x1ca   : > { %12572 = vst [vmem:[#allocation358_spill] sm:$0xff] %v10093_v1  ;;  %3425 = vmatpush.bf16.msrb.mxu0 %v10093_v1  ;;  %3451 = vmatpush.bf16.msrb.mxu2 %v10099_v42  ;;  %v7522_v10 = vld [vmem:[#allocation12 + $0x318] sm:$0xf]  ;;  %v10118_v14 = vor.u32 %v7891_v61, %v7556_v6  ;;  %v7819_v32 = vld [vmem:[#allocation12 + $0x11c] sm:$0xf] }
 0x1cb   : > { %12573 = vst [vmem:[#allocation359_spill] sm:$0xff] %v10097_v34  ;;  %v7887_v11 = vld [vmem:[#allocation12 + $0x334] sm:$0xf0]  ;;  %v7268_v1 = vld [vmem:[#allocation12 + $0x138] sm:$0xf0] }
 0x1cc   : > { %12574 = vst [vmem:[#allocation360_spill] sm:$0xff] %v10099_v42  ;;  %3438 = vmatpush.bf16.msrb.mxu1 %v10097_v34  ;;  %3464 = vmatpush.bf16.msrb.mxu3 %v10103_v23  ;;  %v7883_v59 = vld [vmem:[#allocation12 + $0x31c] sm:$0xf]  ;;  %v10121_v34 = vor.u32 %v7823_v62, %v7266_v58  ;;  %v10125_v28 = vor.u32 %v7887_v11, %v7522_v10  ;;  %v7234_v0 = vld [vmem:[#allocation12 + $0xd8] sm:$0xf] }
 0x1cd   : > { %12575 = vst [vmem:[#allocation361_spill] sm:$0xff] %v10103_v23  ;;  %v7524_v50 = vld [vmem:[#allocation12 + $0x338] sm:$0xf0]  ;;  %v10127_v36 = vor.u32 %v7819_v32, %v7268_v1  ;;  %v7815_v61 = vld [vmem:[#allocation12 + $0xf4] sm:$0xf0]  ;;  %v2539_v23 = vpop.f32.mrf.mxu1 }
 0x1ce   : > { %12576 = vst [vmem:[#allocation362_spill] sm:$0xff] %v10109_v12  ;;  %3426 = vmatpush.bf16.msrb.mxu0 %v10109_v12  ;;  %3452 = vmatpush.bf16.msrb.mxu2 %v10115_v46  ;;  %v7490_v6 = vld [vmem:[#allocation12 + $0x2d8] sm:$0xf]  ;;  %v10130_v42 = vor.u32 %v7883_v59, %v7524_v50  ;;  %v7811_v62 = vld [vmem:[#allocation12 + $0xdc] sm:$0xf]  ;;  %v10132_v53 = vadd.f32 %v2539_v23, %v2526_v40 }
 0x1cf   : > { %12577 = vst [vmem:[#allocation363_spill] sm:$0xff] %v10113_v57  ;;  %v7879_v12 = vld [vmem:[#allocation12 + $0x2f4] sm:$0xf0]  ;;  %v7236_v58 = vld [vmem:[#allocation12 + $0xf8] sm:$0xf0]  ;;  %v10135_v11 = vor.u32 %v7815_v61, %v7234_v0  ;;  %v2565_v61 = vpop.f32.mrf.mxu3 }
 0x1d0   : > { %12578 = vst [vmem:[#allocation364_spill] sm:$0xff] %v10115_v46  ;;  %3439 = vmatpush.bf16.msrb.mxu1 %v10113_v57  ;;  %3465 = vmatpush.bf16.msrb.mxu3 %v10118_v14  ;;  %v7875_v57 = vld [vmem:[#allocation12 + $0x2dc] sm:$0xf]  ;;  %v10139_v32 = vor.u32 %v7879_v12, %v7490_v6  ;;  %v10141_v10 = vor.u32 %v7811_v62, %v7236_v58  ;;  %v7202_v1 = vld [vmem:[#allocation12 + $0x98] sm:$0xf]  ;;  %v2528_v6 = vpop.f32.mrf.mxu0 }
 0x1d1   : > { %12579 = vst [vmem:[#allocation365_spill] sm:$0xff] %v10118_v14  ;;  %v7492_v20 = vld [vmem:[#allocation12 + $0x2f8] sm:$0xf0]  ;;  %v7807_v59 = vld [vmem:[#allocation12 + $0xb4] sm:$0xf0]  ;;  %v2552_v14 = vpop.f32.mrf.mxu2 }
 0x1d2   : > { %12580 = vst [vmem:[#allocation366_spill] sm:$0xff] %v10121_v34  ;;  %3427 = vmatpush.bf16.msrb.mxu0 %v10121_v34  ;;  %3453 = vmatpush.bf16.msrb.mxu2 %v10127_v36  ;;  %v7458_v50 = vld [vmem:[#allocation12 + $0x298] sm:$0xf]  ;;  %v10144_v23 = vor.u32 %v7875_v57, %v7492_v20  ;;  %v7803_v34 = vld [vmem:[#allocation12 + $0x9c] sm:$0xf]  ;;  %v10146_v49 = vadd.f32 %v2565_v61, %v2552_v14 }
 0x1d3   : > { %12581 = vst [vmem:[#allocation367_spill] sm:$0xff] %v10125_v28  ;;  %v7871_v40 = vld [vmem:[#allocation12 + $0x2b4] sm:$0xf0]  ;;  %v7204_v0 = vld [vmem:[#allocation12 + $0xb8] sm:$0xf0]  ;;  %v10149_v12 = vor.u32 %v7807_v59, %v7202_v1 }
 0x1d4   : > { %12582 = vst [vmem:[#allocation368_spill] sm:$0xff] %v10127_v36  ;;  %3440 = vmatpush.bf16.msrb.mxu1 %v10125_v28  ;;  %3466 = vmatpush.bf16.msrb.mxu3 %v10130_v42  ;;  %v7867_v46 = vld [vmem:[#allocation12 + $0x29c] sm:$0xf]  ;;  %v10153_v62 = vor.u32 %v7871_v40, %v7458_v50  ;;  %v10155_v20 = vor.u32 %v7803_v34, %v7204_v0  ;;  %v7170_v57 = vld [vmem:[#allocation12 + $0x58] sm:$0xf] }
 0x1d5   : > { %12583 = vst [vmem:[#allocation369_spill] sm:$0xff] %v10130_v42  ;;  %v7460_v28 = vld [vmem:[#allocation12 + $0x2b8] sm:$0xf0]  ;;  %v7799_v58 = vld [vmem:[#allocation12 + $0x74] sm:$0xf0]  ;;  %v2541_v36 = vpop.f32.mrf.mxu1 }
 0x1d6   : > { %12584 = vst [vmem:[#allocation370_spill] sm:$0xff] %v10135_v11  ;;  %3428 = vmatpush.bf16.msrb.mxu0 %v10135_v11  ;;  %3454 = vmatpush.bf16.msrb.mxu2 %v10141_v10  ;;  %v7426_v42 = vld [vmem:[#allocation12 + $0x258] sm:$0xf]  ;;  %v10158_v14 = vor.u32 %v7867_v46, %v7460_v28  ;;  %v7795_v1 = vld [vmem:[#allocation12 + $0x5c] sm:$0xf] }
 0x1d7   : > { %12585 = vst [vmem:[#allocation371_spill] sm:$0xff] %v10139_v32  ;;  %v7863_v61 = vld [vmem:[#allocation12 + $0x274] sm:$0xf0]  ;;  %v7172_v59 = vld [vmem:[#allocation12 + $0x78] sm:$0xf0] }
 0x1d8   : > { %12586 = vst [vmem:[#allocation372_spill] sm:$0xff] %v10141_v10  ;;  %3441 = vmatpush.bf16.msrb.mxu1 %v10139_v32  ;;  %3467 = vmatpush.bf16.msrb.mxu3 %v10144_v23  ;;  %v7859_v6 = vld [vmem:[#allocation12 + $0x25c] sm:$0xf]  ;;  %v10161_v10 = vor.u32 %v7799_v58, %v7170_v57  ;;  %v10165_v34 = vor.u32 %v7863_v61, %v7426_v42  ;;  %v7138_v50 = vld [vmem:[#allocation12 + $0x18] sm:$0xf]  ;;  %v2567_v58 = vpop.f32.mrf.mxu3 }
 0x1d9   : > { %12587 = vst [vmem:[#allocation373_spill] sm:$0xff] %v10144_v23  ;;  %v7428_v11 = vld [vmem:[#allocation12 + $0x278] sm:$0xf0]  ;;  %v10167_v36 = vor.u32 %v7795_v1, %v7172_v59  ;;  %v7791_v46 = vld [vmem:[#allocation12 + $0x34] sm:$0xf0]  ;;  %v2554_v40 = vpop.f32.mrf.mxu2 }
 0x1da   : > { %12588 = vst [vmem:[#allocation374_spill] sm:$0xff] %v10149_v12  ;;  %3429 = vmatpush.bf16.msrb.mxu0 %v10149_v12  ;;  %3455 = vmatpush.bf16.msrb.mxu2 %v10155_v20  ;;  %v7394_v28 = vld [vmem:[#allocation12 + $0x218] sm:$0xf]  ;;  %v10170_v0 = vor.u32 %v7859_v6, %v7428_v11  ;;  %v7787_v12 = vld [vmem:[#allocation12 + $0x1c] sm:$0xf]  ;;  %v10173_v42 = vor.u32 %v7791_v46, %v7138_v50 }
 0x1db   : > { %12589 = vst [vmem:[#allocation375_spill] sm:$0xff] %v10153_v62  ;;  %v7855_v23 = vld [vmem:[#allocation12 + $0x234] sm:$0xf0]  ;;  %v7140_v57 = vld [vmem:[#allocation12 + $0x38] sm:$0xf0] }
 0x1dc   : > { %12590 = vst [vmem:[#allocation376_spill] sm:$0xff] %v10155_v20  ;;  %3442 = vmatpush.bf16.msrb.mxu1 %v10153_v62  ;;  %3468 = vmatpush.bf16.msrb.mxu3 %v10158_v14  ;;  %v7851_v32 = vld [vmem:[#allocation12 + $0x21c] sm:$0xf]  ;;  %v10177_v61 = vor.u32 %v7855_v23, %v7394_v28  ;;  %v10179_v1 = vor.u32 %v7787_v12, %v7140_v57 }
 0x1dd   : > { %12591 = vst [vmem:[#allocation377_spill] sm:$0xff] %v10158_v14  ;;  %v7396_v62 = vld [vmem:[#allocation12 + $0x238] sm:$0xf0] }
 0x1de   : > { %12592 = vst [vmem:[#allocation378_spill] sm:$0xff] %v10161_v10  ;;  %3430 = vmatpush.bf16.msrb.mxu0 %v10161_v10  ;;  %3456 = vmatpush.bf16.msrb.mxu2 %v10167_v36  ;;  %v10182_v11 = vor.u32 %v7851_v32, %v7396_v62 }
 0x1df   : > { %12593 = vst [vmem:[#allocation379_spill] sm:$0xff] %v10165_v34 }
 0x1e0   : > { %12594 = vst [vmem:[#allocation380_spill] sm:$0xff] %v10167_v36  ;;  %3443 = vmatpush.bf16.msrb.mxu1 %v10165_v34  ;;  %3469 = vmatpush.bf16.msrb.mxu3 %v10170_v0 }
 0x1e1   : > { %12595 = vst [vmem:[#allocation381_spill] sm:$0xff] %v10170_v0 }
 0x1e2   : > { %12596 = vst [vmem:[#allocation382_spill] sm:$0xff] %v10173_v42  ;;  %3431 = vmatpush.bf16.msrb.mxu0 %v10173_v42  ;;  %3457 = vmatpush.bf16.msrb.mxu2 %v10179_v1  ;;  %v2578_v23 = vpop.f32.mrf.mxu0 }
 0x1e3   : > { %12597 = vst [vmem:[#allocation383_spill] sm:$0xff] %v10177_v61 }
 0x1e4   : > { %12598 = vst [vmem:[#allocation384_spill] sm:$0xff] %v10179_v1  ;;  %3444 = vmatpush.bf16.msrb.mxu1 %v10177_v61  ;;  %3470 = vmatpush.bf16.msrb.mxu3 %v10182_v11  ;;  %v2591_v32 = vpop.f32.mrf.mxu1 }
 0x1e5   : > { %12599 = vst [vmem:[#allocation385_spill] sm:$0xff] %v10182_v11  ;;  %3432 = vmatmul.bf16.vlgmr.msrb.gmra.mxu0 %v9904_v5  ;;  %3458 = vmatmul.bf16.vlgmr.msrb.gmra.mxu2 %v9904_v5  ;;  %v10192_v12 = vadd.f32 %v2591_v32, %v2578_v23 }
 0x1e7   : > { %3445 = vmatmul.bf16.vlgmr.msrb.gmra.mxu1 %v9906_v21  ;;  %3471 = vmatmul.bf16.vlgmr.msrb.gmra.mxu3 %v9906_v21 }
 0x1e8   : > { %v2604_v62 = vpop.f32.mrf.mxu2 }
 0x1ea   : > { %v2617_v59 = vpop.f32.mrf.mxu3  ;;  %v2580_v50 = vpop.f32.mrf.mxu0 }
 0x1eb   : > { %v10194_v6 = vadd.f32 %v2617_v59, %v2604_v62 }
 0x1ec   : > { %v2593_v46 = vpop.f32.mrf.mxu1 }
 0x1f0   : > { %v2606_v28 = vpop.f32.mrf.mxu2 }
 0x1f1   : > { %v10201_v28 = vld [vmem:[#allocation15] sm:$0xff] }
 0x1f2   : > { %v2619_v40 = vpop.f32.mrf.mxu3  ;;  %v10204_v34 = vperm.slane %v10201_v28, 2 }
 0x20a   : > { %v3277_v57 = vpop.f32.mrf.mxu0  ;;  %v3290_v58 = vpop.f32.mrf.mxu1 }
 0x20b   : > { %v3278_v46 = vadd.f32 %v3277_v57, %v9921_v7 }
 0x212   : > { %v3303_v11 = vpop.f32.mrf.mxu2  ;;  %v3316_v5 = vpop.f32.mrf.mxu3 }
 0x213   : > { %v3279_v1 = vpop.f32.mrf.mxu0  ;;  %v3292_v21 = vpop.f32.mrf.mxu1 }
 0x21a   : > { %v3305_v61 = vpop.f32.mrf.mxu2  ;;  %v3318_v42 = vpop.f32.mrf.mxu3 }
 0x21b   : > { %v3291_v61 = vadd.f32 %v3290_v58, %v3278_v46  ;;  %v10207_v42 = vperm.slane %v10201_v28, 0 }
 0x21d   : > { %12600 = vst [vmem:[#allocation386_spill] sm:$0xff] %v10207_v42  ;;  %v3493_v7 = vadd.f32 %v10207_v42, %v3291_v61 }
 0x21f   : > { %v3501_v58 = vmul.f32 0.5, %v3493_v7 }
 0x222   : > { %v3329_v23 = vpop.f32.mrf.mxu0 }
 0x223   : > { %v3330_v50 = vadd.f32 %v3329_v23, %v10028_v9  ;;  %v3304_v9 = vadd.f32 %v3303_v11, %v9938_v63  ;;  %v10214_v23 = vperm.slane %v10201_v28, 3 }
 0x224   : > { %v3342_v32 = vpop.f32.mrf.mxu1 }
 0x225   : > { %v3343_v40 = vadd.f32 %v3342_v32, %v3330_v50  ;;  %12601 = vst [vmem:[#allocation387_spill] sm:$0xff] %v10214_v23  ;;  %v10217_v50 = vperm.slane %v10201_v28, 1 }
 0x227   : > { %12602 = vst [vmem:[#allocation388_spill] sm:$0xff] %v10217_v50 }
 0x228   : > { %v3355_v0 = vpop.f32.mrf.mxu2 }
 0x229   : > { %v3356_v10 = vadd.f32 %v3355_v0, %v10042_v30 }
 0x22a   : > { %v3368_v36 = vpop.f32.mrf.mxu3  ;;  %v3331_v62 = vpop.f32.mrf.mxu0 }
 0x22b   : > { %v3495_v62 = vadd.f32 %v10204_v34, %v3343_v40  ;;  %v3369_v57 = vadd.f32 %v3368_v36, %v3356_v10  ;;  %v10223_v36 = vperm.slane %v10201_v28, 4 }
 0x22c   : > { %v3344_v59 = vpop.f32.mrf.mxu1 }
 0x22d   : > { %v3509_v32 = vmul.f32 0.5, %v3495_v62  ;;  %v3317_v59 = vadd.f32 %v3316_v5, %v3304_v9  ;;  %v3496_v46 = vadd.f32 %v10214_v23, %v3369_v57  ;;  %12603 = vst [vmem:[#allocation389_spill] sm:$0xff] %v10223_v36 }
 0x22f   : > { %8191 = vtanh.f32 %v3509_v32  ;;  %v3494_v30 = vadd.f32 %v10217_v50, %v3317_v59  ;;  %v3510_v0 = vmul.f32 0.5, %v3496_v46 }
 0x230   : > { %v3357_v1 = vpop.f32.mrf.mxu2  ;;  %8193 = vtanh.f32 %v3501_v58 }
 0x231   : > { %v3502_v40 = vmul.f32 0.5, %v3494_v30  ;;  %8195 = vtanh.f32 %v3510_v0  ;;  %v872_v0 = vld [vmem:[#allocation3] sm:$0xff] }
 0x232   : > { %v3370_v21 = vpop.f32.mrf.mxu3 }
 0x233   : > { %8197 = vtanh.f32 %v3502_v40 }
 0x235   : > { %v8192_v5 = vpop.eup %8191 }
 0x236   : > { %v8194_v21 = vpop.eup %8193  ;;  %v3513_v62 = vmul.f32 0.5, %v8192_v5 }
 0x237   : > { %v3505_v7 = vmul.f32 0.5, %v8194_v21  ;;  %v8196_v46 = vpop.eup %8195 }
 0x238   : > { %v3515_v30 = vadd.f32 0.5, %v3513_v62 }
 0x242   : > { %v3381_v63 = vpop.f32.mrf.mxu0 }
 0x243   : > { %v3382_v11 = vadd.f32 %v3381_v63, %v10132_v53  ;;  %v10228_v53 = vperm.slane %v10201_v28, 5 }
 0x244   : > { %v3394_v10 = vpop.f32.mrf.mxu1 }
 0x245   : > { %v3395_v1 = vadd.f32 %v3394_v10, %v3382_v11  ;;  %v8198_v11 = vpop.eup %8197  ;;  %v3507_v10 = vadd.f32 0.5, %v3505_v7 }
 0x247   : > { %v3497_v61 = vadd.f32 %v10223_v36, %v3395_v1  ;;  %v3514_v1 = vmul.f32 0.5, %v8196_v46 }
 0x248   : > { %v3407_v9 = vpop.f32.mrf.mxu2 }
 0x249   : > { %8199 = vtanh.f32 %v3497_v61  ;;  %v3408_v57 = vadd.f32 %v3407_v9, %v10146_v49  ;;  %v3527_v61 = vmul.f32 %v3515_v30, %v872_v0  ;;  %v3506_v49 = vmul.f32 0.5, %v8198_v11 }
 0x24a   : > { %v3420_v32 = vpop.f32.mrf.mxu3  ;;  %v3383_v59 = vpop.f32.mrf.mxu0  ;;  %v3516_v23 = vadd.f32 0.5, %v3514_v1  ;;  %v10233_v30 = vperm.slane %v10201_v28, 6 }
 0x24b   : > { %v3421_v63 = vadd.f32 %v3420_v32, %v3408_v57  ;;  %v873_v59 = vld [vmem:[#allocation3 + $0x18] sm:$0xff] }
 0x24c   : > { %v3396_v58 = vpop.f32.mrf.mxu1  ;;  %v3528_v57 = vmul.f32 %v3516_v23, %v873_v59  ;;  %v10238_v23 = vperm.slane %v10201_v28, 7 }
 0x24d   : > { %v3498_v40 = vadd.f32 %v10228_v53, %v3421_v63  ;;  %v3508_v58 = vadd.f32 0.5, %v3506_v49 }
 0x24f   : > { %v8200_v5 = vpop.eup %8199  ;;  %8201 = vtanh.f32 %v3498_v40 }
 0x250   : > { %v3529_v21 = vmul.f32 %v8200_v5, %v3507_v10  ;;  %v3409_v9 = vpop.f32.mrf.mxu2 }
 0x252   : > { %v3531_v36 = vadd.f32 %v3529_v21, %v3527_v61  ;;  %v3422_v50 = vpop.f32.mrf.mxu3 }
 0x254   : > { %3542 = vst [vmem:[#allocation3] sm:$0xff] %v3531_v36 }
 0x255   : > { %v8202_v62 = vpop.eup %8201 }
 0x256   : > { %v3530_v32 = vmul.f32 %v8202_v62, %v3508_v58 }
 0x258   : > { %v3532_v42 = vadd.f32 %v3530_v32, %v3528_v57 }
 0x25a   : > { %3543 = vst [vmem:[#allocation3 + $0x18] sm:$0xff] %v3532_v42 }
 0x262   : > { %v3433_v7 = vpop.f32.mrf.mxu0 }
 0x263   : > { %v3434_v63 = vadd.f32 %v3433_v7, %v10192_v12 }
 0x264   : > { %v3446_v46 = vpop.f32.mrf.mxu1 }
 0x265   : > { %v3447_v0 = vadd.f32 %v3446_v46, %v3434_v63 }
 0x267   : > { %v3499_v11 = vadd.f32 %v10233_v30, %v3447_v0 }
 0x268   : > { %v3459_v10 = vpop.f32.mrf.mxu2 }
 0x269   : > { %v3519_v50 = vmul.f32 0.5, %v3499_v11  ;;  %v3460_v40 = vadd.f32 %v3459_v10, %v10194_v6 }
 0x26a   : > { %v3472_v5 = vpop.f32.mrf.mxu3  ;;  %v3435_v1 = vpop.f32.mrf.mxu0 }
 0x26b   : > { %8203 = vtanh.f32 %v3519_v50  ;;  %v3473_v21 = vadd.f32 %v3472_v5, %v3460_v40 }
 0x26c   : > { %v3448_v61 = vpop.f32.mrf.mxu1  ;;  %8205 = vtanh.f32 %v3531_v36 }
 0x26d   : > { %v3500_v12 = vadd.f32 %v10238_v23, %v3473_v21 }
 0x26f   : > { %v3520_v49 = vmul.f32 0.5, %v3500_v12 }
 0x270   : > { %v3461_v59 = vpop.f32.mrf.mxu2 }
 0x271   : > { %v8204_v9 = vpop.eup %8203  ;;  %8207 = vtanh.f32 %v3520_v49 }
 0x272   : > { %v3523_v58 = vmul.f32 0.5, %v8204_v9  ;;  %v3474_v62 = vpop.f32.mrf.mxu3  ;;  %v8206_v6 = vpop.eup %8205  ;;  %8209 = vtanh.f32 %v3532_v42 }
 0x274   : > { %v3525_v57 = vadd.f32 0.5, %v3523_v58 }
 0x276   : > { %v3535_v32 = vmul.f32 %v8206_v6, %v3525_v57 }
 0x277   : > { %v8208_v28 = vpop.eup %8207 }
 0x278   : > { %v3524_v7 = vmul.f32 0.5, %v8208_v28  ;;  %v8210_v46 = vpop.eup %8209 }
 0x27a   : > { %v3526_v63 = vadd.f32 0.5, %v3524_v7 }
 0x27c   : > { %v3536_v0 = vmul.f32 %v8210_v46, %v3526_v63 }
 0x27d   : > { %3549 = sbr.rel (%p7625_p1) target bundleno = 650 (0x28a), region = 84 }
 0x27e   : > { %v3537_v11 = vpack.c.bf16 %v3536_v0, %v3535_v32 }
 0x280   : > { %3541 = vst [vmem:[#allocation2 + $0x8] sm:$0xff] %v3537_v11 }
 0x281   : > { %3544 = vst [vmem:[%s8912_s2] sm:$0xff] %v3537_v11 }
 0x282   : > { %3550 = vst [vmem:[#allocation17] sm:$0xff] %v9883_v47 }
 0x283   : > { %3551 = vst [vmem:[#allocation17 + $0x8] sm:$0xff] %v9885_v51 }
 0x284   : > { %3553 = vst [vmem:[#allocation17 + $0x10] sm:$0xff] %v3535_v32 }
 0x285   : > { %3554 = vst [vmem:[#allocation17 + $0x18] sm:$0xff] %v3536_v0 }
 0x286   : > { %3555 = vst [vmem:[#allocation19] sm:$0xff] %v9728_v29 }
 0x287   : > { %3556 = vst [vmem:[#allocation19 + $0x8] sm:$0xff] %v9758_v25 }
 0x288   : > { %3558 = vst [vmem:[#allocation19 + $0x10] sm:$0xff] %v3531_v36 }
 0x289   : > { %3559 = vst [vmem:[#allocation19 + $0x18] sm:$0xff] %v3532_v42 }
 0x28a PF: > { %3586 = vmatpush.bf16.msra.mxu0 %v8916_v13  ;;  %3599 = vmatpush.bf16.msra.mxu1 %v8918_v17  ;;  %v3573_v29 = vld [vmem:[#allocation2] sm:$0xff]  ;;  %v12604_v51 = vld [vmem:[#allocation30_spill] sm:$0xff]  ;;  %v12606_v10 = vld [vmem:[#allocation32_spill] sm:$0xff]  ;;  %s4314_s29 = sadd.s32 1, %s10197_s17 }
 0x28b   : > { %3612 = vmatpush.bf16.msra.mxu2 %v8920_v18  ;;  %3625 = vmatpush.bf16.msra.mxu3 %v8923_v22  ;;  %v3580_v25 = vunpack.c.l.b16 %v3573_v29  ;;  %v3581_v47 = vunpack.c.h.b16 %v3573_v29  ;;  %v12605_v42 = vld [vmem:[#allocation31_spill] sm:$0xff]  ;;  %v12607_v40 = vld [vmem:[#allocation33_spill] sm:$0xff]  ;;  %v12608_v5 = vld [vmem:[#allocation34_spill] sm:$0xff]  ;;  %p7631_p4 = scmp.ne.s32.totalorder %s4314_s29, 9 }
 0x28c   : > { %v12609_v1 = vld [vmem:[#allocation35_spill] sm:$0xff]  ;;  %v12610_v61 = vld [vmem:[#allocation36_spill] sm:$0xff]  ;;  %v12611_v21 = vld [vmem:[#allocation37_spill] sm:$0xff] }
 0x28d   : > { %v10277_v36 = vpack.c.b16 %v3580_v25, %v3580_v25  ;;  %v10279_v50 = vpack.c.b16 %v3581_v47, %v3581_v47  ;;  %v12612_v12 = vld [vmem:[#allocation38_spill] sm:$0xff]  ;;  %v12613_v49 = vld [vmem:[#allocation39_spill] sm:$0xff]  ;;  %v12614_v9 = vld [vmem:[#allocation40_spill] sm:$0xff] }
 0x28e   : > { %3587 = vmatpush.bf16.msra.mxu0 %v8927_v26  ;;  %3600 = vmatpush.bf16.msra.mxu1 %v8929_v27  ;;  %v12615_v59 = vld [vmem:[#allocation41_spill] sm:$0xff]  ;;  %v12616_v58 = vld [vmem:[#allocation42_spill] sm:$0xff]  ;;  %v12617_v62 = vld [vmem:[#allocation43_spill] sm:$0xff] }
 0x28f   : > { %3613 = vmatpush.bf16.msra.mxu2 %v8932_v31  ;;  %3626 = vmatpush.bf16.msra.mxu3 %v8934_v35  ;;  %v12618_v57 = vld [vmem:[#allocation44_spill] sm:$0xff]  ;;  %v12619_v6 = vld [vmem:[#allocation45_spill] sm:$0xff]  ;;  %v12620_v32 = vld [vmem:[#allocation46_spill] sm:$0xff] }
 0x290   : > { %v12621_v28 = vld [vmem:[#allocation47_spill] sm:$0xff]  ;;  %v12622_v7 = vld [vmem:[#allocation48_spill] sm:$0xff]  ;;  %v12623_v63 = vld [vmem:[#allocation49_spill] sm:$0xff] }
 0x291   : > { %v12624_v46 = vld [vmem:[#allocation50_spill] sm:$0xff]  ;;  %v12625_v0 = vld [vmem:[#allocation51_spill] sm:$0xff]  ;;  %v12626_v11 = vld [vmem:[#allocation52_spill] sm:$0xff] }
 0x292   : > { %3588 = vmatpush.bf16.msra.mxu0 %v8937_v39  ;;  %3601 = vmatpush.bf16.msra.mxu1 %v8941_v43  ;;  %v12627_v29 = vld [vmem:[#allocation53_spill] sm:$0xff]  ;;  %v12628_v25 = vld [vmem:[#allocation54_spill] sm:$0xff]  ;;  %v12629_v47 = vld [vmem:[#allocation55_spill] sm:$0xff] }
 0x293   : > { %3614 = vmatpush.bf16.msra.mxu2 %v8943_v44  ;;  %3627 = vmatpush.bf16.msra.mxu3 %v8946_v48 }
 0x296   : > { %3589 = vmatpush.bf16.msra.mxu0 %v8949_v54  ;;  %3602 = vmatpush.bf16.msra.mxu1 %v8953_v55 }
 0x297   : > { %3615 = vmatpush.bf16.msra.mxu2 %v8955_v56  ;;  %3628 = vmatpush.bf16.msra.mxu3 %v8958_v60 }
 0x29a   : > { %3590 = vmatpush.bf16.msra.mxu0 %v8961_v2  ;;  %3603 = vmatpush.bf16.msra.mxu1 %v8965_v3 }
 0x29b   : > { %3616 = vmatpush.bf16.msra.mxu2 %v8967_v4  ;;  %3629 = vmatpush.bf16.msra.mxu3 %v8970_v8 }
 0x29e   : > { %3591 = vmatpush.bf16.msra.mxu0 %v8973_v15  ;;  %3604 = vmatpush.bf16.msra.mxu1 %v8977_v16 }
 0x29f   : > { %3617 = vmatpush.bf16.msra.mxu2 %v8979_v19  ;;  %3630 = vmatpush.bf16.msra.mxu3 %v8982_v24 }
 0x2a2   : > { %3592 = vmatpush.bf16.msra.mxu0 %v8985_v33  ;;  %3605 = vmatpush.bf16.msra.mxu1 %v8989_v37  ;;  %v12957_v33 = vld [vmem:[#allocation387_spill] sm:$0xff] }
 0x2a3   : > { %3618 = vmatpush.bf16.msra.mxu2 %v8991_v38  ;;  %3631 = vmatpush.bf16.msra.mxu3 %v8994_v45 }
 0x2a6   : > { %3593 = vmatpush.bf16.msra.mxu0 %v12604_v51  ;;  %3606 = vmatpush.bf16.msra.mxu1 %v12605_v42  ;;  %v12630_v51 = vld [vmem:[#allocation56_spill] sm:$0xff]  ;;  %v12631_v42 = vld [vmem:[#allocation57_spill] sm:$0xff] }
 0x2a7   : > { %3619 = vmatpush.bf16.msra.mxu2 %v12606_v10  ;;  %3632 = vmatpush.bf16.msra.mxu3 %v12607_v40  ;;  %v12632_v10 = vld [vmem:[#allocation58_spill] sm:$0xff]  ;;  %v12633_v40 = vld [vmem:[#allocation59_spill] sm:$0xff] }
 0x2a9   : > { %3594 = vmatmul.bf16.vlgmr.msra.gmra.mxu0 %v10277_v36  ;;  %3607 = vmatmul.bf16.vlgmr.msra.gmra.mxu1 %v10279_v50 }
 0x2aa   : > { %3638 = vmatpush.bf16.msrb.mxu0 %v12608_v5  ;;  %3651 = vmatpush.bf16.msrb.mxu1 %v12609_v1  ;;  %v12634_v5 = vld [vmem:[#allocation60_spill] sm:$0xff]  ;;  %v12635_v1 = vld [vmem:[#allocation61_spill] sm:$0xff] }
 0x2ab   : > { %3664 = vmatpush.bf16.msrb.mxu2 %v12610_v61  ;;  %3677 = vmatpush.bf16.msrb.mxu3 %v12611_v21  ;;  %v12636_v61 = vld [vmem:[#allocation62_spill] sm:$0xff]  ;;  %v12637_v21 = vld [vmem:[#allocation63_spill] sm:$0xff] }
 0x2ac   : > { %3620 = vmatmul.bf16.vlgmr.msra.gmra.mxu2 %v10277_v36  ;;  %3633 = vmatmul.bf16.vlgmr.msra.gmra.mxu3 %v10279_v50 }
 0x2ae   : > { %3639 = vmatpush.bf16.msrb.mxu0 %v12612_v12  ;;  %3652 = vmatpush.bf16.msrb.mxu1 %v12613_v49  ;;  %v12638_v12 = vld [vmem:[#allocation64_spill] sm:$0xff]  ;;  %v12639_v49 = vld [vmem:[#allocation65_spill] sm:$0xff] }
 0x2af   : > { %3665 = vmatpush.bf16.msrb.mxu2 %v12614_v9  ;;  %3678 = vmatpush.bf16.msrb.mxu3 %v12615_v59  ;;  %v12640_v9 = vld [vmem:[#allocation66_spill] sm:$0xff]  ;;  %v12641_v59 = vld [vmem:[#allocation67_spill] sm:$0xff] }
 0x2b2   : > { %3640 = vmatpush.bf16.msrb.mxu0 %v12616_v58  ;;  %3653 = vmatpush.bf16.msrb.mxu1 %v12617_v62  ;;  %v12642_v58 = vld [vmem:[#allocation68_spill] sm:$0xff]  ;;  %v12643_v62 = vld [vmem:[#allocation69_spill] sm:$0xff] }
 0x2b3   : > { %3666 = vmatpush.bf16.msrb.mxu2 %v12618_v57  ;;  %3679 = vmatpush.bf16.msrb.mxu3 %v12619_v6  ;;  %v12644_v57 = vld [vmem:[#allocation70_spill] sm:$0xff]  ;;  %v12645_v6 = vld [vmem:[#allocation71_spill] sm:$0xff] }
 0x2b6   : > { %3641 = vmatpush.bf16.msrb.mxu0 %v12620_v32  ;;  %3654 = vmatpush.bf16.msrb.mxu1 %v12621_v28  ;;  %v12646_v32 = vld [vmem:[#allocation72_spill] sm:$0xff]  ;;  %v12647_v28 = vld [vmem:[#allocation73_spill] sm:$0xff] }
 0x2b7   : > { %3667 = vmatpush.bf16.msrb.mxu2 %v12622_v7  ;;  %3680 = vmatpush.bf16.msrb.mxu3 %v12623_v63  ;;  %v12648_v7 = vld [vmem:[#allocation74_spill] sm:$0xff]  ;;  %v12649_v63 = vld [vmem:[#allocation75_spill] sm:$0xff] }
 0x2ba   : > { %3642 = vmatpush.bf16.msrb.mxu0 %v12624_v46  ;;  %3655 = vmatpush.bf16.msrb.mxu1 %v12625_v0  ;;  %v12650_v46 = vld [vmem:[#allocation76_spill] sm:$0xff]  ;;  %v12651_v0 = vld [vmem:[#allocation77_spill] sm:$0xff] }
 0x2bb   : > { %3668 = vmatpush.bf16.msrb.mxu2 %v12626_v11  ;;  %3681 = vmatpush.bf16.msrb.mxu3 %v12627_v29  ;;  %v12652_v11 = vld [vmem:[#allocation78_spill] sm:$0xff]  ;;  %v12653_v29 = vld [vmem:[#allocation79_spill] sm:$0xff] }
 0x2be   : > { %3643 = vmatpush.bf16.msrb.mxu0 %v12628_v25  ;;  %3656 = vmatpush.bf16.msrb.mxu1 %v12629_v47  ;;  %v12654_v25 = vld [vmem:[#allocation80_spill] sm:$0xff]  ;;  %v12655_v47 = vld [vmem:[#allocation81_spill] sm:$0xff] }
 0x2bf   : > { %3669 = vmatpush.bf16.msrb.mxu2 %v12630_v51  ;;  %3682 = vmatpush.bf16.msrb.mxu3 %v12631_v42  ;;  %v12656_v51 = vld [vmem:[#allocation82_spill] sm:$0xff]  ;;  %v12657_v42 = vld [vmem:[#allocation83_spill] sm:$0xff] }
 0x2c2   : > { %3644 = vmatpush.bf16.msrb.mxu0 %v12632_v10  ;;  %3657 = vmatpush.bf16.msrb.mxu1 %v12633_v40  ;;  %v12658_v10 = vld [vmem:[#allocation84_spill] sm:$0xff]  ;;  %v12659_v40 = vld [vmem:[#allocation85_spill] sm:$0xff] }
 0x2c3   : > { %3670 = vmatpush.bf16.msrb.mxu2 %v12634_v5  ;;  %3683 = vmatpush.bf16.msrb.mxu3 %v12635_v1  ;;  %v12660_v5 = vld [vmem:[#allocation86_spill] sm:$0xff]  ;;  %v12661_v1 = vld [vmem:[#allocation87_spill] sm:$0xff] }
 0x2c6   : > { %3645 = vmatpush.bf16.msrb.mxu0 %v12636_v61  ;;  %3658 = vmatpush.bf16.msrb.mxu1 %v12637_v21  ;;  %v12662_v61 = vld [vmem:[#allocation88_spill] sm:$0xff]  ;;  %v12663_v21 = vld [vmem:[#allocation89_spill] sm:$0xff] }
 0x2c7   : > { %3671 = vmatpush.bf16.msrb.mxu2 %v12638_v12  ;;  %3684 = vmatpush.bf16.msrb.mxu3 %v12639_v49  ;;  %v12664_v12 = vld [vmem:[#allocation90_spill] sm:$0xff]  ;;  %v12665_v49 = vld [vmem:[#allocation91_spill] sm:$0xff] }
 0x2c9   : > { %3646 = vmatmul.bf16.vlgmr.msrb.gmra.mxu0 %v10277_v36  ;;  %3659 = vmatmul.bf16.vlgmr.msrb.gmra.mxu1 %v10279_v50 }
 0x2ca   : > { %3690 = vmatpush.bf16.msra.mxu0 %v12640_v9  ;;  %3703 = vmatpush.bf16.msra.mxu1 %v12641_v59  ;;  %v12666_v9 = vld [vmem:[#allocation92_spill] sm:$0xff]  ;;  %v12667_v59 = vld [vmem:[#allocation93_spill] sm:$0xff] }
 0x2cb   : > { %3716 = vmatpush.bf16.msra.mxu2 %v12642_v58  ;;  %3729 = vmatpush.bf16.msra.mxu3 %v12643_v62  ;;  %v12668_v58 = vld [vmem:[#allocation94_spill] sm:$0xff]  ;;  %v12669_v62 = vld [vmem:[#allocation95_spill] sm:$0xff] }
 0x2cc   : > { %3672 = vmatmul.bf16.vlgmr.msrb.gmra.mxu2 %v10277_v36  ;;  %3685 = vmatmul.bf16.vlgmr.msrb.gmra.mxu3 %v10279_v50 }
 0x2ce   : > { %3691 = vmatpush.bf16.msra.mxu0 %v12644_v57  ;;  %3704 = vmatpush.bf16.msra.mxu1 %v12645_v6  ;;  %v12670_v57 = vld [vmem:[#allocation96_spill] sm:$0xff]  ;;  %v12671_v6 = vld [vmem:[#allocation97_spill] sm:$0xff] }
 0x2cf   : > { %3717 = vmatpush.bf16.msra.mxu2 %v12646_v32  ;;  %3730 = vmatpush.bf16.msra.mxu3 %v12647_v28  ;;  %v12672_v32 = vld [vmem:[#allocation98_spill] sm:$0xff]  ;;  %v12673_v28 = vld [vmem:[#allocation99_spill] sm:$0xff] }
 0x2d2   : > { %3692 = vmatpush.bf16.msra.mxu0 %v12648_v7  ;;  %3705 = vmatpush.bf16.msra.mxu1 %v12649_v63  ;;  %v12674_v7 = vld [vmem:[#allocation100_spill] sm:$0xff]  ;;  %v12675_v63 = vld [vmem:[#allocation101_spill] sm:$0xff] }
 0x2d3   : > { %3718 = vmatpush.bf16.msra.mxu2 %v12650_v46  ;;  %3731 = vmatpush.bf16.msra.mxu3 %v12651_v0  ;;  %v12676_v46 = vld [vmem:[#allocation102_spill] sm:$0xff]  ;;  %v12677_v0 = vld [vmem:[#allocation103_spill] sm:$0xff] }
 0x2d6   : > { %3693 = vmatpush.bf16.msra.mxu0 %v12652_v11  ;;  %3706 = vmatpush.bf16.msra.mxu1 %v12653_v29  ;;  %v12678_v11 = vld [vmem:[#allocation104_spill] sm:$0xff]  ;;  %v12679_v29 = vld [vmem:[#allocation105_spill] sm:$0xff] }
 0x2d7   : > { %3719 = vmatpush.bf16.msra.mxu2 %v12654_v25  ;;  %3732 = vmatpush.bf16.msra.mxu3 %v12655_v47  ;;  %v12680_v25 = vld [vmem:[#allocation106_spill] sm:$0xff]  ;;  %v12681_v47 = vld [vmem:[#allocation107_spill] sm:$0xff] }
 0x2da   : > { %3694 = vmatpush.bf16.msra.mxu0 %v12656_v51  ;;  %3707 = vmatpush.bf16.msra.mxu1 %v12657_v42  ;;  %v12682_v51 = vld [vmem:[#allocation108_spill] sm:$0xff]  ;;  %v12683_v42 = vld [vmem:[#allocation109_spill] sm:$0xff] }
 0x2db   : > { %3720 = vmatpush.bf16.msra.mxu2 %v12658_v10  ;;  %3733 = vmatpush.bf16.msra.mxu3 %v12659_v40  ;;  %v12684_v10 = vld [vmem:[#allocation110_spill] sm:$0xff]  ;;  %v12685_v40 = vld [vmem:[#allocation111_spill] sm:$0xff] }
 0x2de   : > { %3695 = vmatpush.bf16.msra.mxu0 %v12660_v5  ;;  %3708 = vmatpush.bf16.msra.mxu1 %v12661_v1  ;;  %v12686_v5 = vld [vmem:[#allocation112_spill] sm:$0xff]  ;;  %v12687_v1 = vld [vmem:[#allocation113_spill] sm:$0xff] }
 0x2df   : > { %3721 = vmatpush.bf16.msra.mxu2 %v12662_v61  ;;  %3734 = vmatpush.bf16.msra.mxu3 %v12663_v21  ;;  %v12688_v61 = vld [vmem:[#allocation114_spill] sm:$0xff]  ;;  %v12689_v21 = vld [vmem:[#allocation115_spill] sm:$0xff] }
 0x2e2   : > { %3696 = vmatpush.bf16.msra.mxu0 %v12664_v12  ;;  %3709 = vmatpush.bf16.msra.mxu1 %v12665_v49  ;;  %v12690_v12 = vld [vmem:[#allocation116_spill] sm:$0xff]  ;;  %v12691_v49 = vld [vmem:[#allocation117_spill] sm:$0xff] }
 0x2e3   : > { %3722 = vmatpush.bf16.msra.mxu2 %v12666_v9  ;;  %3735 = vmatpush.bf16.msra.mxu3 %v12667_v59  ;;  %v12692_v9 = vld [vmem:[#allocation118_spill] sm:$0xff]  ;;  %v12693_v59 = vld [vmem:[#allocation119_spill] sm:$0xff] }
 0x2e6   : > { %3697 = vmatpush.bf16.msra.mxu0 %v12668_v58  ;;  %3710 = vmatpush.bf16.msra.mxu1 %v12669_v62  ;;  %v12694_v58 = vld [vmem:[#allocation120_spill] sm:$0xff]  ;;  %v12695_v62 = vld [vmem:[#allocation121_spill] sm:$0xff] }
 0x2e7   : > { %3723 = vmatpush.bf16.msra.mxu2 %v12670_v57  ;;  %3736 = vmatpush.bf16.msra.mxu3 %v12671_v6  ;;  %v12696_v57 = vld [vmem:[#allocation122_spill] sm:$0xff]  ;;  %v12697_v6 = vld [vmem:[#allocation123_spill] sm:$0xff] }
 0x2e9   : > { %3698 = vmatmul.bf16.vlgmr.msra.gmra.mxu0 %v10277_v36  ;;  %3711 = vmatmul.bf16.vlgmr.msra.gmra.mxu1 %v10279_v50 }
 0x2ea   : > { %3742 = vmatpush.bf16.msrb.mxu0 %v12672_v32  ;;  %3755 = vmatpush.bf16.msrb.mxu1 %v12673_v28  ;;  %v12698_v32 = vld [vmem:[#allocation124_spill] sm:$0xff]  ;;  %v12699_v28 = vld [vmem:[#allocation125_spill] sm:$0xff] }
 0x2eb   : > { %3768 = vmatpush.bf16.msrb.mxu2 %v12674_v7  ;;  %3781 = vmatpush.bf16.msrb.mxu3 %v12675_v63  ;;  %v12700_v7 = vld [vmem:[#allocation126_spill] sm:$0xff]  ;;  %v12701_v63 = vld [vmem:[#allocation127_spill] sm:$0xff] }
 0x2ec   : > { %3724 = vmatmul.bf16.vlgmr.msra.gmra.mxu2 %v10277_v36  ;;  %3737 = vmatmul.bf16.vlgmr.msra.gmra.mxu3 %v10279_v50 }
 0x2ee   : > { %3743 = vmatpush.bf16.msrb.mxu0 %v12676_v46  ;;  %3756 = vmatpush.bf16.msrb.mxu1 %v12677_v0  ;;  %v12702_v46 = vld [vmem:[#allocation128_spill] sm:$0xff]  ;;  %v12703_v0 = vld [vmem:[#allocation129_spill] sm:$0xff] }
 0x2ef   : > { %3769 = vmatpush.bf16.msrb.mxu2 %v12678_v11  ;;  %3782 = vmatpush.bf16.msrb.mxu3 %v12679_v29  ;;  %v12704_v11 = vld [vmem:[#allocation130_spill] sm:$0xff]  ;;  %v12705_v29 = vld [vmem:[#allocation131_spill] sm:$0xff] }
 0x2f2   : > { %3744 = vmatpush.bf16.msrb.mxu0 %v12680_v25  ;;  %3757 = vmatpush.bf16.msrb.mxu1 %v12681_v47  ;;  %v12706_v25 = vld [vmem:[#allocation132_spill] sm:$0xff]  ;;  %v12707_v47 = vld [vmem:[#allocation133_spill] sm:$0xff] }
 0x2f3   : > { %3770 = vmatpush.bf16.msrb.mxu2 %v12682_v51  ;;  %3783 = vmatpush.bf16.msrb.mxu3 %v12683_v42  ;;  %v12708_v51 = vld [vmem:[#allocation134_spill] sm:$0xff]  ;;  %v12709_v42 = vld [vmem:[#allocation135_spill] sm:$0xff] }
 0x2f6   : > { %3745 = vmatpush.bf16.msrb.mxu0 %v12684_v10  ;;  %3758 = vmatpush.bf16.msrb.mxu1 %v12685_v40  ;;  %v12710_v10 = vld [vmem:[#allocation136_spill] sm:$0xff]  ;;  %v12711_v40 = vld [vmem:[#allocation137_spill] sm:$0xff] }
 0x2f7   : > { %3771 = vmatpush.bf16.msrb.mxu2 %v12686_v5  ;;  %3784 = vmatpush.bf16.msrb.mxu3 %v12687_v1  ;;  %v12712_v5 = vld [vmem:[#allocation138_spill] sm:$0xff]  ;;  %v12713_v1 = vld [vmem:[#allocation139_spill] sm:$0xff] }
 0x2fa   : > { %3746 = vmatpush.bf16.msrb.mxu0 %v12688_v61  ;;  %3759 = vmatpush.bf16.msrb.mxu1 %v12689_v21  ;;  %v12714_v61 = vld [vmem:[#allocation140_spill] sm:$0xff]  ;;  %v12715_v21 = vld [vmem:[#allocation141_spill] sm:$0xff] }
 0x2fb   : > { %3772 = vmatpush.bf16.msrb.mxu2 %v12690_v12  ;;  %3785 = vmatpush.bf16.msrb.mxu3 %v12691_v49  ;;  %v12717_v12 = vld [vmem:[#allocation143_spill] sm:$0xff]  ;;  %v12719_v49 = vld [vmem:[#allocation145_spill] sm:$0xff] }
 0x2fe   : > { %3747 = vmatpush.bf16.msrb.mxu0 %v12692_v9  ;;  %3760 = vmatpush.bf16.msrb.mxu1 %v12693_v59  ;;  %v12720_v9 = vld [vmem:[#allocation146_spill] sm:$0xff]  ;;  %v12721_v59 = vld [vmem:[#allocation147_spill] sm:$0xff] }
 0x2ff   : > { %3773 = vmatpush.bf16.msrb.mxu2 %v12694_v58  ;;  %3786 = vmatpush.bf16.msrb.mxu3 %v12695_v62  ;;  %v12722_v58 = vld [vmem:[#allocation148_spill] sm:$0xff]  ;;  %v12723_v62 = vld [vmem:[#allocation149_spill] sm:$0xff] }
 0x302   : > { %3748 = vmatpush.bf16.msrb.mxu0 %v12696_v57  ;;  %3761 = vmatpush.bf16.msrb.mxu1 %v12697_v6  ;;  %v12724_v57 = vld [vmem:[#allocation150_spill] sm:$0xff]  ;;  %v12725_v6 = vld [vmem:[#allocation151_spill] sm:$0xff] }
 0x303   : > { %3774 = vmatpush.bf16.msrb.mxu2 %v12698_v32  ;;  %3787 = vmatpush.bf16.msrb.mxu3 %v12699_v28  ;;  %v12726_v32 = vld [vmem:[#allocation152_spill] sm:$0xff]  ;;  %v12727_v28 = vld [vmem:[#allocation153_spill] sm:$0xff] }
 0x306   : > { %3749 = vmatpush.bf16.msrb.mxu0 %v12700_v7  ;;  %3762 = vmatpush.bf16.msrb.mxu1 %v12701_v63  ;;  %v3576_v7 = vld [vmem:[#allocation2 + $0x8] sm:$0xff]  ;;  %v12728_v63 = vld [vmem:[#allocation154_spill] sm:$0xff] }
 0x307   : > { %3775 = vmatpush.bf16.msrb.mxu2 %v12702_v46  ;;  %3788 = vmatpush.bf16.msrb.mxu3 %v12703_v0  ;;  %v12729_v46 = vld [vmem:[#allocation155_spill] sm:$0xff]  ;;  %v3832_v0 = vunpack.c.l.b16 %v3576_v7 }
 0x309   : > { %3750 = vmatmul.bf16.vlgmr.msrb.gmra.mxu0 %v10277_v36  ;;  %3763 = vmatmul.bf16.vlgmr.msrb.gmra.mxu1 %v10279_v50 }
 0x30a   : > { %3838 = vmatpush.bf16.msra.mxu0 %v12704_v11  ;;  %3851 = vmatpush.bf16.msra.mxu1 %v12705_v29  ;;  %v3833_v11 = vunpack.c.h.b16 %v3576_v7  ;;  %v12730_v29 = vld [vmem:[#allocation156_spill] sm:$0xff]  ;;  %v12749_v7 = vld [vmem:[#allocation175_spill] sm:$0xff] }
 0x30b   : > { %3864 = vmatpush.bf16.msra.mxu2 %v12706_v25  ;;  %3877 = vmatpush.bf16.msra.mxu3 %v12707_v47  ;;  %v12731_v25 = vld [vmem:[#allocation157_spill] sm:$0xff]  ;;  %v12732_v47 = vld [vmem:[#allocation158_spill] sm:$0xff] }
 0x30c   : > { %3776 = vmatmul.bf16.vlgmr.msrb.gmra.mxu2 %v10277_v36  ;;  %3789 = vmatmul.bf16.vlgmr.msrb.gmra.mxu3 %v10279_v50  ;;  %v12716_v36 = vld [vmem:[#allocation142_spill] sm:$0xff]  ;;  %v12718_v50 = vld [vmem:[#allocation144_spill] sm:$0xff] }
 0x30e   : > { %3839 = vmatpush.bf16.msra.mxu0 %v12708_v51  ;;  %3852 = vmatpush.bf16.msra.mxu1 %v12709_v42  ;;  %v12733_v51 = vld [vmem:[#allocation159_spill] sm:$0xff]  ;;  %v10425_v42 = vpack.c.b16 %v3832_v0, %v3832_v0 }
 0x30f   : > { %3865 = vmatpush.bf16.msra.mxu2 %v12710_v10  ;;  %3878 = vmatpush.bf16.msra.mxu3 %v12711_v40  ;;  %v10427_v10 = vpack.c.b16 %v3833_v11, %v3833_v11  ;;  %v12734_v40 = vld [vmem:[#allocation160_spill] sm:$0xff] }
 0x312   : > { %3840 = vmatpush.bf16.msra.mxu0 %v12712_v5  ;;  %3853 = vmatpush.bf16.msra.mxu1 %v12713_v1  ;;  %v12735_v5 = vld [vmem:[#allocation161_spill] sm:$0xff]  ;;  %v12736_v1 = vld [vmem:[#allocation162_spill] sm:$0xff] }
 0x313   : > { %3866 = vmatpush.bf16.msra.mxu2 %v12714_v61  ;;  %3879 = vmatpush.bf16.msra.mxu3 %v12715_v21  ;;  %v12737_v61 = vld [vmem:[#allocation163_spill] sm:$0xff]  ;;  %v12738_v21 = vld [vmem:[#allocation164_spill] sm:$0xff] }
 0x316   : > { %3841 = vmatpush.bf16.msra.mxu0 %v12716_v36  ;;  %3854 = vmatpush.bf16.msra.mxu1 %v12717_v12  ;;  %v12739_v36 = vld [vmem:[#allocation165_spill] sm:$0xff]  ;;  %v12740_v12 = vld [vmem:[#allocation166_spill] sm:$0xff] }
 0x317   : > { %3867 = vmatpush.bf16.msra.mxu2 %v12718_v50  ;;  %3880 = vmatpush.bf16.msra.mxu3 %v12719_v49  ;;  %v12741_v50 = vld [vmem:[#allocation167_spill] sm:$0xff]  ;;  %v12742_v49 = vld [vmem:[#allocation168_spill] sm:$0xff] }
 0x31a   : > { %3842 = vmatpush.bf16.msra.mxu0 %v12720_v9  ;;  %3855 = vmatpush.bf16.msra.mxu1 %v12721_v59  ;;  %v12743_v9 = vld [vmem:[#allocation169_spill] sm:$0xff]  ;;  %v12744_v59 = vld [vmem:[#allocation170_spill] sm:$0xff] }
 0x31b   : > { %3868 = vmatpush.bf16.msra.mxu2 %v12722_v58  ;;  %3881 = vmatpush.bf16.msra.mxu3 %v12723_v62  ;;  %v12745_v58 = vld [vmem:[#allocation171_spill] sm:$0xff] }
 0x31e   : > { %3843 = vmatpush.bf16.msra.mxu0 %v12724_v57  ;;  %3856 = vmatpush.bf16.msra.mxu1 %v12725_v6  ;;  %v12746_v6 = vld [vmem:[#allocation172_spill] sm:$0xff] }
 0x31f   : > { %3869 = vmatpush.bf16.msra.mxu2 %v12726_v32  ;;  %3882 = vmatpush.bf16.msra.mxu3 %v12727_v28  ;;  %v12747_v32 = vld [vmem:[#allocation173_spill] sm:$0xff]  ;;  %v12748_v28 = vld [vmem:[#allocation174_spill] sm:$0xff] }
 0x322   : > { %3844 = vmatpush.bf16.msra.mxu0 %v12728_v63  ;;  %3857 = vmatpush.bf16.msra.mxu1 %v12729_v46  ;;  %v12750_v63 = vld [vmem:[#allocation176_spill] sm:$0xff]  ;;  %v12751_v46 = vld [vmem:[#allocation177_spill] sm:$0xff] }
 0x323   : > { %3870 = vmatpush.bf16.msra.mxu2 %v12730_v29  ;;  %3883 = vmatpush.bf16.msra.mxu3 %v12731_v25  ;;  %v12752_v29 = vld [vmem:[#allocation178_spill] sm:$0xff]  ;;  %v12753_v25 = vld [vmem:[#allocation179_spill] sm:$0xff] }
 0x326   : > { %3845 = vmatpush.bf16.msra.mxu0 %v12732_v47  ;;  %3858 = vmatpush.bf16.msra.mxu1 %v12733_v51  ;;  %v10445_v62 = vpop.f32.mrf.mxu0  ;;  %v10447_v57 = vpop.f32.mrf.mxu1 }
 0x327   : > { %3871 = vmatpush.bf16.msra.mxu2 %v12734_v40  ;;  %3884 = vmatpush.bf16.msra.mxu3 %v12735_v5  ;;  %v12754_v40 = vld [vmem:[#allocation180_spill] sm:$0xff]  ;;  %v12755_v5 = vld [vmem:[#allocation181_spill] sm:$0xff] }
 0x329   : > { %3846 = vmatmul.bf16.vlgmr.msra.gmra.mxu0 %v10425_v42  ;;  %3859 = vmatmul.bf16.vlgmr.msra.gmra.mxu1 %v10427_v10 }
 0x32a   : > { %3890 = vmatpush.bf16.msrb.mxu0 %v12736_v1  ;;  %3903 = vmatpush.bf16.msrb.mxu1 %v12737_v61  ;;  %v12756_v1 = vld [vmem:[#allocation182_spill] sm:$0xff]  ;;  %v12757_v61 = vld [vmem:[#allocation183_spill] sm:$0xff] }
 0x32b   : > { %3916 = vmatpush.bf16.msrb.mxu2 %v12738_v21  ;;  %3929 = vmatpush.bf16.msrb.mxu3 %v12739_v36  ;;  %v12758_v21 = vld [vmem:[#allocation184_spill] sm:$0xff]  ;;  %v12759_v36 = vld [vmem:[#allocation185_spill] sm:$0xff] }
 0x32c   : > { %3872 = vmatmul.bf16.vlgmr.msra.gmra.mxu2 %v10425_v42  ;;  %3885 = vmatmul.bf16.vlgmr.msra.gmra.mxu3 %v10427_v10 }
 0x32e   : > { %3891 = vmatpush.bf16.msrb.mxu0 %v12740_v12  ;;  %3904 = vmatpush.bf16.msrb.mxu1 %v12741_v50  ;;  %v3597_v47 = vpop.f32.mrf.mxu0  ;;  %v3610_v51 = vpop.f32.mrf.mxu1 }
 0x32f   : > { %3917 = vmatpush.bf16.msrb.mxu2 %v12742_v49  ;;  %3930 = vmatpush.bf16.msrb.mxu3 %v12743_v9  ;;  %v10455_v0 = vpop.f32.mrf.mxu2  ;;  %v10457_v11 = vpop.f32.mrf.mxu3  ;;  %v12760_v49 = vld [vmem:[#allocation186_spill] sm:$0xff]  ;;  %v12761_v9 = vld [vmem:[#allocation187_spill] sm:$0xff] }
 0x330   : > { %v12772_v47 = vld [vmem:[#allocation198_spill] sm:$0xff]  ;;  %v12773_v51 = vld [vmem:[#allocation199_spill] sm:$0xff] }
 0x332   : > { %3892 = vmatpush.bf16.msrb.mxu0 %v12744_v59  ;;  %3905 = vmatpush.bf16.msrb.mxu1 %v12745_v58  ;;  %v12762_v59 = vld [vmem:[#allocation188_spill] sm:$0xff]  ;;  %v12763_v58 = vld [vmem:[#allocation189_spill] sm:$0xff] }
 0x333   : > { %3918 = vmatpush.bf16.msrb.mxu2 %v12746_v6  ;;  %3931 = vmatpush.bf16.msrb.mxu3 %v12747_v32  ;;  %v12764_v6 = vld [vmem:[#allocation190_spill] sm:$0xff]  ;;  %v12765_v32 = vld [vmem:[#allocation191_spill] sm:$0xff] }
 0x336   : > { %3893 = vmatpush.bf16.msrb.mxu0 %v12748_v28  ;;  %3906 = vmatpush.bf16.msrb.mxu1 %v12749_v7  ;;  %v12766_v28 = vld [vmem:[#allocation192_spill] sm:$0xff]  ;;  %v12767_v7 = vld [vmem:[#allocation193_spill] sm:$0xff] }
 0x337   : > { %3919 = vmatpush.bf16.msrb.mxu2 %v12750_v63  ;;  %3932 = vmatpush.bf16.msrb.mxu3 %v12751_v46  ;;  %v3623_v12 = vpop.f32.mrf.mxu2  ;;  %v3636_v50 = vpop.f32.mrf.mxu3  ;;  %v12768_v63 = vld [vmem:[#allocation194_spill] sm:$0xff]  ;;  %v12769_v46 = vld [vmem:[#allocation195_spill] sm:$0xff] }
 0x338   : > { %v12778_v12 = vld [vmem:[#allocation204_spill] sm:$0xff]  ;;  %v12779_v50 = vld [vmem:[#allocation205_spill] sm:$0xff] }
 0x33a   : > { %3894 = vmatpush.bf16.msrb.mxu0 %v12752_v29  ;;  %3907 = vmatpush.bf16.msrb.mxu1 %v12753_v25  ;;  %v12770_v29 = vld [vmem:[#allocation196_spill] sm:$0xff]  ;;  %v12771_v25 = vld [vmem:[#allocation197_spill] sm:$0xff] }
 0x33b   : > { %3920 = vmatpush.bf16.msrb.mxu2 %v12754_v40  ;;  %3933 = vmatpush.bf16.msrb.mxu3 %v12755_v5  ;;  %v12774_v40 = vld [vmem:[#allocation200_spill] sm:$0xff]  ;;  %v12775_v5 = vld [vmem:[#allocation201_spill] sm:$0xff] }
 0x33e   : > { %3895 = vmatpush.bf16.msrb.mxu0 %v12756_v1  ;;  %3908 = vmatpush.bf16.msrb.mxu1 %v12757_v61  ;;  %v12776_v61 = vld [vmem:[#allocation202_spill] sm:$0xff] }
 0x33f   : > { %3921 = vmatpush.bf16.msrb.mxu2 %v12758_v21  ;;  %3934 = vmatpush.bf16.msrb.mxu3 %v12759_v36  ;;  %v12777_v21 = vld [vmem:[#allocation203_spill] sm:$0xff] }
 0x342   : > { %3896 = vmatpush.bf16.msrb.mxu0 %v12760_v49  ;;  %3909 = vmatpush.bf16.msrb.mxu1 %v12761_v9  ;;  %v7627_v49 = vld [vmem:[%s8893_s22 + $0x28] sm:$0xff] }
 0x343   : > { %3922 = vmatpush.bf16.msrb.mxu2 %v12762_v59  ;;  %3935 = vmatpush.bf16.msrb.mxu3 %v12763_v58  ;;  %v12780_v9 = vld [vmem:[#allocation206_spill] sm:$0xff]  ;;  %v12781_v59 = vld [vmem:[#allocation207_spill] sm:$0xff]  ;;  %v12782_v58 = vld [vmem:[#allocation208_spill] sm:$0xff] }
 0x346   : > { %3897 = vmatpush.bf16.msrb.mxu0 %v12764_v6  ;;  %3910 = vmatpush.bf16.msrb.mxu1 %v12765_v32  ;;  %v3647_v1 = vpop.f32.mrf.mxu0  ;;  %v3660_v36 = vpop.f32.mrf.mxu1  ;;  %v12783_v6 = vld [vmem:[#allocation209_spill] sm:$0xff] }
 0x347   : > { %3923 = vmatpush.bf16.msrb.mxu2 %v12766_v28  ;;  %3936 = vmatpush.bf16.msrb.mxu3 %v12767_v7  ;;  %v3567_v28 = vunpack.c.l.bf16 %v7627_v49 }
 0x349   : > { %3898 = vmatmul.bf16.vlgmr.msrb.gmra.mxu0 %v10425_v42  ;;  %3911 = vmatmul.bf16.vlgmr.msrb.gmra.mxu1 %v10427_v10 }
 0x34a   : > { %3942 = vmatpush.bf16.msra.mxu0 %v12768_v63  ;;  %3955 = vmatpush.bf16.msra.mxu1 %v12769_v46  ;;  %v7626_v63 = vld [vmem:[%s8893_s22 + $0x20] sm:$0xff] }
 0x34b   : > { %3968 = vmatpush.bf16.msra.mxu2 %v12770_v29  ;;  %3981 = vmatpush.bf16.msra.mxu3 %v12771_v25  ;;  %v12784_v29 = vld [vmem:[#allocation210_spill] sm:$0xff]  ;;  %v12785_v25 = vld [vmem:[#allocation211_spill] sm:$0xff] }
 0x34c   : > { %3924 = vmatmul.bf16.vlgmr.msrb.gmra.mxu2 %v10425_v42  ;;  %3937 = vmatmul.bf16.vlgmr.msrb.gmra.mxu3 %v10427_v10 }
 0x34e   : > { %3943 = vmatpush.bf16.msra.mxu0 %v12772_v47  ;;  %3956 = vmatpush.bf16.msra.mxu1 %v12773_v51  ;;  %v3649_v46 = vpop.f32.mrf.mxu0  ;;  %v3662_v47 = vpop.f32.mrf.mxu1  ;;  %v12786_v51 = vld [vmem:[#allocation212_spill] sm:$0xff] }
 0x34f   : > { %3969 = vmatpush.bf16.msra.mxu2 %v12774_v40  ;;  %3982 = vmatpush.bf16.msra.mxu3 %v12775_v5  ;;  %v3673_v32 = vpop.f32.mrf.mxu2  ;;  %v3686_v7 = vpop.f32.mrf.mxu3  ;;  %v12787_v40 = vld [vmem:[#allocation213_spill] sm:$0xff]  ;;  %v3565_v5 = vunpack.c.l.bf16 %v7626_v63  ;;  %v12792_v47 = vld [vmem:[#allocation218_spill] sm:$0xff] }
 0x352   : > { %3944 = vmatpush.bf16.msra.mxu0 %v12776_v61  ;;  %3957 = vmatpush.bf16.msra.mxu1 %v12777_v21  ;;  %v3648_v61 = vadd.f32 %v3647_v1, %v3567_v28  ;;  %v12788_v21 = vld [vmem:[#allocation214_spill] sm:$0xff]  ;;  %v12794_v28 = vld [vmem:[#allocation220_spill] sm:$0xff] }
 0x353   : > { %3970 = vmatpush.bf16.msra.mxu2 %v12778_v12  ;;  %3983 = vmatpush.bf16.msra.mxu3 %v12779_v50  ;;  %v12789_v12 = vld [vmem:[#allocation215_spill] sm:$0xff]  ;;  %v3568_v50 = vunpack.c.h.bf16 %v7627_v49 }
 0x354   : > { %v3661_v46 = vadd.f32 %v3660_v36, %v3648_v61  ;;  %v12800_v61 = vld [vmem:[#allocation226_spill] sm:$0xff] }
 0x355   : > { %v3674_v1 = vadd.f32 %v3673_v32, %v3568_v50  ;;  %v12801_v50 = vld [vmem:[#allocation227_spill] sm:$0xff] }
 0x356   : > { %3945 = vmatpush.bf16.msra.mxu0 %v12780_v9  ;;  %3958 = vmatpush.bf16.msra.mxu1 %v12781_v59  ;;  %v12790_v9 = vld [vmem:[#allocation216_spill] sm:$0xff]  ;;  %v12791_v59 = vld [vmem:[#allocation217_spill] sm:$0xff] }
 0x357   : > { %3971 = vmatpush.bf16.msra.mxu2 %v12782_v58  ;;  %3984 = vmatpush.bf16.msra.mxu3 %v12783_v6  ;;  %v3675_v58 = vpop.f32.mrf.mxu2  ;;  %v3596_v6 = vadd.f32 %v10445_v62, %v3565_v5  ;;  %v12797_v62 = vld [vmem:[#allocation223_spill] sm:$0xff]  ;;  %v3687_v36 = vadd.f32 %v3686_v7, %v3674_v1  ;;  %v12799_v5 = vld [vmem:[#allocation225_spill] sm:$0xff]  ;;  %v12804_v7 = vld [vmem:[#allocation230_spill] sm:$0xff] }
 0x359   : > { %v3609_v49 = vadd.f32 %v10447_v57, %v3596_v6  ;;  %v12803_v57 = vld [vmem:[#allocation229_spill] sm:$0xff]  ;;  %v3803_v6 = vmul.f32 0.5, %v3687_v36 }
 0x35a   : > { %3946 = vmatpush.bf16.msra.mxu0 %v12784_v29  ;;  %3959 = vmatpush.bf16.msra.mxu1 %v12785_v25  ;;  %v3688_v29 = vpop.f32.mrf.mxu3  ;;  %v3566_v25 = vunpack.c.h.bf16 %v7626_v63  ;;  %v12798_v63 = vld [vmem:[#allocation224_spill] sm:$0xff] }
 0x35b   : > { %3972 = vmatpush.bf16.msra.mxu2 %v12786_v51  ;;  %3985 = vmatpush.bf16.msra.mxu3 %v12787_v40  ;;  %v12793_v51 = vld [vmem:[#allocation219_spill] sm:$0xff]  ;;  %v12795_v40 = vld [vmem:[#allocation221_spill] sm:$0xff]  ;;  %v3794_v32 = vmul.f32 0.5, %v3609_v49 }
 0x35e   : > { %3947 = vmatpush.bf16.msra.mxu0 %v12788_v21  ;;  %3960 = vmatpush.bf16.msra.mxu1 %v12789_v12  ;;  %v3802_v21 = vmul.f32 0.5, %v3661_v46  ;;  %v3622_v12 = vadd.f32 %v10455_v0, %v3566_v25  ;;  %v7628_v0 = vld [vmem:[%s8893_s22 + $0x30] sm:$0xff]  ;;  %v12806_v25 = vld [vmem:[#allocation232_spill] sm:$0xff] }
 0x35f   : > { %3973 = vmatpush.bf16.msra.mxu2 %v12790_v9  ;;  %3986 = vmatpush.bf16.msra.mxu3 %v12791_v59  ;;  %v12796_v9 = vld [vmem:[#allocation222_spill] sm:$0xff]  ;;  %v12802_v59 = vld [vmem:[#allocation228_spill] sm:$0xff]  ;;  %v12805_v46 = vld [vmem:[#allocation231_spill] sm:$0xff]  ;;  %v3569_v29 = vunpack.c.l.bf16 %v7628_v0 }
 0x360   : > { %8211 = vtanh.f32 %v3802_v21  ;;  %v3635_v58 = vadd.f32 %v10457_v11, %v3622_v12 }
 0x361   : > { %8213 = vtanh.f32 %v3794_v32 }
 0x362   : > { %3948 = vmatpush.bf16.msra.mxu0 %v12792_v47  ;;  %3961 = vmatpush.bf16.msra.mxu1 %v12793_v51  ;;  %v12807_v47 = vld [vmem:[#allocation233_spill] sm:$0xff]  ;;  %v3795_v51 = vmul.f32 0.5, %v3635_v58  ;;  %8215 = vtanh.f32 %v3803_v6  ;;  %v12814_v58 = vld [vmem:[#allocation240_spill] sm:$0xff] }
 0x363   : > { %3974 = vmatpush.bf16.msra.mxu2 %v12794_v28  ;;  %3987 = vmatpush.bf16.msra.mxu3 %v12795_v40  ;;  %v12808_v28 = vld [vmem:[#allocation234_spill] sm:$0xff]  ;;  %v12809_v40 = vld [vmem:[#allocation235_spill] sm:$0xff]  ;;  %v12815_v6 = vld [vmem:[#allocation241_spill] sm:$0xff] }
 0x364   : > { %8217 = vtanh.f32 %v3795_v51 }
 0x366   : > { %3949 = vmatpush.bf16.msra.mxu0 %v12796_v9  ;;  %3962 = vmatpush.bf16.msra.mxu1 %v12797_v62  ;;  %v8212_v11 = vpop.eup %8211  ;;  %v3699_v1 = vpop.f32.mrf.mxu0  ;;  %v12810_v9 = vld [vmem:[#allocation236_spill] sm:$0xff]  ;;  %v12811_v62 = vld [vmem:[#allocation237_spill] sm:$0xff] }
 0x367   : > { %3975 = vmatpush.bf16.msra.mxu2 %v12798_v63  ;;  %3988 = vmatpush.bf16.msra.mxu3 %v12799_v5  ;;  %v3700_v49 = vadd.f32 %v3699_v1, %v3569_v29  ;;  %v3712_v21 = vpop.f32.mrf.mxu1  ;;  %v3806_v12 = vmul.f32 0.5, %v8212_v11  ;;  %v8214_v36 = vpop.eup %8213  ;;  %v3570_v5 = vunpack.c.h.bf16 %v7628_v0  ;;  %v12816_v0 = vld [vmem:[#allocation242_spill] sm:$0xff]  ;;  %v12817_v1 = vld [vmem:[#allocation243_spill] sm:$0xff] }
 0x368   : > { %v8216_v32 = vpop.eup %8215 }
 0x369   : > { %3950 = vmatmul.bf16.vlgmr.msra.gmra.mxu0 %v10425_v42  ;;  %3963 = vmatmul.bf16.vlgmr.msra.gmra.mxu1 %v10427_v10  ;;  %v3713_v63 = vadd.f32 %v3712_v21, %v3700_v49 }
 0x36a   : > { %3994 = vmatpush.bf16.msrb.mxu0 %v12800_v61  ;;  %4007 = vmatpush.bf16.msrb.mxu1 %v12801_v50  ;;  %v12812_v61 = vld [vmem:[#allocation238_spill] sm:$0xff]  ;;  %v12813_v50 = vld [vmem:[#allocation239_spill] sm:$0xff]  ;;  %v8218_v51 = vpop.eup %8217 }
 0x36b   : > { %4020 = vmatpush.bf16.msrb.mxu2 %v12802_v59  ;;  %4033 = vmatpush.bf16.msrb.mxu3 %v12803_v57  ;;  %8219 = vtanh.f32 %v3713_v63  ;;  %v3798_v59 = vmul.f32 0.5, %v8214_v36  ;;  %v3808_v57 = vadd.f32 0.5, %v3806_v12  ;;  %v12818_v12 = vld [vmem:[#allocation244_spill] sm:$0xff]  ;;  %v3799_v36 = vmul.f32 0.5, %v8218_v51 }
 0x36c   : > { %3976 = vmatmul.bf16.vlgmr.msra.gmra.mxu2 %v10425_v42  ;;  %3989 = vmatmul.bf16.vlgmr.msra.gmra.mxu3 %v10427_v10 }
 0x36d   : > { %v3800_v49 = vadd.f32 0.5, %v3798_v59  ;;  %v12823_v59 = vld [vmem:[#allocation249_spill] sm:$0xff] }
 0x36e   : > { %3995 = vmatpush.bf16.msrb.mxu0 %v12804_v7  ;;  %4008 = vmatpush.bf16.msrb.mxu1 %v12805_v46  ;;  %v3574_v46 = vld [vmem:[#allocation3 + $0x8] sm:$0xff]  ;;  %v3701_v11 = vpop.f32.mrf.mxu0 }
 0x36f   : > { %4021 = vmatpush.bf16.msrb.mxu2 %v12806_v25  ;;  %4034 = vmatpush.bf16.msrb.mxu3 %v12807_v47  ;;  %v3725_v7 = vpop.f32.mrf.mxu2  ;;  %v3738_v25 = vpop.f32.mrf.mxu3  ;;  %v3807_v47 = vmul.f32 0.5, %v8216_v32  ;;  %v3820_v21 = vmul.f32 %v3808_v57, %v3574_v46  ;;  %v3575_v32 = vld [vmem:[#allocation3 + $0x10] sm:$0xff]  ;;  %v3801_v46 = vadd.f32 0.5, %v3799_v36  ;;  %v12834_v36 = vld [vmem:[#allocation260_spill] sm:$0xff] }
 0x370   : > { %v3726_v29 = vadd.f32 %v3725_v7, %v3570_v5  ;;  %v12825_v11 = vld [vmem:[#allocation251_spill] sm:$0xff] }
 0x371   : > { %v3809_v63 = vadd.f32 0.5, %v3807_v47  ;;  %v12824_v47 = vld [vmem:[#allocation250_spill] sm:$0xff] }
 0x372   : > { %3996 = vmatpush.bf16.msrb.mxu0 %v12808_v28  ;;  %4009 = vmatpush.bf16.msrb.mxu1 %v12809_v40  ;;  %v3739_v28 = vadd.f32 %v3738_v25, %v3726_v29  ;;  %v3714_v40 = vpop.f32.mrf.mxu1 }
 0x373   : > { %4022 = vmatpush.bf16.msrb.mxu2 %v12810_v9  ;;  %4035 = vmatpush.bf16.msrb.mxu3 %v12811_v62  ;;  %v12819_v9 = vld [vmem:[#allocation245_spill] sm:$0xff]  ;;  %v8220_v62 = vpop.eup %8219  ;;  %v3821_v29 = vmul.f32 %v3809_v63, %v3575_v32  ;;  %v12828_v40 = vld [vmem:[#allocation254_spill] sm:$0xff] }
 0x374   : > { %8221 = vtanh.f32 %v3739_v28  ;;  %v3822_v5 = vmul.f32 %v8220_v62, %v3800_v49  ;;  %v12829_v49 = vld [vmem:[#allocation255_spill] sm:$0xff]  ;;  %v12835_v63 = vld [vmem:[#allocation261_spill] sm:$0xff]  ;;  %v12836_v32 = vld [vmem:[#allocation262_spill] sm:$0xff] }
 0x375   : > { %v12833_v62 = vld [vmem:[#allocation259_spill] sm:$0xff] }
 0x376   : > { %3997 = vmatpush.bf16.msrb.mxu0 %v12812_v61  ;;  %4010 = vmatpush.bf16.msrb.mxu1 %v12813_v50  ;;  %v12820_v61 = vld [vmem:[#allocation246_spill] sm:$0xff]  ;;  %v12821_v50 = vld [vmem:[#allocation247_spill] sm:$0xff] }
 0x377   : > { %4023 = vmatpush.bf16.msrb.mxu2 %v12814_v58  ;;  %4036 = vmatpush.bf16.msrb.mxu3 %v12815_v6  ;;  %v10544_v58 = vadd.f32 %v3822_v5, %v3820_v21  ;;  %v12822_v6 = vld [vmem:[#allocation248_spill] sm:$0xff]  ;;  %v3727_v57 = vpop.f32.mrf.mxu2  ;;  %v3740_v7 = vpop.f32.mrf.mxu3 }
 0x378   : > { %v12830_v21 = vld [vmem:[#allocation256_spill] sm:$0xff]  ;;  %v12840_v7 = vld [vmem:[#allocation266_spill] sm:$0xff] }
 0x379   : > { %4307 = vst [vmem:[#allocation3 + $0x8] sm:$0xff] %v10544_v58  ;;  %v7629_v5 = vld [vmem:[%s8893_s22 + $0x38] sm:$0xff] }
 0x37a   : > { %3998 = vmatpush.bf16.msrb.mxu0 %v12816_v0  ;;  %4011 = vmatpush.bf16.msrb.mxu1 %v12817_v1  ;;  %v8222_v25 = vpop.eup %8221  ;;  %v12826_v0 = vld [vmem:[#allocation252_spill] sm:$0xff]  ;;  %v12827_v1 = vld [vmem:[#allocation253_spill] sm:$0xff] }
 0x37b   : > { %4024 = vmatpush.bf16.msrb.mxu2 %v12818_v12  ;;  %4037 = vmatpush.bf16.msrb.mxu3 %v12819_v9  ;;  %v3823_v51 = vmul.f32 %v8222_v25, %v3801_v46  ;;  %v12831_v12 = vld [vmem:[#allocation257_spill] sm:$0xff]  ;;  %v12832_v9 = vld [vmem:[#allocation258_spill] sm:$0xff]  ;;  %v12841_v46 = vld [vmem:[#allocation267_spill] sm:$0xff] }
 0x37d   : > { %v10553_v28 = vadd.f32 %v3823_v51, %v3821_v29  ;;  %v12844_v51 = vld [vmem:[#allocation270_spill] sm:$0xff] }
 0x37e   : > { %3999 = vmatpush.bf16.msrb.mxu0 %v12820_v61  ;;  %4012 = vmatpush.bf16.msrb.mxu1 %v12821_v50  ;;  %v12837_v61 = vld [vmem:[#allocation263_spill] sm:$0xff]  ;;  %v3571_v50 = vunpack.c.l.bf16 %v7629_v5 }
 0x37f   : > { %4025 = vmatpush.bf16.msrb.mxu2 %v12822_v6  ;;  %4038 = vmatpush.bf16.msrb.mxu3 %v12823_v59  ;;  %4308 = vst [vmem:[#allocation3 + $0x10] sm:$0xff] %v10553_v28  ;;  %v12838_v6 = vld [vmem:[#allocation264_spill] sm:$0xff]  ;;  %v12839_v59 = vld [vmem:[#allocation265_spill] sm:$0xff] }
 0x382   : > { %4000 = vmatpush.bf16.msrb.mxu0 %v12824_v47  ;;  %4013 = vmatpush.bf16.msrb.mxu1 %v12825_v11  ;;  %v12842_v47 = vld [vmem:[#allocation268_spill] sm:$0xff]  ;;  %v3572_v11 = vunpack.c.h.bf16 %v7629_v5 }
 0x383   : > { %4026 = vmatpush.bf16.msrb.mxu2 %v12826_v0  ;;  %4039 = vmatpush.bf16.msrb.mxu3 %v12827_v1  ;;  %v12845_v0 = vld [vmem:[#allocation271_spill] sm:$0xff] }
 0x386   : > { %4001 = vmatpush.bf16.msrb.mxu0 %v12828_v40  ;;  %4014 = vmatpush.bf16.msrb.mxu1 %v12829_v49  ;;  %v3751_v57 = vpop.f32.mrf.mxu0  ;;  %v3764_v25 = vpop.f32.mrf.mxu1  ;;  %v12846_v40 = vld [vmem:[#allocation272_spill] sm:$0xff]  ;;  %v12847_v49 = vld [vmem:[#allocation273_spill] sm:$0xff] }
 0x387   : > { %4027 = vmatpush.bf16.msrb.mxu2 %v12830_v21  ;;  %4040 = vmatpush.bf16.msrb.mxu3 %v12831_v12  ;;  %v3752_v29 = vadd.f32 %v3751_v57, %v3571_v50  ;;  %v12851_v50 = vld [vmem:[#allocation277_spill] sm:$0xff]  ;;  %v12852_v57 = vld [vmem:[#allocation278_spill] sm:$0xff] }
 0x389   : > { %4002 = vmatmul.bf16.vlgmr.msrb.gmra.mxu0 %v10425_v42  ;;  %4015 = vmatmul.bf16.vlgmr.msrb.gmra.mxu1 %v10427_v10 }
 0x38a   : > { %4053 = vmatpush.bf16.msra.mxu0 %v12832_v9  ;;  %4066 = vmatpush.bf16.msra.mxu1 %v12833_v62 }
 0x38b   : > { %4079 = vmatpush.bf16.msra.mxu2 %v12834_v36  ;;  %4092 = vmatpush.bf16.msra.mxu3 %v12835_v63  ;;  %v12848_v36 = vld [vmem:[#allocation274_spill] sm:$0xff]  ;;  %v12849_v63 = vld [vmem:[#allocation275_spill] sm:$0xff] }
 0x38c   : > { %4028 = vmatmul.bf16.vlgmr.msrb.gmra.mxu2 %v10425_v42  ;;  %4041 = vmatmul.bf16.vlgmr.msrb.gmra.mxu3 %v10427_v10  ;;  %v12843_v42 = vld [vmem:[#allocation269_spill] sm:$0xff]  ;;  %v3765_v10 = vadd.f32 %v3764_v25, %v3752_v29 }
 0x38d   : > { %v12855_v29 = vld [vmem:[#allocation281_spill] sm:$0xff] }
 0x38e   : > { %4054 = vmatpush.bf16.msra.mxu0 %v12836_v32  ;;  %4067 = vmatpush.bf16.msra.mxu1 %v12837_v61  ;;  %v3812_v1 = vmul.f32 0.5, %v3765_v10  ;;  %v3753_v62 = vpop.f32.mrf.mxu0  ;;  %v3766_v5 = vpop.f32.mrf.mxu1  ;;  %v12850_v61 = vld [vmem:[#allocation276_spill] sm:$0xff]  ;;  %v12856_v10 = vld [vmem:[#allocation282_spill] sm:$0xff] }
 0x38f   : > { %4080 = vmatpush.bf16.msra.mxu2 %v12838_v6  ;;  %4093 = vmatpush.bf16.msra.mxu3 %v12839_v59  ;;  %v3777_v21 = vpop.f32.mrf.mxu2  ;;  %v3790_v9 = vpop.f32.mrf.mxu3  ;;  %v12864_v5 = vld [vmem:[#allocation290_spill] sm:$0xff] }
 0x390   : > { %8223 = vtanh.f32 %v3812_v1  ;;  %v3778_v12 = vadd.f32 %v3777_v21, %v3572_v11  ;;  %v12857_v11 = vld [vmem:[#allocation283_spill] sm:$0xff]  ;;  %v12860_v21 = vld [vmem:[#allocation286_spill] sm:$0xff] }
 0x392   : > { %4055 = vmatpush.bf16.msra.mxu0 %v12840_v7  ;;  %4068 = vmatpush.bf16.msra.mxu1 %v12841_v46  ;;  %v3791_v32 = vadd.f32 %v3790_v9, %v3778_v12  ;;  %v12853_v7 = vld [vmem:[#allocation279_spill] sm:$0xff]  ;;  %v12854_v46 = vld [vmem:[#allocation280_spill] sm:$0xff] }
 0x393   : > { %4081 = vmatpush.bf16.msra.mxu2 %v12842_v47  ;;  %4094 = vmatpush.bf16.msra.mxu3 %v12843_v42  ;;  %v12861_v12 = vld [vmem:[#allocation287_spill] sm:$0xff] }
 0x394   : > { %v3813_v6 = vmul.f32 0.5, %v3791_v32 }
 0x396   : > { %4056 = vmatpush.bf16.msra.mxu0 %v12844_v51  ;;  %4069 = vmatpush.bf16.msra.mxu1 %v12845_v0  ;;  %v8224_v59 = vpop.eup %8223  ;;  %8225 = vtanh.f32 %v3813_v6  ;;  %v12858_v51 = vld [vmem:[#allocation284_spill] sm:$0xff]  ;;  %v12859_v0 = vld [vmem:[#allocation285_spill] sm:$0xff] }
 0x397   : > { %4082 = vmatpush.bf16.msra.mxu2 %v12846_v40  ;;  %4095 = vmatpush.bf16.msra.mxu3 %v12847_v49  ;;  %v3779_v25 = vpop.f32.mrf.mxu2  ;;  %v3792_v47 = vpop.f32.mrf.mxu3  ;;  %8227 = vtanh.f32 %v10544_v58  ;;  %v3816_v42 = vmul.f32 0.5, %v8224_v59  ;;  %v12866_v59 = vld [vmem:[#allocation292_spill] sm:$0xff] }
 0x398   : > { %8229 = vtanh.f32 %v10553_v28 }
 0x399   : > { %v3818_v40 = vadd.f32 0.5, %v3816_v42  ;;  %v12870_v42 = vld [vmem:[#allocation296_spill] sm:$0xff] }
 0x39a   : > { %4057 = vmatpush.bf16.msra.mxu0 %v12848_v36  ;;  %4070 = vmatpush.bf16.msra.mxu1 %v12849_v63  ;;  %v12862_v36 = vld [vmem:[#allocation288_spill] sm:$0xff]  ;;  %v12863_v63 = vld [vmem:[#allocation289_spill] sm:$0xff] }
 0x39b   : > { %4083 = vmatpush.bf16.msra.mxu2 %v12850_v61  ;;  %4096 = vmatpush.bf16.msra.mxu3 %v12851_v50  ;;  %v12865_v61 = vld [vmem:[#allocation291_spill] sm:$0xff] }
 0x39c   : > { %v8226_v1 = vpop.eup %8225 }
 0x39d   : > { %v3817_v49 = vmul.f32 0.5, %v8226_v1  ;;  %v8228_v9 = vpop.eup %8227  ;;  %v12873_v1 = vld [vmem:[#allocation299_spill] sm:$0xff] }
 0x39e   : > { %4058 = vmatpush.bf16.msra.mxu0 %v12852_v57  ;;  %4071 = vmatpush.bf16.msra.mxu1 %v12853_v7  ;;  %v8230_v32 = vpop.eup %8229  ;;  %v10601_v50 = vmul.f32 %v8228_v9, %v3818_v40  ;;  %v12867_v57 = vld [vmem:[#allocation293_spill] sm:$0xff] }
 0x39f   : > { %4084 = vmatpush.bf16.msra.mxu2 %v12854_v46  ;;  %4097 = vmatpush.bf16.msra.mxu3 %v12855_v29  ;;  %v3819_v62 = vadd.f32 0.5, %v3817_v49  ;;  %v12868_v46 = vld [vmem:[#allocation294_spill] sm:$0xff]  ;;  %v12869_v29 = vld [vmem:[#allocation295_spill] sm:$0xff] }
 0x3a1   : > { %v10603_v6 = vmul.f32 %v8230_v32, %v3819_v62  ;;  %v12876_v62 = vld [vmem:[#allocation302_spill] sm:$0xff]  ;;  %v12879_v32 = vld [vmem:[#allocation305_spill] sm:$0xff] }
 0x3a2   : > { %4059 = vmatpush.bf16.msra.mxu0 %v12856_v10  ;;  %4072 = vmatpush.bf16.msra.mxu1 %v12857_v11  ;;  %v12871_v10 = vld [vmem:[#allocation297_spill] sm:$0xff] }
 0x3a3   : > { %4085 = vmatpush.bf16.msra.mxu2 %v12858_v51  ;;  %4098 = vmatpush.bf16.msra.mxu3 %v12859_v0  ;;  %v3830_v7 = vpack.c.bf16 %v10603_v6, %v10601_v50  ;;  %v12872_v0 = vld [vmem:[#allocation298_spill] sm:$0xff] }
 0x3a5   : > { %v4047_v25 = vunpack.c.l.b16 %v3830_v7  ;;  %v4048_v47 = vunpack.c.h.b16 %v3830_v7  ;;  %4306 = vst [vmem:[#allocation2] sm:$0xff] %v3830_v7  ;;  %v12881_v7 = vld [vmem:[#allocation307_spill] sm:$0xff] }
 0x3a6   : > { %4060 = vmatpush.bf16.msra.mxu0 %v12860_v21  ;;  %4073 = vmatpush.bf16.msra.mxu1 %v12861_v12  ;;  %v3847_v40 = vpop.f32.mrf.mxu0  ;;  %v3860_v49 = vpop.f32.mrf.mxu1  ;;  %v12874_v21 = vld [vmem:[#allocation300_spill] sm:$0xff]  ;;  %v12875_v12 = vld [vmem:[#allocation301_spill] sm:$0xff] }
 0x3a7   : > { %4086 = vmatpush.bf16.msra.mxu2 %v12862_v36  ;;  %4099 = vmatpush.bf16.msra.mxu3 %v12863_v63  ;;  %v10613_v11 = vpack.c.b16 %v4047_v25, %v4047_v25  ;;  %v10615_v51 = vpack.c.b16 %v4048_v47, %v4048_v47  ;;  %v10621_v9 = vadd.f32 %v3860_v49, %v3847_v40  ;;  %v12877_v36 = vld [vmem:[#allocation303_spill] sm:$0xff]  ;;  %v12878_v63 = vld [vmem:[#allocation304_spill] sm:$0xff]  ;;  %v12883_v47 = vld [vmem:[#allocation309_spill] sm:$0xff] }
 0x3a8   : > { %v12882_v25 = vld [vmem:[#allocation308_spill] sm:$0xff] }
 0x3a9   : > { %4061 = vmatmul.bf16.vlgmr.msra.gmra.mxu0 %v10613_v11  ;;  %4074 = vmatmul.bf16.vlgmr.msra.gmra.mxu1 %v10615_v51 }
 0x3aa   : > { %4105 = vmatpush.bf16.msrb.mxu0 %v12864_v5  ;;  %4118 = vmatpush.bf16.msrb.mxu1 %v12865_v61 }
 0x3ab   : > { %4131 = vmatpush.bf16.msrb.mxu2 %v12866_v59  ;;  %4144 = vmatpush.bf16.msrb.mxu3 %v12867_v57  ;;  %v12880_v57 = vld [vmem:[#allocation306_spill] sm:$0xff] }
 0x3ac   : > { %4087 = vmatmul.bf16.vlgmr.msra.gmra.mxu2 %v10613_v11  ;;  %4100 = vmatmul.bf16.vlgmr.msra.gmra.mxu3 %v10615_v51 }
 0x3ae   : > { %4106 = vmatpush.bf16.msrb.mxu0 %v12868_v46  ;;  %4119 = vmatpush.bf16.msrb.mxu1 %v12869_v29  ;;  %v3849_v46 = vpop.f32.mrf.mxu0  ;;  %v3862_v29 = vpop.f32.mrf.mxu1 }
 0x3af   : > { %4132 = vmatpush.bf16.msrb.mxu2 %v12870_v42  ;;  %4145 = vmatpush.bf16.msrb.mxu3 %v12871_v10  ;;  %v3873_v5 = vpop.f32.mrf.mxu2  ;;  %v3886_v61 = vpop.f32.mrf.mxu3  ;;  %v12884_v42 = vld [vmem:[#allocation310_spill] sm:$0xff]  ;;  %v12885_v10 = vld [vmem:[#allocation311_spill] sm:$0xff]  ;;  %v12898_v46 = vld [vmem:[#allocation324_spill] sm:$0xff] }
 0x3b0   : > { %v10631_v59 = vadd.f32 %v3886_v61, %v3873_v5  ;;  %v12894_v5 = vld [vmem:[#allocation320_spill] sm:$0xff]  ;;  %v12895_v61 = vld [vmem:[#allocation321_spill] sm:$0xff] }
 0x3b1   : > { %v12899_v29 = vld [vmem:[#allocation325_spill] sm:$0xff] }
 0x3b2   : > { %4107 = vmatpush.bf16.msrb.mxu0 %v12872_v0  ;;  %4120 = vmatpush.bf16.msrb.mxu1 %v12873_v1  ;;  %v12886_v0 = vld [vmem:[#allocation312_spill] sm:$0xff]  ;;  %v12887_v1 = vld [vmem:[#allocation313_spill] sm:$0xff] }
 0x3b3   : > { %4133 = vmatpush.bf16.msrb.mxu2 %v12874_v21  ;;  %4146 = vmatpush.bf16.msrb.mxu3 %v12875_v12  ;;  %v12888_v21 = vld [vmem:[#allocation314_spill] sm:$0xff]  ;;  %v12889_v12 = vld [vmem:[#allocation315_spill] sm:$0xff] }
 0x3b6   : > { %4108 = vmatpush.bf16.msrb.mxu0 %v12876_v62  ;;  %4121 = vmatpush.bf16.msrb.mxu1 %v12877_v36  ;;  %v12890_v62 = vld [vmem:[#allocation316_spill] sm:$0xff]  ;;  %v12891_v36 = vld [vmem:[#allocation317_spill] sm:$0xff] }
 0x3b7   : > { %4134 = vmatpush.bf16.msrb.mxu2 %v12878_v63  ;;  %4147 = vmatpush.bf16.msrb.mxu3 %v12879_v32  ;;  %v3875_v40 = vpop.f32.mrf.mxu2  ;;  %v3888_v49 = vpop.f32.mrf.mxu3  ;;  %v12892_v63 = vld [vmem:[#allocation318_spill] sm:$0xff]  ;;  %v12893_v32 = vld [vmem:[#allocation319_spill] sm:$0xff] }
 0x3ba   : > { %4109 = vmatpush.bf16.msrb.mxu0 %v12880_v57  ;;  %4122 = vmatpush.bf16.msrb.mxu1 %v12881_v7  ;;  %v12896_v57 = vld [vmem:[#allocation322_spill] sm:$0xff]  ;;  %v12897_v7 = vld [vmem:[#allocation323_spill] sm:$0xff] }
 0x3bb   : > { %4135 = vmatpush.bf16.msrb.mxu2 %v12882_v25  ;;  %4148 = vmatpush.bf16.msrb.mxu3 %v12883_v47  ;;  %v12900_v25 = vld [vmem:[#allocation326_spill] sm:$0xff]  ;;  %v12901_v47 = vld [vmem:[#allocation327_spill] sm:$0xff] }
 0x3be   : > { %4110 = vmatpush.bf16.msrb.mxu0 %v12884_v42  ;;  %4123 = vmatpush.bf16.msrb.mxu1 %v12885_v10  ;;  %v12902_v42 = vld [vmem:[#allocation328_spill] sm:$0xff]  ;;  %v12903_v10 = vld [vmem:[#allocation329_spill] sm:$0xff] }
 0x3bf   : > { %4136 = vmatpush.bf16.msrb.mxu2 %v12886_v0  ;;  %4149 = vmatpush.bf16.msrb.mxu3 %v12887_v1  ;;  %v12904_v0 = vld [vmem:[#allocation330_spill] sm:$0xff]  ;;  %v12905_v1 = vld [vmem:[#allocation331_spill] sm:$0xff] }
 0x3c2   : > { %4111 = vmatpush.bf16.msrb.mxu0 %v12888_v21  ;;  %4124 = vmatpush.bf16.msrb.mxu1 %v12889_v12  ;;  %v12906_v21 = vld [vmem:[#allocation332_spill] sm:$0xff]  ;;  %v12907_v12 = vld [vmem:[#allocation333_spill] sm:$0xff] }
 0x3c3   : > { %4137 = vmatpush.bf16.msrb.mxu2 %v12890_v62  ;;  %4150 = vmatpush.bf16.msrb.mxu3 %v12891_v36  ;;  %v12908_v36 = vld [vmem:[#allocation334_spill] sm:$0xff] }
 0x3c6   : > { %4112 = vmatpush.bf16.msrb.mxu0 %v12892_v63  ;;  %4125 = vmatpush.bf16.msrb.mxu1 %v12893_v32  ;;  %v3899_v40 = vpop.f32.mrf.mxu0  ;;  %v3912_v49 = vpop.f32.mrf.mxu1  ;;  %v12909_v63 = vld [vmem:[#allocation335_spill] sm:$0xff]  ;;  %v12910_v32 = vld [vmem:[#allocation336_spill] sm:$0xff] }
 0x3c7   : > { %4138 = vmatpush.bf16.msrb.mxu2 %v12894_v5  ;;  %4151 = vmatpush.bf16.msrb.mxu3 %v12895_v61  ;;  %v10665_v62 = vadd.f32 %v3912_v49, %v3899_v40  ;;  %v12911_v5 = vld [vmem:[#allocation337_spill] sm:$0xff]  ;;  %v12918_v40 = vld [vmem:[#allocation344_spill] sm:$0xff] }
 0x3c8   : > { %v12919_v49 = vld [vmem:[#allocation345_spill] sm:$0xff] }
 0x3c9   : > { %4113 = vmatmul.bf16.vlgmr.msrb.gmra.mxu0 %v10613_v11  ;;  %4126 = vmatmul.bf16.vlgmr.msrb.gmra.mxu1 %v10615_v51 }
 0x3ca   : > { %4157 = vmatpush.bf16.msra.mxu0 %v12896_v57  ;;  %4170 = vmatpush.bf16.msra.mxu1 %v12897_v7 }
 0x3cb   : > { %4183 = vmatpush.bf16.msra.mxu2 %v12898_v46  ;;  %4196 = vmatpush.bf16.msra.mxu3 %v12899_v29  ;;  %v12912_v46 = vld [vmem:[#allocation338_spill] sm:$0xff]  ;;  %v12913_v29 = vld [vmem:[#allocation339_spill] sm:$0xff] }
 0x3cc   : > { %4139 = vmatmul.bf16.vlgmr.msrb.gmra.mxu2 %v10613_v11  ;;  %4152 = vmatmul.bf16.vlgmr.msrb.gmra.mxu3 %v10615_v51 }
 0x3ce   : > { %4158 = vmatpush.bf16.msra.mxu0 %v12900_v25  ;;  %4171 = vmatpush.bf16.msra.mxu1 %v12901_v47  ;;  %v3901_v25 = vpop.f32.mrf.mxu0  ;;  %v3914_v47 = vpop.f32.mrf.mxu1 }
 0x3cf   : > { %4184 = vmatpush.bf16.msra.mxu2 %v12902_v42  ;;  %4197 = vmatpush.bf16.msra.mxu3 %v12903_v10  ;;  %v3925_v61 = vpop.f32.mrf.mxu2  ;;  %v3938_v57 = vpop.f32.mrf.mxu3  ;;  %v12914_v42 = vld [vmem:[#allocation340_spill] sm:$0xff]  ;;  %v12915_v10 = vld [vmem:[#allocation341_spill] sm:$0xff] }
 0x3d0   : > { %v10671_v7 = vadd.f32 %v3938_v57, %v3925_v61  ;;  %v12924_v61 = vld [vmem:[#allocation352_spill] sm:$0xff]  ;;  %v12925_v57 = vld [vmem:[#allocation353_spill] sm:$0xff] }
 0x3d1   : > { %v12928_v25 = vld [vmem:[#allocation356_spill] sm:$0xff]  ;;  %v12929_v47 = vld [vmem:[#allocation357_spill] sm:$0xff] }
 0x3d2   : > { %4159 = vmatpush.bf16.msra.mxu0 %v12904_v0  ;;  %4172 = vmatpush.bf16.msra.mxu1 %v12905_v1  ;;  %v12916_v0 = vld [vmem:[#allocation342_spill] sm:$0xff]  ;;  %v12917_v1 = vld [vmem:[#allocation343_spill] sm:$0xff] }
 0x3d3   : > { %4185 = vmatpush.bf16.msra.mxu2 %v12906_v21  ;;  %4198 = vmatpush.bf16.msra.mxu3 %v12907_v12 }
 0x3d6   : > { %4160 = vmatpush.bf16.msra.mxu0 %v12908_v36  ;;  %4173 = vmatpush.bf16.msra.mxu1 %v12909_v63  ;;  %v12920_v36 = vld [vmem:[#allocation346_spill] sm:$0xff]  ;;  %v12921_v63 = vld [vmem:[#allocation347_spill] sm:$0xff] }
 0x3d7   : > { %4186 = vmatpush.bf16.msra.mxu2 %v12910_v32  ;;  %4199 = vmatpush.bf16.msra.mxu3 %v12911_v5  ;;  %v3927_v21 = vpop.f32.mrf.mxu2  ;;  %v3940_v12 = vpop.f32.mrf.mxu3  ;;  %v12922_v32 = vld [vmem:[#allocation350_spill] sm:$0xff]  ;;  %v12923_v5 = vld [vmem:[#allocation351_spill] sm:$0xff] }
 0x3da   : > { %4161 = vmatpush.bf16.msra.mxu0 %v12912_v46  ;;  %4174 = vmatpush.bf16.msra.mxu1 %v12913_v29  ;;  %v12926_v46 = vld [vmem:[#allocation354_spill] sm:$0xff]  ;;  %v12927_v29 = vld [vmem:[#allocation355_spill] sm:$0xff] }
 0x3db   : > { %4187 = vmatpush.bf16.msra.mxu2 %v12914_v42  ;;  %4200 = vmatpush.bf16.msra.mxu3 %v12915_v10  ;;  %v12930_v42 = vld [vmem:[#allocation358_spill] sm:$0xff]  ;;  %v12931_v10 = vld [vmem:[#allocation359_spill] sm:$0xff] }
 0x3de   : > { %4162 = vmatpush.bf16.msra.mxu0 %v12916_v0  ;;  %4175 = vmatpush.bf16.msra.mxu1 %v12917_v1  ;;  %v12932_v0 = vld [vmem:[#allocation360_spill] sm:$0xff]  ;;  %v12933_v1 = vld [vmem:[#allocation361_spill] sm:$0xff] }
 0x3df   : > { %4188 = vmatpush.bf16.msra.mxu2 %v12918_v40  ;;  %4201 = vmatpush.bf16.msra.mxu3 %v12919_v49  ;;  %v12934_v40 = vld [vmem:[#allocation362_spill] sm:$0xff]  ;;  %v12935_v49 = vld [vmem:[#allocation363_spill] sm:$0xff] }
 0x3e2   : > { %4163 = vmatpush.bf16.msra.mxu0 %v12920_v36  ;;  %4176 = vmatpush.bf16.msra.mxu1 %v12921_v63  ;;  %v12936_v36 = vld [vmem:[#allocation364_spill] sm:$0xff]  ;;  %v12937_v63 = vld [vmem:[#allocation365_spill] sm:$0xff] }
 0x3e3   : > { %4189 = vmatpush.bf16.msra.mxu2 %v10063_v41  ;;  %4202 = vmatpush.bf16.msra.mxu3 %v10066_v52 }
 0x3e6   : > { %4164 = vmatpush.bf16.msra.mxu0 %v12922_v32  ;;  %4177 = vmatpush.bf16.msra.mxu1 %v12923_v5  ;;  %v3951_v21 = vpop.f32.mrf.mxu0  ;;  %v3964_v12 = vpop.f32.mrf.mxu1  ;;  %v12938_v5 = vld [vmem:[#allocation366_spill] sm:$0xff] }
 0x3e7   : > { %4190 = vmatpush.bf16.msra.mxu2 %v12924_v61  ;;  %4203 = vmatpush.bf16.msra.mxu3 %v12925_v57  ;;  %v10705_v32 = vadd.f32 %v3964_v12, %v3951_v21  ;;  %v12939_v61 = vld [vmem:[#allocation367_spill] sm:$0xff]  ;;  %v12940_v57 = vld [vmem:[#allocation368_spill] sm:$0xff]  ;;  %v12946_v21 = vld [vmem:[#allocation374_spill] sm:$0xff] }
 0x3e8   : > { %v12947_v12 = vld [vmem:[#allocation375_spill] sm:$0xff] }
 0x3e9   : > { %4165 = vmatmul.bf16.vlgmr.msra.gmra.mxu0 %v10613_v11  ;;  %4178 = vmatmul.bf16.vlgmr.msra.gmra.mxu1 %v10615_v51 }
 0x3ea   : > { %4209 = vmatpush.bf16.msrb.mxu0 %v12926_v46  ;;  %4222 = vmatpush.bf16.msrb.mxu1 %v12927_v29  ;;  %v12941_v46 = vld [vmem:[#allocation369_spill] sm:$0xff] }
 0x3eb   : > { %4235 = vmatpush.bf16.msrb.mxu2 %v12928_v25  ;;  %4248 = vmatpush.bf16.msrb.mxu3 %v12929_v47 }
 0x3ec   : > { %4191 = vmatmul.bf16.vlgmr.msra.gmra.mxu2 %v10613_v11  ;;  %4204 = vmatmul.bf16.vlgmr.msra.gmra.mxu3 %v10615_v51 }
 0x3ee   : > { %4210 = vmatpush.bf16.msrb.mxu0 %v12930_v42  ;;  %4223 = vmatpush.bf16.msrb.mxu1 %v12931_v10  ;;  %v12942_v42 = vld [vmem:[#allocation370_spill] sm:$0xff]  ;;  %v12943_v10 = vld [vmem:[#allocation371_spill] sm:$0xff] }
 0x3ef   : > { %4236 = vmatpush.bf16.msrb.mxu2 %v12932_v0  ;;  %4249 = vmatpush.bf16.msrb.mxu3 %v12933_v1  ;;  %v3977_v29 = vpop.f32.mrf.mxu2  ;;  %v3990_v25 = vpop.f32.mrf.mxu3 }
 0x3f0   : > { %v10711_v47 = vadd.f32 %v3990_v25, %v3977_v29  ;;  %v3953_v0 = vpop.f32.mrf.mxu0  ;;  %v3966_v1 = vpop.f32.mrf.mxu1  ;;  %v12952_v29 = vld [vmem:[#allocation382_spill] sm:$0xff]  ;;  %v12953_v25 = vld [vmem:[#allocation383_spill] sm:$0xff] }
 0x3f2   : > { %4211 = vmatpush.bf16.msrb.mxu0 %v12934_v40  ;;  %4224 = vmatpush.bf16.msrb.mxu1 %v12935_v49  ;;  %v12944_v40 = vld [vmem:[#allocation372_spill] sm:$0xff]  ;;  %v12945_v49 = vld [vmem:[#allocation373_spill] sm:$0xff] }
 0x3f3   : > { %4237 = vmatpush.bf16.msrb.mxu2 %v12936_v36  ;;  %4250 = vmatpush.bf16.msrb.mxu3 %v12937_v63 }
 0x3f6   : > { %4212 = vmatpush.bf16.msrb.mxu0 %v12938_v5  ;;  %4225 = vmatpush.bf16.msrb.mxu1 %v12939_v61  ;;  %v12948_v5 = vld [vmem:[#allocation378_spill] sm:$0xff]  ;;  %v12949_v61 = vld [vmem:[#allocation379_spill] sm:$0xff] }
 0x3f7   : > { %4238 = vmatpush.bf16.msrb.mxu2 %v12940_v57  ;;  %4251 = vmatpush.bf16.msrb.mxu3 %v12941_v46  ;;  %v3979_v36 = vpop.f32.mrf.mxu2  ;;  %v3992_v63 = vpop.f32.mrf.mxu3  ;;  %v12950_v57 = vld [vmem:[#allocation380_spill] sm:$0xff]  ;;  %v12951_v46 = vld [vmem:[#allocation381_spill] sm:$0xff] }
 0x3fa   : > { %4213 = vmatpush.bf16.msrb.mxu0 %v12942_v42  ;;  %4226 = vmatpush.bf16.msrb.mxu1 %v12943_v10  ;;  %v12954_v42 = vld [vmem:[#allocation384_spill] sm:$0xff]  ;;  %v12955_v10 = vld [vmem:[#allocation385_spill] sm:$0xff] }
 0x3fb   : > { %4239 = vmatpush.bf16.msrb.mxu2 %v12944_v40  ;;  %4252 = vmatpush.bf16.msrb.mxu3 %v12945_v49 }
 0x3fe   : > { %4214 = vmatpush.bf16.msrb.mxu0 %v12946_v21  ;;  %4227 = vmatpush.bf16.msrb.mxu1 %v12947_v12 }
 0x3ff   : > { %4240 = vmatpush.bf16.msrb.mxu2 %v10155_v20  ;;  %4253 = vmatpush.bf16.msrb.mxu3 %v10158_v14 }
 0x402   : > { %4215 = vmatpush.bf16.msrb.mxu0 %v12948_v5  ;;  %4228 = vmatpush.bf16.msrb.mxu1 %v12949_v61 }
 0x403   : > { %4241 = vmatpush.bf16.msrb.mxu2 %v12950_v57  ;;  %4254 = vmatpush.bf16.msrb.mxu3 %v12951_v46 }
 0x406   : > { %4216 = vmatpush.bf16.msrb.mxu0 %v12952_v29  ;;  %4229 = vmatpush.bf16.msrb.mxu1 %v12953_v25  ;;  %v4003_v0 = vpop.f32.mrf.mxu0  ;;  %v4016_v1 = vpop.f32.mrf.mxu1 }
 0x407   : > { %4242 = vmatpush.bf16.msrb.mxu2 %v12954_v42  ;;  %4255 = vmatpush.bf16.msrb.mxu3 %v12955_v10  ;;  %v10733_v40 = vadd.f32 %v4016_v1, %v4003_v0 }
 0x409   : > { %4217 = vmatmul.bf16.vlgmr.msrb.gmra.mxu0 %v10613_v11  ;;  %4230 = vmatmul.bf16.vlgmr.msrb.gmra.mxu1 %v10615_v51 }
 0x40a   : > { %4243 = vmatmul.bf16.vlgmr.msrb.gmra.mxu2 %v10613_v11  ;;  %4256 = vmatmul.bf16.vlgmr.msrb.gmra.mxu3 %v10615_v51 }
 0x40e   : > { %v4005_v36 = vpop.f32.mrf.mxu0  ;;  %v4018_v63 = vpop.f32.mrf.mxu1 }
 0x40f   : > { %v4029_v49 = vpop.f32.mrf.mxu2  ;;  %v4042_v21 = vpop.f32.mrf.mxu3 }
 0x410   : > { %v10735_v12 = vadd.f32 %v4042_v21, %v4029_v49 }
 0x417   : > { %v4031_v5 = vpop.f32.mrf.mxu2  ;;  %v4044_v61 = vpop.f32.mrf.mxu3 }
 0x426   : > { %v4062_v57 = vpop.f32.mrf.mxu0  ;;  %v4075_v46 = vpop.f32.mrf.mxu1 }
 0x427   : > { %v4063_v36 = vadd.f32 %v4062_v57, %v10621_v9  ;;  %v12958_v9 = vld [vmem:[#allocation388_spill] sm:$0xff] }
 0x429   : > { %v4076_v41 = vadd.f32 %v4075_v46, %v4063_v36 }
 0x42e   : > { %v4064_v11 = vpop.f32.mrf.mxu0  ;;  %v4077_v42 = vpop.f32.mrf.mxu1 }
 0x42f   : > { %v4088_v29 = vpop.f32.mrf.mxu2  ;;  %v4101_v25 = vpop.f32.mrf.mxu3 }
 0x430   : > { %v4089_v42 = vadd.f32 %v4088_v29, %v10631_v59 }
 0x437   : > { %v4090_v51 = vpop.f32.mrf.mxu2  ;;  %v4103_v10 = vpop.f32.mrf.mxu3 }
 0x438   : > { %v12956_v51 = vld [vmem:[#allocation386_spill] sm:$0xff] }
 0x439   : > { %v4261_v10 = vadd.f32 %v4076_v41, %v12956_v51 }
 0x446   : > { %v4114_v14 = vpop.f32.mrf.mxu0  ;;  %v4127_v0 = vpop.f32.mrf.mxu1 }
 0x447   : > { %v4115_v21 = vadd.f32 %v4114_v14, %v10665_v62 }
 0x449   : > { %v4128_v63 = vadd.f32 %v4127_v0, %v4115_v21 }
 0x44b   : > { %v4263_v11 = vadd.f32 %v4128_v63, %v10204_v34 }
 0x44d   : > { %v4277_v37 = vmul.f32 0.5, %v4263_v11  ;;  %v3577_v11 = vld [vmem:[#allocation3] sm:$0xff] }
 0x44e   : > { %v4116_v52 = vpop.f32.mrf.mxu0  ;;  %v4129_v49 = vpop.f32.mrf.mxu1 }
 0x44f   : > { %v4140_v1 = vpop.f32.mrf.mxu2  ;;  %v4153_v20 = vpop.f32.mrf.mxu3  ;;  %v4102_v52 = vadd.f32 %v4101_v25, %v4089_v42  ;;  %v4269_v49 = vmul.f32 0.5, %v4261_v10  ;;  %8231 = vtanh.f32 %v4277_v37 }
 0x450   : > { %v4141_v45 = vadd.f32 %v4140_v1, %v10671_v7 }
 0x451   : > { %v4262_v62 = vadd.f32 %v4102_v52, %v12958_v9  ;;  %8233 = vtanh.f32 %v4269_v49 }
 0x452   : > { %v4154_v38 = vadd.f32 %v4153_v20, %v4141_v45  ;;  %v12959_v45 = vld [vmem:[#allocation389_spill] sm:$0xff] }
 0x453   : > { %v4270_v1 = vmul.f32 0.5, %v4262_v62 }
 0x454   : > { %v4264_v14 = vadd.f32 %v4154_v38, %v12957_v33 }
 0x455   : > { %v8232_v21 = vpop.eup %8231 }
 0x456   : > { %v4278_v57 = vmul.f32 0.5, %v4264_v14  ;;  %v4281_v29 = vmul.f32 0.5, %v8232_v21 }
 0x457   : > { %v4142_v5 = vpop.f32.mrf.mxu2  ;;  %v4155_v61 = vpop.f32.mrf.mxu3 }
 0x458   : > { %8235 = vtanh.f32 %v4278_v57  ;;  %v8234_v41 = vpop.eup %8233  ;;  %v4283_v61 = vadd.f32 0.5, %v4281_v29 }
 0x459   : > { %8237 = vtanh.f32 %v4270_v1  ;;  %v4273_v38 = vmul.f32 0.5, %v8234_v41 }
 0x45a   : > { %v4295_v14 = vmul.f32 %v4283_v61, %v3577_v11 }
 0x45b   : > { %v4275_v51 = vadd.f32 0.5, %v4273_v38 }
 0x45e   : > { %v8236_v5 = vpop.eup %8235 }
 0x45f   : > { %v8238_v42 = vpop.eup %8237  ;;  %v4282_v49 = vmul.f32 0.5, %v8236_v5 }
 0x460   : > { %v4274_v62 = vmul.f32 0.5, %v8238_v42 }
 0x462   : > { %v4276_v1 = vadd.f32 0.5, %v4274_v62 }
 0x466   : > { %v4166_v46 = vpop.f32.mrf.mxu0  ;;  %v4179_v0 = vpop.f32.mrf.mxu1 }
 0x467   : > { %v4167_v7 = vadd.f32 %v4166_v46, %v10705_v32 }
 0x469   : > { %v4180_v59 = vadd.f32 %v4179_v0, %v4167_v7  ;;  %v3578_v7 = vld [vmem:[#allocation3 + $0x18] sm:$0xff] }
 0x46b   : > { %v4265_v20 = vadd.f32 %v4180_v59, %v12959_v45 }
 0x46d   : > { %8239 = vtanh.f32 %v4265_v20 }
 0x46e   : > { %v4168_v36 = vpop.f32.mrf.mxu0  ;;  %v4181_v63 = vpop.f32.mrf.mxu1 }
 0x46f   : > { %v4192_v33 = vpop.f32.mrf.mxu2  ;;  %v4205_v37 = vpop.f32.mrf.mxu3 }
 0x470   : > { %v4193_v25 = vadd.f32 %v4192_v33, %v10711_v47  ;;  %v4284_v47 = vadd.f32 0.5, %v4282_v49 }
 0x472   : > { %v4206_v32 = vadd.f32 %v4205_v37, %v4193_v25  ;;  %v4296_v59 = vmul.f32 %v4284_v47, %v3578_v7 }
 0x473   : > { %v8240_v52 = vpop.eup %8239 }
 0x474   : > { %v4266_v10 = vadd.f32 %v4206_v32, %v10228_v53  ;;  %v4297_v9 = vmul.f32 %v8240_v52, %v4275_v51 }
 0x476   : > { %8241 = vtanh.f32 %v4266_v10  ;;  %v4299_v0 = vadd.f32 %v4297_v9, %v4295_v14 }
 0x477   : > { %v4194_v57 = vpop.f32.mrf.mxu2  ;;  %v4207_v46 = vpop.f32.mrf.mxu3 }
 0x478   : > { %4310 = vst [vmem:[#allocation3] sm:$0xff] %v4299_v0 }
 0x47c   : > { %v8242_v21 = vpop.eup %8241 }
 0x47d   : > { %v4298_v41 = vmul.f32 %v8242_v21, %v4276_v1 }
 0x47f   : > { %v4300_v45 = vadd.f32 %v4298_v41, %v4296_v59 }
 0x481   : > { %4311 = vst [vmem:[#allocation3 + $0x18] sm:$0xff] %v4300_v45 }
 0x486   : > { %v4218_v20 = vpop.f32.mrf.mxu0  ;;  %v4231_v29 = vpop.f32.mrf.mxu1 }
 0x487   : > { %v4219_v33 = vadd.f32 %v4218_v20, %v10733_v40 }
 0x489   : > { %v4232_v37 = vadd.f32 %v4231_v29, %v4219_v33 }
 0x48b   : > { %v4267_v38 = vadd.f32 %v4232_v37, %v10233_v30 }
 0x48d   : > { %v4287_v25 = vmul.f32 0.5, %v4267_v38  ;;  %v4244_v36 = vpop.f32.mrf.mxu2  ;;  %v4257_v63 = vpop.f32.mrf.mxu3 }
 0x48e   : > { %v4245_v5 = vadd.f32 %v4244_v36, %v10735_v12  ;;  %v4220_v61 = vpop.f32.mrf.mxu0  ;;  %v4233_v32 = vpop.f32.mrf.mxu1 }
 0x48f   : > { %8243 = vtanh.f32 %v4287_v25 }
 0x490   : > { %v4258_v11 = vadd.f32 %v4257_v63, %v4245_v5  ;;  %8245 = vtanh.f32 %v4299_v0 }
 0x492   : > { %v4268_v42 = vadd.f32 %v4258_v11, %v10238_v23 }
 0x494   : > { %v4288_v51 = vmul.f32 0.5, %v4268_v42 }
 0x495   : > { %v8244_v10 = vpop.eup %8243  ;;  %v4246_v52 = vpop.f32.mrf.mxu2 }
 0x496   : > { %v4259_v40 = vpop.f32.mrf.mxu3  ;;  %v4291_v49 = vmul.f32 0.5, %v8244_v10  ;;  %8247 = vtanh.f32 %v4288_v51  ;;  %v8246_v9 = vpop.eup %8245 }
 0x497   : > { %8249 = vtanh.f32 %v4300_v45 }
 0x498   : > { %v4293_v14 = vadd.f32 0.5, %v4291_v49 }
 0x49a   : > { %v4303_v62 = vmul.f32 %v8246_v9, %v4293_v14 }
 0x49c   : > { %v8248_v57 = vpop.eup %8247 }
 0x49d   : > { %v4292_v12 = vmul.f32 0.5, %v8248_v57  ;;  %v8250_v47 = vpop.eup %8249 }
 0x49f   : > { %v4294_v46 = vadd.f32 0.5, %v4292_v12 }
 0x4a1   : > { %v4304_v7 = vmul.f32 %v8250_v47, %v4294_v46 }
 0x4a2   : > { %4318 = sbr.rel (%p7631_p4) target bundleno = 1199 (0x4af), region = 88 }
 0x4a3   : > { %v4305_v1 = vpack.c.bf16 %v4304_v7, %v4303_v62 }
 0x4a5   : > { %4309 = vst [vmem:[#allocation2 + $0x8] sm:$0xff] %v4305_v1 }
 0x4a6   : > { %7630 = vst [vmem:[%s8912_s2 + $0x8] sm:$0xff] %v4305_v1 }
 0x4a7   : > { %4319 = vst [vmem:[#allocation17] sm:$0xff] %v10601_v50 }
 0x4a8   : > { %4320 = vst [vmem:[#allocation17 + $0x8] sm:$0xff] %v10603_v6 }
 0x4a9   : > { %4322 = vst [vmem:[#allocation17 + $0x10] sm:$0xff] %v4303_v62 }
 0x4aa   : > { %4323 = vst [vmem:[#allocation17 + $0x18] sm:$0xff] %v4304_v7 }
 0x4ab   : > { %4324 = vst [vmem:[#allocation19] sm:$0xff] %v10544_v58 }
 0x4ac   : > { %4325 = vst [vmem:[#allocation19 + $0x8] sm:$0xff] %v10553_v28 }
 0x4ad   : > { %4327 = vst [vmem:[#allocation19 + $0x10] sm:$0xff] %v4299_v0 }
 0x4ae   : > { %4328 = vst [vmem:[#allocation19 + $0x18] sm:$0xff] %v4300_v45 }
 0x4af PF: > { %4355 = vmatpush.bf16.msra.mxu0 %v8916_v13  ;;  %4368 = vmatpush.bf16.msra.mxu1 %v8918_v17  ;;  %v4342_v58 = vld [vmem:[#allocation2] sm:$0xff]  ;;  %v12960_v28 = vld [vmem:[#allocation26_spill] sm:$0xff]  ;;  %v12962_v21 = vld [vmem:[#allocation28_spill] sm:$0xff]  ;;  %s5083_s23 = sadd.s32 2, %s10197_s17 }
 0x4b0   : > { %4381 = vmatpush.bf16.msra.mxu2 %v8920_v18  ;;  %4394 = vmatpush.bf16.msra.mxu3 %v8923_v22  ;;  %v12961_v50 = vld [vmem:[#allocation27_spill] sm:$0xff]  ;;  %v4349_v6 = vunpack.c.l.b16 %v4342_v58  ;;  %v4350_v0 = vunpack.c.h.b16 %v4342_v58  ;;  %v12963_v59 = vld [vmem:[#allocation29_spill] sm:$0xff]  ;;  %v12964_v41 = vld [vmem:[#allocation30_spill] sm:$0xff]  ;;  %p7637_p12 = scmp.ne.s32.totalorder %s5083_s23, 9 }
 0x4b1   : > { %v12965_v45 = vld [vmem:[#allocation31_spill] sm:$0xff]  ;;  %v12966_v33 = vld [vmem:[#allocation32_spill] sm:$0xff]  ;;  %v12967_v37 = vld [vmem:[#allocation33_spill] sm:$0xff] }
 0x4b2   : > { %v10791_v20 = vpack.c.b16 %v4349_v6, %v4349_v6  ;;  %v10793_v29 = vpack.c.b16 %v4350_v0, %v4350_v0  ;;  %v12968_v38 = vld [vmem:[#allocation34_spill] sm:$0xff]  ;;  %v12969_v25 = vld [vmem:[#allocation35_spill] sm:$0xff]  ;;  %v12970_v36 = vld [vmem:[#allocation36_spill] sm:$0xff] }
 0x4b3   : > { %4356 = vmatpush.bf16.msra.mxu0 %v8927_v26  ;;  %4369 = vmatpush.bf16.msra.mxu1 %v8929_v27  ;;  %v12971_v63 = vld [vmem:[#allocation37_spill] sm:$0xff]  ;;  %v12972_v5 = vld [vmem:[#allocation38_spill] sm:$0xff]  ;;  %v12973_v61 = vld [vmem:[#allocation39_spill] sm:$0xff] }
 0x4b4   : > { %4382 = vmatpush.bf16.msra.mxu2 %v8932_v31  ;;  %4395 = vmatpush.bf16.msra.mxu3 %v8934_v35  ;;  %v12974_v32 = vld [vmem:[#allocation40_spill] sm:$0xff]  ;;  %v12975_v11 = vld [vmem:[#allocation41_spill] sm:$0xff]  ;;  %v12976_v42 = vld [vmem:[#allocation42_spill] sm:$0xff] }
 0x4b5   : > { %v12977_v51 = vld [vmem:[#allocation43_spill] sm:$0xff]  ;;  %v12978_v10 = vld [vmem:[#allocation44_spill] sm:$0xff]  ;;  %v12979_v52 = vld [vmem:[#allocation45_spill] sm:$0xff] }
 0x4b6   : > { %v12980_v40 = vld [vmem:[#allocation46_spill] sm:$0xff]  ;;  %v12981_v49 = vld [vmem:[#allocation47_spill] sm:$0xff]  ;;  %v12982_v14 = vld [vmem:[#allocation48_spill] sm:$0xff] }
 0x4b7   : > { %4357 = vmatpush.bf16.msra.mxu0 %v8937_v39  ;;  %4370 = vmatpush.bf16.msra.mxu1 %v8941_v43  ;;  %v12983_v9 = vld [vmem:[#allocation49_spill] sm:$0xff]  ;;  %v12984_v62 = vld [vmem:[#allocation50_spill] sm:$0xff]  ;;  %v12985_v57 = vld [vmem:[#allocation51_spill] sm:$0xff] }
 0x4b8   : > { %4383 = vmatpush.bf16.msra.mxu2 %v8943_v44  ;;  %4396 = vmatpush.bf16.msra.mxu3 %v8946_v48  ;;  %v12986_v12 = vld [vmem:[#allocation52_spill] sm:$0xff]  ;;  %v12987_v46 = vld [vmem:[#allocation53_spill] sm:$0xff]  ;;  %v12988_v47 = vld [vmem:[#allocation54_spill] sm:$0xff] }
 0x4b9   : > { %v12989_v7 = vld [vmem:[#allocation55_spill] sm:$0xff]  ;;  %v12990_v1 = vld [vmem:[#allocation56_spill] sm:$0xff]  ;;  %v12991_v58 = vld [vmem:[#allocation57_spill] sm:$0xff] }
 0x4ba   : > { %v12994_v6 = vld [vmem:[#allocation60_spill] sm:$0xff]  ;;  %v12995_v0 = vld [vmem:[#allocation61_spill] sm:$0xff] }
 0x4bb   : > { %4358 = vmatpush.bf16.msra.mxu0 %v8949_v54  ;;  %4371 = vmatpush.bf16.msra.mxu1 %v8953_v55 }
 0x4bc   : > { %4384 = vmatpush.bf16.msra.mxu2 %v8955_v56  ;;  %4397 = vmatpush.bf16.msra.mxu3 %v8958_v60 }
 0x4bf   : > { %4359 = vmatpush.bf16.msra.mxu0 %v8961_v2  ;;  %4372 = vmatpush.bf16.msra.mxu1 %v8965_v3 }
 0x4c0   : > { %4385 = vmatpush.bf16.msra.mxu2 %v8967_v4  ;;  %4398 = vmatpush.bf16.msra.mxu3 %v8970_v8 }
 0x4c3   : > { %4360 = vmatpush.bf16.msra.mxu0 %v8973_v15  ;;  %4373 = vmatpush.bf16.msra.mxu1 %v8977_v16 }
 0x4c4   : > { %4386 = vmatpush.bf16.msra.mxu2 %v8979_v19  ;;  %4399 = vmatpush.bf16.msra.mxu3 %v8982_v24 }
 0x4c7   : > { %4361 = vmatpush.bf16.msra.mxu0 %v12960_v28  ;;  %4374 = vmatpush.bf16.msra.mxu1 %v12961_v50  ;;  %v12992_v28 = vld [vmem:[#allocation58_spill] sm:$0xff]  ;;  %v12993_v50 = vld [vmem:[#allocation59_spill] sm:$0xff] }
 0x4c8   : > { %4387 = vmatpush.bf16.msra.mxu2 %v12962_v21  ;;  %4400 = vmatpush.bf16.msra.mxu3 %v12963_v59  ;;  %v12996_v21 = vld [vmem:[#allocation62_spill] sm:$0xff]  ;;  %v12997_v59 = vld [vmem:[#allocation63_spill] sm:$0xff] }
 0x4cb   : > { %4362 = vmatpush.bf16.msra.mxu0 %v12964_v41  ;;  %4375 = vmatpush.bf16.msra.mxu1 %v12965_v45  ;;  %v12998_v41 = vld [vmem:[#allocation64_spill] sm:$0xff]  ;;  %v12999_v45 = vld [vmem:[#allocation65_spill] sm:$0xff] }
 0x4cc   : > { %4388 = vmatpush.bf16.msra.mxu2 %v12966_v33  ;;  %4401 = vmatpush.bf16.msra.mxu3 %v12967_v37  ;;  %v13000_v33 = vld [vmem:[#allocation66_spill] sm:$0xff]  ;;  %v13001_v37 = vld [vmem:[#allocation67_spill] sm:$0xff] }
 0x4ce   : > { %4363 = vmatmul.bf16.vlgmr.msra.gmra.mxu0 %v10791_v20  ;;  %4376 = vmatmul.bf16.vlgmr.msra.gmra.mxu1 %v10793_v29 }
 0x4cf   : > { %4407 = vmatpush.bf16.msrb.mxu0 %v12968_v38  ;;  %4420 = vmatpush.bf16.msrb.mxu1 %v12969_v25  ;;  %v13002_v38 = vld [vmem:[#allocation68_spill] sm:$0xff]  ;;  %v13003_v25 = vld [vmem:[#allocation69_spill] sm:$0xff] }
 0x4d0   : > { %4433 = vmatpush.bf16.msrb.mxu2 %v12970_v36  ;;  %4446 = vmatpush.bf16.msrb.mxu3 %v12971_v63  ;;  %v13004_v36 = vld [vmem:[#allocation70_spill] sm:$0xff]  ;;  %v13005_v63 = vld [vmem:[#allocation71_spill] sm:$0xff] }
 0x4d1   : > { %4389 = vmatmul.bf16.vlgmr.msra.gmra.mxu2 %v10791_v20  ;;  %4402 = vmatmul.bf16.vlgmr.msra.gmra.mxu3 %v10793_v29 }
 0x4d3   : > { %4408 = vmatpush.bf16.msrb.mxu0 %v12972_v5  ;;  %4421 = vmatpush.bf16.msrb.mxu1 %v12973_v61  ;;  %v13006_v5 = vld [vmem:[#allocation72_spill] sm:$0xff]  ;;  %v13007_v61 = vld [vmem:[#allocation73_spill] sm:$0xff] }
 0x4d4   : > { %4434 = vmatpush.bf16.msrb.mxu2 %v12974_v32  ;;  %4447 = vmatpush.bf16.msrb.mxu3 %v12975_v11  ;;  %v13008_v32 = vld [vmem:[#allocation74_spill] sm:$0xff]  ;;  %v13009_v11 = vld [vmem:[#allocation75_spill] sm:$0xff] }
 0x4d7   : > { %4409 = vmatpush.bf16.msrb.mxu0 %v12976_v42  ;;  %4422 = vmatpush.bf16.msrb.mxu1 %v12977_v51  ;;  %v13010_v42 = vld [vmem:[#allocation76_spill] sm:$0xff]  ;;  %v13011_v51 = vld [vmem:[#allocation77_spill] sm:$0xff] }
 0x4d8   : > { %4435 = vmatpush.bf16.msrb.mxu2 %v12978_v10  ;;  %4448 = vmatpush.bf16.msrb.mxu3 %v12979_v52  ;;  %v13012_v10 = vld [vmem:[#allocation78_spill] sm:$0xff]  ;;  %v13013_v52 = vld [vmem:[#allocation79_spill] sm:$0xff] }
 0x4db   : > { %4410 = vmatpush.bf16.msrb.mxu0 %v12980_v40  ;;  %4423 = vmatpush.bf16.msrb.mxu1 %v12981_v49  ;;  %v13014_v40 = vld [vmem:[#allocation80_spill] sm:$0xff]  ;;  %v13015_v49 = vld [vmem:[#allocation81_spill] sm:$0xff] }
 0x4dc   : > { %4436 = vmatpush.bf16.msrb.mxu2 %v12982_v14  ;;  %4449 = vmatpush.bf16.msrb.mxu3 %v12983_v9  ;;  %v13016_v14 = vld [vmem:[#allocation82_spill] sm:$0xff]  ;;  %v13017_v9 = vld [vmem:[#allocation83_spill] sm:$0xff] }
 0x4df   : > { %4411 = vmatpush.bf16.msrb.mxu0 %v12984_v62  ;;  %4424 = vmatpush.bf16.msrb.mxu1 %v12985_v57  ;;  %v13018_v62 = vld [vmem:[#allocation84_spill] sm:$0xff]  ;;  %v13019_v57 = vld [vmem:[#allocation85_spill] sm:$0xff] }
 0x4e0   : > { %4437 = vmatpush.bf16.msrb.mxu2 %v12986_v12  ;;  %4450 = vmatpush.bf16.msrb.mxu3 %v12987_v46  ;;  %v13020_v12 = vld [vmem:[#allocation86_spill] sm:$0xff]  ;;  %v13021_v46 = vld [vmem:[#allocation87_spill] sm:$0xff] }
 0x4e3   : > { %4412 = vmatpush.bf16.msrb.mxu0 %v12988_v47  ;;  %4425 = vmatpush.bf16.msrb.mxu1 %v12989_v7  ;;  %v13022_v47 = vld [vmem:[#allocation88_spill] sm:$0xff]  ;;  %v13023_v7 = vld [vmem:[#allocation89_spill] sm:$0xff] }
 0x4e4   : > { %4438 = vmatpush.bf16.msrb.mxu2 %v12990_v1  ;;  %4451 = vmatpush.bf16.msrb.mxu3 %v12991_v58  ;;  %v13024_v1 = vld [vmem:[#allocation90_spill] sm:$0xff]  ;;  %v13025_v58 = vld [vmem:[#allocation91_spill] sm:$0xff] }
 0x4e7   : > { %4413 = vmatpush.bf16.msrb.mxu0 %v12992_v28  ;;  %4426 = vmatpush.bf16.msrb.mxu1 %v12993_v50  ;;  %v13026_v28 = vld [vmem:[#allocation92_spill] sm:$0xff]  ;;  %v13027_v50 = vld [vmem:[#allocation93_spill] sm:$0xff] }
 0x4e8   : > { %4439 = vmatpush.bf16.msrb.mxu2 %v12994_v6  ;;  %4452 = vmatpush.bf16.msrb.mxu3 %v12995_v0  ;;  %v13028_v6 = vld [vmem:[#allocation94_spill] sm:$0xff]  ;;  %v13029_v0 = vld [vmem:[#allocation95_spill] sm:$0xff] }
 0x4eb   : > { %4414 = vmatpush.bf16.msrb.mxu0 %v12996_v21  ;;  %4427 = vmatpush.bf16.msrb.mxu1 %v12997_v59  ;;  %v13030_v21 = vld [vmem:[#allocation96_spill] sm:$0xff]  ;;  %v13031_v59 = vld [vmem:[#allocation97_spill] sm:$0xff] }
 0x4ec   : > { %4440 = vmatpush.bf16.msrb.mxu2 %v12998_v41  ;;  %4453 = vmatpush.bf16.msrb.mxu3 %v12999_v45  ;;  %v13032_v41 = vld [vmem:[#allocation98_spill] sm:$0xff]  ;;  %v13033_v45 = vld [vmem:[#allocation99_spill] sm:$0xff] }
 0x4ee   : > { %4415 = vmatmul.bf16.vlgmr.msrb.gmra.mxu0 %v10791_v20  ;;  %4428 = vmatmul.bf16.vlgmr.msrb.gmra.mxu1 %v10793_v29 }
 0x4ef   : > { %4459 = vmatpush.bf16.msra.mxu0 %v13000_v33  ;;  %4472 = vmatpush.bf16.msra.mxu1 %v13001_v37  ;;  %v13034_v33 = vld [vmem:[#allocation100_spill] sm:$0xff]  ;;  %v13035_v37 = vld [vmem:[#allocation101_spill] sm:$0xff] }
 0x4f0   : > { %4485 = vmatpush.bf16.msra.mxu2 %v13002_v38  ;;  %4498 = vmatpush.bf16.msra.mxu3 %v13003_v25  ;;  %v13036_v38 = vld [vmem:[#allocation102_spill] sm:$0xff]  ;;  %v13037_v25 = vld [vmem:[#allocation103_spill] sm:$0xff] }
 0x4f1   : > { %4441 = vmatmul.bf16.vlgmr.msrb.gmra.mxu2 %v10791_v20  ;;  %4454 = vmatmul.bf16.vlgmr.msrb.gmra.mxu3 %v10793_v29 }
 0x4f3   : > { %4460 = vmatpush.bf16.msra.mxu0 %v13004_v36  ;;  %4473 = vmatpush.bf16.msra.mxu1 %v13005_v63  ;;  %v13038_v36 = vld [vmem:[#allocation104_spill] sm:$0xff]  ;;  %v13039_v63 = vld [vmem:[#allocation105_spill] sm:$0xff] }
 0x4f4   : > { %4486 = vmatpush.bf16.msra.mxu2 %v13006_v5  ;;  %4499 = vmatpush.bf16.msra.mxu3 %v13007_v61  ;;  %v13040_v5 = vld [vmem:[#allocation106_spill] sm:$0xff]  ;;  %v13041_v61 = vld [vmem:[#allocation107_spill] sm:$0xff] }
 0x4f7   : > { %4461 = vmatpush.bf16.msra.mxu0 %v13008_v32  ;;  %4474 = vmatpush.bf16.msra.mxu1 %v13009_v11  ;;  %v13042_v32 = vld [vmem:[#allocation108_spill] sm:$0xff]  ;;  %v13043_v11 = vld [vmem:[#allocation109_spill] sm:$0xff] }
 0x4f8   : > { %4487 = vmatpush.bf16.msra.mxu2 %v13010_v42  ;;  %4500 = vmatpush.bf16.msra.mxu3 %v13011_v51  ;;  %v13044_v42 = vld [vmem:[#allocation110_spill] sm:$0xff]  ;;  %v13045_v51 = vld [vmem:[#allocation111_spill] sm:$0xff] }
 0x4fb   : > { %4462 = vmatpush.bf16.msra.mxu0 %v13012_v10  ;;  %4475 = vmatpush.bf16.msra.mxu1 %v13013_v52  ;;  %v13046_v10 = vld [vmem:[#allocation112_spill] sm:$0xff]  ;;  %v13047_v52 = vld [vmem:[#allocation113_spill] sm:$0xff] }
 0x4fc   : > { %4488 = vmatpush.bf16.msra.mxu2 %v13014_v40  ;;  %4501 = vmatpush.bf16.msra.mxu3 %v13015_v49  ;;  %v13048_v40 = vld [vmem:[#allocation114_spill] sm:$0xff]  ;;  %v13049_v49 = vld [vmem:[#allocation115_spill] sm:$0xff] }
 0x4ff   : > { %4463 = vmatpush.bf16.msra.mxu0 %v13016_v14  ;;  %4476 = vmatpush.bf16.msra.mxu1 %v13017_v9  ;;  %v13050_v14 = vld [vmem:[#allocation116_spill] sm:$0xff]  ;;  %v13051_v9 = vld [vmem:[#allocation117_spill] sm:$0xff] }
 0x500   : > { %4489 = vmatpush.bf16.msra.mxu2 %v13018_v62  ;;  %4502 = vmatpush.bf16.msra.mxu3 %v13019_v57  ;;  %v13052_v62 = vld [vmem:[#allocation118_spill] sm:$0xff]  ;;  %v13053_v57 = vld [vmem:[#allocation119_spill] sm:$0xff] }
 0x503   : > { %4464 = vmatpush.bf16.msra.mxu0 %v13020_v12  ;;  %4477 = vmatpush.bf16.msra.mxu1 %v13021_v46  ;;  %v13054_v12 = vld [vmem:[#allocation120_spill] sm:$0xff]  ;;  %v13055_v46 = vld [vmem:[#allocation121_spill] sm:$0xff] }
 0x504   : > { %4490 = vmatpush.bf16.msra.mxu2 %v13022_v47  ;;  %4503 = vmatpush.bf16.msra.mxu3 %v13023_v7  ;;  %v13056_v47 = vld [vmem:[#allocation122_spill] sm:$0xff]  ;;  %v13057_v7 = vld [vmem:[#allocation123_spill] sm:$0xff] }
 0x507   : > { %4465 = vmatpush.bf16.msra.mxu0 %v13024_v1  ;;  %4478 = vmatpush.bf16.msra.mxu1 %v13025_v58  ;;  %v13058_v1 = vld [vmem:[#allocation124_spill] sm:$0xff]  ;;  %v13059_v58 = vld [vmem:[#allocation125_spill] sm:$0xff] }
 0x508   : > { %4491 = vmatpush.bf16.msra.mxu2 %v13026_v28  ;;  %4504 = vmatpush.bf16.msra.mxu3 %v13027_v50  ;;  %v13060_v28 = vld [vmem:[#allocation126_spill] sm:$0xff]  ;;  %v13061_v50 = vld [vmem:[#allocation127_spill] sm:$0xff] }
 0x50b   : > { %4466 = vmatpush.bf16.msra.mxu0 %v13028_v6  ;;  %4479 = vmatpush.bf16.msra.mxu1 %v13029_v0  ;;  %v13062_v6 = vld [vmem:[#allocation128_spill] sm:$0xff]  ;;  %v13063_v0 = vld [vmem:[#allocation129_spill] sm:$0xff] }
 0x50c   : > { %4492 = vmatpush.bf16.msra.mxu2 %v13030_v21  ;;  %4505 = vmatpush.bf16.msra.mxu3 %v13031_v59  ;;  %v13064_v21 = vld [vmem:[#allocation130_spill] sm:$0xff]  ;;  %v13065_v59 = vld [vmem:[#allocation131_spill] sm:$0xff] }
 0x50e   : > { %4467 = vmatmul.bf16.vlgmr.msra.gmra.mxu0 %v10791_v20  ;;  %4480 = vmatmul.bf16.vlgmr.msra.gmra.mxu1 %v10793_v29 }
 0x50f   : > { %4511 = vmatpush.bf16.msrb.mxu0 %v13032_v41  ;;  %4524 = vmatpush.bf16.msrb.mxu1 %v13033_v45  ;;  %v13066_v41 = vld [vmem:[#allocation132_spill] sm:$0xff]  ;;  %v13067_v45 = vld [vmem:[#allocation133_spill] sm:$0xff] }
 0x510   : > { %4537 = vmatpush.bf16.msrb.mxu2 %v13034_v33  ;;  %4550 = vmatpush.bf16.msrb.mxu3 %v13035_v37  ;;  %v13068_v33 = vld [vmem:[#allocation134_spill] sm:$0xff]  ;;  %v13069_v37 = vld [vmem:[#allocation135_spill] sm:$0xff] }
 0x511   : > { %4493 = vmatmul.bf16.vlgmr.msra.gmra.mxu2 %v10791_v20  ;;  %4506 = vmatmul.bf16.vlgmr.msra.gmra.mxu3 %v10793_v29 }
 0x513   : > { %4512 = vmatpush.bf16.msrb.mxu0 %v13036_v38  ;;  %4525 = vmatpush.bf16.msrb.mxu1 %v13037_v25  ;;  %v13070_v38 = vld [vmem:[#allocation136_spill] sm:$0xff]  ;;  %v13071_v25 = vld [vmem:[#allocation137_spill] sm:$0xff] }
 0x514   : > { %4538 = vmatpush.bf16.msrb.mxu2 %v13038_v36  ;;  %4551 = vmatpush.bf16.msrb.mxu3 %v13039_v63  ;;  %v13072_v36 = vld [vmem:[#allocation138_spill] sm:$0xff]  ;;  %v13073_v63 = vld [vmem:[#allocation139_spill] sm:$0xff] }
 0x517   : > { %4513 = vmatpush.bf16.msrb.mxu0 %v13040_v5  ;;  %4526 = vmatpush.bf16.msrb.mxu1 %v13041_v61  ;;  %v13074_v5 = vld [vmem:[#allocation140_spill] sm:$0xff]  ;;  %v13075_v61 = vld [vmem:[#allocation141_spill] sm:$0xff] }
 0x518   : > { %4539 = vmatpush.bf16.msrb.mxu2 %v13042_v32  ;;  %4552 = vmatpush.bf16.msrb.mxu3 %v13043_v11  ;;  %v13077_v32 = vld [vmem:[#allocation143_spill] sm:$0xff]  ;;  %v13079_v11 = vld [vmem:[#allocation145_spill] sm:$0xff] }
 0x51b   : > { %4514 = vmatpush.bf16.msrb.mxu0 %v13044_v42  ;;  %4527 = vmatpush.bf16.msrb.mxu1 %v13045_v51  ;;  %v13080_v42 = vld [vmem:[#allocation146_spill] sm:$0xff]  ;;  %v13081_v51 = vld [vmem:[#allocation147_spill] sm:$0xff] }
 0x51c   : > { %4540 = vmatpush.bf16.msrb.mxu2 %v13046_v10  ;;  %4553 = vmatpush.bf16.msrb.mxu3 %v13047_v52  ;;  %v13082_v10 = vld [vmem:[#allocation148_spill] sm:$0xff]  ;;  %v13083_v52 = vld [vmem:[#allocation149_spill] sm:$0xff] }
 0x51f   : > { %4515 = vmatpush.bf16.msrb.mxu0 %v13048_v40  ;;  %4528 = vmatpush.bf16.msrb.mxu1 %v13049_v49  ;;  %v13084_v40 = vld [vmem:[#allocation150_spill] sm:$0xff]  ;;  %v13085_v49 = vld [vmem:[#allocation151_spill] sm:$0xff] }
 0x520   : > { %4541 = vmatpush.bf16.msrb.mxu2 %v13050_v14  ;;  %4554 = vmatpush.bf16.msrb.mxu3 %v13051_v9  ;;  %v13086_v14 = vld [vmem:[#allocation152_spill] sm:$0xff]  ;;  %v13087_v9 = vld [vmem:[#allocation153_spill] sm:$0xff] }
 0x523   : > { %4516 = vmatpush.bf16.msrb.mxu0 %v13052_v62  ;;  %4529 = vmatpush.bf16.msrb.mxu1 %v13053_v57  ;;  %v4345_v62 = vld [vmem:[#allocation2 + $0x8] sm:$0xff]  ;;  %v13088_v57 = vld [vmem:[#allocation154_spill] sm:$0xff] }
 0x524   : > { %4542 = vmatpush.bf16.msrb.mxu2 %v13054_v12  ;;  %4555 = vmatpush.bf16.msrb.mxu3 %v13055_v46  ;;  %v13089_v12 = vld [vmem:[#allocation155_spill] sm:$0xff]  ;;  %v4601_v46 = vunpack.c.l.b16 %v4345_v62 }
 0x527   : > { %4517 = vmatpush.bf16.msrb.mxu0 %v13056_v47  ;;  %4530 = vmatpush.bf16.msrb.mxu1 %v13057_v7  ;;  %v4602_v47 = vunpack.c.h.b16 %v4345_v62  ;;  %v13090_v7 = vld [vmem:[#allocation156_spill] sm:$0xff] }
 0x528   : > { %4543 = vmatpush.bf16.msrb.mxu2 %v13058_v1  ;;  %4556 = vmatpush.bf16.msrb.mxu3 %v13059_v58  ;;  %v13091_v1 = vld [vmem:[#allocation157_spill] sm:$0xff]  ;;  %v13092_v58 = vld [vmem:[#allocation158_spill] sm:$0xff] }
 0x52b   : > { %4518 = vmatpush.bf16.msrb.mxu0 %v13060_v28  ;;  %4531 = vmatpush.bf16.msrb.mxu1 %v13061_v50  ;;  %v13093_v28 = vld [vmem:[#allocation159_spill] sm:$0xff]  ;;  %v10939_v50 = vpack.c.b16 %v4601_v46, %v4601_v46  ;;  %v13116_v46 = vld [vmem:[#allocation182_spill] sm:$0xff] }
 0x52c   : > { %4544 = vmatpush.bf16.msrb.mxu2 %v13062_v6  ;;  %4557 = vmatpush.bf16.msrb.mxu3 %v13063_v0  ;;  %v10941_v6 = vpack.c.b16 %v4602_v47, %v4602_v47  ;;  %v13094_v0 = vld [vmem:[#allocation160_spill] sm:$0xff]  ;;  %v13117_v47 = vld [vmem:[#allocation183_spill] sm:$0xff] }
 0x52e   : > { %4519 = vmatmul.bf16.vlgmr.msrb.gmra.mxu0 %v10791_v20  ;;  %4532 = vmatmul.bf16.vlgmr.msrb.gmra.mxu1 %v10793_v29 }
 0x52f   : > { %4607 = vmatpush.bf16.msra.mxu0 %v13064_v21  ;;  %4620 = vmatpush.bf16.msra.mxu1 %v13065_v59  ;;  %v13095_v21 = vld [vmem:[#allocation161_spill] sm:$0xff]  ;;  %v13096_v59 = vld [vmem:[#allocation162_spill] sm:$0xff] }
 0x530   : > { %4633 = vmatpush.bf16.msra.mxu2 %v13066_v41  ;;  %4646 = vmatpush.bf16.msra.mxu3 %v13067_v45  ;;  %v13097_v41 = vld [vmem:[#allocation163_spill] sm:$0xff]  ;;  %v13098_v45 = vld [vmem:[#allocation164_spill] sm:$0xff] }
 0x531   : > { %4545 = vmatmul.bf16.vlgmr.msrb.gmra.mxu2 %v10791_v20  ;;  %4558 = vmatmul.bf16.vlgmr.msrb.gmra.mxu3 %v10793_v29  ;;  %v13076_v20 = vld [vmem:[#allocation142_spill] sm:$0xff]  ;;  %v13078_v29 = vld [vmem:[#allocation144_spill] sm:$0xff] }
 0x533   : > { %4608 = vmatpush.bf16.msra.mxu0 %v13068_v33  ;;  %4621 = vmatpush.bf16.msra.mxu1 %v13069_v37  ;;  %v13099_v33 = vld [vmem:[#allocation165_spill] sm:$0xff]  ;;  %v13100_v37 = vld [vmem:[#allocation166_spill] sm:$0xff] }
 0x534   : > { %4634 = vmatpush.bf16.msra.mxu2 %v13070_v38  ;;  %4647 = vmatpush.bf16.msra.mxu3 %v13071_v25  ;;  %v13101_v38 = vld [vmem:[#allocation167_spill] sm:$0xff]  ;;  %v13102_v25 = vld [vmem:[#allocation168_spill] sm:$0xff] }
 0x537   : > { %4609 = vmatpush.bf16.msra.mxu0 %v13072_v36  ;;  %4622 = vmatpush.bf16.msra.mxu1 %v13073_v63  ;;  %v13103_v36 = vld [vmem:[#allocation169_spill] sm:$0xff]  ;;  %v13104_v63 = vld [vmem:[#allocation170_spill] sm:$0xff] }
 0x538   : > { %4635 = vmatpush.bf16.msra.mxu2 %v13074_v5  ;;  %4648 = vmatpush.bf16.msra.mxu3 %v13075_v61  ;;  %v13105_v5 = vld [vmem:[#allocation171_spill] sm:$0xff] }
 0x53b   : > { %4610 = vmatpush.bf16.msra.mxu0 %v13076_v20  ;;  %4623 = vmatpush.bf16.msra.mxu1 %v13077_v32  ;;  %v13106_v32 = vld [vmem:[#allocation172_spill] sm:$0xff] }
 0x53c   : > { %4636 = vmatpush.bf16.msra.mxu2 %v13078_v29  ;;  %4649 = vmatpush.bf16.msra.mxu3 %v13079_v11  ;;  %v13107_v29 = vld [vmem:[#allocation173_spill] sm:$0xff]  ;;  %v13108_v11 = vld [vmem:[#allocation174_spill] sm:$0xff] }
 0x53f   : > { %4611 = vmatpush.bf16.msra.mxu0 %v13080_v42  ;;  %4624 = vmatpush.bf16.msra.mxu1 %v13081_v51  ;;  %v13109_v42 = vld [vmem:[#allocation175_spill] sm:$0xff]  ;;  %v13110_v51 = vld [vmem:[#allocation176_spill] sm:$0xff] }
 0x540   : > { %4637 = vmatpush.bf16.msra.mxu2 %v13082_v10  ;;  %4650 = vmatpush.bf16.msra.mxu3 %v13083_v52  ;;  %v13111_v10 = vld [vmem:[#allocation177_spill] sm:$0xff] }
 0x543   : > { %4612 = vmatpush.bf16.msra.mxu0 %v13084_v40  ;;  %4625 = vmatpush.bf16.msra.mxu1 %v13085_v49  ;;  %v13112_v49 = vld [vmem:[#allocation178_spill] sm:$0xff] }
 0x544   : > { %4638 = vmatpush.bf16.msra.mxu2 %v13086_v14  ;;  %4651 = vmatpush.bf16.msra.mxu3 %v13087_v9  ;;  %v13113_v14 = vld [vmem:[#allocation179_spill] sm:$0xff] }
 0x547   : > { %4613 = vmatpush.bf16.msra.mxu0 %v13088_v57  ;;  %4626 = vmatpush.bf16.msra.mxu1 %v13089_v12  ;;  %v13114_v57 = vld [vmem:[#allocation180_spill] sm:$0xff]  ;;  %v13115_v12 = vld [vmem:[#allocation181_spill] sm:$0xff] }
 0x548   : > { %4639 = vmatpush.bf16.msra.mxu2 %v13090_v7  ;;  %4652 = vmatpush.bf16.msra.mxu3 %v13091_v1  ;;  %v13118_v7 = vld [vmem:[#allocation184_spill] sm:$0xff]  ;;  %v13119_v1 = vld [vmem:[#allocation185_spill] sm:$0xff] }
 0x54b   : > { %4614 = vmatpush.bf16.msra.mxu0 %v13092_v58  ;;  %4627 = vmatpush.bf16.msra.mxu1 %v13093_v28  ;;  %v10959_v61 = vpop.f32.mrf.mxu0  ;;  %v10961_v20 = vpop.f32.mrf.mxu1 }
 0x54c   : > { %4640 = vmatpush.bf16.msra.mxu2 %v13094_v0  ;;  %4653 = vmatpush.bf16.msra.mxu3 %v13095_v21  ;;  %v13120_v0 = vld [vmem:[#allocation186_spill] sm:$0xff]  ;;  %v13121_v21 = vld [vmem:[#allocation187_spill] sm:$0xff] }
 0x54e   : > { %4615 = vmatmul.bf16.vlgmr.msra.gmra.mxu0 %v10939_v50  ;;  %4628 = vmatmul.bf16.vlgmr.msra.gmra.mxu1 %v10941_v6 }
 0x54f   : > { %4659 = vmatpush.bf16.msrb.mxu0 %v13096_v59  ;;  %4672 = vmatpush.bf16.msrb.mxu1 %v13097_v41  ;;  %v13122_v59 = vld [vmem:[#allocation188_spill] sm:$0xff]  ;;  %v13123_v41 = vld [vmem:[#allocation189_spill] sm:$0xff] }
 0x550   : > { %4685 = vmatpush.bf16.msrb.mxu2 %v13098_v45  ;;  %4698 = vmatpush.bf16.msrb.mxu3 %v13099_v33  ;;  %v13124_v45 = vld [vmem:[#allocation190_spill] sm:$0xff]  ;;  %v13125_v33 = vld [vmem:[#allocation191_spill] sm:$0xff] }
 0x551   : > { %4641 = vmatmul.bf16.vlgmr.msra.gmra.mxu2 %v10939_v50  ;;  %4654 = vmatmul.bf16.vlgmr.msra.gmra.mxu3 %v10941_v6 }
 0x553   : > { %4660 = vmatpush.bf16.msrb.mxu0 %v13100_v37  ;;  %4673 = vmatpush.bf16.msrb.mxu1 %v13101_v38  ;;  %v4366_v9 = vpop.f32.mrf.mxu0  ;;  %v4379_v62 = vpop.f32.mrf.mxu1  ;;  %v13126_v37 = vld [vmem:[#allocation192_spill] sm:$0xff]  ;;  %v13127_v38 = vld [vmem:[#allocation193_spill] sm:$0xff] }
 0x554   : > { %4686 = vmatpush.bf16.msrb.mxu2 %v13102_v25  ;;  %4699 = vmatpush.bf16.msrb.mxu3 %v13103_v36  ;;  %v10969_v52 = vpop.f32.mrf.mxu2  ;;  %v10971_v40 = vpop.f32.mrf.mxu3  ;;  %v13128_v25 = vld [vmem:[#allocation194_spill] sm:$0xff]  ;;  %v13129_v36 = vld [vmem:[#allocation195_spill] sm:$0xff]  ;;  %v13138_v9 = vld [vmem:[#allocation204_spill] sm:$0xff] }
 0x555   : > { %v13139_v62 = vld [vmem:[#allocation205_spill] sm:$0xff] }
 0x557   : > { %4661 = vmatpush.bf16.msrb.mxu0 %v13104_v63  ;;  %4674 = vmatpush.bf16.msrb.mxu1 %v13105_v5  ;;  %v13130_v63 = vld [vmem:[#allocation196_spill] sm:$0xff]  ;;  %v13131_v5 = vld [vmem:[#allocation197_spill] sm:$0xff] }
 0x558   : > { %4687 = vmatpush.bf16.msrb.mxu2 %v13106_v32  ;;  %4700 = vmatpush.bf16.msrb.mxu3 %v13107_v29  ;;  %v13132_v32 = vld [vmem:[#allocation198_spill] sm:$0xff]  ;;  %v13133_v29 = vld [vmem:[#allocation199_spill] sm:$0xff] }
 0x55b   : > { %4662 = vmatpush.bf16.msrb.mxu0 %v13108_v11  ;;  %4675 = vmatpush.bf16.msrb.mxu1 %v13109_v42  ;;  %v13134_v11 = vld [vmem:[#allocation200_spill] sm:$0xff]  ;;  %v13135_v42 = vld [vmem:[#allocation201_spill] sm:$0xff] }
 0x55c   : > { %4688 = vmatpush.bf16.msrb.mxu2 %v13110_v51  ;;  %4701 = vmatpush.bf16.msrb.mxu3 %v13111_v10  ;;  %v4392_v58 = vpop.f32.mrf.mxu2  ;;  %v4405_v28 = vpop.f32.mrf.mxu3  ;;  %v13136_v10 = vld [vmem:[#allocation202_spill] sm:$0xff] }
 0x55f   : > { %4663 = vmatpush.bf16.msrb.mxu0 %v13112_v49  ;;  %4676 = vmatpush.bf16.msrb.mxu1 %v13113_v14  ;;  %v13137_v49 = vld [vmem:[#allocation203_spill] sm:$0xff] }
 0x560   : > { %4689 = vmatpush.bf16.msrb.mxu2 %v13114_v57  ;;  %4702 = vmatpush.bf16.msrb.mxu3 %v13115_v12  ;;  %v7633_v57 = vld [vmem:[%s8893_s22 + $0x48] sm:$0xff] }
 0x561   : > { %v13140_v12 = vld [vmem:[#allocation206_spill] sm:$0xff]  ;;  %v4336_v58 = vunpack.c.l.bf16 %v7633_v57 }
 0x563   : > { %4664 = vmatpush.bf16.msrb.mxu0 %v13116_v46  ;;  %4677 = vmatpush.bf16.msrb.mxu1 %v13117_v47  ;;  %v13141_v46 = vld [vmem:[#allocation207_spill] sm:$0xff]  ;;  %v13142_v47 = vld [vmem:[#allocation208_spill] sm:$0xff] }
 0x564   : > { %4690 = vmatpush.bf16.msrb.mxu2 %v13118_v7  ;;  %4703 = vmatpush.bf16.msrb.mxu3 %v13119_v1  ;;  %v13143_v7 = vld [vmem:[#allocation209_spill] sm:$0xff] }
 0x567   : > { %4665 = vmatpush.bf16.msrb.mxu0 %v13120_v0  ;;  %4678 = vmatpush.bf16.msrb.mxu1 %v13121_v21  ;;  %v7632_v0 = vld [vmem:[%s8893_s22 + $0x40] sm:$0xff] }
 0x568   : > { %4691 = vmatpush.bf16.msrb.mxu2 %v13122_v59  ;;  %4704 = vmatpush.bf16.msrb.mxu3 %v13123_v41  ;;  %v13144_v59 = vld [vmem:[#allocation210_spill] sm:$0xff]  ;;  %v13145_v41 = vld [vmem:[#allocation211_spill] sm:$0xff] }
 0x56b   : > { %4666 = vmatpush.bf16.msrb.mxu0 %v13124_v45  ;;  %4679 = vmatpush.bf16.msrb.mxu1 %v13125_v33  ;;  %v4416_v51 = vpop.f32.mrf.mxu0  ;;  %v4429_v14 = vpop.f32.mrf.mxu1  ;;  %v13146_v33 = vld [vmem:[#allocation212_spill] sm:$0xff] }
 0x56c   : > { %4692 = vmatpush.bf16.msrb.mxu2 %v13126_v37  ;;  %4705 = vmatpush.bf16.msrb.mxu3 %v13127_v38  ;;  %v13147_v37 = vld [vmem:[#allocation213_spill] sm:$0xff]  ;;  %v4334_v38 = vunpack.c.l.bf16 %v7632_v0 }
 0x56e   : > { %4667 = vmatmul.bf16.vlgmr.msrb.gmra.mxu0 %v10939_v50  ;;  %4680 = vmatmul.bf16.vlgmr.msrb.gmra.mxu1 %v10941_v6 }
 0x56f   : > { %4711 = vmatpush.bf16.msra.mxu0 %v13128_v25  ;;  %4724 = vmatpush.bf16.msra.mxu1 %v13129_v36  ;;  %v4417_v25 = vadd.f32 %v4416_v51, %v4336_v58  ;;  %v13148_v36 = vld [vmem:[#allocation214_spill] sm:$0xff] }
 0x570   : > { %4737 = vmatpush.bf16.msra.mxu2 %v13130_v63  ;;  %4750 = vmatpush.bf16.msra.mxu3 %v13131_v5  ;;  %v13149_v63 = vld [vmem:[#allocation215_spill] sm:$0xff]  ;;  %v4337_v5 = vunpack.c.h.bf16 %v7633_v57 }
 0x571   : > { %4693 = vmatmul.bf16.vlgmr.msrb.gmra.mxu2 %v10939_v50  ;;  %4706 = vmatmul.bf16.vlgmr.msrb.gmra.mxu3 %v10941_v6 }
 0x573   : > { %4712 = vmatpush.bf16.msra.mxu0 %v13132_v32  ;;  %4725 = vmatpush.bf16.msra.mxu1 %v13133_v29  ;;  %v4418_v21 = vpop.f32.mrf.mxu0  ;;  %v4431_v45 = vpop.f32.mrf.mxu1  ;;  %v13150_v32 = vld [vmem:[#allocation216_spill] sm:$0xff]  ;;  %v13151_v29 = vld [vmem:[#allocation217_spill] sm:$0xff] }
 0x574   : > { %4738 = vmatpush.bf16.msra.mxu2 %v13134_v11  ;;  %4751 = vmatpush.bf16.msra.mxu3 %v13135_v42  ;;  %v4442_v1 = vpop.f32.mrf.mxu2  ;;  %v4455_v28 = vpop.f32.mrf.mxu3  ;;  %v4365_v42 = vadd.f32 %v10959_v61, %v4334_v38  ;;  %v13156_v21 = vld [vmem:[#allocation222_spill] sm:$0xff]  ;;  %v13157_v61 = vld [vmem:[#allocation223_spill] sm:$0xff] }
 0x575   : > { %v4443_v51 = vadd.f32 %v4442_v1, %v4337_v5  ;;  %v13161_v45 = vld [vmem:[#allocation227_spill] sm:$0xff]  ;;  %v13167_v5 = vld [vmem:[#allocation233_spill] sm:$0xff] }
 0x576   : > { %v4378_v57 = vadd.f32 %v10961_v20, %v4365_v42  ;;  %v13163_v20 = vld [vmem:[#allocation229_spill] sm:$0xff]  ;;  %v13169_v42 = vld [vmem:[#allocation235_spill] sm:$0xff] }
 0x577   : > { %4713 = vmatpush.bf16.msra.mxu0 %v13136_v10  ;;  %4726 = vmatpush.bf16.msra.mxu1 %v13137_v49  ;;  %v4430_v10 = vadd.f32 %v4429_v14, %v4417_v25  ;;  %v4456_v14 = vadd.f32 %v4455_v28, %v4443_v51  ;;  %v13164_v28 = vld [vmem:[#allocation230_spill] sm:$0xff]  ;;  %v13165_v25 = vld [vmem:[#allocation231_spill] sm:$0xff] }
 0x578   : > { %4739 = vmatpush.bf16.msra.mxu2 %v13138_v9  ;;  %4752 = vmatpush.bf16.msra.mxu3 %v13139_v62  ;;  %v4335_v9 = vunpack.c.h.bf16 %v7632_v0  ;;  %v13152_v62 = vld [vmem:[#allocation218_spill] sm:$0xff]  ;;  %v13158_v0 = vld [vmem:[#allocation224_spill] sm:$0xff]  ;;  %v4563_v1 = vmul.f32 0.5, %v4378_v57 }
 0x579   : > { %v4572_v38 = vmul.f32 0.5, %v4456_v14  ;;  %v13174_v14 = vld [vmem:[#allocation240_spill] sm:$0xff] }
 0x57a   : > { %v4391_v58 = vadd.f32 %v10969_v52, %v4335_v9  ;;  %v7634_v52 = vld [vmem:[%s8893_s22 + $0x50] sm:$0xff] }
 0x57b   : > { %4714 = vmatpush.bf16.msra.mxu0 %v13140_v12  ;;  %4727 = vmatpush.bf16.msra.mxu1 %v13141_v46  ;;  %v13153_v12 = vld [vmem:[#allocation219_spill] sm:$0xff]  ;;  %v13154_v46 = vld [vmem:[#allocation220_spill] sm:$0xff] }
 0x57c   : > { %4740 = vmatpush.bf16.msra.mxu2 %v13142_v47  ;;  %4753 = vmatpush.bf16.msra.mxu3 %v13143_v7  ;;  %v4444_v11 = vpop.f32.mrf.mxu2  ;;  %v4457_v49 = vpop.f32.mrf.mxu3  ;;  %v13155_v47 = vld [vmem:[#allocation221_spill] sm:$0xff]  ;;  %v4571_v7 = vmul.f32 0.5, %v4430_v10 }
 0x57d   : > { %v13168_v11 = vld [vmem:[#allocation234_spill] sm:$0xff] }
 0x57e   : > { %8251 = vtanh.f32 %v4571_v7  ;;  %v13172_v7 = vld [vmem:[#allocation238_spill] sm:$0xff] }
 0x57f   : > { %4715 = vmatpush.bf16.msra.mxu0 %v13144_v59  ;;  %4728 = vmatpush.bf16.msra.mxu1 %v13145_v41  ;;  %v13159_v59 = vld [vmem:[#allocation225_spill] sm:$0xff]  ;;  %v13160_v41 = vld [vmem:[#allocation226_spill] sm:$0xff]  ;;  %8253 = vtanh.f32 %v4563_v1 }
 0x580   : > { %4741 = vmatpush.bf16.msra.mxu2 %v13146_v33  ;;  %4754 = vmatpush.bf16.msra.mxu3 %v13147_v37  ;;  %v13162_v33 = vld [vmem:[#allocation228_spill] sm:$0xff]  ;;  %v4404_v37 = vadd.f32 %v10971_v40, %v4391_v58  ;;  %8255 = vtanh.f32 %v4572_v38  ;;  %v13173_v58 = vld [vmem:[#allocation239_spill] sm:$0xff]  ;;  %v4343_v1 = vld [vmem:[#allocation3 + $0x8] sm:$0xff] }
 0x581   : > { %v13177_v38 = vld [vmem:[#allocation243_spill] sm:$0xff] }
 0x583   : > { %4716 = vmatpush.bf16.msra.mxu0 %v13148_v36  ;;  %4729 = vmatpush.bf16.msra.mxu1 %v13149_v63  ;;  %v4338_v36 = vunpack.c.l.bf16 %v7634_v52  ;;  %v13166_v63 = vld [vmem:[#allocation232_spill] sm:$0xff] }
 0x584   : > { %4742 = vmatpush.bf16.msra.mxu2 %v13150_v32  ;;  %4755 = vmatpush.bf16.msra.mxu3 %v13151_v29  ;;  %v8252_v40 = vpop.eup %8251  ;;  %v4564_v32 = vmul.f32 0.5, %v4404_v37 }
 0x585   : > { %v4575_v9 = vmul.f32 0.5, %v8252_v40  ;;  %v8254_v51 = vpop.eup %8253  ;;  %v13179_v40 = vld [vmem:[#allocation245_spill] sm:$0xff] }
 0x586   : > { %8257 = vtanh.f32 %v4564_v32  ;;  %v8256_v57 = vpop.eup %8255 }
 0x587   : > { %4717 = vmatpush.bf16.msra.mxu0 %v13152_v62  ;;  %4730 = vmatpush.bf16.msra.mxu1 %v13153_v12  ;;  %v13170_v62 = vld [vmem:[#allocation236_spill] sm:$0xff]  ;;  %v13171_v12 = vld [vmem:[#allocation237_spill] sm:$0xff] }
 0x588   : > { %4743 = vmatpush.bf16.msra.mxu2 %v13154_v46  ;;  %4756 = vmatpush.bf16.msra.mxu3 %v13155_v47  ;;  %v4339_v47 = vunpack.c.h.bf16 %v7634_v52  ;;  %v13176_v52 = vld [vmem:[#allocation242_spill] sm:$0xff] }
 0x58b   : > { %4718 = vmatpush.bf16.msra.mxu0 %v13156_v21  ;;  %4731 = vmatpush.bf16.msra.mxu1 %v13157_v61  ;;  %v4468_v29 = vpop.f32.mrf.mxu0  ;;  %v4481_v49 = vpop.f32.mrf.mxu1  ;;  %v4567_v21 = vmul.f32 0.5, %v8254_v51  ;;  %v4577_v61 = vadd.f32 0.5, %v4575_v9  ;;  %v13181_v9 = vld [vmem:[#allocation247_spill] sm:$0xff]  ;;  %v13183_v51 = vld [vmem:[#allocation249_spill] sm:$0xff] }
 0x58c   : > { %4744 = vmatpush.bf16.msra.mxu2 %v13158_v0  ;;  %4757 = vmatpush.bf16.msra.mxu3 %v13159_v59  ;;  %v4469_v10 = vadd.f32 %v4468_v29, %v4338_v36  ;;  %v13175_v0 = vld [vmem:[#allocation241_spill] sm:$0xff]  ;;  %v8258_v37 = vpop.eup %8257 }
 0x58d   : > { %v4569_v36 = vadd.f32 0.5, %v4567_v21  ;;  %v4568_v29 = vmul.f32 0.5, %v8258_v37  ;;  %v13184_v21 = vld [vmem:[#allocation250_spill] sm:$0xff] }
 0x58e   : > { %4719 = vmatmul.bf16.vlgmr.msra.gmra.mxu0 %v10939_v50  ;;  %4732 = vmatmul.bf16.vlgmr.msra.gmra.mxu1 %v10941_v6  ;;  %v4482_v46 = vadd.f32 %v4481_v49, %v4469_v10  ;;  %v4344_v10 = vld [vmem:[#allocation3 + $0x10] sm:$0xff]  ;;  %v13180_v49 = vld [vmem:[#allocation246_spill] sm:$0xff] }
 0x58f   : > { %4763 = vmatpush.bf16.msrb.mxu0 %v13160_v41  ;;  %4776 = vmatpush.bf16.msrb.mxu1 %v13161_v45  ;;  %v13192_v37 = vld [vmem:[#allocation258_spill] sm:$0xff] }
 0x590   : > { %4789 = vmatpush.bf16.msrb.mxu2 %v13162_v33  ;;  %4802 = vmatpush.bf16.msrb.mxu3 %v13163_v20  ;;  %8259 = vtanh.f32 %v4482_v46  ;;  %v4576_v33 = vmul.f32 0.5, %v8256_v57  ;;  %v4570_v57 = vadd.f32 0.5, %v4568_v29 }
 0x591   : > { %4745 = vmatmul.bf16.vlgmr.msra.gmra.mxu2 %v10939_v50  ;;  %4758 = vmatmul.bf16.vlgmr.msra.gmra.mxu3 %v10941_v6 }
 0x593   : > { %4764 = vmatpush.bf16.msrb.mxu0 %v13164_v28  ;;  %4777 = vmatpush.bf16.msrb.mxu1 %v13165_v25  ;;  %v4470_v20 = vpop.f32.mrf.mxu0  ;;  %v4483_v25 = vpop.f32.mrf.mxu1 }
 0x594   : > { %4790 = vmatpush.bf16.msrb.mxu2 %v13166_v63  ;;  %4803 = vmatpush.bf16.msrb.mxu3 %v13167_v5  ;;  %v4494_v59 = vpop.f32.mrf.mxu2  ;;  %v4507_v45 = vpop.f32.mrf.mxu3  ;;  %v4589_v63 = vmul.f32 %v4577_v61, %v4343_v1  ;;  %v13178_v5 = vld [vmem:[#allocation244_spill] sm:$0xff]  ;;  %v13185_v61 = vld [vmem:[#allocation251_spill] sm:$0xff]  ;;  %v13191_v20 = vld [vmem:[#allocation257_spill] sm:$0xff] }
 0x595   : > { %v4495_v41 = vadd.f32 %v4494_v59, %v4339_v47  ;;  %v13187_v59 = vld [vmem:[#allocation253_spill] sm:$0xff]  ;;  %v7635_v25 = vld [vmem:[%s8893_s22 + $0x58] sm:$0xff] }
 0x596   : > { %v8260_v32 = vpop.eup %8259 }
 0x597   : > { %4765 = vmatpush.bf16.msrb.mxu0 %v13168_v11  ;;  %4778 = vmatpush.bf16.msrb.mxu1 %v13169_v42  ;;  %v4508_v28 = vadd.f32 %v4507_v45, %v4495_v41  ;;  %v4578_v11 = vadd.f32 0.5, %v4576_v33  ;;  %v4591_v42 = vmul.f32 %v8260_v32, %v4569_v36  ;;  %v13188_v41 = vld [vmem:[#allocation254_spill] sm:$0xff]  ;;  %v13189_v45 = vld [vmem:[#allocation255_spill] sm:$0xff]  ;;  %v13190_v33 = vld [vmem:[#allocation256_spill] sm:$0xff] }
 0x598   : > { %4791 = vmatpush.bf16.msrb.mxu2 %v13170_v62  ;;  %4804 = vmatpush.bf16.msrb.mxu3 %v13171_v12  ;;  %v13182_v12 = vld [vmem:[#allocation248_spill] sm:$0xff]  ;;  %v13196_v36 = vld [vmem:[#allocation262_spill] sm:$0xff]  ;;  %v13199_v32 = vld [vmem:[#allocation265_spill] sm:$0xff] }
 0x599   : > { %8261 = vtanh.f32 %v4508_v28  ;;  %v11058_v62 = vadd.f32 %v4591_v42, %v4589_v63  ;;  %v13195_v28 = vld [vmem:[#allocation261_spill] sm:$0xff]  ;;  %v13197_v63 = vld [vmem:[#allocation263_spill] sm:$0xff] }
 0x59a   : > { %v13201_v42 = vld [vmem:[#allocation267_spill] sm:$0xff] }
 0x59b   : > { %4766 = vmatpush.bf16.msrb.mxu0 %v13172_v7  ;;  %4779 = vmatpush.bf16.msrb.mxu1 %v13173_v58  ;;  %v4590_v7 = vmul.f32 %v4578_v11, %v4344_v10  ;;  %5076 = vst [vmem:[#allocation3 + $0x8] sm:$0xff] %v11058_v62  ;;  %v13200_v11 = vld [vmem:[#allocation266_spill] sm:$0xff] }
 0x59c   : > { %4792 = vmatpush.bf16.msrb.mxu2 %v13174_v14  ;;  %4805 = vmatpush.bf16.msrb.mxu3 %v13175_v0  ;;  %v4496_v46 = vpop.f32.mrf.mxu2  ;;  %v4509_v47 = vpop.f32.mrf.mxu3  ;;  %v13186_v0 = vld [vmem:[#allocation252_spill] sm:$0xff] }
 0x59d   : > { %v13205_v46 = vld [vmem:[#allocation271_spill] sm:$0xff] }
 0x59f   : > { %4767 = vmatpush.bf16.msrb.mxu0 %v13176_v52  ;;  %4780 = vmatpush.bf16.msrb.mxu1 %v13177_v38  ;;  %v8262_v58 = vpop.eup %8261  ;;  %v13193_v52 = vld [vmem:[#allocation259_spill] sm:$0xff]  ;;  %v13194_v38 = vld [vmem:[#allocation260_spill] sm:$0xff] }
 0x5a0   : > { %4793 = vmatpush.bf16.msrb.mxu2 %v13178_v5  ;;  %4806 = vmatpush.bf16.msrb.mxu3 %v13179_v40  ;;  %v4592_v14 = vmul.f32 %v8262_v58, %v4570_v57  ;;  %v4340_v5 = vunpack.c.l.bf16 %v7635_v25  ;;  %v13198_v40 = vld [vmem:[#allocation264_spill] sm:$0xff] }
 0x5a1   : > { %v13206_v57 = vld [vmem:[#allocation272_spill] sm:$0xff] }
 0x5a2   : > { %v11067_v1 = vadd.f32 %v4592_v14, %v4590_v7  ;;  %v13207_v7 = vld [vmem:[#allocation273_spill] sm:$0xff] }
 0x5a3   : > { %4768 = vmatpush.bf16.msrb.mxu0 %v13180_v49  ;;  %4781 = vmatpush.bf16.msrb.mxu1 %v13181_v9  ;;  %v13202_v9 = vld [vmem:[#allocation268_spill] sm:$0xff] }
 0x5a4   : > { %4794 = vmatpush.bf16.msrb.mxu2 %v13182_v12  ;;  %4807 = vmatpush.bf16.msrb.mxu3 %v13183_v51  ;;  %5077 = vst [vmem:[#allocation3 + $0x10] sm:$0xff] %v11067_v1  ;;  %v4341_v12 = vunpack.c.h.bf16 %v7635_v25  ;;  %v13204_v51 = vld [vmem:[#allocation270_spill] sm:$0xff]  ;;  %v13214_v25 = vld [vmem:[#allocation280_spill] sm:$0xff] }
 0x5a7   : > { %4769 = vmatpush.bf16.msrb.mxu0 %v13184_v21  ;;  %4782 = vmatpush.bf16.msrb.mxu1 %v13185_v61 }
 0x5a8   : > { %4795 = vmatpush.bf16.msrb.mxu2 %v13186_v0  ;;  %4808 = vmatpush.bf16.msrb.mxu3 %v13187_v59  ;;  %v13208_v0 = vld [vmem:[#allocation274_spill] sm:$0xff]  ;;  %v13209_v59 = vld [vmem:[#allocation275_spill] sm:$0xff] }
 0x5ab   : > { %4770 = vmatpush.bf16.msrb.mxu0 %v13188_v41  ;;  %4783 = vmatpush.bf16.msrb.mxu1 %v13189_v45  ;;  %v4520_v29 = vpop.f32.mrf.mxu0  ;;  %v4533_v49 = vpop.f32.mrf.mxu1 }
 0x5ac   : > { %4796 = vmatpush.bf16.msrb.mxu2 %v13190_v33  ;;  %4809 = vmatpush.bf16.msrb.mxu3 %v13191_v20  ;;  %v4521_v10 = vadd.f32 %v4520_v29, %v4340_v5  ;;  %v13210_v33 = vld [vmem:[#allocation276_spill] sm:$0xff]  ;;  %v13211_v20 = vld [vmem:[#allocation277_spill] sm:$0xff]  ;;  %v13217_v29 = vld [vmem:[#allocation283_spill] sm:$0xff] }
 0x5ae   : > { %4771 = vmatmul.bf16.vlgmr.msrb.gmra.mxu0 %v10939_v50  ;;  %4784 = vmatmul.bf16.vlgmr.msrb.gmra.mxu1 %v10941_v6 }
 0x5af   : > { %4822 = vmatpush.bf16.msra.mxu0 %v13192_v37  ;;  %4835 = vmatpush.bf16.msra.mxu1 %v13193_v52 }
 0x5b0   : > { %4848 = vmatpush.bf16.msra.mxu2 %v13194_v38  ;;  %4861 = vmatpush.bf16.msra.mxu3 %v13195_v28  ;;  %v13212_v38 = vld [vmem:[#allocation278_spill] sm:$0xff]  ;;  %v13213_v28 = vld [vmem:[#allocation279_spill] sm:$0xff] }
 0x5b1   : > { %4797 = vmatmul.bf16.vlgmr.msrb.gmra.mxu2 %v10939_v50  ;;  %4810 = vmatmul.bf16.vlgmr.msrb.gmra.mxu3 %v10941_v6  ;;  %v13203_v50 = vld [vmem:[#allocation269_spill] sm:$0xff]  ;;  %v4534_v6 = vadd.f32 %v4533_v49, %v4521_v10 }
 0x5b3   : > { %4823 = vmatpush.bf16.msra.mxu0 %v13196_v36  ;;  %4836 = vmatpush.bf16.msra.mxu1 %v13197_v63  ;;  %v4581_v47 = vmul.f32 0.5, %v4534_v6  ;;  %v4522_v14 = vpop.f32.mrf.mxu0  ;;  %v4535_v45 = vpop.f32.mrf.mxu1  ;;  %v13215_v36 = vld [vmem:[#allocation281_spill] sm:$0xff]  ;;  %v13221_v6 = vld [vmem:[#allocation287_spill] sm:$0xff] }
 0x5b4   : > { %4849 = vmatpush.bf16.msra.mxu2 %v13198_v40  ;;  %4862 = vmatpush.bf16.msra.mxu3 %v13199_v32  ;;  %v4546_v58 = vpop.f32.mrf.mxu2  ;;  %v4559_v61 = vpop.f32.mrf.mxu3  ;;  %v13216_v32 = vld [vmem:[#allocation282_spill] sm:$0xff]  ;;  %v13226_v14 = vld [vmem:[#allocation292_spill] sm:$0xff]  ;;  %v13229_v45 = vld [vmem:[#allocation295_spill] sm:$0xff] }
 0x5b5   : > { %8263 = vtanh.f32 %v4581_v47  ;;  %v4547_v21 = vadd.f32 %v4546_v58, %v4341_v12  ;;  %v13223_v47 = vld [vmem:[#allocation289_spill] sm:$0xff]  ;;  %v13225_v58 = vld [vmem:[#allocation291_spill] sm:$0xff] }
 0x5b7   : > { %4824 = vmatpush.bf16.msra.mxu0 %v13200_v11  ;;  %4837 = vmatpush.bf16.msra.mxu1 %v13201_v42  ;;  %v4560_v41 = vadd.f32 %v4559_v61, %v4547_v21  ;;  %v13218_v11 = vld [vmem:[#allocation284_spill] sm:$0xff]  ;;  %v13219_v42 = vld [vmem:[#allocation285_spill] sm:$0xff] }
 0x5b8   : > { %4850 = vmatpush.bf16.msra.mxu2 %v13202_v9  ;;  %4863 = vmatpush.bf16.msra.mxu3 %v13203_v50  ;;  %v13220_v50 = vld [vmem:[#allocation286_spill] sm:$0xff] }
 0x5b9   : > { %v4582_v37 = vmul.f32 0.5, %v4560_v41  ;;  %v13228_v41 = vld [vmem:[#allocation294_spill] sm:$0xff] }
 0x5bb   : > { %4825 = vmatpush.bf16.msra.mxu0 %v13204_v51  ;;  %4838 = vmatpush.bf16.msra.mxu1 %v13205_v46  ;;  %v8264_v52 = vpop.eup %8263  ;;  %8265 = vtanh.f32 %v4582_v37  ;;  %v13222_v46 = vld [vmem:[#allocation288_spill] sm:$0xff] }
 0x5bc   : > { %4851 = vmatpush.bf16.msra.mxu2 %v13206_v57  ;;  %4864 = vmatpush.bf16.msra.mxu3 %v13207_v7  ;;  %v4548_v63 = vpop.f32.mrf.mxu2  ;;  %v4561_v5 = vpop.f32.mrf.mxu3  ;;  %8267 = vtanh.f32 %v11058_v62  ;;  %v4585_v40 = vmul.f32 0.5, %v8264_v52  ;;  %v13224_v7 = vld [vmem:[#allocation290_spill] sm:$0xff]  ;;  %v13230_v37 = vld [vmem:[#allocation296_spill] sm:$0xff]  ;;  %v13231_v52 = vld [vmem:[#allocation297_spill] sm:$0xff] }
 0x5bd   : > { %8269 = vtanh.f32 %v11067_v1 }
 0x5be   : > { %v4587_v49 = vadd.f32 0.5, %v4585_v40  ;;  %v13234_v40 = vld [vmem:[#allocation300_spill] sm:$0xff] }
 0x5bf   : > { %4826 = vmatpush.bf16.msra.mxu0 %v13208_v0  ;;  %4839 = vmatpush.bf16.msra.mxu1 %v13209_v59  ;;  %v13227_v0 = vld [vmem:[#allocation293_spill] sm:$0xff] }
 0x5c0   : > { %4852 = vmatpush.bf16.msra.mxu2 %v13210_v33  ;;  %4865 = vmatpush.bf16.msra.mxu3 %v13211_v20 }
 0x5c1   : > { %v8266_v10 = vpop.eup %8265 }
 0x5c2   : > { %v4586_v9 = vmul.f32 0.5, %v8266_v10  ;;  %v8268_v12 = vpop.eup %8267  ;;  %v13238_v10 = vld [vmem:[#allocation304_spill] sm:$0xff] }
 0x5c3   : > { %4827 = vmatpush.bf16.msra.mxu0 %v13212_v38  ;;  %4840 = vmatpush.bf16.msra.mxu1 %v13213_v28  ;;  %v8270_v57 = vpop.eup %8269  ;;  %v11115_v21 = vmul.f32 %v8268_v12, %v4587_v49  ;;  %v13239_v49 = vld [vmem:[#allocation305_spill] sm:$0xff]  ;;  %v13240_v12 = vld [vmem:[#allocation306_spill] sm:$0xff] }
 0x5c4   : > { %4853 = vmatpush.bf16.msra.mxu2 %v13214_v25  ;;  %4866 = vmatpush.bf16.msra.mxu3 %v13215_v36  ;;  %v4588_v51 = vadd.f32 0.5, %v4586_v9  ;;  %v13232_v25 = vld [vmem:[#allocation298_spill] sm:$0xff]  ;;  %v13233_v36 = vld [vmem:[#allocation299_spill] sm:$0xff] }
 0x5c6   : > { %v11117_v61 = vmul.f32 %v8270_v57, %v4588_v51  ;;  %v13241_v51 = vld [vmem:[#allocation307_spill] sm:$0xff]  ;;  %v13242_v57 = vld [vmem:[#allocation308_spill] sm:$0xff] }
 0x5c7   : > { %4828 = vmatpush.bf16.msra.mxu0 %v13216_v32  ;;  %4841 = vmatpush.bf16.msra.mxu1 %v13217_v29  ;;  %v13235_v32 = vld [vmem:[#allocation301_spill] sm:$0xff] }
 0x5c8   : > { %4854 = vmatpush.bf16.msra.mxu2 %v13218_v11  ;;  %4867 = vmatpush.bf16.msra.mxu3 %v13219_v42  ;;  %v4599_v59 = vpack.c.bf16 %v11117_v61, %v11115_v21  ;;  %v13236_v11 = vld [vmem:[#allocation302_spill] sm:$0xff]  ;;  %v13237_v42 = vld [vmem:[#allocation303_spill] sm:$0xff] }
 0x5ca   : > { %v4816_v33 = vunpack.c.l.b16 %v4599_v59  ;;  %v4817_v20 = vunpack.c.h.b16 %v4599_v59  ;;  %5075 = vst [vmem:[#allocation2] sm:$0xff] %v4599_v59  ;;  %v13247_v59 = vld [vmem:[#allocation313_spill] sm:$0xff] }
 0x5cb   : > { %4829 = vmatpush.bf16.msra.mxu0 %v13220_v50  ;;  %4842 = vmatpush.bf16.msra.mxu1 %v13221_v6  ;;  %v4616_v63 = vpop.f32.mrf.mxu0  ;;  %v4629_v5 = vpop.f32.mrf.mxu1 }
 0x5cc   : > { %4855 = vmatpush.bf16.msra.mxu2 %v13222_v46  ;;  %4868 = vmatpush.bf16.msra.mxu3 %v13223_v47  ;;  %v11127_v38 = vpack.c.b16 %v4816_v33, %v4816_v33  ;;  %v11129_v28 = vpack.c.b16 %v4817_v20, %v4817_v20  ;;  %v11135_v29 = vadd.f32 %v4629_v5, %v4616_v63  ;;  %v13248_v33 = vld [vmem:[#allocation314_spill] sm:$0xff]  ;;  %v13249_v20 = vld [vmem:[#allocation315_spill] sm:$0xff]  ;;  %v13254_v63 = vld [vmem:[#allocation320_spill] sm:$0xff] }
 0x5cd   : > { %v13255_v5 = vld [vmem:[#allocation321_spill] sm:$0xff] }
 0x5ce   : > { %4830 = vmatmul.bf16.vlgmr.msra.gmra.mxu0 %v11127_v38  ;;  %4843 = vmatmul.bf16.vlgmr.msra.gmra.mxu1 %v11129_v28 }
 0x5cf   : > { %4874 = vmatpush.bf16.msrb.mxu0 %v13224_v7  ;;  %4887 = vmatpush.bf16.msrb.mxu1 %v13225_v58  ;;  %v13243_v7 = vld [vmem:[#allocation309_spill] sm:$0xff]  ;;  %v13244_v58 = vld [vmem:[#allocation310_spill] sm:$0xff] }
 0x5d0   : > { %4900 = vmatpush.bf16.msrb.mxu2 %v13226_v14  ;;  %4913 = vmatpush.bf16.msrb.mxu3 %v13227_v0  ;;  %v13245_v14 = vld [vmem:[#allocation311_spill] sm:$0xff]  ;;  %v13246_v0 = vld [vmem:[#allocation312_spill] sm:$0xff] }
 0x5d1   : > { %4856 = vmatmul.bf16.vlgmr.msra.gmra.mxu2 %v11127_v38  ;;  %4869 = vmatmul.bf16.vlgmr.msra.gmra.mxu3 %v11129_v28 }
 0x5d3   : > { %4875 = vmatpush.bf16.msrb.mxu0 %v13228_v41  ;;  %4888 = vmatpush.bf16.msrb.mxu1 %v13229_v45  ;;  %v4618_v46 = vpop.f32.mrf.mxu0  ;;  %v4631_v47 = vpop.f32.mrf.mxu1 }
 0x5d4   : > { %4901 = vmatpush.bf16.msrb.mxu2 %v13230_v37  ;;  %4914 = vmatpush.bf16.msrb.mxu3 %v13231_v52  ;;  %v4642_v9 = vpop.f32.mrf.mxu2  ;;  %v4655_v50 = vpop.f32.mrf.mxu3  ;;  %v13250_v37 = vld [vmem:[#allocation316_spill] sm:$0xff]  ;;  %v13251_v52 = vld [vmem:[#allocation317_spill] sm:$0xff] }
 0x5d5   : > { %v11145_v6 = vadd.f32 %v4655_v50, %v4642_v9  ;;  %v13262_v9 = vld [vmem:[#allocation328_spill] sm:$0xff]  ;;  %v13263_v50 = vld [vmem:[#allocation329_spill] sm:$0xff] }
 0x5d7   : > { %4876 = vmatpush.bf16.msrb.mxu0 %v13232_v25  ;;  %4889 = vmatpush.bf16.msrb.mxu1 %v13233_v36  ;;  %v13252_v25 = vld [vmem:[#allocation318_spill] sm:$0xff]  ;;  %v13253_v36 = vld [vmem:[#allocation319_spill] sm:$0xff] }
 0x5d8   : > { %4902 = vmatpush.bf16.msrb.mxu2 %v13234_v40  ;;  %4915 = vmatpush.bf16.msrb.mxu3 %v13235_v32  ;;  %v13256_v40 = vld [vmem:[#allocation322_spill] sm:$0xff]  ;;  %v13257_v32 = vld [vmem:[#allocation323_spill] sm:$0xff] }
 0x5db   : > { %4877 = vmatpush.bf16.msrb.mxu0 %v13236_v11  ;;  %4890 = vmatpush.bf16.msrb.mxu1 %v13237_v42  ;;  %v13258_v11 = vld [vmem:[#allocation324_spill] sm:$0xff]  ;;  %v13259_v42 = vld [vmem:[#allocation325_spill] sm:$0xff] }
 0x5dc   : > { %4903 = vmatpush.bf16.msrb.mxu2 %v13238_v10  ;;  %4916 = vmatpush.bf16.msrb.mxu3 %v13239_v49  ;;  %v4644_v41 = vpop.f32.mrf.mxu2  ;;  %v4657_v45 = vpop.f32.mrf.mxu3  ;;  %v13260_v10 = vld [vmem:[#allocation326_spill] sm:$0xff]  ;;  %v13261_v49 = vld [vmem:[#allocation327_spill] sm:$0xff] }
 0x5dd   : > { %v13271_v41 = vld [vmem:[#allocation337_spill] sm:$0xff] }
 0x5df   : > { %4878 = vmatpush.bf16.msrb.mxu0 %v13240_v12  ;;  %4891 = vmatpush.bf16.msrb.mxu1 %v13241_v51  ;;  %v13264_v12 = vld [vmem:[#allocation330_spill] sm:$0xff]  ;;  %v13265_v51 = vld [vmem:[#allocation331_spill] sm:$0xff] }
 0x5e0   : > { %4904 = vmatpush.bf16.msrb.mxu2 %v13242_v57  ;;  %4917 = vmatpush.bf16.msrb.mxu3 %v13243_v7  ;;  %v13266_v57 = vld [vmem:[#allocation332_spill] sm:$0xff]  ;;  %v13267_v7 = vld [vmem:[#allocation333_spill] sm:$0xff] }
 0x5e3   : > { %4879 = vmatpush.bf16.msrb.mxu0 %v13244_v58  ;;  %4892 = vmatpush.bf16.msrb.mxu1 %v13245_v14  ;;  %v13268_v14 = vld [vmem:[#allocation334_spill] sm:$0xff] }
 0x5e4   : > { %4905 = vmatpush.bf16.msrb.mxu2 %v13246_v0  ;;  %4918 = vmatpush.bf16.msrb.mxu3 %v13247_v59  ;;  %v13269_v0 = vld [vmem:[#allocation335_spill] sm:$0xff]  ;;  %v13270_v59 = vld [vmem:[#allocation336_spill] sm:$0xff] }
 0x5e7   : > { %4880 = vmatpush.bf16.msrb.mxu0 %v13248_v33  ;;  %4893 = vmatpush.bf16.msrb.mxu1 %v13249_v20 }
 0x5e8   : > { %4906 = vmatpush.bf16.msrb.mxu2 %v13250_v37  ;;  %4919 = vmatpush.bf16.msrb.mxu3 %v13251_v52  ;;  %v13272_v37 = vld [vmem:[#allocation338_spill] sm:$0xff]  ;;  %v13273_v52 = vld [vmem:[#allocation339_spill] sm:$0xff] }
 0x5eb   : > { %4881 = vmatpush.bf16.msrb.mxu0 %v13252_v25  ;;  %4894 = vmatpush.bf16.msrb.mxu1 %v13253_v36  ;;  %v4668_v46 = vpop.f32.mrf.mxu0  ;;  %v4681_v47 = vpop.f32.mrf.mxu1 }
 0x5ec   : > { %4907 = vmatpush.bf16.msrb.mxu2 %v13254_v63  ;;  %4920 = vmatpush.bf16.msrb.mxu3 %v13255_v5  ;;  %v11179_v58 = vadd.f32 %v4681_v47, %v4668_v46  ;;  %v13274_v63 = vld [vmem:[#allocation340_spill] sm:$0xff]  ;;  %v13275_v5 = vld [vmem:[#allocation341_spill] sm:$0xff]  ;;  %v13284_v46 = vld [vmem:[#allocation350_spill] sm:$0xff] }
 0x5ed   : > { %v13285_v47 = vld [vmem:[#allocation351_spill] sm:$0xff] }
 0x5ee   : > { %4882 = vmatmul.bf16.vlgmr.msrb.gmra.mxu0 %v11127_v38  ;;  %4895 = vmatmul.bf16.vlgmr.msrb.gmra.mxu1 %v11129_v28 }
 0x5ef   : > { %4926 = vmatpush.bf16.msra.mxu0 %v13256_v40  ;;  %4939 = vmatpush.bf16.msra.mxu1 %v13257_v32  ;;  %v13276_v40 = vld [vmem:[#allocation342_spill] sm:$0xff]  ;;  %v13277_v32 = vld [vmem:[#allocation343_spill] sm:$0xff] }
 0x5f0   : > { %4952 = vmatpush.bf16.msra.mxu2 %v13258_v11  ;;  %4965 = vmatpush.bf16.msra.mxu3 %v13259_v42  ;;  %v13278_v11 = vld [vmem:[#allocation344_spill] sm:$0xff]  ;;  %v13279_v42 = vld [vmem:[#allocation345_spill] sm:$0xff] }
 0x5f1   : > { %4908 = vmatmul.bf16.vlgmr.msrb.gmra.mxu2 %v11127_v38  ;;  %4921 = vmatmul.bf16.vlgmr.msrb.gmra.mxu3 %v11129_v28 }
 0x5f3   : > { %4927 = vmatpush.bf16.msra.mxu0 %v13260_v10  ;;  %4940 = vmatpush.bf16.msra.mxu1 %v13261_v49  ;;  %v4670_v25 = vpop.f32.mrf.mxu0  ;;  %v4683_v36 = vpop.f32.mrf.mxu1 }
 0x5f4   : > { %4953 = vmatpush.bf16.msra.mxu2 %v13262_v9  ;;  %4966 = vmatpush.bf16.msra.mxu3 %v13263_v50  ;;  %v4694_v45 = vpop.f32.mrf.mxu2  ;;  %v4707_v33 = vpop.f32.mrf.mxu3  ;;  %v13280_v9 = vld [vmem:[#allocation346_spill] sm:$0xff]  ;;  %v13281_v50 = vld [vmem:[#allocation347_spill] sm:$0xff] }
 0x5f5   : > { %v11185_v20 = vadd.f32 %v4707_v33, %v4694_v45  ;;  %v13292_v45 = vld [vmem:[#allocation358_spill] sm:$0xff]  ;;  %v13293_v33 = vld [vmem:[#allocation359_spill] sm:$0xff] }
 0x5f6   : > { %v13296_v25 = vld [vmem:[#allocation362_spill] sm:$0xff]  ;;  %v13297_v36 = vld [vmem:[#allocation363_spill] sm:$0xff] }
 0x5f7   : > { %4928 = vmatpush.bf16.msra.mxu0 %v13264_v12  ;;  %4941 = vmatpush.bf16.msra.mxu1 %v13265_v51  ;;  %v13282_v12 = vld [vmem:[#allocation348_spill] sm:$0xff]  ;;  %v13283_v51 = vld [vmem:[#allocation349_spill] sm:$0xff] }
 0x5f8   : > { %4954 = vmatpush.bf16.msra.mxu2 %v13266_v57  ;;  %4967 = vmatpush.bf16.msra.mxu3 %v13267_v7  ;;  %v13286_v57 = vld [vmem:[#allocation352_spill] sm:$0xff]  ;;  %v13287_v7 = vld [vmem:[#allocation353_spill] sm:$0xff] }
 0x5fb   : > { %4929 = vmatpush.bf16.msra.mxu0 %v13268_v14  ;;  %4942 = vmatpush.bf16.msra.mxu1 %v13269_v0  ;;  %v13288_v14 = vld [vmem:[#allocation354_spill] sm:$0xff]  ;;  %v13289_v0 = vld [vmem:[#allocation355_spill] sm:$0xff] }
 0x5fc   : > { %4955 = vmatpush.bf16.msra.mxu2 %v13270_v59  ;;  %4968 = vmatpush.bf16.msra.mxu3 %v13271_v41  ;;  %v4696_v10 = vpop.f32.mrf.mxu2  ;;  %v4709_v49 = vpop.f32.mrf.mxu3  ;;  %v13290_v59 = vld [vmem:[#allocation356_spill] sm:$0xff]  ;;  %v13291_v41 = vld [vmem:[#allocation357_spill] sm:$0xff] }
 0x5fd   : > { %v13301_v10 = vld [vmem:[#allocation367_spill] sm:$0xff]  ;;  %v13302_v49 = vld [vmem:[#allocation368_spill] sm:$0xff] }
 0x5ff   : > { %4930 = vmatpush.bf16.msra.mxu0 %v13272_v37  ;;  %4943 = vmatpush.bf16.msra.mxu1 %v13273_v52  ;;  %v13294_v37 = vld [vmem:[#allocation360_spill] sm:$0xff]  ;;  %v13295_v52 = vld [vmem:[#allocation361_spill] sm:$0xff] }
 0x600   : > { %4956 = vmatpush.bf16.msra.mxu2 %v13274_v63  ;;  %4969 = vmatpush.bf16.msra.mxu3 %v13275_v5 }
 0x603   : > { %4931 = vmatpush.bf16.msra.mxu0 %v13276_v40  ;;  %4944 = vmatpush.bf16.msra.mxu1 %v13277_v32  ;;  %v13298_v40 = vld [vmem:[#allocation364_spill] sm:$0xff]  ;;  %v13299_v32 = vld [vmem:[#allocation365_spill] sm:$0xff] }
 0x604   : > { %4957 = vmatpush.bf16.msra.mxu2 %v13278_v11  ;;  %4970 = vmatpush.bf16.msra.mxu3 %v13279_v42  ;;  %v13300_v42 = vld [vmem:[#allocation366_spill] sm:$0xff] }
 0x607   : > { %4932 = vmatpush.bf16.msra.mxu0 %v13280_v9  ;;  %4945 = vmatpush.bf16.msra.mxu1 %v13281_v50  ;;  %v13303_v9 = vld [vmem:[#allocation369_spill] sm:$0xff] }
 0x608   : > { %4958 = vmatpush.bf16.msra.mxu2 %v13282_v12  ;;  %4971 = vmatpush.bf16.msra.mxu3 %v13283_v51 }
 0x60b   : > { %4933 = vmatpush.bf16.msra.mxu0 %v13284_v46  ;;  %4946 = vmatpush.bf16.msra.mxu1 %v13285_v47  ;;  %v4720_v63 = vpop.f32.mrf.mxu0  ;;  %v4733_v5 = vpop.f32.mrf.mxu1  ;;  %v13304_v46 = vld [vmem:[#allocation370_spill] sm:$0xff]  ;;  %v13305_v47 = vld [vmem:[#allocation371_spill] sm:$0xff] }
 0x60c   : > { %4959 = vmatpush.bf16.msra.mxu2 %v13286_v57  ;;  %4972 = vmatpush.bf16.msra.mxu3 %v13287_v7  ;;  %v11219_v11 = vadd.f32 %v4733_v5, %v4720_v63  ;;  %v13314_v63 = vld [vmem:[#allocation380_spill] sm:$0xff]  ;;  %v13315_v5 = vld [vmem:[#allocation381_spill] sm:$0xff] }
 0x60e   : > { %4934 = vmatmul.bf16.vlgmr.msra.gmra.mxu0 %v11127_v38  ;;  %4947 = vmatmul.bf16.vlgmr.msra.gmra.mxu1 %v11129_v28 }
 0x60f   : > { %4978 = vmatpush.bf16.msrb.mxu0 %v13288_v14  ;;  %4991 = vmatpush.bf16.msrb.mxu1 %v13289_v0  ;;  %v13306_v14 = vld [vmem:[#allocation372_spill] sm:$0xff]  ;;  %v13307_v0 = vld [vmem:[#allocation373_spill] sm:$0xff] }
 0x610   : > { %5004 = vmatpush.bf16.msrb.mxu2 %v13290_v59  ;;  %5017 = vmatpush.bf16.msrb.mxu3 %v13291_v41  ;;  %v13308_v59 = vld [vmem:[#allocation374_spill] sm:$0xff]  ;;  %v13309_v41 = vld [vmem:[#allocation375_spill] sm:$0xff] }
 0x611   : > { %4960 = vmatmul.bf16.vlgmr.msra.gmra.mxu2 %v11127_v38  ;;  %4973 = vmatmul.bf16.vlgmr.msra.gmra.mxu3 %v11129_v28 }
 0x613   : > { %4979 = vmatpush.bf16.msrb.mxu0 %v13292_v45  ;;  %4992 = vmatpush.bf16.msrb.mxu1 %v13293_v33  ;;  %v4722_v57 = vpop.f32.mrf.mxu0  ;;  %v4735_v7 = vpop.f32.mrf.mxu1  ;;  %v13310_v45 = vld [vmem:[#allocation376_spill] sm:$0xff]  ;;  %v13311_v33 = vld [vmem:[#allocation377_spill] sm:$0xff] }
 0x614   : > { %5005 = vmatpush.bf16.msrb.mxu2 %v13294_v37  ;;  %5018 = vmatpush.bf16.msrb.mxu3 %v13295_v52  ;;  %v4746_v50 = vpop.f32.mrf.mxu2  ;;  %v4759_v12 = vpop.f32.mrf.mxu3 }
 0x615   : > { %v11225_v51 = vadd.f32 %v4759_v12, %v4746_v50 }
 0x617   : > { %4980 = vmatpush.bf16.msrb.mxu0 %v13296_v25  ;;  %4993 = vmatpush.bf16.msrb.mxu1 %v13297_v36  ;;  %v13312_v25 = vld [vmem:[#allocation378_spill] sm:$0xff]  ;;  %v13313_v36 = vld [vmem:[#allocation379_spill] sm:$0xff] }
 0x618   : > { %5006 = vmatpush.bf16.msrb.mxu2 %v13298_v40  ;;  %5019 = vmatpush.bf16.msrb.mxu3 %v13299_v32  ;;  %v13316_v40 = vld [vmem:[#allocation382_spill] sm:$0xff]  ;;  %v13317_v32 = vld [vmem:[#allocation383_spill] sm:$0xff] }
 0x61b   : > { %4981 = vmatpush.bf16.msrb.mxu0 %v13300_v42  ;;  %4994 = vmatpush.bf16.msrb.mxu1 %v13301_v10  ;;  %v13318_v42 = vld [vmem:[#allocation384_spill] sm:$0xff]  ;;  %v13319_v10 = vld [vmem:[#allocation385_spill] sm:$0xff] }
 0x61c   : > { %5007 = vmatpush.bf16.msrb.mxu2 %v13302_v49  ;;  %5020 = vmatpush.bf16.msrb.mxu3 %v13303_v9  ;;  %v4748_v37 = vpop.f32.mrf.mxu2  ;;  %v4761_v52 = vpop.f32.mrf.mxu3 }
 0x61f   : > { %4982 = vmatpush.bf16.msrb.mxu0 %v13304_v46  ;;  %4995 = vmatpush.bf16.msrb.mxu1 %v13305_v47 }
 0x620   : > { %5008 = vmatpush.bf16.msrb.mxu2 %v13306_v14  ;;  %5021 = vmatpush.bf16.msrb.mxu3 %v13307_v0 }
 0x623   : > { %4983 = vmatpush.bf16.msrb.mxu0 %v13308_v59  ;;  %4996 = vmatpush.bf16.msrb.mxu1 %v13309_v41 }
 0x624   : > { %5009 = vmatpush.bf16.msrb.mxu2 %v13310_v45  ;;  %5022 = vmatpush.bf16.msrb.mxu3 %v13311_v33 }
 0x627   : > { %4984 = vmatpush.bf16.msrb.mxu0 %v13312_v25  ;;  %4997 = vmatpush.bf16.msrb.mxu1 %v13313_v36 }
 0x628   : > { %5010 = vmatpush.bf16.msrb.mxu2 %v13314_v63  ;;  %5023 = vmatpush.bf16.msrb.mxu3 %v13315_v5 }
 0x62b   : > { %4985 = vmatpush.bf16.msrb.mxu0 %v13316_v40  ;;  %4998 = vmatpush.bf16.msrb.mxu1 %v13317_v32  ;;  %v4772_v49 = vpop.f32.mrf.mxu0  ;;  %v4785_v9 = vpop.f32.mrf.mxu1 }
 0x62c   : > { %5011 = vmatpush.bf16.msrb.mxu2 %v13318_v42  ;;  %5024 = vmatpush.bf16.msrb.mxu3 %v13319_v10  ;;  %v11247_v50 = vadd.f32 %v4785_v9, %v4772_v49 }
 0x62e   : > { %4986 = vmatmul.bf16.vlgmr.msrb.gmra.mxu0 %v11127_v38  ;;  %4999 = vmatmul.bf16.vlgmr.msrb.gmra.mxu1 %v11129_v28 }
 0x62f   : > { %5012 = vmatmul.bf16.vlgmr.msrb.gmra.mxu2 %v11127_v38  ;;  %5025 = vmatmul.bf16.vlgmr.msrb.gmra.mxu3 %v11129_v28 }
 0x633   : > { %v4774_v57 = vpop.f32.mrf.mxu0  ;;  %v4787_v7 = vpop.f32.mrf.mxu1 }
 0x634   : > { %v4798_v12 = vpop.f32.mrf.mxu2  ;;  %v4811_v46 = vpop.f32.mrf.mxu3 }
 0x635   : > { %v11249_v47 = vadd.f32 %v4811_v46, %v4798_v12 }
 0x63c   : > { %v4800_v14 = vpop.f32.mrf.mxu2  ;;  %v4813_v0 = vpop.f32.mrf.mxu3 }
 0x63d   : > { %v13320_v0 = vld [vmem:[#allocation386_spill] sm:$0xff] }
 0x64b   : > { %v4831_v59 = vpop.f32.mrf.mxu0  ;;  %v4844_v41 = vpop.f32.mrf.mxu1 }
 0x64c   : > { %v4832_v10 = vadd.f32 %v4831_v59, %v11135_v29  ;;  %v13322_v29 = vld [vmem:[#allocation388_spill] sm:$0xff] }
 0x64e   : > { %v4845_v46 = vadd.f32 %v4844_v41, %v4832_v10 }
 0x653   : > { %v4833_v38 = vpop.f32.mrf.mxu0  ;;  %v4846_v37 = vpop.f32.mrf.mxu1 }
 0x654   : > { %v4857_v45 = vpop.f32.mrf.mxu2  ;;  %v4870_v33 = vpop.f32.mrf.mxu3  ;;  %v5030_v38 = vadd.f32 %v4845_v46, %v13320_v0 }
 0x655   : > { %v4858_v14 = vadd.f32 %v4857_v45, %v11145_v6 }
 0x65c   : > { %v4859_v28 = vpop.f32.mrf.mxu2  ;;  %v4872_v52 = vpop.f32.mrf.mxu3 }
 0x65d   : > { %v4871_v52 = vadd.f32 %v4870_v33, %v4858_v14 }
 0x65f   : > { %v5031_v59 = vadd.f32 %v4871_v52, %v13322_v29 }
 0x66b   : > { %v4883_v25 = vpop.f32.mrf.mxu0  ;;  %v4896_v36 = vpop.f32.mrf.mxu1 }
 0x66c   : > { %v4884_v42 = vadd.f32 %v4883_v25, %v11179_v58 }
 0x66e   : > { %v4897_v49 = vadd.f32 %v4896_v36, %v4884_v42 }
 0x670   : > { %v5032_v7 = vadd.f32 %v4897_v49, %v10204_v34 }
 0x672   : > { %v5046_v28 = vmul.f32 0.5, %v5032_v7 }
 0x673   : > { %v4885_v40 = vpop.f32.mrf.mxu0  ;;  %v4898_v32 = vpop.f32.mrf.mxu1 }
 0x674   : > { %v4909_v63 = vpop.f32.mrf.mxu2  ;;  %v4922_v5 = vpop.f32.mrf.mxu3  ;;  %v5038_v40 = vmul.f32 0.5, %v5030_v38  ;;  %v13321_v32 = vld [vmem:[#allocation387_spill] sm:$0xff]  ;;  %8271 = vtanh.f32 %v5046_v28  ;;  %v4346_v38 = vld [vmem:[#allocation3] sm:$0xff] }
 0x675   : > { %v4910_v57 = vadd.f32 %v4909_v63, %v11185_v20  ;;  %v5039_v63 = vmul.f32 0.5, %v5031_v59 }
 0x676   : > { %8273 = vtanh.f32 %v5038_v40 }
 0x677   : > { %v4923_v37 = vadd.f32 %v4922_v5, %v4910_v57  ;;  %v13323_v5 = vld [vmem:[#allocation389_spill] sm:$0xff] }
 0x679   : > { %v5033_v58 = vadd.f32 %v4923_v37, %v13321_v32 }
 0x67a   : > { %v8272_v42 = vpop.eup %8271 }
 0x67b   : > { %v5047_v25 = vmul.f32 0.5, %v5033_v58  ;;  %v5050_v33 = vmul.f32 0.5, %v8272_v42 }
 0x67c   : > { %v4911_v9 = vpop.f32.mrf.mxu2  ;;  %v4924_v12 = vpop.f32.mrf.mxu3 }
 0x67d   : > { %8275 = vtanh.f32 %v5047_v25  ;;  %v8274_v45 = vpop.eup %8273  ;;  %v5052_v0 = vadd.f32 0.5, %v5050_v33 }
 0x67e   : > { %8277 = vtanh.f32 %v5039_v63  ;;  %v5042_v12 = vmul.f32 0.5, %v8274_v45 }
 0x67f   : > { %v5064_v58 = vmul.f32 %v5052_v0, %v4346_v38 }
 0x680   : > { %v5044_v28 = vadd.f32 0.5, %v5042_v12 }
 0x683   : > { %v8276_v14 = vpop.eup %8275 }
 0x684   : > { %v8278_v37 = vpop.eup %8277  ;;  %v5051_v32 = vmul.f32 0.5, %v8276_v14 }
 0x685   : > { %v5043_v59 = vmul.f32 0.5, %v8278_v37 }
 0x687   : > { %v5045_v63 = vadd.f32 0.5, %v5043_v59 }
 0x68b   : > { %v4935_v41 = vpop.f32.mrf.mxu0  ;;  %v4948_v36 = vpop.f32.mrf.mxu1 }
 0x68c   : > { %v4936_v20 = vadd.f32 %v4935_v41, %v11219_v11 }
 0x68e   : > { %v4949_v6 = vadd.f32 %v4948_v36, %v4936_v20  ;;  %v4347_v20 = vld [vmem:[#allocation3 + $0x18] sm:$0xff] }
 0x690   : > { %v5034_v10 = vadd.f32 %v4949_v6, %v13323_v5 }
 0x692   : > { %8279 = vtanh.f32 %v5034_v10 }
 0x693   : > { %v4937_v57 = vpop.f32.mrf.mxu0  ;;  %v4950_v7 = vpop.f32.mrf.mxu1 }
 0x694   : > { %v4961_v49 = vpop.f32.mrf.mxu2  ;;  %v4974_v9 = vpop.f32.mrf.mxu3 }
 0x695   : > { %v4962_v46 = vadd.f32 %v4961_v49, %v11225_v51  ;;  %v5053_v51 = vadd.f32 0.5, %v5051_v32 }
 0x697   : > { %v4975_v11 = vadd.f32 %v4974_v9, %v4962_v46  ;;  %v5065_v6 = vmul.f32 %v5053_v51, %v4347_v20 }
 0x698   : > { %v8280_v40 = vpop.eup %8279 }
 0x699   : > { %v5035_v52 = vadd.f32 %v4975_v11, %v10228_v53  ;;  %v5066_v29 = vmul.f32 %v8280_v40, %v5044_v28 }
 0x69b   : > { %8281 = vtanh.f32 %v5035_v52  ;;  %v5068_v36 = vadd.f32 %v5066_v29, %v5064_v58 }
 0x69c   : > { %v4963_v25 = vpop.f32.mrf.mxu2  ;;  %v4976_v41 = vpop.f32.mrf.mxu3 }
 0x69d   : > { %5079 = vst [vmem:[#allocation3] sm:$0xff] %v5068_v36 }
 0x6a1   : > { %v8282_v42 = vpop.eup %8281 }
 0x6a2   : > { %v5067_v45 = vmul.f32 %v8282_v42, %v5045_v63 }
 0x6a4   : > { %v5069_v5 = vadd.f32 %v5067_v45, %v5065_v6 }
 0x6a6   : > { %5080 = vst [vmem:[#allocation3 + $0x18] sm:$0xff] %v5069_v5 }
 0x6ab   : > { %v4987_v10 = vpop.f32.mrf.mxu0  ;;  %v5000_v33 = vpop.f32.mrf.mxu1 }
 0x6ac   : > { %v4988_v49 = vadd.f32 %v4987_v10, %v11247_v50 }
 0x6ae   : > { %v5001_v9 = vadd.f32 %v5000_v33, %v4988_v49 }
 0x6b0   : > { %v5036_v12 = vadd.f32 %v5001_v9, %v10233_v30 }
 0x6b2   : > { %v5056_v46 = vmul.f32 0.5, %v5036_v12  ;;  %v5013_v57 = vpop.f32.mrf.mxu2  ;;  %v5026_v7 = vpop.f32.mrf.mxu3 }
 0x6b3   : > { %v5014_v14 = vadd.f32 %v5013_v57, %v11249_v47  ;;  %v4989_v0 = vpop.f32.mrf.mxu0  ;;  %v5002_v11 = vpop.f32.mrf.mxu1 }
 0x6b4   : > { %8283 = vtanh.f32 %v5056_v46 }
 0x6b5   : > { %v5027_v38 = vadd.f32 %v5026_v7, %v5014_v14  ;;  %8285 = vtanh.f32 %v5068_v36 }
 0x6b7   : > { %v5037_v37 = vadd.f32 %v5027_v38, %v10238_v23 }
 0x6b9   : > { %v5057_v28 = vmul.f32 0.5, %v5037_v37 }
 0x6ba   : > { %v8284_v52 = vpop.eup %8283  ;;  %v5015_v40 = vpop.f32.mrf.mxu2 }
 0x6bb   : > { %v5028_v50 = vpop.f32.mrf.mxu3  ;;  %v5060_v32 = vmul.f32 0.5, %v8284_v52  ;;  %8287 = vtanh.f32 %v5057_v28  ;;  %v8286_v29 = vpop.eup %8285 }
 0x6bc   : > { %8289 = vtanh.f32 %v5069_v5 }
 0x6bd   : > { %v5062_v58 = vadd.f32 0.5, %v5060_v32 }
 0x6bf   : > { %v5072_v59 = vmul.f32 %v8286_v29, %v5062_v58 }
 0x6c1   : > { %v8288_v25 = vpop.eup %8287 }
 0x6c2   : > { %v5061_v47 = vmul.f32 0.5, %v8288_v25  ;;  %v8290_v51 = vpop.eup %8289 }
 0x6c4   : > { %v5063_v41 = vadd.f32 0.5, %v5061_v47 }
 0x6c6   : > { %v5073_v20 = vmul.f32 %v8290_v51, %v5063_v41 }
 0x6c7   : > { %5087 = sbr.rel (%p7637_p12) target bundleno = 1748 (0x6d4), region = 92 }
 0x6c8   : > { %v5074_v63 = vpack.c.bf16 %v5073_v20, %v5072_v59 }
 0x6ca   : > { %5078 = vst [vmem:[#allocation2 + $0x8] sm:$0xff] %v5074_v63 }
 0x6cb   : > { %7636 = vst [vmem:[%s8912_s2 + $0x10] sm:$0xff] %v5074_v63 }
 0x6cc   : > { %5088 = vst [vmem:[#allocation17] sm:$0xff] %v11115_v21 }
 0x6cd   : > { %5089 = vst [vmem:[#allocation17 + $0x8] sm:$0xff] %v11117_v61 }
 0x6ce   : > { %5091 = vst [vmem:[#allocation17 + $0x10] sm:$0xff] %v5072_v59 }
 0x6cf   : > { %5092 = vst [vmem:[#allocation17 + $0x18] sm:$0xff] %v5073_v20 }
 0x6d0   : > { %5093 = vst [vmem:[#allocation19] sm:$0xff] %v11058_v62 }
 0x6d1   : > { %5094 = vst [vmem:[#allocation19 + $0x8] sm:$0xff] %v11067_v1 }
 0x6d2   : > { %5096 = vst [vmem:[#allocation19 + $0x10] sm:$0xff] %v5068_v36 }
 0x6d3   : > { %5097 = vst [vmem:[#allocation19 + $0x18] sm:$0xff] %v5069_v5 }
 0x6d4 PF: > { %5124 = vmatpush.bf16.msra.mxu0 %v8916_v13  ;;  %5137 = vmatpush.bf16.msra.mxu1 %v8918_v17  ;;  %v5111_v13 = vld [vmem:[#allocation2] sm:$0xff]  ;;  %v13324_v17 = vld [vmem:[#allocation26_spill] sm:$0xff]  ;;  %v13343_v62 = vld [vmem:[#allocation45_spill] sm:$0xff]  ;;  %s5852_s19 = sadd.s32 3, %s10197_s17 }
 0x6d5   : > { %5150 = vmatpush.bf16.msra.mxu2 %v8920_v18  ;;  %5163 = vmatpush.bf16.msra.mxu3 %v8923_v22  ;;  %v13325_v18 = vld [vmem:[#allocation27_spill] sm:$0xff]  ;;  %v5118_v22 = vunpack.c.l.b16 %v5111_v13  ;;  %v13344_v1 = vld [vmem:[#allocation46_spill] sm:$0xff]  ;;  %v13346_v61 = vld [vmem:[#allocation48_spill] sm:$0xff]  ;;  %p7643_p13 = scmp.ne.s32.totalorder %s5852_s19, 9 }
 0x6d6   : > { %v13345_v21 = vld [vmem:[#allocation47_spill] sm:$0xff]  ;;  %v13347_v36 = vld [vmem:[#allocation49_spill] sm:$0xff]  ;;  %v13348_v42 = vld [vmem:[#allocation50_spill] sm:$0xff] }
 0x6d7   : > { %v13349_v6 = vld [vmem:[#allocation51_spill] sm:$0xff]  ;;  %v13350_v45 = vld [vmem:[#allocation52_spill] sm:$0xff]  ;;  %v13351_v5 = vld [vmem:[#allocation53_spill] sm:$0xff] }
 0x6d8   : > { %5125 = vmatpush.bf16.msra.mxu0 %v8927_v26  ;;  %5138 = vmatpush.bf16.msra.mxu1 %v8929_v27  ;;  %v5119_v26 = vunpack.c.h.b16 %v5111_v13  ;;  %v13326_v27 = vld [vmem:[#allocation28_spill] sm:$0xff]  ;;  %v13352_v10 = vld [vmem:[#allocation54_spill] sm:$0xff]  ;;  %v13353_v33 = vld [vmem:[#allocation55_spill] sm:$0xff] }
 0x6d9   : > { %5151 = vmatpush.bf16.msra.mxu2 %v8932_v31  ;;  %5164 = vmatpush.bf16.msra.mxu3 %v8934_v35  ;;  %v13327_v31 = vld [vmem:[#allocation29_spill] sm:$0xff]  ;;  %v13328_v35 = vld [vmem:[#allocation30_spill] sm:$0xff]  ;;  %v13354_v49 = vld [vmem:[#allocation56_spill] sm:$0xff] }
 0x6da   : > { %v13355_v9 = vld [vmem:[#allocation57_spill] sm:$0xff]  ;;  %v13356_v12 = vld [vmem:[#allocation58_spill] sm:$0xff]  ;;  %v13357_v46 = vld [vmem:[#allocation59_spill] sm:$0xff] }
 0x6db   : > { %v13358_v57 = vld [vmem:[#allocation60_spill] sm:$0xff]  ;;  %v13359_v7 = vld [vmem:[#allocation61_spill] sm:$0xff]  ;;  %v13360_v14 = vld [vmem:[#allocation62_spill] sm:$0xff] }
 0x6dc   : > { %5126 = vmatpush.bf16.msra.mxu0 %v8937_v39  ;;  %5139 = vmatpush.bf16.msra.mxu1 %v8941_v43  ;;  %v13329_v39 = vld [vmem:[#allocation31_spill] sm:$0xff]  ;;  %v11305_v43 = vpack.c.b16 %v5118_v22, %v5118_v22  ;;  %v13362_v11 = vld [vmem:[#allocation64_spill] sm:$0xff]  ;;  %v13363_v38 = vld [vmem:[#allocation65_spill] sm:$0xff] }
 0x6dd   : > { %5152 = vmatpush.bf16.msra.mxu2 %v8943_v44  ;;  %5165 = vmatpush.bf16.msra.mxu3 %v8946_v48  ;;  %v11307_v44 = vpack.c.b16 %v5119_v26, %v5119_v26  ;;  %v13330_v48 = vld [vmem:[#allocation32_spill] sm:$0xff]  ;;  %v13361_v0 = vld [vmem:[#allocation63_spill] sm:$0xff]  ;;  %v13364_v37 = vld [vmem:[#allocation66_spill] sm:$0xff] }
 0x6de   : > { %v13365_v28 = vld [vmem:[#allocation67_spill] sm:$0xff]  ;;  %v13366_v52 = vld [vmem:[#allocation68_spill] sm:$0xff]  ;;  %v13367_v40 = vld [vmem:[#allocation69_spill] sm:$0xff] }
 0x6df   : > { %v13368_v50 = vld [vmem:[#allocation70_spill] sm:$0xff]  ;;  %v13369_v32 = vld [vmem:[#allocation71_spill] sm:$0xff]  ;;  %v13370_v58 = vld [vmem:[#allocation72_spill] sm:$0xff] }
 0x6e0   : > { %5127 = vmatpush.bf16.msra.mxu0 %v8949_v54  ;;  %5140 = vmatpush.bf16.msra.mxu1 %v8953_v55  ;;  %v13331_v54 = vld [vmem:[#allocation33_spill] sm:$0xff]  ;;  %v13332_v55 = vld [vmem:[#allocation34_spill] sm:$0xff]  ;;  %v13373_v25 = vld [vmem:[#allocation75_spill] sm:$0xff] }
 0x6e1   : > { %5153 = vmatpush.bf16.msra.mxu2 %v8955_v56  ;;  %5166 = vmatpush.bf16.msra.mxu3 %v8958_v60  ;;  %v13333_v56 = vld [vmem:[#allocation35_spill] sm:$0xff]  ;;  %v13334_v60 = vld [vmem:[#allocation36_spill] sm:$0xff]  ;;  %v13371_v29 = vld [vmem:[#allocation73_spill] sm:$0xff] }
 0x6e2   : > { %v13372_v59 = vld [vmem:[#allocation74_spill] sm:$0xff]  ;;  %v13374_v47 = vld [vmem:[#allocation76_spill] sm:$0xff]  ;;  %v13375_v41 = vld [vmem:[#allocation77_spill] sm:$0xff] }
 0x6e3   : > { %v13376_v51 = vld [vmem:[#allocation78_spill] sm:$0xff]  ;;  %v13377_v20 = vld [vmem:[#allocation79_spill] sm:$0xff]  ;;  %v13378_v63 = vld [vmem:[#allocation80_spill] sm:$0xff] }
 0x6e4   : > { %5128 = vmatpush.bf16.msra.mxu0 %v8961_v2  ;;  %5141 = vmatpush.bf16.msra.mxu1 %v8965_v3  ;;  %v13335_v2 = vld [vmem:[#allocation37_spill] sm:$0xff]  ;;  %v13336_v3 = vld [vmem:[#allocation38_spill] sm:$0xff]  ;;  %v13382_v22 = vld [vmem:[#allocation84_spill] sm:$0xff] }
 0x6e5   : > { %5154 = vmatpush.bf16.msra.mxu2 %v8967_v4  ;;  %5167 = vmatpush.bf16.msra.mxu3 %v8970_v8  ;;  %v13337_v4 = vld [vmem:[#allocation39_spill] sm:$0xff]  ;;  %v13338_v8 = vld [vmem:[#allocation40_spill] sm:$0xff]  ;;  %v13379_v13 = vld [vmem:[#allocation81_spill] sm:$0xff] }
 0x6e6   : > { %v13383_v26 = vld [vmem:[#allocation85_spill] sm:$0xff] }
 0x6e8   : > { %5129 = vmatpush.bf16.msra.mxu0 %v8973_v15  ;;  %5142 = vmatpush.bf16.msra.mxu1 %v8977_v16  ;;  %v13339_v15 = vld [vmem:[#allocation41_spill] sm:$0xff]  ;;  %v13340_v16 = vld [vmem:[#allocation42_spill] sm:$0xff] }
 0x6e9   : > { %5155 = vmatpush.bf16.msra.mxu2 %v8979_v19  ;;  %5168 = vmatpush.bf16.msra.mxu3 %v8982_v24  ;;  %v13341_v19 = vld [vmem:[#allocation43_spill] sm:$0xff]  ;;  %v13342_v24 = vld [vmem:[#allocation44_spill] sm:$0xff] }
 0x6ec   : > { %5130 = vmatpush.bf16.msra.mxu0 %v13324_v17  ;;  %5143 = vmatpush.bf16.msra.mxu1 %v13325_v18  ;;  %v13380_v17 = vld [vmem:[#allocation82_spill] sm:$0xff]  ;;  %v13381_v18 = vld [vmem:[#allocation83_spill] sm:$0xff] }
 0x6ed   : > { %5156 = vmatpush.bf16.msra.mxu2 %v13326_v27  ;;  %5169 = vmatpush.bf16.msra.mxu3 %v13327_v31  ;;  %v13384_v27 = vld [vmem:[#allocation86_spill] sm:$0xff]  ;;  %v13385_v31 = vld [vmem:[#allocation87_spill] sm:$0xff] }
 0x6f0   : > { %5131 = vmatpush.bf16.msra.mxu0 %v13328_v35  ;;  %5144 = vmatpush.bf16.msra.mxu1 %v13329_v39  ;;  %v13386_v35 = vld [vmem:[#allocation88_spill] sm:$0xff]  ;;  %v13387_v39 = vld [vmem:[#allocation89_spill] sm:$0xff] }
 0x6f1   : > { %5157 = vmatpush.bf16.msra.mxu2 %v13330_v48  ;;  %5170 = vmatpush.bf16.msra.mxu3 %v13331_v54  ;;  %v13388_v48 = vld [vmem:[#allocation90_spill] sm:$0xff]  ;;  %v13389_v54 = vld [vmem:[#allocation91_spill] sm:$0xff] }
 0x6f3   : > { %5132 = vmatmul.bf16.vlgmr.msra.gmra.mxu0 %v11305_v43  ;;  %5145 = vmatmul.bf16.vlgmr.msra.gmra.mxu1 %v11307_v44 }
 0x6f4   : > { %5176 = vmatpush.bf16.msrb.mxu0 %v13332_v55  ;;  %5189 = vmatpush.bf16.msrb.mxu1 %v13333_v56  ;;  %v13390_v55 = vld [vmem:[#allocation92_spill] sm:$0xff]  ;;  %v13391_v56 = vld [vmem:[#allocation93_spill] sm:$0xff] }
 0x6f5   : > { %5202 = vmatpush.bf16.msrb.mxu2 %v13334_v60  ;;  %5215 = vmatpush.bf16.msrb.mxu3 %v13335_v2  ;;  %v13392_v60 = vld [vmem:[#allocation94_spill] sm:$0xff]  ;;  %v13393_v2 = vld [vmem:[#allocation95_spill] sm:$0xff] }
 0x6f6   : > { %5158 = vmatmul.bf16.vlgmr.msra.gmra.mxu2 %v11305_v43  ;;  %5171 = vmatmul.bf16.vlgmr.msra.gmra.mxu3 %v11307_v44 }
 0x6f8   : > { %5177 = vmatpush.bf16.msrb.mxu0 %v13336_v3  ;;  %5190 = vmatpush.bf16.msrb.mxu1 %v13337_v4  ;;  %v13394_v3 = vld [vmem:[#allocation96_spill] sm:$0xff]  ;;  %v13395_v4 = vld [vmem:[#allocation97_spill] sm:$0xff] }
 0x6f9   : > { %5203 = vmatpush.bf16.msrb.mxu2 %v13338_v8  ;;  %5216 = vmatpush.bf16.msrb.mxu3 %v13339_v15  ;;  %v13396_v8 = vld [vmem:[#allocation98_spill] sm:$0xff]  ;;  %v13397_v15 = vld [vmem:[#allocation99_spill] sm:$0xff] }
 0x6fc   : > { %5178 = vmatpush.bf16.msrb.mxu0 %v13340_v16  ;;  %5191 = vmatpush.bf16.msrb.mxu1 %v13341_v19  ;;  %v13398_v16 = vld [vmem:[#allocation100_spill] sm:$0xff]  ;;  %v13399_v19 = vld [vmem:[#allocation101_spill] sm:$0xff] }
 0x6fd   : > { %5204 = vmatpush.bf16.msrb.mxu2 %v13342_v24  ;;  %5217 = vmatpush.bf16.msrb.mxu3 %v13343_v62  ;;  %v13400_v24 = vld [vmem:[#allocation102_spill] sm:$0xff]  ;;  %v13401_v62 = vld [vmem:[#allocation103_spill] sm:$0xff] }
 0x700   : > { %5179 = vmatpush.bf16.msrb.mxu0 %v13344_v1  ;;  %5192 = vmatpush.bf16.msrb.mxu1 %v13345_v21  ;;  %v13402_v1 = vld [vmem:[#allocation104_spill] sm:$0xff]  ;;  %v13403_v21 = vld [vmem:[#allocation105_spill] sm:$0xff] }
 0x701   : > { %5205 = vmatpush.bf16.msrb.mxu2 %v13346_v61  ;;  %5218 = vmatpush.bf16.msrb.mxu3 %v13347_v36  ;;  %v13404_v61 = vld [vmem:[#allocation106_spill] sm:$0xff]  ;;  %v13405_v36 = vld [vmem:[#allocation107_spill] sm:$0xff] }
 0x704   : > { %5180 = vmatpush.bf16.msrb.mxu0 %v13348_v42  ;;  %5193 = vmatpush.bf16.msrb.mxu1 %v13349_v6  ;;  %v13406_v42 = vld [vmem:[#allocation108_spill] sm:$0xff]  ;;  %v13407_v6 = vld [vmem:[#allocation109_spill] sm:$0xff] }
 0x705   : > { %5206 = vmatpush.bf16.msrb.mxu2 %v13350_v45  ;;  %5219 = vmatpush.bf16.msrb.mxu3 %v13351_v5  ;;  %v13408_v45 = vld [vmem:[#allocation110_spill] sm:$0xff]  ;;  %v13409_v5 = vld [vmem:[#allocation111_spill] sm:$0xff] }
 0x708   : > { %5181 = vmatpush.bf16.msrb.mxu0 %v13352_v10  ;;  %5194 = vmatpush.bf16.msrb.mxu1 %v13353_v33  ;;  %v13410_v10 = vld [vmem:[#allocation112_spill] sm:$0xff]  ;;  %v13411_v33 = vld [vmem:[#allocation113_spill] sm:$0xff] }
 0x709   : > { %5207 = vmatpush.bf16.msrb.mxu2 %v13354_v49  ;;  %5220 = vmatpush.bf16.msrb.mxu3 %v13355_v9  ;;  %v13412_v49 = vld [vmem:[#allocation114_spill] sm:$0xff]  ;;  %v13413_v9 = vld [vmem:[#allocation115_spill] sm:$0xff] }
 0x70c   : > { %5182 = vmatpush.bf16.msrb.mxu0 %v13356_v12  ;;  %5195 = vmatpush.bf16.msrb.mxu1 %v13357_v46  ;;  %v13414_v12 = vld [vmem:[#allocation116_spill] sm:$0xff]  ;;  %v13415_v46 = vld [vmem:[#allocation117_spill] sm:$0xff] }
 0x70d   : > { %5208 = vmatpush.bf16.msrb.mxu2 %v13358_v57  ;;  %5221 = vmatpush.bf16.msrb.mxu3 %v13359_v7  ;;  %v13416_v57 = vld [vmem:[#allocation118_spill] sm:$0xff]  ;;  %v13417_v7 = vld [vmem:[#allocation119_spill] sm:$0xff] }
 0x710   : > { %5183 = vmatpush.bf16.msrb.mxu0 %v13360_v14  ;;  %5196 = vmatpush.bf16.msrb.mxu1 %v13361_v0  ;;  %v13418_v14 = vld [vmem:[#allocation120_spill] sm:$0xff]  ;;  %v13419_v0 = vld [vmem:[#allocation121_spill] sm:$0xff] }
 0x711   : > { %5209 = vmatpush.bf16.msrb.mxu2 %v13362_v11  ;;  %5222 = vmatpush.bf16.msrb.mxu3 %v13363_v38  ;;  %v13420_v11 = vld [vmem:[#allocation122_spill] sm:$0xff]  ;;  %v13421_v38 = vld [vmem:[#allocation123_spill] sm:$0xff] }
 0x713   : > { %5184 = vmatmul.bf16.vlgmr.msrb.gmra.mxu0 %v11305_v43  ;;  %5197 = vmatmul.bf16.vlgmr.msrb.gmra.mxu1 %v11307_v44 }
 0x714   : > { %5228 = vmatpush.bf16.msra.mxu0 %v13364_v37  ;;  %5241 = vmatpush.bf16.msra.mxu1 %v13365_v28  ;;  %v13422_v37 = vld [vmem:[#allocation124_spill] sm:$0xff]  ;;  %v13423_v28 = vld [vmem:[#allocation125_spill] sm:$0xff] }
 0x715   : > { %5254 = vmatpush.bf16.msra.mxu2 %v13366_v52  ;;  %5267 = vmatpush.bf16.msra.mxu3 %v13367_v40  ;;  %v13424_v52 = vld [vmem:[#allocation126_spill] sm:$0xff]  ;;  %v13425_v40 = vld [vmem:[#allocation127_spill] sm:$0xff] }
 0x716   : > { %5210 = vmatmul.bf16.vlgmr.msrb.gmra.mxu2 %v11305_v43  ;;  %5223 = vmatmul.bf16.vlgmr.msrb.gmra.mxu3 %v11307_v44 }
 0x718   : > { %5229 = vmatpush.bf16.msra.mxu0 %v13368_v50  ;;  %5242 = vmatpush.bf16.msra.mxu1 %v13369_v32  ;;  %v13426_v50 = vld [vmem:[#allocation128_spill] sm:$0xff]  ;;  %v13427_v32 = vld [vmem:[#allocation129_spill] sm:$0xff] }
 0x719   : > { %5255 = vmatpush.bf16.msra.mxu2 %v13370_v58  ;;  %5268 = vmatpush.bf16.msra.mxu3 %v13371_v29  ;;  %v13428_v58 = vld [vmem:[#allocation130_spill] sm:$0xff]  ;;  %v13429_v29 = vld [vmem:[#allocation131_spill] sm:$0xff] }
 0x71c   : > { %5230 = vmatpush.bf16.msra.mxu0 %v13372_v59  ;;  %5243 = vmatpush.bf16.msra.mxu1 %v13373_v25  ;;  %v13430_v59 = vld [vmem:[#allocation132_spill] sm:$0xff]  ;;  %v13431_v25 = vld [vmem:[#allocation133_spill] sm:$0xff] }
 0x71d   : > { %5256 = vmatpush.bf16.msra.mxu2 %v13374_v47  ;;  %5269 = vmatpush.bf16.msra.mxu3 %v13375_v41  ;;  %v13432_v47 = vld [vmem:[#allocation134_spill] sm:$0xff]  ;;  %v13433_v41 = vld [vmem:[#allocation135_spill] sm:$0xff] }
 0x720   : > { %5231 = vmatpush.bf16.msra.mxu0 %v13376_v51  ;;  %5244 = vmatpush.bf16.msra.mxu1 %v13377_v20  ;;  %v13434_v51 = vld [vmem:[#allocation136_spill] sm:$0xff]  ;;  %v13435_v20 = vld [vmem:[#allocation137_spill] sm:$0xff] }
 0x721   : > { %5257 = vmatpush.bf16.msra.mxu2 %v13378_v63  ;;  %5270 = vmatpush.bf16.msra.mxu3 %v13379_v13  ;;  %v13436_v63 = vld [vmem:[#allocation138_spill] sm:$0xff]  ;;  %v13437_v13 = vld [vmem:[#allocation139_spill] sm:$0xff] }
 0x724   : > { %5232 = vmatpush.bf16.msra.mxu0 %v13380_v17  ;;  %5245 = vmatpush.bf16.msra.mxu1 %v13381_v18  ;;  %v13438_v17 = vld [vmem:[#allocation140_spill] sm:$0xff]  ;;  %v13439_v18 = vld [vmem:[#allocation141_spill] sm:$0xff] }
 0x725   : > { %5258 = vmatpush.bf16.msra.mxu2 %v13382_v22  ;;  %5271 = vmatpush.bf16.msra.mxu3 %v13383_v26  ;;  %v13441_v22 = vld [vmem:[#allocation143_spill] sm:$0xff]  ;;  %v13443_v26 = vld [vmem:[#allocation145_spill] sm:$0xff] }
 0x728   : > { %5233 = vmatpush.bf16.msra.mxu0 %v13384_v27  ;;  %5246 = vmatpush.bf16.msra.mxu1 %v13385_v31  ;;  %v13444_v27 = vld [vmem:[#allocation146_spill] sm:$0xff]  ;;  %v13445_v31 = vld [vmem:[#allocation147_spill] sm:$0xff] }
 0x729   : > { %5259 = vmatpush.bf16.msra.mxu2 %v13386_v35  ;;  %5272 = vmatpush.bf16.msra.mxu3 %v13387_v39  ;;  %v13446_v35 = vld [vmem:[#allocation148_spill] sm:$0xff]  ;;  %v13447_v39 = vld [vmem:[#allocation149_spill] sm:$0xff] }
 0x72c   : > { %5234 = vmatpush.bf16.msra.mxu0 %v13388_v48  ;;  %5247 = vmatpush.bf16.msra.mxu1 %v13389_v54  ;;  %v13448_v48 = vld [vmem:[#allocation150_spill] sm:$0xff]  ;;  %v13449_v54 = vld [vmem:[#allocation151_spill] sm:$0xff] }
 0x72d   : > { %5260 = vmatpush.bf16.msra.mxu2 %v13390_v55  ;;  %5273 = vmatpush.bf16.msra.mxu3 %v13391_v56  ;;  %v13450_v55 = vld [vmem:[#allocation152_spill] sm:$0xff]  ;;  %v13451_v56 = vld [vmem:[#allocation153_spill] sm:$0xff] }
 0x730   : > { %5235 = vmatpush.bf16.msra.mxu0 %v13392_v60  ;;  %5248 = vmatpush.bf16.msra.mxu1 %v13393_v2  ;;  %v5114_v60 = vld [vmem:[#allocation2 + $0x8] sm:$0xff]  ;;  %v13452_v2 = vld [vmem:[#allocation154_spill] sm:$0xff] }
 0x731   : > { %5261 = vmatpush.bf16.msra.mxu2 %v13394_v3  ;;  %5274 = vmatpush.bf16.msra.mxu3 %v13395_v4  ;;  %v13453_v3 = vld [vmem:[#allocation155_spill] sm:$0xff]  ;;  %v5370_v4 = vunpack.c.l.b16 %v5114_v60 }
 0x733   : > { %5236 = vmatmul.bf16.vlgmr.msra.gmra.mxu0 %v11305_v43  ;;  %5249 = vmatmul.bf16.vlgmr.msra.gmra.mxu1 %v11307_v44 }
 0x734   : > { %5280 = vmatpush.bf16.msrb.mxu0 %v13396_v8  ;;  %5293 = vmatpush.bf16.msrb.mxu1 %v13397_v15  ;;  %v5371_v8 = vunpack.c.h.b16 %v5114_v60  ;;  %v13454_v15 = vld [vmem:[#allocation156_spill] sm:$0xff]  ;;  %v13499_v60 = vld [vmem:[#allocation201_spill] sm:$0xff] }
 0x735   : > { %5306 = vmatpush.bf16.msrb.mxu2 %v13398_v16  ;;  %5319 = vmatpush.bf16.msrb.mxu3 %v13399_v19  ;;  %v13455_v16 = vld [vmem:[#allocation157_spill] sm:$0xff]  ;;  %v13456_v19 = vld [vmem:[#allocation158_spill] sm:$0xff] }
 0x736   : > { %5262 = vmatmul.bf16.vlgmr.msra.gmra.mxu2 %v11305_v43  ;;  %5275 = vmatmul.bf16.vlgmr.msra.gmra.mxu3 %v11307_v44 }
 0x738   : > { %5281 = vmatpush.bf16.msrb.mxu0 %v13400_v24  ;;  %5294 = vmatpush.bf16.msrb.mxu1 %v13401_v62  ;;  %v13457_v24 = vld [vmem:[#allocation159_spill] sm:$0xff]  ;;  %v11453_v62 = vpack.c.b16 %v5370_v4, %v5370_v4 }
 0x739   : > { %5307 = vmatpush.bf16.msrb.mxu2 %v13402_v1  ;;  %5320 = vmatpush.bf16.msrb.mxu3 %v13403_v21  ;;  %v11455_v1 = vpack.c.b16 %v5371_v8, %v5371_v8  ;;  %v13458_v21 = vld [vmem:[#allocation160_spill] sm:$0xff]  ;;  %v13501_v4 = vld [vmem:[#allocation203_spill] sm:$0xff] }
 0x73c   : > { %5282 = vmatpush.bf16.msrb.mxu0 %v13404_v61  ;;  %5295 = vmatpush.bf16.msrb.mxu1 %v13405_v36  ;;  %v13459_v61 = vld [vmem:[#allocation161_spill] sm:$0xff]  ;;  %v13460_v36 = vld [vmem:[#allocation162_spill] sm:$0xff] }
 0x73d   : > { %5308 = vmatpush.bf16.msrb.mxu2 %v13406_v42  ;;  %5321 = vmatpush.bf16.msrb.mxu3 %v13407_v6  ;;  %v13461_v42 = vld [vmem:[#allocation163_spill] sm:$0xff]  ;;  %v13462_v6 = vld [vmem:[#allocation164_spill] sm:$0xff] }
 0x740   : > { %5283 = vmatpush.bf16.msrb.mxu0 %v13408_v45  ;;  %5296 = vmatpush.bf16.msrb.mxu1 %v13409_v5  ;;  %v13463_v45 = vld [vmem:[#allocation165_spill] sm:$0xff]  ;;  %v13464_v5 = vld [vmem:[#allocation166_spill] sm:$0xff] }
 0x741   : > { %5309 = vmatpush.bf16.msrb.mxu2 %v13410_v10  ;;  %5322 = vmatpush.bf16.msrb.mxu3 %v13411_v33  ;;  %v13465_v10 = vld [vmem:[#allocation167_spill] sm:$0xff]  ;;  %v13466_v33 = vld [vmem:[#allocation168_spill] sm:$0xff] }
 0x744   : > { %5284 = vmatpush.bf16.msrb.mxu0 %v13412_v49  ;;  %5297 = vmatpush.bf16.msrb.mxu1 %v13413_v9  ;;  %v13467_v49 = vld [vmem:[#allocation169_spill] sm:$0xff]  ;;  %v13468_v9 = vld [vmem:[#allocation170_spill] sm:$0xff] }
 0x745   : > { %5310 = vmatpush.bf16.msrb.mxu2 %v13414_v12  ;;  %5323 = vmatpush.bf16.msrb.mxu3 %v13415_v46  ;;  %v13469_v12 = vld [vmem:[#allocation171_spill] sm:$0xff] }
 0x748   : > { %5285 = vmatpush.bf16.msrb.mxu0 %v13416_v57  ;;  %5298 = vmatpush.bf16.msrb.mxu1 %v13417_v7  ;;  %v13470_v7 = vld [vmem:[#allocation172_spill] sm:$0xff] }
 0x749   : > { %5311 = vmatpush.bf16.msrb.mxu2 %v13418_v14  ;;  %5324 = vmatpush.bf16.msrb.mxu3 %v13419_v0  ;;  %v13471_v14 = vld [vmem:[#allocation173_spill] sm:$0xff]  ;;  %v13472_v0 = vld [vmem:[#allocation174_spill] sm:$0xff] }
 0x74c   : > { %5286 = vmatpush.bf16.msrb.mxu0 %v13420_v11  ;;  %5299 = vmatpush.bf16.msrb.mxu1 %v13421_v38  ;;  %v13473_v11 = vld [vmem:[#allocation175_spill] sm:$0xff]  ;;  %v13474_v38 = vld [vmem:[#allocation176_spill] sm:$0xff] }
 0x74d   : > { %5312 = vmatpush.bf16.msrb.mxu2 %v13422_v37  ;;  %5325 = vmatpush.bf16.msrb.mxu3 %v13423_v28  ;;  %v13475_v37 = vld [vmem:[#allocation177_spill] sm:$0xff] }
 0x750   : > { %5287 = vmatpush.bf16.msrb.mxu0 %v13424_v52  ;;  %5300 = vmatpush.bf16.msrb.mxu1 %v13425_v40  ;;  %v13476_v40 = vld [vmem:[#allocation178_spill] sm:$0xff] }
 0x751   : > { %5313 = vmatpush.bf16.msrb.mxu2 %v13426_v50  ;;  %5326 = vmatpush.bf16.msrb.mxu3 %v13427_v32  ;;  %v13477_v50 = vld [vmem:[#allocation179_spill] sm:$0xff] }
 0x753   : > { %5288 = vmatmul.bf16.vlgmr.msrb.gmra.mxu0 %v11305_v43  ;;  %5301 = vmatmul.bf16.vlgmr.msrb.gmra.mxu1 %v11307_v44 }
 0x754   : > { %5376 = vmatpush.bf16.msra.mxu0 %v13428_v58  ;;  %5389 = vmatpush.bf16.msra.mxu1 %v13429_v29  ;;  %v13478_v29 = vld [vmem:[#allocation180_spill] sm:$0xff] }
 0x755   : > { %5402 = vmatpush.bf16.msra.mxu2 %v13430_v59  ;;  %5415 = vmatpush.bf16.msra.mxu3 %v13431_v25  ;;  %v13479_v59 = vld [vmem:[#allocation181_spill] sm:$0xff]  ;;  %v13480_v25 = vld [vmem:[#allocation182_spill] sm:$0xff] }
 0x756   : > { %5314 = vmatmul.bf16.vlgmr.msrb.gmra.mxu2 %v11305_v43  ;;  %5327 = vmatmul.bf16.vlgmr.msrb.gmra.mxu3 %v11307_v44  ;;  %v13440_v43 = vld [vmem:[#allocation142_spill] sm:$0xff]  ;;  %v13442_v44 = vld [vmem:[#allocation144_spill] sm:$0xff] }
 0x758   : > { %5377 = vmatpush.bf16.msra.mxu0 %v13432_v47  ;;  %5390 = vmatpush.bf16.msra.mxu1 %v13433_v41  ;;  %v13481_v47 = vld [vmem:[#allocation183_spill] sm:$0xff]  ;;  %v13482_v41 = vld [vmem:[#allocation184_spill] sm:$0xff] }
 0x759   : > { %5403 = vmatpush.bf16.msra.mxu2 %v13434_v51  ;;  %5416 = vmatpush.bf16.msra.mxu3 %v13435_v20  ;;  %v13483_v51 = vld [vmem:[#allocation185_spill] sm:$0xff] }
 0x75c   : > { %5378 = vmatpush.bf16.msra.mxu0 %v13436_v63  ;;  %5391 = vmatpush.bf16.msra.mxu1 %v13437_v13  ;;  %v13484_v13 = vld [vmem:[#allocation186_spill] sm:$0xff] }
 0x75d   : > { %5404 = vmatpush.bf16.msra.mxu2 %v13438_v17  ;;  %5417 = vmatpush.bf16.msra.mxu3 %v13439_v18  ;;  %v13485_v17 = vld [vmem:[#allocation187_spill] sm:$0xff]  ;;  %v13486_v18 = vld [vmem:[#allocation188_spill] sm:$0xff] }
 0x760   : > { %5379 = vmatpush.bf16.msra.mxu0 %v13440_v43  ;;  %5392 = vmatpush.bf16.msra.mxu1 %v13441_v22  ;;  %v13487_v43 = vld [vmem:[#allocation189_spill] sm:$0xff]  ;;  %v13488_v22 = vld [vmem:[#allocation190_spill] sm:$0xff] }
 0x761   : > { %5405 = vmatpush.bf16.msra.mxu2 %v13442_v44  ;;  %5418 = vmatpush.bf16.msra.mxu3 %v13443_v26  ;;  %v13489_v44 = vld [vmem:[#allocation191_spill] sm:$0xff]  ;;  %v13490_v26 = vld [vmem:[#allocation192_spill] sm:$0xff] }
 0x764   : > { %5380 = vmatpush.bf16.msra.mxu0 %v13444_v27  ;;  %5393 = vmatpush.bf16.msra.mxu1 %v13445_v31  ;;  %v13491_v27 = vld [vmem:[#allocation193_spill] sm:$0xff]  ;;  %v13492_v31 = vld [vmem:[#allocation194_spill] sm:$0xff] }
 0x765   : > { %5406 = vmatpush.bf16.msra.mxu2 %v13446_v35  ;;  %5419 = vmatpush.bf16.msra.mxu3 %v13447_v39  ;;  %v13493_v35 = vld [vmem:[#allocation195_spill] sm:$0xff]  ;;  %v13494_v39 = vld [vmem:[#allocation196_spill] sm:$0xff] }
 0x768   : > { %5381 = vmatpush.bf16.msra.mxu0 %v13448_v48  ;;  %5394 = vmatpush.bf16.msra.mxu1 %v13449_v54  ;;  %v13495_v48 = vld [vmem:[#allocation197_spill] sm:$0xff]  ;;  %v13496_v54 = vld [vmem:[#allocation198_spill] sm:$0xff] }
 0x769   : > { %5407 = vmatpush.bf16.msra.mxu2 %v13450_v55  ;;  %5420 = vmatpush.bf16.msra.mxu3 %v13451_v56  ;;  %v13497_v55 = vld [vmem:[#allocation199_spill] sm:$0xff]  ;;  %v13498_v56 = vld [vmem:[#allocation200_spill] sm:$0xff] }
 0x76c   : > { %5382 = vmatpush.bf16.msra.mxu0 %v13452_v2  ;;  %5395 = vmatpush.bf16.msra.mxu1 %v13453_v3  ;;  %v13500_v3 = vld [vmem:[#allocation202_spill] sm:$0xff] }
 0x76d   : > { %5408 = vmatpush.bf16.msra.mxu2 %v13454_v15  ;;  %5421 = vmatpush.bf16.msra.mxu3 %v13455_v16  ;;  %v13502_v15 = vld [vmem:[#allocation204_spill] sm:$0xff]  ;;  %v13503_v16 = vld [vmem:[#allocation205_spill] sm:$0xff] }
 0x770   : > { %5383 = vmatpush.bf16.msra.mxu0 %v13456_v19  ;;  %5396 = vmatpush.bf16.msra.mxu1 %v13457_v24  ;;  %v11473_v46 = vpop.f32.mrf.mxu0  ;;  %v11475_v57 = vpop.f32.mrf.mxu1  ;;  %v7639_v19 = vld [vmem:[%s8893_s22 + $0x68] sm:$0xff] }
 0x771   : > { %5409 = vmatpush.bf16.msra.mxu2 %v13458_v21  ;;  %5422 = vmatpush.bf16.msra.mxu3 %v13459_v61  ;;  %v13504_v24 = vld [vmem:[#allocation206_spill] sm:$0xff]  ;;  %v13505_v21 = vld [vmem:[#allocation207_spill] sm:$0xff]  ;;  %v13506_v61 = vld [vmem:[#allocation208_spill] sm:$0xff] }
 0x773   : > { %5384 = vmatmul.bf16.vlgmr.msra.gmra.mxu0 %v11453_v62  ;;  %5397 = vmatmul.bf16.vlgmr.msra.gmra.mxu1 %v11455_v1 }
 0x774   : > { %5428 = vmatpush.bf16.msrb.mxu0 %v13460_v36  ;;  %5441 = vmatpush.bf16.msrb.mxu1 %v13461_v42  ;;  %v13507_v36 = vld [vmem:[#allocation209_spill] sm:$0xff] }
 0x775   : > { %5454 = vmatpush.bf16.msrb.mxu2 %v13462_v6  ;;  %5467 = vmatpush.bf16.msrb.mxu3 %v13463_v45  ;;  %v5105_v6 = vunpack.c.l.bf16 %v7639_v19 }
 0x776   : > { %5410 = vmatmul.bf16.vlgmr.msra.gmra.mxu2 %v11453_v62  ;;  %5423 = vmatmul.bf16.vlgmr.msra.gmra.mxu3 %v11455_v1 }
 0x778   : > { %5429 = vmatpush.bf16.msrb.mxu0 %v13464_v5  ;;  %5442 = vmatpush.bf16.msrb.mxu1 %v13465_v10  ;;  %v5135_v32 = vpop.f32.mrf.mxu0  ;;  %v5148_v58 = vpop.f32.mrf.mxu1  ;;  %v7638_v5 = vld [vmem:[%s8893_s22 + $0x60] sm:$0xff] }
 0x779   : > { %5455 = vmatpush.bf16.msrb.mxu2 %v13466_v33  ;;  %5468 = vmatpush.bf16.msrb.mxu3 %v13467_v49  ;;  %v11483_v28 = vpop.f32.mrf.mxu2  ;;  %v11485_v52 = vpop.f32.mrf.mxu3  ;;  %v13508_v33 = vld [vmem:[#allocation210_spill] sm:$0xff]  ;;  %v13509_v49 = vld [vmem:[#allocation211_spill] sm:$0xff] }
 0x77c   : > { %5430 = vmatpush.bf16.msrb.mxu0 %v13468_v9  ;;  %5443 = vmatpush.bf16.msrb.mxu1 %v13469_v12  ;;  %v13510_v12 = vld [vmem:[#allocation212_spill] sm:$0xff] }
 0x77d   : > { %5456 = vmatpush.bf16.msrb.mxu2 %v13470_v7  ;;  %5469 = vmatpush.bf16.msrb.mxu3 %v13471_v14  ;;  %v13511_v7 = vld [vmem:[#allocation213_spill] sm:$0xff]  ;;  %v5103_v14 = vunpack.c.l.bf16 %v7638_v5 }
 0x77f   : > { %v5134_v58 = vadd.f32 %v11473_v46, %v5103_v14  ;;  %v13521_v46 = vld [vmem:[#allocation223_spill] sm:$0xff] }
 0x780   : > { %5431 = vmatpush.bf16.msrb.mxu0 %v13472_v0  ;;  %5444 = vmatpush.bf16.msrb.mxu1 %v13473_v11  ;;  %v13512_v11 = vld [vmem:[#allocation214_spill] sm:$0xff] }
 0x781   : > { %5457 = vmatpush.bf16.msrb.mxu2 %v13474_v38  ;;  %5470 = vmatpush.bf16.msrb.mxu3 %v13475_v37  ;;  %v5161_v20 = vpop.f32.mrf.mxu2  ;;  %v5174_v63 = vpop.f32.mrf.mxu3  ;;  %v13513_v38 = vld [vmem:[#allocation215_spill] sm:$0xff]  ;;  %v5106_v37 = vunpack.c.h.bf16 %v7639_v19 }
 0x782   : > { %v13518_v20 = vld [vmem:[#allocation220_spill] sm:$0xff]  ;;  %v13519_v63 = vld [vmem:[#allocation221_spill] sm:$0xff] }
 0x784   : > { %5432 = vmatpush.bf16.msrb.mxu0 %v13476_v40  ;;  %5445 = vmatpush.bf16.msrb.mxu1 %v13477_v50  ;;  %v13514_v40 = vld [vmem:[#allocation216_spill] sm:$0xff]  ;;  %v13515_v50 = vld [vmem:[#allocation217_spill] sm:$0xff] }
 0x785   : > { %5458 = vmatpush.bf16.msrb.mxu2 %v13478_v29  ;;  %5471 = vmatpush.bf16.msrb.mxu3 %v13479_v59 }
 0x788   : > { %5433 = vmatpush.bf16.msrb.mxu0 %v13480_v25  ;;  %5446 = vmatpush.bf16.msrb.mxu1 %v13481_v47  ;;  %v5104_v25 = vunpack.c.h.bf16 %v7638_v5  ;;  %v13516_v47 = vld [vmem:[#allocation218_spill] sm:$0xff] }
 0x789   : > { %5459 = vmatpush.bf16.msrb.mxu2 %v13482_v41  ;;  %5472 = vmatpush.bf16.msrb.mxu3 %v13483_v51  ;;  %v13517_v41 = vld [vmem:[#allocation219_spill] sm:$0xff] }
 0x78c   : > { %5434 = vmatpush.bf16.msrb.mxu0 %v13484_v13  ;;  %5447 = vmatpush.bf16.msrb.mxu1 %v13485_v17  ;;  %v5147_v13 = vadd.f32 %v11475_v57, %v5134_v58  ;;  %v13527_v57 = vld [vmem:[#allocation229_spill] sm:$0xff]  ;;  %v13541_v58 = vld [vmem:[#allocation243_spill] sm:$0xff] }
 0x78d   : > { %5460 = vmatpush.bf16.msrb.mxu2 %v13486_v18  ;;  %5473 = vmatpush.bf16.msrb.mxu3 %v13487_v43  ;;  %v5160_v18 = vadd.f32 %v11483_v28, %v5104_v25  ;;  %v13520_v43 = vld [vmem:[#allocation222_spill] sm:$0xff]  ;;  %v7640_v28 = vld [vmem:[%s8893_s22 + $0x70] sm:$0xff] }
 0x790   : > { %5435 = vmatpush.bf16.msrb.mxu0 %v13488_v22  ;;  %5448 = vmatpush.bf16.msrb.mxu1 %v13489_v44  ;;  %v5185_v2 = vpop.f32.mrf.mxu0  ;;  %v5198_v8 = vpop.f32.mrf.mxu1  ;;  %v13522_v44 = vld [vmem:[#allocation224_spill] sm:$0xff] }
 0x791   : > { %5461 = vmatpush.bf16.msrb.mxu2 %v13490_v26  ;;  %5474 = vmatpush.bf16.msrb.mxu3 %v13491_v27  ;;  %v5186_v0 = vadd.f32 %v5185_v2, %v5105_v6  ;;  %v13523_v26 = vld [vmem:[#allocation225_spill] sm:$0xff]  ;;  %v5332_v27 = vmul.f32 0.5, %v5147_v13  ;;  %v13530_v2 = vld [vmem:[#allocation232_spill] sm:$0xff] }
 0x793   : > { %5436 = vmatmul.bf16.vlgmr.msrb.gmra.mxu0 %v11453_v62  ;;  %5449 = vmatmul.bf16.vlgmr.msrb.gmra.mxu1 %v11455_v1  ;;  %v5199_v29 = vadd.f32 %v5198_v8, %v5186_v0  ;;  %v5112_v0 = vld [vmem:[#allocation3 + $0x8] sm:$0xff] }
 0x794   : > { %5480 = vmatpush.bf16.msra.mxu0 %v13492_v31  ;;  %5493 = vmatpush.bf16.msra.mxu1 %v13493_v35  ;;  %v13524_v31 = vld [vmem:[#allocation226_spill] sm:$0xff]  ;;  %v13525_v35 = vld [vmem:[#allocation227_spill] sm:$0xff] }
 0x795   : > { %5506 = vmatpush.bf16.msra.mxu2 %v13494_v39  ;;  %5519 = vmatpush.bf16.msra.mxu3 %v13495_v48  ;;  %v5340_v17 = vmul.f32 0.5, %v5199_v29  ;;  %v13526_v39 = vld [vmem:[#allocation228_spill] sm:$0xff]  ;;  %v5173_v48 = vadd.f32 %v11485_v52, %v5160_v18  ;;  %v5113_v18 = vld [vmem:[#allocation3 + $0x10] sm:$0xff] }
 0x796   : > { %5462 = vmatmul.bf16.vlgmr.msrb.gmra.mxu2 %v11453_v62  ;;  %5475 = vmatmul.bf16.vlgmr.msrb.gmra.mxu3 %v11455_v1 }
 0x797   : > { %8291 = vtanh.f32 %v5340_v17 }
 0x798   : > { %5481 = vmatpush.bf16.msra.mxu0 %v13496_v54  ;;  %5494 = vmatpush.bf16.msra.mxu1 %v13497_v55  ;;  %v5187_v10 = vpop.f32.mrf.mxu0  ;;  %v5200_v9 = vpop.f32.mrf.mxu1  ;;  %8293 = vtanh.f32 %v5332_v27  ;;  %v13528_v55 = vld [vmem:[#allocation230_spill] sm:$0xff] }
 0x799   : > { %5507 = vmatpush.bf16.msra.mxu2 %v13498_v56  ;;  %5520 = vmatpush.bf16.msra.mxu3 %v13499_v60  ;;  %v5211_v42 = vpop.f32.mrf.mxu2  ;;  %v5224_v45 = vpop.f32.mrf.mxu3  ;;  %v13529_v56 = vld [vmem:[#allocation231_spill] sm:$0xff]  ;;  %v5107_v60 = vunpack.c.l.bf16 %v7640_v28  ;;  %v13536_v10 = vld [vmem:[#allocation238_spill] sm:$0xff] }
 0x79a   : > { %v5212_v51 = vadd.f32 %v5211_v42, %v5106_v37 }
 0x79c   : > { %5482 = vmatpush.bf16.msra.mxu0 %v13500_v3  ;;  %5495 = vmatpush.bf16.msra.mxu1 %v13501_v4  ;;  %v5225_v22 = vadd.f32 %v5224_v45, %v5212_v51  ;;  %v13531_v3 = vld [vmem:[#allocation233_spill] sm:$0xff]  ;;  %v5333_v4 = vmul.f32 0.5, %v5173_v48  ;;  %v5108_v45 = vunpack.c.h.bf16 %v7640_v28  ;;  %v13548_v28 = vld [vmem:[#allocation250_spill] sm:$0xff]  ;;  %v13549_v48 = vld [vmem:[#allocation251_spill] sm:$0xff] }
 0x79d   : > { %5508 = vmatpush.bf16.msra.mxu2 %v13502_v15  ;;  %5521 = vmatpush.bf16.msra.mxu3 %v13503_v16  ;;  %v8292_v52 = vpop.eup %8291  ;;  %v13532_v15 = vld [vmem:[#allocation234_spill] sm:$0xff]  ;;  %v13533_v16 = vld [vmem:[#allocation235_spill] sm:$0xff]  ;;  %v13543_v51 = vld [vmem:[#allocation245_spill] sm:$0xff] }
 0x79e   : > { %v5341_v54 = vmul.f32 0.5, %v5225_v22  ;;  %v8294_v42 = vpop.eup %8293 }
 0x7a0   : > { %5483 = vmatpush.bf16.msra.mxu0 %v13504_v24  ;;  %5496 = vmatpush.bf16.msra.mxu1 %v13505_v21  ;;  %8295 = vtanh.f32 %v5341_v54  ;;  %v5344_v21 = vmul.f32 0.5, %v8292_v52  ;;  %v13554_v52 = vld [vmem:[#allocation256_spill] sm:$0xff] }
 0x7a1   : > { %5509 = vmatpush.bf16.msra.mxu2 %v13506_v61  ;;  %5522 = vmatpush.bf16.msra.mxu3 %v13507_v36  ;;  %v5213_v32 = vpop.f32.mrf.mxu2  ;;  %v5226_v59 = vpop.f32.mrf.mxu3  ;;  %v13534_v61 = vld [vmem:[#allocation236_spill] sm:$0xff]  ;;  %v13535_v36 = vld [vmem:[#allocation237_spill] sm:$0xff]  ;;  %8297 = vtanh.f32 %v5333_v4 }
 0x7a2   : > { %v5346_v9 = vadd.f32 0.5, %v5344_v21  ;;  %v13540_v32 = vld [vmem:[#allocation242_spill] sm:$0xff]  ;;  %v13555_v4 = vld [vmem:[#allocation257_spill] sm:$0xff] }
 0x7a3   : > { %v13560_v21 = vld [vmem:[#allocation262_spill] sm:$0xff] }
 0x7a4   : > { %5484 = vmatpush.bf16.msra.mxu0 %v13508_v33  ;;  %5497 = vmatpush.bf16.msra.mxu1 %v13509_v49  ;;  %v13537_v33 = vld [vmem:[#allocation239_spill] sm:$0xff]  ;;  %v5336_v49 = vmul.f32 0.5, %v8294_v42  ;;  %v13562_v42 = vld [vmem:[#allocation264_spill] sm:$0xff] }
 0x7a5   : > { %5510 = vmatpush.bf16.msra.mxu2 %v13510_v12  ;;  %5523 = vmatpush.bf16.msra.mxu3 %v13511_v7  ;;  %v13538_v12 = vld [vmem:[#allocation240_spill] sm:$0xff]  ;;  %v13539_v7 = vld [vmem:[#allocation241_spill] sm:$0xff] }
 0x7a6   : > { %v8296_v5 = vpop.eup %8295  ;;  %v5338_v25 = vadd.f32 0.5, %v5336_v49 }
 0x7a7   : > { %v5345_v37 = vmul.f32 0.5, %v8296_v5  ;;  %v13564_v5 = vld [vmem:[#allocation266_spill] sm:$0xff] }
 0x7a8   : > { %5485 = vmatpush.bf16.msra.mxu0 %v13512_v11  ;;  %5498 = vmatpush.bf16.msra.mxu1 %v13513_v38 }
 0x7a9   : > { %5511 = vmatpush.bf16.msra.mxu2 %v13514_v40  ;;  %5524 = vmatpush.bf16.msra.mxu3 %v13515_v50  ;;  %v8298_v50 = vpop.eup %8297  ;;  %v5347_v13 = vadd.f32 0.5, %v5345_v37 }
 0x7ac   : > { %5486 = vmatpush.bf16.msra.mxu0 %v13516_v47  ;;  %5499 = vmatpush.bf16.msra.mxu1 %v13517_v41  ;;  %v5358_v47 = vmul.f32 %v5346_v9, %v5112_v0  ;;  %v13542_v41 = vld [vmem:[#allocation244_spill] sm:$0xff] }
 0x7ad   : > { %5512 = vmatpush.bf16.msra.mxu2 %v13518_v20  ;;  %5525 = vmatpush.bf16.msra.mxu3 %v13519_v63  ;;  %v5337_v63 = vmul.f32 0.5, %v8298_v50  ;;  %v13566_v9 = vld [vmem:[#allocation268_spill] sm:$0xff] }
 0x7b0   : > { %5487 = vmatpush.bf16.msra.mxu0 %v13520_v43  ;;  %5500 = vmatpush.bf16.msra.mxu1 %v13521_v46  ;;  %v5237_v8 = vpop.f32.mrf.mxu0  ;;  %v5250_v24 = vpop.f32.mrf.mxu1  ;;  %v13544_v43 = vld [vmem:[#allocation246_spill] sm:$0xff]  ;;  %v13545_v46 = vld [vmem:[#allocation247_spill] sm:$0xff] }
 0x7b1   : > { %5513 = vmatpush.bf16.msra.mxu2 %v13522_v44  ;;  %5526 = vmatpush.bf16.msra.mxu3 %v13523_v26  ;;  %v5238_v19 = vadd.f32 %v5237_v8, %v5107_v60  ;;  %v13546_v44 = vld [vmem:[#allocation248_spill] sm:$0xff]  ;;  %v13547_v26 = vld [vmem:[#allocation249_spill] sm:$0xff]  ;;  %v13556_v8 = vld [vmem:[#allocation258_spill] sm:$0xff] }
 0x7b3   : > { %5488 = vmatmul.bf16.vlgmr.msra.gmra.mxu0 %v11453_v62  ;;  %5501 = vmatmul.bf16.vlgmr.msra.gmra.mxu1 %v11455_v1  ;;  %v5251_v6 = vadd.f32 %v5250_v24, %v5238_v19  ;;  %v13559_v19 = vld [vmem:[#allocation261_spill] sm:$0xff]  ;;  %v7641_v24 = vld [vmem:[%s8893_s22 + $0x78] sm:$0xff] }
 0x7b4   : > { %5532 = vmatpush.bf16.msrb.mxu0 %v13524_v31  ;;  %5545 = vmatpush.bf16.msrb.mxu1 %v13525_v35  ;;  %v5339_v35 = vadd.f32 0.5, %v5337_v63  ;;  %v13576_v63 = vld [vmem:[#allocation278_spill] sm:$0xff] }
 0x7b5   : > { %5558 = vmatpush.bf16.msrb.mxu2 %v13526_v39  ;;  %5571 = vmatpush.bf16.msrb.mxu3 %v13527_v57  ;;  %8299 = vtanh.f32 %v5251_v6  ;;  %v5359_v39 = vmul.f32 %v5347_v13, %v5113_v18  ;;  %v13563_v6 = vld [vmem:[#allocation265_spill] sm:$0xff]  ;;  %v13577_v13 = vld [vmem:[#allocation279_spill] sm:$0xff] }
 0x7b6   : > { %5514 = vmatmul.bf16.vlgmr.msra.gmra.mxu2 %v11453_v62  ;;  %5527 = vmatmul.bf16.vlgmr.msra.gmra.mxu3 %v11455_v1  ;;  %v13579_v18 = vld [vmem:[#allocation281_spill] sm:$0xff] }
 0x7b8   : > { %5533 = vmatpush.bf16.msrb.mxu0 %v13528_v55  ;;  %5546 = vmatpush.bf16.msrb.mxu1 %v13529_v56  ;;  %v5239_v40 = vpop.f32.mrf.mxu0  ;;  %v5252_v59 = vpop.f32.mrf.mxu1  ;;  %v13550_v55 = vld [vmem:[#allocation252_spill] sm:$0xff]  ;;  %v13551_v56 = vld [vmem:[#allocation253_spill] sm:$0xff] }
 0x7b9   : > { %5559 = vmatpush.bf16.msrb.mxu2 %v13530_v2  ;;  %5572 = vmatpush.bf16.msrb.mxu3 %v13531_v3  ;;  %v5263_v14 = vpop.f32.mrf.mxu2  ;;  %v5276_v38 = vpop.f32.mrf.mxu3  ;;  %v13552_v2 = vld [vmem:[#allocation254_spill] sm:$0xff]  ;;  %v13553_v3 = vld [vmem:[#allocation255_spill] sm:$0xff] }
 0x7ba   : > { %v5264_v11 = vadd.f32 %v5263_v14, %v5108_v45  ;;  %v13569_v14 = vld [vmem:[#allocation271_spill] sm:$0xff] }
 0x7bb   : > { %v8300_v20 = vpop.eup %8299 }
 0x7bc   : > { %5534 = vmatpush.bf16.msrb.mxu0 %v13532_v15  ;;  %5547 = vmatpush.bf16.msrb.mxu1 %v13533_v16  ;;  %v5277_v29 = vadd.f32 %v5276_v38, %v5264_v11  ;;  %v5360_v17 = vmul.f32 %v8300_v20, %v5338_v25  ;;  %v13557_v15 = vld [vmem:[#allocation259_spill] sm:$0xff]  ;;  %v13558_v16 = vld [vmem:[#allocation260_spill] sm:$0xff]  ;;  %v13571_v38 = vld [vmem:[#allocation273_spill] sm:$0xff] }
 0x7bd   : > { %5560 = vmatpush.bf16.msrb.mxu2 %v13534_v61  ;;  %5573 = vmatpush.bf16.msrb.mxu3 %v13535_v36  ;;  %v13561_v61 = vld [vmem:[#allocation263_spill] sm:$0xff]  ;;  %v5109_v36 = vunpack.c.l.bf16 %v7641_v24  ;;  %v13570_v11 = vld [vmem:[#allocation272_spill] sm:$0xff] }
 0x7be   : > { %8301 = vtanh.f32 %v5277_v29  ;;  %v11572_v22 = vadd.f32 %v5360_v17, %v5358_v47  ;;  %v13573_v29 = vld [vmem:[#allocation275_spill] sm:$0xff]  ;;  %v13574_v47 = vld [vmem:[#allocation276_spill] sm:$0xff] }
 0x7bf   : > { %v13578_v17 = vld [vmem:[#allocation280_spill] sm:$0xff] }
 0x7c0   : > { %5535 = vmatpush.bf16.msrb.mxu0 %v13536_v10  ;;  %5548 = vmatpush.bf16.msrb.mxu1 %v13537_v33  ;;  %5845 = vst [vmem:[#allocation3 + $0x8] sm:$0xff] %v11572_v22  ;;  %v13565_v10 = vld [vmem:[#allocation267_spill] sm:$0xff] }
 0x7c1   : > { %5561 = vmatpush.bf16.msrb.mxu2 %v13538_v12  ;;  %5574 = vmatpush.bf16.msrb.mxu3 %v13539_v7  ;;  %v5265_v27 = vpop.f32.mrf.mxu2  ;;  %v5278_v31 = vpop.f32.mrf.mxu3  ;;  %v5110_v12 = vunpack.c.h.bf16 %v7641_v24  ;;  %v13568_v7 = vld [vmem:[#allocation270_spill] sm:$0xff]  ;;  %v13591_v24 = vld [vmem:[#allocation293_spill] sm:$0xff] }
 0x7c2   : > { %v13581_v27 = vld [vmem:[#allocation283_spill] sm:$0xff]  ;;  %v13582_v31 = vld [vmem:[#allocation284_spill] sm:$0xff] }
 0x7c4   : > { %5536 = vmatpush.bf16.msrb.mxu0 %v13540_v32  ;;  %5549 = vmatpush.bf16.msrb.mxu1 %v13541_v58  ;;  %v8302_v57 = vpop.eup %8301  ;;  %v13572_v58 = vld [vmem:[#allocation274_spill] sm:$0xff] }
 0x7c5   : > { %5562 = vmatpush.bf16.msrb.mxu2 %v13542_v41  ;;  %5575 = vmatpush.bf16.msrb.mxu3 %v13543_v51  ;;  %v5361_v54 = vmul.f32 %v8302_v57, %v5339_v35  ;;  %v13575_v41 = vld [vmem:[#allocation277_spill] sm:$0xff] }
 0x7c6   : > { %v13583_v35 = vld [vmem:[#allocation285_spill] sm:$0xff] }
 0x7c7   : > { %v11581_v60 = vadd.f32 %v5361_v54, %v5359_v39  ;;  %v13585_v54 = vld [vmem:[#allocation287_spill] sm:$0xff] }
 0x7c8   : > { %5537 = vmatpush.bf16.msrb.mxu0 %v13544_v43  ;;  %5550 = vmatpush.bf16.msrb.mxu1 %v13545_v46 }
 0x7c9   : > { %5563 = vmatpush.bf16.msrb.mxu2 %v13546_v44  ;;  %5576 = vmatpush.bf16.msrb.mxu3 %v13547_v26  ;;  %5846 = vst [vmem:[#allocation3 + $0x10] sm:$0xff] %v11581_v60  ;;  %v13580_v26 = vld [vmem:[#allocation282_spill] sm:$0xff] }
 0x7cc   : > { %5538 = vmatpush.bf16.msrb.mxu0 %v13548_v28  ;;  %5551 = vmatpush.bf16.msrb.mxu1 %v13549_v48  ;;  %v13584_v48 = vld [vmem:[#allocation286_spill] sm:$0xff] }
 0x7cd   : > { %5564 = vmatpush.bf16.msrb.mxu2 %v13550_v55  ;;  %5577 = vmatpush.bf16.msrb.mxu3 %v13551_v56 }
 0x7d0   : > { %5539 = vmatpush.bf16.msrb.mxu0 %v13552_v2  ;;  %5552 = vmatpush.bf16.msrb.mxu1 %v13553_v3  ;;  %v5289_v45 = vpop.f32.mrf.mxu0  ;;  %v5302_v49 = vpop.f32.mrf.mxu1  ;;  %v13586_v2 = vld [vmem:[#allocation288_spill] sm:$0xff]  ;;  %v13587_v3 = vld [vmem:[#allocation289_spill] sm:$0xff] }
 0x7d1   : > { %5565 = vmatpush.bf16.msrb.mxu2 %v13554_v52  ;;  %5578 = vmatpush.bf16.msrb.mxu3 %v13555_v4  ;;  %v5290_v33 = vadd.f32 %v5289_v45, %v5109_v36  ;;  %v13588_v4 = vld [vmem:[#allocation290_spill] sm:$0xff]  ;;  %v13593_v36 = vld [vmem:[#allocation295_spill] sm:$0xff]  ;;  %v13594_v45 = vld [vmem:[#allocation296_spill] sm:$0xff] }
 0x7d3   : > { %5540 = vmatmul.bf16.vlgmr.msrb.gmra.mxu0 %v11453_v62  ;;  %5553 = vmatmul.bf16.vlgmr.msrb.gmra.mxu1 %v11455_v1 }
 0x7d4   : > { %5591 = vmatpush.bf16.msra.mxu0 %v13556_v8  ;;  %5604 = vmatpush.bf16.msra.mxu1 %v13557_v15  ;;  %v13589_v8 = vld [vmem:[#allocation291_spill] sm:$0xff] }
 0x7d5   : > { %5617 = vmatpush.bf16.msra.mxu2 %v13558_v16  ;;  %5630 = vmatpush.bf16.msra.mxu3 %v13559_v19  ;;  %v13590_v19 = vld [vmem:[#allocation292_spill] sm:$0xff] }
 0x7d6   : > { %5566 = vmatmul.bf16.vlgmr.msrb.gmra.mxu2 %v11453_v62  ;;  %5579 = vmatmul.bf16.vlgmr.msrb.gmra.mxu3 %v11455_v1  ;;  %v13567_v62 = vld [vmem:[#allocation269_spill] sm:$0xff]  ;;  %v5303_v1 = vadd.f32 %v5302_v49, %v5290_v33  ;;  %v13596_v49 = vld [vmem:[#allocation298_spill] sm:$0xff] }
 0x7d8   : > { %5592 = vmatpush.bf16.msra.mxu0 %v13560_v21  ;;  %5605 = vmatpush.bf16.msra.mxu1 %v13561_v61  ;;  %v5350_v0 = vmul.f32 0.5, %v5303_v1  ;;  %v5291_v32 = vpop.f32.mrf.mxu0  ;;  %v5304_v25 = vpop.f32.mrf.mxu1  ;;  %v13592_v61 = vld [vmem:[#allocation294_spill] sm:$0xff] }
 0x7d9   : > { %5618 = vmatpush.bf16.msra.mxu2 %v13562_v42  ;;  %5631 = vmatpush.bf16.msra.mxu3 %v13563_v6  ;;  %v5315_v37 = vpop.f32.mrf.mxu2  ;;  %v5328_v50 = vpop.f32.mrf.mxu3 }
 0x7da   : > { %8303 = vtanh.f32 %v5350_v0  ;;  %v5316_v40 = vadd.f32 %v5315_v37, %v5110_v12  ;;  %v13598_v12 = vld [vmem:[#allocation300_spill] sm:$0xff]  ;;  %v13600_v0 = vld [vmem:[#allocation302_spill] sm:$0xff]  ;;  %v13603_v37 = vld [vmem:[#allocation305_spill] sm:$0xff] }
 0x7dc   : > { %5593 = vmatpush.bf16.msra.mxu0 %v13564_v5  ;;  %5606 = vmatpush.bf16.msra.mxu1 %v13565_v10  ;;  %v5329_v59 = vadd.f32 %v5328_v50, %v5316_v40  ;;  %v13595_v5 = vld [vmem:[#allocation297_spill] sm:$0xff] }
 0x7dd   : > { %5619 = vmatpush.bf16.msra.mxu2 %v13566_v9  ;;  %5632 = vmatpush.bf16.msra.mxu3 %v13567_v62  ;;  %v13597_v9 = vld [vmem:[#allocation299_spill] sm:$0xff] }
 0x7de   : > { %v5351_v51 = vmul.f32 0.5, %v5329_v59 }
 0x7e0   : > { %5594 = vmatpush.bf16.msra.mxu0 %v13568_v7  ;;  %5607 = vmatpush.bf16.msra.mxu1 %v13569_v14  ;;  %v8304_v20 = vpop.eup %8303  ;;  %8305 = vtanh.f32 %v5351_v51  ;;  %v13599_v7 = vld [vmem:[#allocation301_spill] sm:$0xff]  ;;  %v13608_v51 = vld [vmem:[#allocation310_spill] sm:$0xff] }
 0x7e1   : > { %5620 = vmatpush.bf16.msra.mxu2 %v13570_v11  ;;  %5633 = vmatpush.bf16.msra.mxu3 %v13571_v38  ;;  %v5317_v43 = vpop.f32.mrf.mxu2  ;;  %v5330_v46 = vpop.f32.mrf.mxu3  ;;  %8307 = vtanh.f32 %v11572_v22  ;;  %v5354_v44 = vmul.f32 0.5, %v8304_v20  ;;  %v13601_v11 = vld [vmem:[#allocation303_spill] sm:$0xff]  ;;  %v13602_v38 = vld [vmem:[#allocation304_spill] sm:$0xff] }
 0x7e2   : > { %8309 = vtanh.f32 %v11581_v60  ;;  %v13609_v20 = vld [vmem:[#allocation311_spill] sm:$0xff]  ;;  %v13612_v43 = vld [vmem:[#allocation314_spill] sm:$0xff] }
 0x7e3   : > { %v5356_v57 = vadd.f32 0.5, %v5354_v44  ;;  %v13613_v46 = vld [vmem:[#allocation315_spill] sm:$0xff]  ;;  %v13614_v44 = vld [vmem:[#allocation316_spill] sm:$0xff] }
 0x7e4   : > { %5595 = vmatpush.bf16.msra.mxu0 %v13572_v58  ;;  %5608 = vmatpush.bf16.msra.mxu1 %v13573_v29  ;;  %v13604_v58 = vld [vmem:[#allocation306_spill] sm:$0xff]  ;;  %v13605_v29 = vld [vmem:[#allocation307_spill] sm:$0xff] }
 0x7e5   : > { %5621 = vmatpush.bf16.msra.mxu2 %v13574_v47  ;;  %5634 = vmatpush.bf16.msra.mxu3 %v13575_v41  ;;  %v13606_v47 = vld [vmem:[#allocation308_spill] sm:$0xff]  ;;  %v13607_v41 = vld [vmem:[#allocation309_spill] sm:$0xff] }
 0x7e6   : > { %v8306_v39 = vpop.eup %8305 }
 0x7e7   : > { %v5355_v28 = vmul.f32 0.5, %v8306_v39  ;;  %v8308_v55 = vpop.eup %8307  ;;  %v13619_v39 = vld [vmem:[#allocation321_spill] sm:$0xff] }
 0x7e8   : > { %5596 = vmatpush.bf16.msra.mxu0 %v13576_v63  ;;  %5609 = vmatpush.bf16.msra.mxu1 %v13577_v13  ;;  %v8310_v52 = vpop.eup %8309  ;;  %v11629_v15 = vmul.f32 %v8308_v55, %v5356_v57  ;;  %v13610_v63 = vld [vmem:[#allocation312_spill] sm:$0xff]  ;;  %v13611_v13 = vld [vmem:[#allocation313_spill] sm:$0xff]  ;;  %v13620_v57 = vld [vmem:[#allocation322_spill] sm:$0xff] }
 0x7e9   : > { %5622 = vmatpush.bf16.msra.mxu2 %v13578_v17  ;;  %5635 = vmatpush.bf16.msra.mxu3 %v13579_v18  ;;  %v5357_v56 = vadd.f32 0.5, %v5355_v28  ;;  %v13621_v28 = vld [vmem:[#allocation323_spill] sm:$0xff]  ;;  %v13624_v55 = vld [vmem:[#allocation326_spill] sm:$0xff] }
 0x7eb   : > { %v11631_v16 = vmul.f32 %v8310_v52, %v5357_v56  ;;  %v13625_v56 = vld [vmem:[#allocation327_spill] sm:$0xff]  ;;  %v13628_v52 = vld [vmem:[#allocation330_spill] sm:$0xff] }
 0x7ec   : > { %5597 = vmatpush.bf16.msra.mxu0 %v13580_v26  ;;  %5610 = vmatpush.bf16.msra.mxu1 %v13581_v27  ;;  %v13615_v26 = vld [vmem:[#allocation317_spill] sm:$0xff]  ;;  %v13616_v27 = vld [vmem:[#allocation318_spill] sm:$0xff] }
 0x7ed   : > { %5623 = vmatpush.bf16.msra.mxu2 %v13582_v31  ;;  %5636 = vmatpush.bf16.msra.mxu3 %v13583_v35  ;;  %v5368_v21 = vpack.c.bf16 %v11631_v16, %v11629_v15  ;;  %v13617_v31 = vld [vmem:[#allocation319_spill] sm:$0xff]  ;;  %v13618_v35 = vld [vmem:[#allocation320_spill] sm:$0xff] }
 0x7ef   : > { %v5585_v42 = vunpack.c.l.b16 %v5368_v21  ;;  %v5586_v6 = vunpack.c.h.b16 %v5368_v21  ;;  %5844 = vst [vmem:[#allocation2] sm:$0xff] %v5368_v21  ;;  %v13631_v21 = vld [vmem:[#allocation333_spill] sm:$0xff] }
 0x7f0   : > { %5598 = vmatpush.bf16.msra.mxu0 %v13584_v48  ;;  %5611 = vmatpush.bf16.msra.mxu1 %v13585_v54  ;;  %v5385_v62 = vpop.f32.mrf.mxu0  ;;  %v5398_v1 = vpop.f32.mrf.mxu1  ;;  %v13622_v48 = vld [vmem:[#allocation324_spill] sm:$0xff]  ;;  %v13623_v54 = vld [vmem:[#allocation325_spill] sm:$0xff] }
 0x7f1   : > { %5624 = vmatpush.bf16.msra.mxu2 %v13586_v2  ;;  %5637 = vmatpush.bf16.msra.mxu3 %v13587_v3  ;;  %v11641_v10 = vpack.c.b16 %v5585_v42, %v5585_v42  ;;  %v11643_v33 = vpack.c.b16 %v5586_v6, %v5586_v6  ;;  %v11649_v14 = vadd.f32 %v5398_v1, %v5385_v62  ;;  %v13626_v2 = vld [vmem:[#allocation328_spill] sm:$0xff]  ;;  %v13627_v3 = vld [vmem:[#allocation329_spill] sm:$0xff]  ;;  %v13633_v42 = vld [vmem:[#allocation335_spill] sm:$0xff] }
 0x7f2   : > { %v13634_v6 = vld [vmem:[#allocation336_spill] sm:$0xff]  ;;  %v13636_v62 = vld [vmem:[#allocation338_spill] sm:$0xff]  ;;  %v13637_v1 = vld [vmem:[#allocation339_spill] sm:$0xff] }
 0x7f3   : > { %5599 = vmatmul.bf16.vlgmr.msra.gmra.mxu0 %v11641_v10  ;;  %5612 = vmatmul.bf16.vlgmr.msra.gmra.mxu1 %v11643_v33 }
 0x7f4   : > { %5643 = vmatpush.bf16.msrb.mxu0 %v13588_v4  ;;  %5656 = vmatpush.bf16.msrb.mxu1 %v13589_v8  ;;  %v13629_v4 = vld [vmem:[#allocation331_spill] sm:$0xff] }
 0x7f5   : > { %5669 = vmatpush.bf16.msrb.mxu2 %v13590_v19  ;;  %5682 = vmatpush.bf16.msrb.mxu3 %v13591_v24  ;;  %v13630_v24 = vld [vmem:[#allocation332_spill] sm:$0xff] }
 0x7f6   : > { %5625 = vmatmul.bf16.vlgmr.msra.gmra.mxu2 %v11641_v10  ;;  %5638 = vmatmul.bf16.vlgmr.msra.gmra.mxu3 %v11643_v33 }
 0x7f8   : > { %5644 = vmatpush.bf16.msrb.mxu0 %v13592_v61  ;;  %5657 = vmatpush.bf16.msrb.mxu1 %v13593_v36  ;;  %v5387_v59 = vpop.f32.mrf.mxu0  ;;  %v5400_v25 = vpop.f32.mrf.mxu1  ;;  %v13632_v36 = vld [vmem:[#allocation334_spill] sm:$0xff] }
 0x7f9   : > { %5670 = vmatpush.bf16.msrb.mxu2 %v13594_v45  ;;  %5683 = vmatpush.bf16.msrb.mxu3 %v13595_v5  ;;  %v5411_v40 = vpop.f32.mrf.mxu2  ;;  %v5424_v50 = vpop.f32.mrf.mxu3  ;;  %v13635_v45 = vld [vmem:[#allocation337_spill] sm:$0xff]  ;;  %v13644_v59 = vld [vmem:[#allocation346_spill] sm:$0xff]  ;;  %v13645_v25 = vld [vmem:[#allocation347_spill] sm:$0xff] }
 0x7fa   : > { %v11659_v32 = vadd.f32 %v5424_v50, %v5411_v40  ;;  %v13642_v40 = vld [vmem:[#allocation344_spill] sm:$0xff]  ;;  %v13643_v50 = vld [vmem:[#allocation345_spill] sm:$0xff] }
 0x7fc   : > { %5645 = vmatpush.bf16.msrb.mxu0 %v13596_v49  ;;  %5658 = vmatpush.bf16.msrb.mxu1 %v13597_v9 }
 0x7fd   : > { %5671 = vmatpush.bf16.msrb.mxu2 %v13598_v12  ;;  %5684 = vmatpush.bf16.msrb.mxu3 %v13599_v7 }
 0x800   : > { %5646 = vmatpush.bf16.msrb.mxu0 %v13600_v0  ;;  %5659 = vmatpush.bf16.msrb.mxu1 %v13601_v11  ;;  %v13638_v0 = vld [vmem:[#allocation340_spill] sm:$0xff]  ;;  %v13639_v11 = vld [vmem:[#allocation341_spill] sm:$0xff] }
 0x801   : > { %5672 = vmatpush.bf16.msrb.mxu2 %v13602_v38  ;;  %5685 = vmatpush.bf16.msrb.mxu3 %v13603_v37  ;;  %v5413_v17 = vpop.f32.mrf.mxu2  ;;  %v5426_v18 = vpop.f32.mrf.mxu3  ;;  %v13640_v38 = vld [vmem:[#allocation342_spill] sm:$0xff]  ;;  %v13641_v37 = vld [vmem:[#allocation343_spill] sm:$0xff] }
 0x802   : > { %v13652_v17 = vld [vmem:[#allocation354_spill] sm:$0xff]  ;;  %v13653_v18 = vld [vmem:[#allocation355_spill] sm:$0xff] }
 0x804   : > { %5647 = vmatpush.bf16.msrb.mxu0 %v13604_v58  ;;  %5660 = vmatpush.bf16.msrb.mxu1 %v13605_v29 }
 0x805   : > { %5673 = vmatpush.bf16.msrb.mxu2 %v13606_v47  ;;  %5686 = vmatpush.bf16.msrb.mxu3 %v13607_v41  ;;  %v13646_v47 = vld [vmem:[#allocation348_spill] sm:$0xff]  ;;  %v13647_v41 = vld [vmem:[#allocation349_spill] sm:$0xff] }
 0x808   : > { %5648 = vmatpush.bf16.msrb.mxu0 %v13608_v51  ;;  %5661 = vmatpush.bf16.msrb.mxu1 %v13609_v20  ;;  %v13648_v51 = vld [vmem:[#allocation350_spill] sm:$0xff]  ;;  %v13649_v20 = vld [vmem:[#allocation351_spill] sm:$0xff] }
 0x809   : > { %5674 = vmatpush.bf16.msrb.mxu2 %v13610_v63  ;;  %5687 = vmatpush.bf16.msrb.mxu3 %v13611_v13  ;;  %v13650_v63 = vld [vmem:[#allocation352_spill] sm:$0xff]  ;;  %v13651_v13 = vld [vmem:[#allocation353_spill] sm:$0xff] }
 0x80c   : > { %5649 = vmatpush.bf16.msrb.mxu0 %v13612_v43  ;;  %5662 = vmatpush.bf16.msrb.mxu1 %v13613_v46  ;;  %v13654_v43 = vld [vmem:[#allocation356_spill] sm:$0xff]  ;;  %v13655_v46 = vld [vmem:[#allocation357_spill] sm:$0xff] }
 0x80d   : > { %5675 = vmatpush.bf16.msrb.mxu2 %v13614_v44  ;;  %5688 = vmatpush.bf16.msrb.mxu3 %v13615_v26  ;;  %v13656_v44 = vld [vmem:[#allocation358_spill] sm:$0xff]  ;;  %v13657_v26 = vld [vmem:[#allocation359_spill] sm:$0xff] }
 0x810   : > { %5650 = vmatpush.bf16.msrb.mxu0 %v13616_v27  ;;  %5663 = vmatpush.bf16.msrb.mxu1 %v13617_v31  ;;  %v5437_v8 = vpop.f32.mrf.mxu0  ;;  %v5450_v19 = vpop.f32.mrf.mxu1  ;;  %v13658_v27 = vld [vmem:[#allocation360_spill] sm:$0xff]  ;;  %v13659_v31 = vld [vmem:[#allocation361_spill] sm:$0xff] }
 0x811   : > { %5676 = vmatpush.bf16.msrb.mxu2 %v13618_v35  ;;  %5689 = vmatpush.bf16.msrb.mxu3 %v13619_v39  ;;  %v11693_v61 = vadd.f32 %v5450_v19, %v5437_v8  ;;  %v13660_v35 = vld [vmem:[#allocation362_spill] sm:$0xff]  ;;  %v13661_v39 = vld [vmem:[#allocation363_spill] sm:$0xff] }
 0x813   : > { %5651 = vmatmul.bf16.vlgmr.msrb.gmra.mxu0 %v11641_v10  ;;  %5664 = vmatmul.bf16.vlgmr.msrb.gmra.mxu1 %v11643_v33 }
 0x814   : > { %5695 = vmatpush.bf16.msra.mxu0 %v13620_v57  ;;  %5708 = vmatpush.bf16.msra.mxu1 %v13621_v28 }
 0x815   : > { %5721 = vmatpush.bf16.msra.mxu2 %v13622_v48  ;;  %5734 = vmatpush.bf16.msra.mxu3 %v13623_v54  ;;  %v13662_v48 = vld [vmem:[#allocation364_spill] sm:$0xff]  ;;  %v13663_v54 = vld [vmem:[#allocation365_spill] sm:$0xff] }
 0x816   : > { %5677 = vmatmul.bf16.vlgmr.msrb.gmra.mxu2 %v11641_v10  ;;  %5690 = vmatmul.bf16.vlgmr.msrb.gmra.mxu3 %v11643_v33 }
 0x818   : > { %5696 = vmatpush.bf16.msra.mxu0 %v13624_v55  ;;  %5709 = vmatpush.bf16.msra.mxu1 %v13625_v56  ;;  %v5439_v12 = vpop.f32.mrf.mxu0  ;;  %v5452_v7 = vpop.f32.mrf.mxu1  ;;  %v13664_v56 = vld [vmem:[#allocation366_spill] sm:$0xff] }
 0x819   : > { %5722 = vmatpush.bf16.msra.mxu2 %v13626_v2  ;;  %5735 = vmatpush.bf16.msra.mxu3 %v13627_v3  ;;  %v5463_v5 = vpop.f32.mrf.mxu2  ;;  %v5476_v49 = vpop.f32.mrf.mxu3  ;;  %v13665_v2 = vld [vmem:[#allocation367_spill] sm:$0xff]  ;;  %v13666_v3 = vld [vmem:[#allocation368_spill] sm:$0xff] }
 0x81a   : > { %v11699_v9 = vadd.f32 %v5476_v49, %v5463_v5  ;;  %v13672_v5 = vld [vmem:[#allocation374_spill] sm:$0xff]  ;;  %v13673_v49 = vld [vmem:[#allocation375_spill] sm:$0xff] }
 0x81c   : > { %5697 = vmatpush.bf16.msra.mxu0 %v13628_v52  ;;  %5710 = vmatpush.bf16.msra.mxu1 %v13629_v4  ;;  %v13667_v52 = vld [vmem:[#allocation369_spill] sm:$0xff] }
 0x81d   : > { %5723 = vmatpush.bf16.msra.mxu2 %v13630_v24  ;;  %5736 = vmatpush.bf16.msra.mxu3 %v13631_v21  ;;  %v13668_v24 = vld [vmem:[#allocation370_spill] sm:$0xff]  ;;  %v13669_v21 = vld [vmem:[#allocation371_spill] sm:$0xff] }
 0x820   : > { %5698 = vmatpush.bf16.msra.mxu0 %v13632_v36  ;;  %5711 = vmatpush.bf16.msra.mxu1 %v13633_v42 }
 0x821   : > { %5724 = vmatpush.bf16.msra.mxu2 %v13634_v6  ;;  %5737 = vmatpush.bf16.msra.mxu3 %v13635_v45  ;;  %v5465_v58 = vpop.f32.mrf.mxu2  ;;  %v5478_v29 = vpop.f32.mrf.mxu3  ;;  %v13670_v6 = vld [vmem:[#allocation372_spill] sm:$0xff]  ;;  %v13671_v45 = vld [vmem:[#allocation373_spill] sm:$0xff] }
 0x822   : > { %v13682_v58 = vld [vmem:[#allocation384_spill] sm:$0xff]  ;;  %v13683_v29 = vld [vmem:[#allocation385_spill] sm:$0xff] }
 0x824   : > { %5699 = vmatpush.bf16.msra.mxu0 %v13636_v62  ;;  %5712 = vmatpush.bf16.msra.mxu1 %v13637_v1  ;;  %v13674_v62 = vld [vmem:[#allocation376_spill] sm:$0xff]  ;;  %v13675_v1 = vld [vmem:[#allocation377_spill] sm:$0xff] }
 0x825   : > { %5725 = vmatpush.bf16.msra.mxu2 %v13638_v0  ;;  %5738 = vmatpush.bf16.msra.mxu3 %v13639_v11  ;;  %v13676_v0 = vld [vmem:[#allocation378_spill] sm:$0xff]  ;;  %v13677_v11 = vld [vmem:[#allocation379_spill] sm:$0xff] }
 0x828   : > { %5700 = vmatpush.bf16.msra.mxu0 %v13640_v38  ;;  %5713 = vmatpush.bf16.msra.mxu1 %v13641_v37  ;;  %v13678_v38 = vld [vmem:[#allocation380_spill] sm:$0xff]  ;;  %v13679_v37 = vld [vmem:[#allocation381_spill] sm:$0xff] }
 0x829   : > { %5726 = vmatpush.bf16.msra.mxu2 %v13642_v40  ;;  %5739 = vmatpush.bf16.msra.mxu3 %v13643_v50  ;;  %v13680_v40 = vld [vmem:[#allocation382_spill] sm:$0xff]  ;;  %v13681_v50 = vld [vmem:[#allocation383_spill] sm:$0xff] }
 0x82c   : > { %5701 = vmatpush.bf16.msra.mxu0 %v13644_v59  ;;  %5714 = vmatpush.bf16.msra.mxu1 %v13645_v25 }
 0x82d   : > { %5727 = vmatpush.bf16.msra.mxu2 %v13646_v47  ;;  %5740 = vmatpush.bf16.msra.mxu3 %v13647_v41 }
 0x830   : > { %5702 = vmatpush.bf16.msra.mxu0 %v13648_v51  ;;  %5715 = vmatpush.bf16.msra.mxu1 %v13649_v20  ;;  %v5489_v57 = vpop.f32.mrf.mxu0  ;;  %v5502_v28 = vpop.f32.mrf.mxu1 }
 0x831   : > { %5728 = vmatpush.bf16.msra.mxu2 %v13650_v63  ;;  %5741 = vmatpush.bf16.msra.mxu3 %v13651_v13  ;;  %v11733_v55 = vadd.f32 %v5502_v28, %v5489_v57 }
 0x833   : > { %5703 = vmatmul.bf16.vlgmr.msra.gmra.mxu0 %v11641_v10  ;;  %5716 = vmatmul.bf16.vlgmr.msra.gmra.mxu1 %v11643_v33 }
 0x834   : > { %5747 = vmatpush.bf16.msrb.mxu0 %v13652_v17  ;;  %5760 = vmatpush.bf16.msrb.mxu1 %v13653_v18 }
 0x835   : > { %5773 = vmatpush.bf16.msrb.mxu2 %v13654_v43  ;;  %5786 = vmatpush.bf16.msrb.mxu3 %v13655_v46 }
 0x836   : > { %5729 = vmatmul.bf16.vlgmr.msra.gmra.mxu2 %v11641_v10  ;;  %5742 = vmatmul.bf16.vlgmr.msra.gmra.mxu3 %v11643_v33 }
 0x838   : > { %5748 = vmatpush.bf16.msrb.mxu0 %v13656_v44  ;;  %5761 = vmatpush.bf16.msrb.mxu1 %v13657_v26  ;;  %v5491_v36 = vpop.f32.mrf.mxu0  ;;  %v5504_v42 = vpop.f32.mrf.mxu1 }
 0x839   : > { %5774 = vmatpush.bf16.msrb.mxu2 %v13658_v27  ;;  %5787 = vmatpush.bf16.msrb.mxu3 %v13659_v31  ;;  %v5515_v4 = vpop.f32.mrf.mxu2  ;;  %v5528_v8 = vpop.f32.mrf.mxu3  ;;  %v13684_v42 = vld [vmem:[#allocation386_spill] sm:$0xff] }
 0x83a   : > { %v11739_v19 = vadd.f32 %v5528_v8, %v5515_v4 }
 0x83c   : > { %5749 = vmatpush.bf16.msrb.mxu0 %v13660_v35  ;;  %5762 = vmatpush.bf16.msrb.mxu1 %v13661_v39 }
 0x83d   : > { %5775 = vmatpush.bf16.msrb.mxu2 %v13662_v48  ;;  %5788 = vmatpush.bf16.msrb.mxu3 %v13663_v54 }
 0x840   : > { %5750 = vmatpush.bf16.msrb.mxu0 %v13664_v56  ;;  %5763 = vmatpush.bf16.msrb.mxu1 %v13665_v2 }
 0x841   : > { %5776 = vmatpush.bf16.msrb.mxu2 %v13666_v3  ;;  %5789 = vmatpush.bf16.msrb.mxu3 %v13667_v52  ;;  %v5517_v12 = vpop.f32.mrf.mxu2  ;;  %v5530_v7 = vpop.f32.mrf.mxu3 }
 0x844   : > { %5751 = vmatpush.bf16.msrb.mxu0 %v13668_v24  ;;  %5764 = vmatpush.bf16.msrb.mxu1 %v13669_v21 }
 0x845   : > { %5777 = vmatpush.bf16.msrb.mxu2 %v13670_v6  ;;  %5790 = vmatpush.bf16.msrb.mxu3 %v13671_v45 }
 0x848   : > { %5752 = vmatpush.bf16.msrb.mxu0 %v13672_v5  ;;  %5765 = vmatpush.bf16.msrb.mxu1 %v13673_v49 }
 0x849   : > { %5778 = vmatpush.bf16.msrb.mxu2 %v13674_v62  ;;  %5791 = vmatpush.bf16.msrb.mxu3 %v13675_v1  ;;  %v13685_v1 = vld [vmem:[#allocation387_spill] sm:$0xff] }
 0x84c   : > { %5753 = vmatpush.bf16.msrb.mxu0 %v13676_v0  ;;  %5766 = vmatpush.bf16.msrb.mxu1 %v13677_v11 }
 0x84d   : > { %5779 = vmatpush.bf16.msrb.mxu2 %v13678_v38  ;;  %5792 = vmatpush.bf16.msrb.mxu3 %v13679_v37 }
 0x850   : > { %5754 = vmatpush.bf16.msrb.mxu0 %v13680_v40  ;;  %5767 = vmatpush.bf16.msrb.mxu1 %v13681_v50  ;;  %v5541_v59 = vpop.f32.mrf.mxu0  ;;  %v5554_v25 = vpop.f32.mrf.mxu1  ;;  %v13687_v40 = vld [vmem:[#allocation389_spill] sm:$0xff] }
 0x851   : > { %5780 = vmatpush.bf16.msrb.mxu2 %v13682_v58  ;;  %5793 = vmatpush.bf16.msrb.mxu3 %v13683_v29  ;;  %v11761_v47 = vadd.f32 %v5554_v25, %v5541_v59 }
 0x853   : > { %5755 = vmatmul.bf16.vlgmr.msrb.gmra.mxu0 %v11641_v10  ;;  %5768 = vmatmul.bf16.vlgmr.msrb.gmra.mxu1 %v11643_v33 }
 0x854   : > { %5781 = vmatmul.bf16.vlgmr.msrb.gmra.mxu2 %v11641_v10  ;;  %5794 = vmatmul.bf16.vlgmr.msrb.gmra.mxu3 %v11643_v33 }
 0x858   : > { %v5543_v63 = vpop.f32.mrf.mxu0  ;;  %v5556_v13 = vpop.f32.mrf.mxu1 }
 0x859   : > { %v5567_v41 = vpop.f32.mrf.mxu2  ;;  %v5580_v51 = vpop.f32.mrf.mxu3 }
 0x85a   : > { %v11763_v20 = vadd.f32 %v5580_v51, %v5567_v41 }
 0x861   : > { %v5569_v17 = vpop.f32.mrf.mxu2  ;;  %v5582_v18 = vpop.f32.mrf.mxu3 }
 0x862   : > { %v5115_v18 = vld [vmem:[#allocation3] sm:$0xff] }
 0x870   : > { %v5600_v43 = vpop.f32.mrf.mxu0  ;;  %v5613_v46 = vpop.f32.mrf.mxu1 }
 0x871   : > { %v5601_v2 = vadd.f32 %v5600_v43, %v11649_v14  ;;  %v13686_v14 = vld [vmem:[#allocation388_spill] sm:$0xff] }
 0x873   : > { %v5614_v8 = vadd.f32 %v5613_v46, %v5601_v2 }
 0x875   : > { %v5799_v6 = vadd.f32 %v5614_v8, %v13684_v42 }
 0x877   : > { %v5807_v62 = vmul.f32 0.5, %v5799_v6 }
 0x878   : > { %v5602_v10 = vpop.f32.mrf.mxu0  ;;  %v5615_v27 = vpop.f32.mrf.mxu1 }
 0x879   : > { %v5626_v44 = vpop.f32.mrf.mxu2  ;;  %v5639_v26 = vpop.f32.mrf.mxu3 }
 0x87a   : > { %v5627_v36 = vadd.f32 %v5626_v44, %v11659_v32 }
 0x87c   : > { %v5640_v49 = vadd.f32 %v5639_v26, %v5627_v36 }
 0x87e   : > { %v5800_v12 = vadd.f32 %v5640_v49, %v13686_v14 }
 0x881   : > { %v5628_v33 = vpop.f32.mrf.mxu2  ;;  %v5641_v31 = vpop.f32.mrf.mxu3 }
 0x890   : > { %v5652_v35 = vpop.f32.mrf.mxu0  ;;  %v5665_v39 = vpop.f32.mrf.mxu1 }
 0x891   : > { %v5653_v56 = vadd.f32 %v5652_v35, %v11693_v61 }
 0x893   : > { %v5666_v3 = vadd.f32 %v5665_v39, %v5653_v56 }
 0x895   : > { %v5801_v21 = vadd.f32 %v5666_v3, %v10204_v34  ;;  %v5808_v34 = vmul.f32 0.5, %v5800_v12 }
 0x897   : > { %v5815_v5 = vmul.f32 0.5, %v5801_v21 }
 0x898   : > { %v5654_v48 = vpop.f32.mrf.mxu0  ;;  %v5667_v54 = vpop.f32.mrf.mxu1 }
 0x899   : > { %v5678_v57 = vpop.f32.mrf.mxu2  ;;  %v5691_v28 = vpop.f32.mrf.mxu3  ;;  %8311 = vtanh.f32 %v5815_v5 }
 0x89a   : > { %v5679_v24 = vadd.f32 %v5678_v57, %v11699_v9  ;;  %8313 = vtanh.f32 %v5807_v62 }
 0x89c   : > { %v5692_v45 = vadd.f32 %v5691_v28, %v5679_v24  ;;  %v5116_v28 = vld [vmem:[#allocation3 + $0x18] sm:$0xff] }
 0x89e   : > { %v5802_v61 = vadd.f32 %v5692_v45, %v13685_v1 }
 0x89f   : > { %v8312_v38 = vpop.eup %8311 }
 0x8a0   : > { %v5816_v7 = vmul.f32 0.5, %v5802_v61  ;;  %v8314_v37 = vpop.eup %8313  ;;  %v5819_v58 = vmul.f32 0.5, %v8312_v38 }
 0x8a1   : > { %v5680_v52 = vpop.f32.mrf.mxu2  ;;  %v5693_v4 = vpop.f32.mrf.mxu3  ;;  %v5811_v25 = vmul.f32 0.5, %v8314_v37 }
 0x8a2   : > { %8315 = vtanh.f32 %v5816_v7  ;;  %v5821_v17 = vadd.f32 0.5, %v5819_v58 }
 0x8a3   : > { %8317 = vtanh.f32 %v5808_v34  ;;  %v5813_v46 = vadd.f32 0.5, %v5811_v25 }
 0x8a4   : > { %v5833_v27 = vmul.f32 %v5821_v17, %v5115_v18 }
 0x8a8   : > { %v8316_v13 = vpop.eup %8315 }
 0x8a9   : > { %v8318_v43 = vpop.eup %8317  ;;  %v5820_v10 = vmul.f32 0.5, %v8316_v13 }
 0x8aa   : > { %v5812_v31 = vmul.f32 0.5, %v8318_v43 }
 0x8ac   : > { %v5814_v48 = vadd.f32 0.5, %v5812_v31 }
 0x8b0   : > { %v5704_v0 = vpop.f32.mrf.mxu0  ;;  %v5717_v11 = vpop.f32.mrf.mxu1 }
 0x8b1   : > { %v5705_v9 = vadd.f32 %v5704_v0, %v11733_v55 }
 0x8b3   : > { %v5718_v32 = vadd.f32 %v5717_v11, %v5705_v9 }
 0x8b5   : > { %v5803_v50 = vadd.f32 %v5718_v32, %v13687_v40 }
 0x8b7   : > { %8319 = vtanh.f32 %v5803_v50 }
 0x8b8   : > { %v5706_v51 = vpop.f32.mrf.mxu0  ;;  %v5719_v63 = vpop.f32.mrf.mxu1 }
 0x8b9   : > { %v5730_v29 = vpop.f32.mrf.mxu2  ;;  %v5743_v59 = vpop.f32.mrf.mxu3 }
 0x8ba   : > { %v5731_v41 = vadd.f32 %v5730_v29, %v11739_v19  ;;  %v5822_v19 = vadd.f32 0.5, %v5820_v10 }
 0x8bc   : > { %v5744_v55 = vadd.f32 %v5743_v59, %v5731_v41  ;;  %v5834_v56 = vmul.f32 %v5822_v19, %v5116_v28 }
 0x8bd   : > { %v8320_v26 = vpop.eup %8319 }
 0x8be   : > { %v5804_v44 = vadd.f32 %v5744_v55, %v10228_v53  ;;  %v5835_v33 = vmul.f32 %v8320_v26, %v5813_v46 }
 0x8c0   : > { %8321 = vtanh.f32 %v5804_v44  ;;  %v5837_v57 = vadd.f32 %v5835_v33, %v5833_v27 }
 0x8c1   : > { %v5732_v35 = vpop.f32.mrf.mxu2  ;;  %v5745_v39 = vpop.f32.mrf.mxu3 }
 0x8c2   : > { %5848 = vst [vmem:[#allocation3] sm:$0xff] %v5837_v57 }
 0x8c6   : > { %v8322_v54 = vpop.eup %8321 }
 0x8c7   : > { %v5836_v2 = vmul.f32 %v8322_v54, %v5814_v48 }
 0x8c9   : > { %v5838_v3 = vadd.f32 %v5836_v2, %v5834_v56 }
 0x8cb   : > { %5849 = vst [vmem:[#allocation3 + $0x18] sm:$0xff] %v5838_v3 }
 0x8d0   : > { %v5756_v52 = vpop.f32.mrf.mxu0  ;;  %v5769_v53 = vpop.f32.mrf.mxu1 }
 0x8d1   : > { %v5757_v4 = vadd.f32 %v5756_v52, %v11761_v47 }
 0x8d3   : > { %v5770_v8 = vadd.f32 %v5769_v53, %v5757_v4 }
 0x8d5   : > { %v5805_v24 = vadd.f32 %v5770_v8, %v10233_v30 }
 0x8d7   : > { %v5825_v21 = vmul.f32 0.5, %v5805_v24  ;;  %v5782_v36 = vpop.f32.mrf.mxu2  ;;  %v5795_v42 = vpop.f32.mrf.mxu3 }
 0x8d8   : > { %v5783_v6 = vadd.f32 %v5782_v36, %v11763_v20  ;;  %v5758_v45 = vpop.f32.mrf.mxu0  ;;  %v5771_v5 = vpop.f32.mrf.mxu1 }
 0x8d9   : > { %8323 = vtanh.f32 %v5825_v21 }
 0x8da   : > { %v5796_v49 = vadd.f32 %v5795_v42, %v5783_v6  ;;  %8325 = vtanh.f32 %v5837_v57 }
 0x8dc   : > { %v5806_v62 = vadd.f32 %v5796_v49, %v10238_v23 }
 0x8de   : > { %v5826_v1 = vmul.f32 0.5, %v5806_v62 }
 0x8df   : > { %v8324_v61 = vpop.eup %8323  ;;  %v5784_v14 = vpop.f32.mrf.mxu2 }
 0x8e0   : > { %v5797_v47 = vpop.f32.mrf.mxu3  ;;  %v5829_v12 = vmul.f32 0.5, %v8324_v61  ;;  %8327 = vtanh.f32 %v5826_v1  ;;  %v8326_v7 = vpop.eup %8325 }
 0x8e1   : > { %8329 = vtanh.f32 %v5838_v3 }
 0x8e2   : > { %v5831_v30 = vadd.f32 0.5, %v5829_v12 }
 0x8e4   : > { %v5841_v0 = vmul.f32 %v8326_v7, %v5831_v30 }
 0x8e6   : > { %v8328_v11 = vpop.eup %8327 }
 0x8e7   : > { %v5830_v20 = vmul.f32 0.5, %v8328_v11  ;;  %v8330_v34 = vpop.eup %8329 }
 0x8e9   : > { %v5832_v9 = vadd.f32 0.5, %v5830_v20 }
 0x8eb   : > { %v5842_v38 = vmul.f32 %v8330_v34, %v5832_v9 }
 0x8ec   : > { %5856 = sbr.rel (%p7643_p13) target bundleno = 2297 (0x8f9), region = 96 }
 0x8ed   : > { %v5843_v32 = vpack.c.bf16 %v5842_v38, %v5841_v0 }
 0x8ef   : > { %5847 = vst [vmem:[#allocation2 + $0x8] sm:$0xff] %v5843_v32 }
 0x8f0   : > { %7642 = vst [vmem:[%s8912_s2 + $0x18] sm:$0xff] %v5843_v32 }
 0x8f1   : > { %5857 = vst [vmem:[#allocation17] sm:$0xff] %v11629_v15 }
 0x8f2   : > { %5858 = vst [vmem:[#allocation17 + $0x8] sm:$0xff] %v11631_v16 }
 0x8f3   : > { %5860 = vst [vmem:[#allocation17 + $0x10] sm:$0xff] %v5841_v0 }
 0x8f4   : > { %5861 = vst [vmem:[#allocation17 + $0x18] sm:$0xff] %v5842_v38 }
 0x8f5   : > { %5862 = vst [vmem:[#allocation19] sm:$0xff] %v11572_v22 }
 0x8f6   : > { %5863 = vst [vmem:[#allocation19 + $0x8] sm:$0xff] %v11581_v60 }
 0x8f7   : > { %5865 = vst [vmem:[#allocation19 + $0x10] sm:$0xff] %v5837_v57 }
 0x8f8   : > { %5866 = vst [vmem:[#allocation19 + $0x18] sm:$0xff] %v5838_v3 }
 0x8f9 PF: > { %s8691_s28 = smov [#allocation17]   ;;  %s5897_s15 = sshll.u32 %s11850_s8, 4  ;;  %s5898_s15 = int_to_ptr.hbm [resolvable:$true] %s5897_s15 }
 0x8fa   : > { %s5895_s26 = sshll.u32 %s8691_s28, 4  ;;  %s12219_s13 = smov 256   ;;  %s5896_s26 = int_to_ptr.vmem [resolvable:$true] %s5895_s26 }
 0x8fb   : > { %s8693_s3 = smov 16   ;;  %p13688_p7 = scmp.eq.s32.totalorder %s8771_s16, 2 }
 0x8fc   : > { %s8041_s4 = sshll.u32 %s8771_s16, 5  ;;  %s5881_s29 = sshll.u32 %s8912_s2, 4  ;;  %s5882_s29 = int_to_ptr.vmem [resolvable:$true] %s5881_s29 }
 0x8fd   : > { %8070 = dma.vmem_to_hbm [thread:$0]  (%p13688_p7), %s5896_s26, 512, %s5898_s15, [#allocation18], %s12219_s13, %s12219_s13, %s8693_s3  }
 0x8fe   : > { %s5880_s17 = scalar_lea.hbm %s11849_s7, %s8041_s4  ;;  %s5868_s19 = scalar_lea.sflag [#allocation6], %s8889_s14 }
 0x8ff   : > { %s5883_s23 = sshll.u32 %s5880_s17, 4  ;;  %s8589_s26 = scalar_lea.hbm %s11849_s7, 96  ;;  %s5884_s23 = int_to_ptr.hbm [resolvable:$true] %s5883_s23 }
 0x900   : > { %s8583_s28 = sshra.s32 %s5884_s23, 4  ;;  %s8584_s28 = int_to_ptr.hbm [resolvable:$true] %s8583_s28 }
 0x901   : > { %s8585_s27 = scalar_lea.hbm %s8584_s28, 32  ;;  %p8590_p0 = scmp.lt.s32.totalorder %s8584_s28, %s11849_s7 }
 0x902   : > { %p8586_p8 = scmp.ne.s32.totalorder %s8584_s28, %s8585_s27  ;;  %p8591_p11 = scmp.lt.s32.totalorder %s8589_s26, %s8585_s27 }
 0x904   : > { %p8587_p9 = pnand %p8586_p8, %p8855_p5  ;;  %p8592_p2 = por %p8591_p11, %p8590_p0 }
 0x906   : > { %p8588_p10 = pneg %p8587_p9 }
 0x908   : > { %p8593_p3 = pnand %p8592_p2, %p8588_p10 }
 0x90a   : > { %8596 = shalt.err (!%p8593_p3)
}
 0x90b   : > { %s8694_s14 = smov 128   ;;  %s8695_s2 = smov 8  }
 0x90c   : > { %8068 = dma.vmem_to_hbm [thread:$0]  (%p8855_p5), %s5882_s29, 512, %s5884_s23, %s5868_s19, %s8694_s14, %s8694_s14, %s8695_s2  }
 0x90d   : > { %s8696_s4 = smov [#allocation19]   ;;  %s5911_s17 = sshll.u32 %s11851_s9, 4  ;;  %s5912_s17 = int_to_ptr.hbm [resolvable:$true] %s5911_s17 }
 0x90e   : > { %s5909_s22 = sshll.u32 %s8696_s4, 4  ;;  %p13689_p1 = pmov %p13688_p7  ;;  %s5910_s22 = int_to_ptr.vmem [resolvable:$true] %s5909_s22 }
 0x90f   : > { %s13690_s13 = smov 256  }
 0x910   : > { %8072 = dma.vmem_to_hbm [thread:$0]  (%p13689_p1), %s5910_s22, 512, %s5912_s17, [#allocation18], %s13690_s13, %s13690_s13, %s8693_s3  }
 0x911   : > { %p13691_p4 = pmov %p13689_p1 }
 0x912   : > { %p13692_p12 = pmov %p13689_p1 }
 0x913   : > { %8658 = dma.done.wait (%p13691_p4), [#allocation18], 1024  }
 0x914   : > { %8660 = vsyncadd (%p13692_p12), [#allocation18], 4294966272 }
 0x915 PF: > { %p8122_p5 = scmp.ge.s32.totalorder %s8679_s12, 2  ;;  %s5936_s18 = sand.u32 1, %s8667_s30  }
 0x916   : > { %s5937_s29 = scalar_lea.sflag [#allocation6], %s5936_s18 }
 0x917   : > { %p8102_p13 = pnand %p8122_p5, %p8859_p6 }
 0x919   : > { %p8103_p7 = pneg %p8102_p13 }
 0x91b   : > { %8662 = dma.done.wait (%p8103_p7), %s5937_s29, 512  }
 0x91c   : > { %8664 = vsyncadd (%p8103_p7), %s5937_s29, 4294966784  ;;  %p27_p8 = scmp.ge.s32.totalorder %s8827_s25, 5   ;;  %s13693_s30 = smov %s8671_s10 }
 0x91d   : > { %s13694_s10 = smov %s8675_s11  ;;  %s13695_s11 = smov %s8838_s20 }
 0x91e   : > { %s13696_s12 = smov %s8827_s25  ;;  %29 = sbr.rel (!%p27_p8) target bundleno = 15 (0xf), region = 169 }
 0x923   :  { %5943 = vsyncpa [#allocation5], 1 }
 0x924   :  { %5945 = vsyncpa [#allocation5 + $0x1], 1 }
 0x925   :  { %5946 = vsyncpa [#allocation8], 1 }
 0x926   :  { %5947 = vsyncpa [#allocation11], 1 }
 0x927   :  { %5948 = vsyncpa [#allocation14], 1 }
 0x928   :  { %5949 = vsyncpa [#allocation6], 1 }
 0x929   :  { %5951 = vsyncpa [#allocation6 + $0x1], 1 }
 0x92a   :  { %5952 = vsyncpa [#allocation18], 1 }

</bundles_post_ra>
